<compile_context>
chip_gen: v7x
topology: tpu7x:2x2x1
jax: 0.10.0
libtpu: 0.0.40
codegen_flags: <defaults>
</compile_context>

<pallas_src>
import jax
import jax.numpy as jnp
from jax.experimental import pallas as pl
from jax.experimental.pallas import tpu as pltpu

N = 2                       # batch
H = W = 28                  # spatial (forced by fc in_features = 9 * 24 * 24)
K = 5                       # conv kernel size
C_OUT = 9
OH = OW = H - K + 1         # 24
FC_IN = C_OUT * OH * OW     # 5184
FC_OUT = 10

EPAD = OH * W               # 672: strided-flat activation width (e' = i*W + j)
XPAD = 896                  # H*W=784 padded so every window slice stays in-bounds
                            # (max base 28*4+4=116, 116+672=788 <= 896; 7 lane tiles)


# ----------------------------------------------------------------------------
# Fused kernel: conv(5x5, 1->9) + bias + ReLU + Linear(5184->10) + log_softmax.
#   x_ref   : (N, XPAD)            f32  VMEM   flattened, zero-padded image rows
#   cw_ref  : (C_OUT*K*K,)         f32  SMEM   conv weight, flat (c, kh, kw)
#   cb_ref  : (C_OUT,)             f32  SMEM   conv bias
#   fcw_ref : (C_OUT, EPAD, FC_OUT)f32  VMEM   fc weight, strided-flat, 0-padded j
#   fcb_ref : (1, FC_OUT)          f32  VMEM   fc bias
#   o_ref   : (N, FC_OUT)          f32  VMEM   log-probabilities
#   win_ref : (K*K, N, EPAD)       f32  VMEM   scratch: hoisted shifted windows
# ----------------------------------------------------------------------------
def one_conv_kernel(x_ref, cw_ref, cb_ref, fcw_ref, fcb_ref, o_ref, win_ref):
    x = x_ref[...]                                   # (N, XPAD), 7 vregs

    # Hoist the 25 shifted windows out of the channel loop (25 slices, not 225).
    # win[k][n, i*W + j] == x[n, i + kh, j + kw]  for k = kh*K + kw.
    for kh in range(K):
        for kw in range(K):
            base = kh * W + kw
            win_ref[kh * K + kw] = x[:, base:base + EPAD]        # (N, EPAD)

    logits = jnp.zeros((N, FC_OUT), jnp.float32)
    for c in range(C_OUT):
        # Conv for channel c: pure scalar-broadcast FMA on a lane-dense (N, 672)
        # accumulator.  Positions with j >= OW hold garbage, zeroed later by the
        # padded fc weight.
        acc = jnp.full((N, EPAD), cb_ref[c], dtype=jnp.float32)
        for k in range(K * K):
            acc = acc + win_ref[k] * cw_ref[c * K * K + k]
        a = jnp.maximum(acc, 0.0)                    # ReLU

        # FC contraction for this channel on the MXU: (N, 672) @ (672, 10).
        # Equivalent to einsum('nce,ceo->no') unrolled over c; consumes the
        # activation directly, no (N, 5184) repack.
        logits = logits + jnp.dot(a, fcw_ref[c],
                                  preferred_element_type=jnp.float32)

    logits = logits + fcb_ref[...]                   # broadcast (1, 10)

    # log_softmax over dim=1 (max-shifted, numerically stable).
    m = jnp.max(logits, axis=1, keepdims=True)
    shifted = logits - m
    lse = jnp.log(jnp.sum(jnp.exp(shifted), axis=1, keepdims=True))
    o_ref[...] = shifted - lse


@jax.jit
def one_conv_forward(x_nchw, conv_w, conv_b, fc_w, fc_b):
    """Forward pass.  Parameters are in PyTorch layout:
       conv_w (9,1,5,5), conv_b (9,), fc_w (10, 5184), fc_b (10,)."""
    # ---- layout plumbing only (no compute) --------------------------------
    # Flatten image rows and pad so every window lane-slice is in-bounds.
    x2d = jnp.pad(x_nchw.reshape(N, H * W), ((0, 0), (0, XPAD - H * W)))
    # PyTorch Linear stores (out, in); bring to (in, out) then to the kernel's
    # strided-flat layout (C_OUT, OH*W, FC_OUT) with zeros at padded j columns.
    fcw = fc_w.T.reshape(C_OUT, OH, OW, FC_OUT)
    fcw = jnp.pad(fcw, ((0, 0), (0, 0), (0, W - OW), (0, 0)))
    fcw = fcw.reshape(C_OUT, EPAD, FC_OUT)

    return pl.pallas_call(
        one_conv_kernel,
        out_shape=jax.ShapeDtypeStruct((N, FC_OUT), jnp.float32),
        in_specs=[
            pl.BlockSpec(memory_space=pltpu.MemorySpace.VMEM),   # x2d
            pl.BlockSpec(memory_space=pltpu.MemorySpace.SMEM),   # conv weight (flat)
            pl.BlockSpec(memory_space=pltpu.MemorySpace.SMEM),   # conv bias
            pl.BlockSpec(memory_space=pltpu.MemorySpace.VMEM),   # fc weight
            pl.BlockSpec(memory_space=pltpu.MemorySpace.VMEM),   # fc bias
        ],
        out_specs=pl.BlockSpec(memory_space=pltpu.MemorySpace.VMEM),
        scratch_shapes=[pltpu.VMEM((K * K, N, EPAD), jnp.float32)],
        cost_estimate=pl.CostEstimate(
            flops=730_000,            # ~0.52 MF conv + ~0.21 MF fc
            transcendentals=N * (FC_OUT + 1),
            bytes_accessed=260_000,
        ),
    )(x2d, conv_w.reshape(-1), conv_b, fcw, fc_b.reshape(1, FC_OUT))


# ---------------------------------------------------------------------------
# Pure-JAX reference (same math as the PyTorch module) for correctness checks.
# ---------------------------------------------------------------------------
def reference_forward(x_nchw, conv_w, conv_b, fc_w, fc_b):
    xi = x_nchw[:, 0]                                            # (N, H, W)
    conv = jnp.zeros((N, C_OUT, OH, OW), jnp.float32)
    for kh in range(K):
        for kw in range(K):
            conv = conv + (xi[:, None, kh:kh + OH, kw:kw + OW]
                           * conv_w[None, :, 0, kh, kw, None, None])
    act = jnp.maximum(conv + conv_b[None, :, None, None], 0.0)
    logits = act.reshape(N, FC_IN) @ fc_w.T + fc_b               # nn.Flatten order
    return jax.nn.log_softmax(logits, axis=1)


if __name__ == "__main__":
    key = jax.random.PRNGKey(0)
    k_x, k_cw, k_cb, k_fw, k_fb = jax.random.split(key, 5)

    # Deterministic synthetic parameters, PyTorch layouts & fan-in bounds.
    conv_bound = 1.0 / (1 * K * K) ** 0.5
    conv_w = jax.random.uniform(k_cw, (C_OUT, 1, K, K), jnp.float32,
                                -conv_bound, conv_bound)
    conv_b = jax.random.uniform(k_cb, (C_OUT,), jnp.float32,
                                -conv_bound, conv_bound)
    fc_bound = 1.0 / float(FC_IN) ** 0.5
    fc_w = jax.random.uniform(k_fw, (FC_OUT, FC_IN), jnp.float32,
                              -fc_bound, fc_bound)
    fc_b = jax.random.uniform(k_fb, (FC_OUT,), jnp.float32,
                              -fc_bound, fc_bound)

    x = jax.random.normal(k_x, (N, 1, H, W), jnp.float32)

    out = jax.block_until_ready(one_conv_forward(x, conv_w, conv_b, fc_w, fc_b))
    ref = reference_forward(x, conv_w, conv_b, fc_w, fc_b)

    assert out.shape == (N, FC_OUT)
    # log_softmax rows must exponentiate-and-sum to 1.
    assert jnp.allclose(jnp.sum(jnp.exp(out), axis=1), 1.0, atol=1e-4)
    # Match the pure-JAX reference of the PyTorch forward.
    assert jnp.allclose(out, ref, atol=2e-3, rtol=2e-3)
    print("KERNEL_OK")
</pallas_src>

<mosaic_0001>
module attributes {stable_mosaic.version = 11 : i64} {
  func.func @one_conv_kernel(%arg0: memref<2x896xf32, #tpu.memory_space<vmem>>, %arg1: memref<225xf32, #tpu.memory_space<smem>>, %arg2: memref<9xf32, #tpu.memory_space<smem>>, %arg3: memref<9x672x10xf32, #tpu.memory_space<vmem>>, %arg4: memref<1x10xf32, #tpu.memory_space<vmem>>, %arg5: memref<2x10xf32, #tpu.memory_space<vmem>>, %arg6: memref<25x2x672xf32, #tpu.memory_space<vmem>>) attributes {dimension_semantics = [], scalar_prefetch = 0 : i64, scratch_operands = 1 : i64, tpu.core_type = #tpu.core_type<tc>} {
    %c0 = arith.constant 0 : index
    %c0_0 = arith.constant 0 : index
    %0 = vector.load %arg0[%c0, %c0_0] : memref<2x896xf32, #tpu.memory_space<vmem>>, vector<2x896xf32>
    %1 = vector.extract_strided_slice %0 {offsets = [0, 0], sizes = [2, 672], strides = [1, 1]} : vector<2x896xf32> to vector<2x672xf32>
    %c0_1 = arith.constant 0 : index
    %c0_2 = arith.constant 0 : index
    %c0_3 = arith.constant 0 : index
    %2 = vector.load %arg6[%c0_1, %c0_2, %c0_3] : memref<25x2x672xf32, #tpu.memory_space<vmem>>, vector<1x2x672xf32>
    %3 = vector.shape_cast %2 : vector<1x2x672xf32> to vector<2x672xf32>
    %4 = vector.shape_cast %1 : vector<2x672xf32> to vector<1x2x672xf32>
    tpu.vector_store %arg6[%c0_1, %c0_2, %c0_3], %4 {strides = array<i32>} : memref<25x2x672xf32, #tpu.memory_space<vmem>>, vector<1x2x672xf32>,
    %5 = vector.extract_strided_slice %0 {offsets = [0, 1], sizes = [2, 672], strides = [1, 1]} : vector<2x896xf32> to vector<2x672xf32>
    %c1 = arith.constant 1 : index
    %c0_4 = arith.constant 0 : index
    %c0_5 = arith.constant 0 : index
    %6 = vector.load %arg6[%c1, %c0_4, %c0_5] : memref<25x2x672xf32, #tpu.memory_space<vmem>>, vector<1x2x672xf32>
    %7 = vector.shape_cast %6 : vector<1x2x672xf32> to vector<2x672xf32>
    %8 = vector.shape_cast %5 : vector<2x672xf32> to vector<1x2x672xf32>
    tpu.vector_store %arg6[%c1, %c0_4, %c0_5], %8 {strides = array<i32>} : memref<25x2x672xf32, #tpu.memory_space<vmem>>, vector<1x2x672xf32>,
    %9 = vector.extract_strided_slice %0 {offsets = [0, 2], sizes = [2, 672], strides = [1, 1]} : vector<2x896xf32> to vector<2x672xf32>
    %c2 = arith.constant 2 : index
    %c0_6 = arith.constant 0 : index
    %c0_7 = arith.constant 0 : index
    %10 = vector.load %arg6[%c2, %c0_6, %c0_7] : memref<25x2x672xf32, #tpu.memory_space<vmem>>, vector<1x2x672xf32>
    %11 = vector.shape_cast %10 : vector<1x2x672xf32> to vector<2x672xf32>
    %12 = vector.shape_cast %9 : vector<2x672xf32> to vector<1x2x672xf32>
    tpu.vector_store %arg6[%c2, %c0_6, %c0_7], %12 {strides = array<i32>} : memref<25x2x672xf32, #tpu.memory_space<vmem>>, vector<1x2x672xf32>,
    %13 = vector.extract_strided_slice %0 {offsets = [0, 3], sizes = [2, 672], strides = [1, 1]} : vector<2x896xf32> to vector<2x672xf32>
    %c3 = arith.constant 3 : index
    %c0_8 = arith.constant 0 : index
    %c0_9 = arith.constant 0 : index
    %14 = vector.load %arg6[%c3, %c0_8, %c0_9] : memref<25x2x672xf32, #tpu.memory_space<vmem>>, vector<1x2x672xf32>
    %15 = vector.shape_cast %14 : vector<1x2x672xf32> to vector<2x672xf32>
    %16 = vector.shape_cast %13 : vector<2x672xf32> to vector<1x2x672xf32>
    tpu.vector_store %arg6[%c3, %c0_8, %c0_9], %16 {strides = array<i32>} : memref<25x2x672xf32, #tpu.memory_space<vmem>>, vector<1x2x672xf32>,
    %17 = vector.extract_strided_slice %0 {offsets = [0, 4], sizes = [2, 672], strides = [1, 1]} : vector<2x896xf32> to vector<2x672xf32>
    %c4 = arith.constant 4 : index
    %c0_10 = arith.constant 0 : index
    %c0_11 = arith.constant 0 : index
    %18 = vector.load %arg6[%c4, %c0_10, %c0_11] : memref<25x2x672xf32, #tpu.memory_space<vmem>>, vector<1x2x672xf32>
    %19 = vector.shape_cast %18 : vector<1x2x672xf32> to vector<2x672xf32>
    %20 = vector.shape_cast %17 : vector<2x672xf32> to vector<1x2x672xf32>
    tpu.vector_store %arg6[%c4, %c0_10, %c0_11], %20 {strides = array<i32>} : memref<25x2x672xf32, #tpu.memory_space<vmem>>, vector<1x2x672xf32>,
    %21 = vector.extract_strided_slice %0 {offsets = [0, 28], sizes = [2, 672], strides = [1, 1]} : vector<2x896xf32> to vector<2x672xf32>
    %c5 = arith.constant 5 : index
    %c0_12 = arith.constant 0 : index
    %c0_13 = arith.constant 0 : index
    %22 = vector.load %arg6[%c5, %c0_12, %c0_13] : memref<25x2x672xf32, #tpu.memory_space<vmem>>, vector<1x2x672xf32>
    %23 = vector.shape_cast %22 : vector<1x2x672xf32> to vector<2x672xf32>
    %24 = vector.shape_cast %21 : vector<2x672xf32> to vector<1x2x672xf32>
    tpu.vector_store %arg6[%c5, %c0_12, %c0_13], %24 {strides = array<i32>} : memref<25x2x672xf32, #tpu.memory_space<vmem>>, vector<1x2x672xf32>,
    %25 = vector.extract_strided_slice %0 {offsets = [0, 29], sizes = [2, 672], strides = [1, 1]} : vector<2x896xf32> to vector<2x672xf32>
    %c6 = arith.constant 6 : index
    %c0_14 = arith.constant 0 : index
    %c0_15 = arith.constant 0 : index
    %26 = vector.load %arg6[%c6, %c0_14, %c0_15] : memref<25x2x672xf32, #tpu.memory_space<vmem>>, vector<1x2x672xf32>
    %27 = vector.shape_cast %26 : vector<1x2x672xf32> to vector<2x672xf32>
    %28 = vector.shape_cast %25 : vector<2x672xf32> to vector<1x2x672xf32>
    tpu.vector_store %arg6[%c6, %c0_14, %c0_15], %28 {strides = array<i32>} : memref<25x2x672xf32, #tpu.memory_space<vmem>>, vector<1x2x672xf32>,
    %29 = vector.extract_strided_slice %0 {offsets = [0, 30], sizes = [2, 672], strides = [1, 1]} : vector<2x896xf32> to vector<2x672xf32>
    %c7 = arith.constant 7 : index
    %c0_16 = arith.constant 0 : index
    %c0_17 = arith.constant 0 : index
    %30 = vector.load %arg6[%c7, %c0_16, %c0_17] : memref<25x2x672xf32, #tpu.memory_space<vmem>>, vector<1x2x672xf32>
    %31 = vector.shape_cast %30 : vector<1x2x672xf32> to vector<2x672xf32>
    %32 = vector.shape_cast %29 : vector<2x672xf32> to vector<1x2x672xf32>
    tpu.vector_store %arg6[%c7, %c0_16, %c0_17], %32 {strides = array<i32>} : memref<25x2x672xf32, #tpu.memory_space<vmem>>, vector<1x2x672xf32>,
    %33 = vector.extract_strided_slice %0 {offsets = [0, 31], sizes = [2, 672], strides = [1, 1]} : vector<2x896xf32> to vector<2x672xf32>
    %c8 = arith.constant 8 : index
    %c0_18 = arith.constant 0 : index
    %c0_19 = arith.constant 0 : index
    %34 = vector.load %arg6[%c8, %c0_18, %c0_19] : memref<25x2x672xf32, #tpu.memory_space<vmem>>, vector<1x2x672xf32>
    %35 = vector.shape_cast %34 : vector<1x2x672xf32> to vector<2x672xf32>
    %36 = vector.shape_cast %33 : vector<2x672xf32> to vector<1x2x672xf32>
    tpu.vector_store %arg6[%c8, %c0_18, %c0_19], %36 {strides = array<i32>} : memref<25x2x672xf32, #tpu.memory_space<vmem>>, vector<1x2x672xf32>,
    %37 = vector.extract_strided_slice %0 {offsets = [0, 32], sizes = [2, 672], strides = [1, 1]} : vector<2x896xf32> to vector<2x672xf32>
    %c9 = arith.constant 9 : index
    %c0_20 = arith.constant 0 : index
    %c0_21 = arith.constant 0 : index
    %38 = vector.load %arg6[%c9, %c0_20, %c0_21] : memref<25x2x672xf32, #tpu.memory_space<vmem>>, vector<1x2x672xf32>
    %39 = vector.shape_cast %38 : vector<1x2x672xf32> to vector<2x672xf32>
    %40 = vector.shape_cast %37 : vector<2x672xf32> to vector<1x2x672xf32>
    tpu.vector_store %arg6[%c9, %c0_20, %c0_21], %40 {strides = array<i32>} : memref<25x2x672xf32, #tpu.memory_space<vmem>>, vector<1x2x672xf32>,
    %41 = vector.extract_strided_slice %0 {offsets = [0, 56], sizes = [2, 672], strides = [1, 1]} : vector<2x896xf32> to vector<2x672xf32>
    %c10 = arith.constant 10 : index
    %c0_22 = arith.constant 0 : index
    %c0_23 = arith.constant 0 : index
    %42 = vector.load %arg6[%c10, %c0_22, %c0_23] : memref<25x2x672xf32, #tpu.memory_space<vmem>>, vector<1x2x672xf32>
    %43 = vector.shape_cast %42 : vector<1x2x672xf32> to vector<2x672xf32>
    %44 = vector.shape_cast %41 : vector<2x672xf32> to vector<1x2x672xf32>
    tpu.vector_store %arg6[%c10, %c0_22, %c0_23], %44 {strides = array<i32>} : memref<25x2x672xf32, #tpu.memory_space<vmem>>, vector<1x2x672xf32>,
    %45 = vector.extract_strided_slice %0 {offsets = [0, 57], sizes = [2, 672], strides = [1, 1]} : vector<2x896xf32> to vector<2x672xf32>
    %c11 = arith.constant 11 : index
    %c0_24 = arith.constant 0 : index
    %c0_25 = arith.constant 0 : index
    %46 = vector.load %arg6[%c11, %c0_24, %c0_25] : memref<25x2x672xf32, #tpu.memory_space<vmem>>, vector<1x2x672xf32>
    %47 = vector.shape_cast %46 : vector<1x2x672xf32> to vector<2x672xf32>
    %48 = vector.shape_cast %45 : vector<2x672xf32> to vector<1x2x672xf32>
    tpu.vector_store %arg6[%c11, %c0_24, %c0_25], %48 {strides = array<i32>} : memref<25x2x672xf32, #tpu.memory_space<vmem>>, vector<1x2x672xf32>,
    %49 = vector.extract_strided_slice %0 {offsets = [0, 58], sizes = [2, 672], strides = [1, 1]} : vector<2x896xf32> to vector<2x672xf32>
    %c12 = arith.constant 12 : index
    %c0_26 = arith.constant 0 : index
    %c0_27 = arith.constant 0 : index
    %50 = vector.load %arg6[%c12, %c0_26, %c0_27] : memref<25x2x672xf32, #tpu.memory_space<vmem>>, vector<1x2x672xf32>
    %51 = vector.shape_cast %50 : vector<1x2x672xf32> to vector<2x672xf32>
    %52 = vector.shape_cast %49 : vector<2x672xf32> to vector<1x2x672xf32>
    tpu.vector_store %arg6[%c12, %c0_26, %c0_27], %52 {strides = array<i32>} : memref<25x2x672xf32, #tpu.memory_space<vmem>>, vector<1x2x672xf32>,
    %53 = vector.extract_strided_slice %0 {offsets = [0, 59], sizes = [2, 672], strides = [1, 1]} : vector<2x896xf32> to vector<2x672xf32>
    %c13 = arith.constant 13 : index
    %c0_28 = arith.constant 0 : index
    %c0_29 = arith.constant 0 : index
    %54 = vector.load %arg6[%c13, %c0_28, %c0_29] : memref<25x2x672xf32, #tpu.memory_space<vmem>>, vector<1x2x672xf32>
    %55 = vector.shape_cast %54 : vector<1x2x672xf32> to vector<2x672xf32>
    %56 = vector.shape_cast %53 : vector<2x672xf32> to vector<1x2x672xf32>
    tpu.vector_store %arg6[%c13, %c0_28, %c0_29], %56 {strides = array<i32>} : memref<25x2x672xf32, #tpu.memory_space<vmem>>, vector<1x2x672xf32>,
    %57 = vector.extract_strided_slice %0 {offsets = [0, 60], sizes = [2, 672], strides = [1, 1]} : vector<2x896xf32> to vector<2x672xf32>
    %c14 = arith.constant 14 : index
    %c0_30 = arith.constant 0 : index
    %c0_31 = arith.constant 0 : index
    %58 = vector.load %arg6[%c14, %c0_30, %c0_31] : memref<25x2x672xf32, #tpu.memory_space<vmem>>, vector<1x2x672xf32>
    %59 = vector.shape_cast %58 : vector<1x2x672xf32> to vector<2x672xf32>
    %60 = vector.shape_cast %57 : vector<2x672xf32> to vector<1x2x672xf32>
    tpu.vector_store %arg6[%c14, %c0_30, %c0_31], %60 {strides = array<i32>} : memref<25x2x672xf32, #tpu.memory_space<vmem>>, vector<1x2x672xf32>,
    %61 = vector.extract_strided_slice %0 {offsets = [0, 84], sizes = [2, 672], strides = [1, 1]} : vector<2x896xf32> to vector<2x672xf32>
    %c15 = arith.constant 15 : index
    %c0_32 = arith.constant 0 : index
    %c0_33 = arith.constant 0 : index
    %62 = vector.load %arg6[%c15, %c0_32, %c0_33] : memref<25x2x672xf32, #tpu.memory_space<vmem>>, vector<1x2x672xf32>
    %63 = vector.shape_cast %62 : vector<1x2x672xf32> to vector<2x672xf32>
    %64 = vector.shape_cast %61 : vector<2x672xf32> to vector<1x2x672xf32>
    tpu.vector_store %arg6[%c15, %c0_32, %c0_33], %64 {strides = array<i32>} : memref<25x2x672xf32, #tpu.memory_space<vmem>>, vector<1x2x672xf32>,
    %65 = vector.extract_strided_slice %0 {offsets = [0, 85], sizes = [2, 672], strides = [1, 1]} : vector<2x896xf32> to vector<2x672xf32>
    %c16 = arith.constant 16 : index
    %c0_34 = arith.constant 0 : index
    %c0_35 = arith.constant 0 : index
    %66 = vector.load %arg6[%c16, %c0_34, %c0_35] : memref<25x2x672xf32, #tpu.memory_space<vmem>>, vector<1x2x672xf32>
    %67 = vector.shape_cast %66 : vector<1x2x672xf32> to vector<2x672xf32>
    %68 = vector.shape_cast %65 : vector<2x672xf32> to vector<1x2x672xf32>
    tpu.vector_store %arg6[%c16, %c0_34, %c0_35], %68 {strides = array<i32>} : memref<25x2x672xf32, #tpu.memory_space<vmem>>, vector<1x2x672xf32>,
    %69 = vector.extract_strided_slice %0 {offsets = [0, 86], sizes = [2, 672], strides = [1, 1]} : vector<2x896xf32> to vector<2x672xf32>
    %c17 = arith.constant 17 : index
    %c0_36 = arith.constant 0 : index
    %c0_37 = arith.constant 0 : index
    %70 = vector.load %arg6[%c17, %c0_36, %c0_37] : memref<25x2x672xf32, #tpu.memory_space<vmem>>, vector<1x2x672xf32>
    %71 = vector.shape_cast %70 : vector<1x2x672xf32> to vector<2x672xf32>
    %72 = vector.shape_cast %69 : vector<2x672xf32> to vector<1x2x672xf32>
    tpu.vector_store %arg6[%c17, %c0_36, %c0_37], %72 {strides = array<i32>} : memref<25x2x672xf32, #tpu.memory_space<vmem>>, vector<1x2x672xf32>,
    %73 = vector.extract_strided_slice %0 {offsets = [0, 87], sizes = [2, 672], strides = [1, 1]} : vector<2x896xf32> to vector<2x672xf32>
    %c18 = arith.constant 18 : index
    %c0_38 = arith.constant 0 : index
    %c0_39 = arith.constant 0 : index
    %74 = vector.load %arg6[%c18, %c0_38, %c0_39] : memref<25x2x672xf32, #tpu.memory_space<vmem>>, vector<1x2x672xf32>
    %75 = vector.shape_cast %74 : vector<1x2x672xf32> to vector<2x672xf32>
    %76 = vector.shape_cast %73 : vector<2x672xf32> to vector<1x2x672xf32>
    tpu.vector_store %arg6[%c18, %c0_38, %c0_39], %76 {strides = array<i32>} : memref<25x2x672xf32, #tpu.memory_space<vmem>>, vector<1x2x672xf32>,
    %77 = vector.extract_strided_slice %0 {offsets = [0, 88], sizes = [2, 672], strides = [1, 1]} : vector<2x896xf32> to vector<2x672xf32>
    %c19 = arith.constant 19 : index
    %c0_40 = arith.constant 0 : index
    %c0_41 = arith.constant 0 : index
    %78 = vector.load %arg6[%c19, %c0_40, %c0_41] : memref<25x2x672xf32, #tpu.memory_space<vmem>>, vector<1x2x672xf32>
    %79 = vector.shape_cast %78 : vector<1x2x672xf32> to vector<2x672xf32>
    %80 = vector.shape_cast %77 : vector<2x672xf32> to vector<1x2x672xf32>
    tpu.vector_store %arg6[%c19, %c0_40, %c0_41], %80 {strides = array<i32>} : memref<25x2x672xf32, #tpu.memory_space<vmem>>, vector<1x2x672xf32>,
    %81 = vector.extract_strided_slice %0 {offsets = [0, 112], sizes = [2, 672], strides = [1, 1]} : vector<2x896xf32> to vector<2x672xf32>
    %c20 = arith.constant 20 : index
    %c0_42 = arith.constant 0 : index
    %c0_43 = arith.constant 0 : index
    %82 = vector.load %arg6[%c20, %c0_42, %c0_43] : memref<25x2x672xf32, #tpu.memory_space<vmem>>, vector<1x2x672xf32>
    %83 = vector.shape_cast %82 : vector<1x2x672xf32> to vector<2x672xf32>
    %84 = vector.shape_cast %81 : vector<2x672xf32> to vector<1x2x672xf32>
    tpu.vector_store %arg6[%c20, %c0_42, %c0_43], %84 {strides = array<i32>} : memref<25x2x672xf32, #tpu.memory_space<vmem>>, vector<1x2x672xf32>,
    %85 = vector.extract_strided_slice %0 {offsets = [0, 113], sizes = [2, 672], strides = [1, 1]} : vector<2x896xf32> to vector<2x672xf32>
    %c21 = arith.constant 21 : index
    %c0_44 = arith.constant 0 : index
    %c0_45 = arith.constant 0 : index
    %86 = vector.load %arg6[%c21, %c0_44, %c0_45] : memref<25x2x672xf32, #tpu.memory_space<vmem>>, vector<1x2x672xf32>
    %87 = vector.shape_cast %86 : vector<1x2x672xf32> to vector<2x672xf32>
    %88 = vector.shape_cast %85 : vector<2x672xf32> to vector<1x2x672xf32>
    tpu.vector_store %arg6[%c21, %c0_44, %c0_45], %88 {strides = array<i32>} : memref<25x2x672xf32, #tpu.memory_space<vmem>>, vector<1x2x672xf32>,
    %89 = vector.extract_strided_slice %0 {offsets = [0, 114], sizes = [2, 672], strides = [1, 1]} : vector<2x896xf32> to vector<2x672xf32>
    %c22 = arith.constant 22 : index
    %c0_46 = arith.constant 0 : index
    %c0_47 = arith.constant 0 : index
    %90 = vector.load %arg6[%c22, %c0_46, %c0_47] : memref<25x2x672xf32, #tpu.memory_space<vmem>>, vector<1x2x672xf32>
    %91 = vector.shape_cast %90 : vector<1x2x672xf32> to vector<2x672xf32>
    %92 = vector.shape_cast %89 : vector<2x672xf32> to vector<1x2x672xf32>
    tpu.vector_store %arg6[%c22, %c0_46, %c0_47], %92 {strides = array<i32>} : memref<25x2x672xf32, #tpu.memory_space<vmem>>, vector<1x2x672xf32>,
    %93 = vector.extract_strided_slice %0 {offsets = [0, 115], sizes = [2, 672], strides = [1, 1]} : vector<2x896xf32> to vector<2x672xf32>
    %c23 = arith.constant 23 : index
    %c0_48 = arith.constant 0 : index
    %c0_49 = arith.constant 0 : index
    %94 = vector.load %arg6[%c23, %c0_48, %c0_49] : memref<25x2x672xf32, #tpu.memory_space<vmem>>, vector<1x2x672xf32>
    %95 = vector.shape_cast %94 : vector<1x2x672xf32> to vector<2x672xf32>
    %96 = vector.shape_cast %93 : vector<2x672xf32> to vector<1x2x672xf32>
    tpu.vector_store %arg6[%c23, %c0_48, %c0_49], %96 {strides = array<i32>} : memref<25x2x672xf32, #tpu.memory_space<vmem>>, vector<1x2x672xf32>,
    %97 = vector.extract_strided_slice %0 {offsets = [0, 116], sizes = [2, 672], strides = [1, 1]} : vector<2x896xf32> to vector<2x672xf32>
    %c24 = arith.constant 24 : index
    %c0_50 = arith.constant 0 : index
    %c0_51 = arith.constant 0 : index
    %98 = vector.load %arg6[%c24, %c0_50, %c0_51] : memref<25x2x672xf32, #tpu.memory_space<vmem>>, vector<1x2x672xf32>
    %99 = vector.shape_cast %98 : vector<1x2x672xf32> to vector<2x672xf32>
    %100 = vector.shape_cast %97 : vector<2x672xf32> to vector<1x2x672xf32>
    tpu.vector_store %arg6[%c24, %c0_50, %c0_51], %100 {strides = array<i32>} : memref<25x2x672xf32, #tpu.memory_space<vmem>>, vector<1x2x672xf32>,
    %cst = arith.constant 0.000000e+00 : f32
    %101 = vector.broadcast %cst : f32 to vector<2x10xf32>
    %c0_52 = arith.constant 0 : index
    %102 = memref.load %arg2[%c0_52] : memref<9xf32, #tpu.memory_space<smem>>
    %103 = vector.broadcast %102 : f32 to vector<2x672xf32>
    %c0_53 = arith.constant 0 : index
    %c0_54 = arith.constant 0 : index
    %c0_55 = arith.constant 0 : index
    %104 = vector.load %arg6[%c0_53, %c0_54, %c0_55] : memref<25x2x672xf32, #tpu.memory_space<vmem>>, vector<1x2x672xf32>
    %105 = vector.shape_cast %104 : vector<1x2x672xf32> to vector<2x672xf32>
    %c0_56 = arith.constant 0 : index
    %106 = memref.load %arg1[%c0_56] : memref<225xf32, #tpu.memory_space<smem>>
    %107 = vector.broadcast %106 : f32 to vector<2x672xf32>
    %108 = arith.mulf %105, %107 : vector<2x672xf32>
    %109 = arith.addf %103, %108 : vector<2x672xf32>
    %c1_57 = arith.constant 1 : index
    %c0_58 = arith.constant 0 : index
    %c0_59 = arith.constant 0 : index
    %110 = vector.load %arg6[%c1_57, %c0_58, %c0_59] : memref<25x2x672xf32, #tpu.memory_space<vmem>>, vector<1x2x672xf32>
    %111 = vector.shape_cast %110 : vector<1x2x672xf32> to vector<2x672xf32>
    %c1_60 = arith.constant 1 : index
    %112 = memref.load %arg1[%c1_60] : memref<225xf32, #tpu.memory_space<smem>>
    %113 = vector.broadcast %112 : f32 to vector<2x672xf32>
    %114 = arith.mulf %111, %113 : vector<2x672xf32>
    %115 = arith.addf %109, %114 : vector<2x672xf32>
    %c2_61 = arith.constant 2 : index
    %c0_62 = arith.constant 0 : index
    %c0_63 = arith.constant 0 : index
    %116 = vector.load %arg6[%c2_61, %c0_62, %c0_63] : memref<25x2x672xf32, #tpu.memory_space<vmem>>, vector<1x2x672xf32>
    %117 = vector.shape_cast %116 : vector<1x2x672xf32> to vector<2x672xf32>
    %c2_64 = arith.constant 2 : index
    %118 = memref.load %arg1[%c2_64] : memref<225xf32, #tpu.memory_space<smem>>
    %119 = vector.broadcast %118 : f32 to vector<2x672xf32>
    %120 = arith.mulf %117, %119 : vector<2x672xf32>
    %121 = arith.addf %115, %120 : vector<2x672xf32>
    %c3_65 = arith.constant 3 : index
    %c0_66 = arith.constant 0 : index
    %c0_67 = arith.constant 0 : index
    %122 = vector.load %arg6[%c3_65, %c0_66, %c0_67] : memref<25x2x672xf32, #tpu.memory_space<vmem>>, vector<1x2x672xf32>
    %123 = vector.shape_cast %122 : vector<1x2x672xf32> to vector<2x672xf32>
    %c3_68 = arith.constant 3 : index
    %124 = memref.load %arg1[%c3_68] : memref<225xf32, #tpu.memory_space<smem>>
    %125 = vector.broadcast %124 : f32 to vector<2x672xf32>
    %126 = arith.mulf %123, %125 : vector<2x672xf32>
    %127 = arith.addf %121, %126 : vector<2x672xf32>
    %c4_69 = arith.constant 4 : index
    %c0_70 = arith.constant 0 : index
    %c0_71 = arith.constant 0 : index
    %128 = vector.load %arg6[%c4_69, %c0_70, %c0_71] : memref<25x2x672xf32, #tpu.memory_space<vmem>>, vector<1x2x672xf32>
    %129 = vector.shape_cast %128 : vector<1x2x672xf32> to vector<2x672xf32>
    %c4_72 = arith.constant 4 : index
    %130 = memref.load %arg1[%c4_72] : memref<225xf32, #tpu.memory_space<smem>>
    %131 = vector.broadcast %130 : f32 to vector<2x672xf32>
    %132 = arith.mulf %129, %131 : vector<2x672xf32>
    %133 = arith.addf %127, %132 : vector<2x672xf32>
    %c5_73 = arith.constant 5 : index
    %c0_74 = arith.constant 0 : index
    %c0_75 = arith.constant 0 : index
    %134 = vector.load %arg6[%c5_73, %c0_74, %c0_75] : memref<25x2x672xf32, #tpu.memory_space<vmem>>, vector<1x2x672xf32>
    %135 = vector.shape_cast %134 : vector<1x2x672xf32> to vector<2x672xf32>
    %c5_76 = arith.constant 5 : index
    %136 = memref.load %arg1[%c5_76] : memref<225xf32, #tpu.memory_space<smem>>
    %137 = vector.broadcast %136 : f32 to vector<2x672xf32>
    %138 = arith.mulf %135, %137 : vector<2x672xf32>
    %139 = arith.addf %133, %138 : vector<2x672xf32>
    %c6_77 = arith.constant 6 : index
    %c0_78 = arith.constant 0 : index
    %c0_79 = arith.constant 0 : index
    %140 = vector.load %arg6[%c6_77, %c0_78, %c0_79] : memref<25x2x672xf32, #tpu.memory_space<vmem>>, vector<1x2x672xf32>
    %141 = vector.shape_cast %140 : vector<1x2x672xf32> to vector<2x672xf32>
    %c6_80 = arith.constant 6 : index
    %142 = memref.load %arg1[%c6_80] : memref<225xf32, #tpu.memory_space<smem>>
    %143 = vector.broadcast %142 : f32 to vector<2x672xf32>
    %144 = arith.mulf %141, %143 : vector<2x672xf32>
    %145 = arith.addf %139, %144 : vector<2x672xf32>
    %c7_81 = arith.constant 7 : index
    %c0_82 = arith.constant 0 : index
    %c0_83 = arith.constant 0 : index
    %146 = vector.load %arg6[%c7_81, %c0_82, %c0_83] : memref<25x2x672xf32, #tpu.memory_space<vmem>>, vector<1x2x672xf32>
    %147 = vector.shape_cast %146 : vector<1x2x672xf32> to vector<2x672xf32>
    %c7_84 = arith.constant 7 : index
    %148 = memref.load %arg1[%c7_84] : memref<225xf32, #tpu.memory_space<smem>>
    %149 = vector.broadcast %148 : f32 to vector<2x672xf32>
    %150 = arith.mulf %147, %149 : vector<2x672xf32>
    %151 = arith.addf %145, %150 : vector<2x672xf32>
    %c8_85 = arith.constant 8 : index
    %c0_86 = arith.constant 0 : index
    %c0_87 = arith.constant 0 : index
    %152 = vector.load %arg6[%c8_85, %c0_86, %c0_87] : memref<25x2x672xf32, #tpu.memory_space<vmem>>, vector<1x2x672xf32>
    %153 = vector.shape_cast %152 : vector<1x2x672xf32> to vector<2x672xf32>
    %c8_88 = arith.constant 8 : index
    %154 = memref.load %arg1[%c8_88] : memref<225xf32, #tpu.memory_space<smem>>
    %155 = vector.broadcast %154 : f32 to vector<2x672xf32>
    %156 = arith.mulf %153, %155 : vector<2x672xf32>
    %157 = arith.addf %151, %156 : vector<2x672xf32>
    %c9_89 = arith.constant 9 : index
    %c0_90 = arith.constant 0 : index
    %c0_91 = arith.constant 0 : index
    %158 = vector.load %arg6[%c9_89, %c0_90, %c0_91] : memref<25x2x672xf32, #tpu.memory_space<vmem>>, vector<1x2x672xf32>
    %159 = vector.shape_cast %158 : vector<1x2x672xf32> to vector<2x672xf32>
    %c9_92 = arith.constant 9 : index
    %160 = memref.load %arg1[%c9_92] : memref<225xf32, #tpu.memory_space<smem>>
    %161 = vector.broadcast %160 : f32 to vector<2x672xf32>
    %162 = arith.mulf %159, %161 : vector<2x672xf32>
    %163 = arith.addf %157, %162 : vector<2x672xf32>
    %c10_93 = arith.constant 10 : index
    %c0_94 = arith.constant 0 : index
    %c0_95 = arith.constant 0 : index
    %164 = vector.load %arg6[%c10_93, %c0_94, %c0_95] : memref<25x2x672xf32, #tpu.memory_space<vmem>>, vector<1x2x672xf32>
    %165 = vector.shape_cast %164 : vector<1x2x672xf32> to vector<2x672xf32>
    %c10_96 = arith.constant 10 : index
    %166 = memref.load %arg1[%c10_96] : memref<225xf32, #tpu.memory_space<smem>>
    %167 = vector.broadcast %166 : f32 to vector<2x672xf32>
    %168 = arith.mulf %165, %167 : vector<2x672xf32>
    %169 = arith.addf %163, %168 : vector<2x672xf32>
    %c11_97 = arith.constant 11 : index
    %c0_98 = arith.constant 0 : index
    %c0_99 = arith.constant 0 : index
    %170 = vector.load %arg6[%c11_97, %c0_98, %c0_99] : memref<25x2x672xf32, #tpu.memory_space<vmem>>, vector<1x2x672xf32>
    %171 = vector.shape_cast %170 : vector<1x2x672xf32> to vector<2x672xf32>
    %c11_100 = arith.constant 11 : index
    %172 = memref.load %arg1[%c11_100] : memref<225xf32, #tpu.memory_space<smem>>
    %173 = vector.broadcast %172 : f32 to vector<2x672xf32>
    %174 = arith.mulf %171, %173 : vector<2x672xf32>
    %175 = arith.addf %169, %174 : vector<2x672xf32>
    %c12_101 = arith.constant 12 : index
    %c0_102 = arith.constant 0 : index
    %c0_103 = arith.constant 0 : index
    %176 = vector.load %arg6[%c12_101, %c0_102, %c0_103] : memref<25x2x672xf32, #tpu.memory_space<vmem>>, vector<1x2x672xf32>
    %177 = vector.shape_cast %176 : vector<1x2x672xf32> to vector<2x672xf32>
    %c12_104 = arith.constant 12 : index
    %178 = memref.load %arg1[%c12_104] : memref<225xf32, #tpu.memory_space<smem>>
    %179 = vector.broadcast %178 : f32 to vector<2x672xf32>
    %180 = arith.mulf %177, %179 : vector<2x672xf32>
    %181 = arith.addf %175, %180 : vector<2x672xf32>
    %c13_105 = arith.constant 13 : index
    %c0_106 = arith.constant 0 : index
    %c0_107 = arith.constant 0 : index
    %182 = vector.load %arg6[%c13_105, %c0_106, %c0_107] : memref<25x2x672xf32, #tpu.memory_space<vmem>>, vector<1x2x672xf32>
    %183 = vector.shape_cast %182 : vector<1x2x672xf32> to vector<2x672xf32>
    %c13_108 = arith.constant 13 : index
    %184 = memref.load %arg1[%c13_108] : memref<225xf32, #tpu.memory_space<smem>>
    %185 = vector.broadcast %184 : f32 to vector<2x672xf32>
    %186 = arith.mulf %183, %185 : vector<2x672xf32>
    %187 = arith.addf %181, %186 : vector<2x672xf32>
    %c14_109 = arith.constant 14 : index
    %c0_110 = arith.constant 0 : index
    %c0_111 = arith.constant 0 : index
    %188 = vector.load %arg6[%c14_109, %c0_110, %c0_111] : memref<25x2x672xf32, #tpu.memory_space<vmem>>, vector<1x2x672xf32>
    %189 = vector.shape_cast %188 : vector<1x2x672xf32> to vector<2x672xf32>
    %c14_112 = arith.constant 14 : index
    %190 = memref.load %arg1[%c14_112] : memref<225xf32, #tpu.memory_space<smem>>
    %191 = vector.broadcast %190 : f32 to vector<2x672xf32>
    %192 = arith.mulf %189, %191 : vector<2x672xf32>
    %193 = arith.addf %187, %192 : vector<2x672xf32>
    %c15_113 = arith.constant 15 : index
    %c0_114 = arith.constant 0 : index
    %c0_115 = arith.constant 0 : index
    %194 = vector.load %arg6[%c15_113, %c0_114, %c0_115] : memref<25x2x672xf32, #tpu.memory_space<vmem>>, vector<1x2x672xf32>
    %195 = vector.shape_cast %194 : vector<1x2x672xf32> to vector<2x672xf32>
    %c15_116 = arith.constant 15 : index
    %196 = memref.load %arg1[%c15_116] : memref<225xf32, #tpu.memory_space<smem>>
    %197 = vector.broadcast %196 : f32 to vector<2x672xf32>
    %198 = arith.mulf %195, %197 : vector<2x672xf32>
    %199 = arith.addf %193, %198 : vector<2x672xf32>
    %c16_117 = arith.constant 16 : index
    %c0_118 = arith.constant 0 : index
    %c0_119 = arith.constant 0 : index
    %200 = vector.load %arg6[%c16_117, %c0_118, %c0_119] : memref<25x2x672xf32, #tpu.memory_space<vmem>>, vector<1x2x672xf32>
    %201 = vector.shape_cast %200 : vector<1x2x672xf32> to vector<2x672xf32>
    %c16_120 = arith.constant 16 : index
    %202 = memref.load %arg1[%c16_120] : memref<225xf32, #tpu.memory_space<smem>>
    %203 = vector.broadcast %202 : f32 to vector<2x672xf32>
    %204 = arith.mulf %201, %203 : vector<2x672xf32>
    %205 = arith.addf %199, %204 : vector<2x672xf32>
    %c17_121 = arith.constant 17 : index
    %c0_122 = arith.constant 0 : index
    %c0_123 = arith.constant 0 : index
    %206 = vector.load %arg6[%c17_121, %c0_122, %c0_123] : memref<25x2x672xf32, #tpu.memory_space<vmem>>, vector<1x2x672xf32>
    %207 = vector.shape_cast %206 : vector<1x2x672xf32> to vector<2x672xf32>
    %c17_124 = arith.constant 17 : index
    %208 = memref.load %arg1[%c17_124] : memref<225xf32, #tpu.memory_space<smem>>
    %209 = vector.broadcast %208 : f32 to vector<2x672xf32>
    %210 = arith.mulf %207, %209 : vector<2x672xf32>
    %211 = arith.addf %205, %210 : vector<2x672xf32>
    %c18_125 = arith.constant 18 : index
    %c0_126 = arith.constant 0 : index
    %c0_127 = arith.constant 0 : index
    %212 = vector.load %arg6[%c18_125, %c0_126, %c0_127] : memref<25x2x672xf32, #tpu.memory_space<vmem>>, vector<1x2x672xf32>
    %213 = vector.shape_cast %212 : vector<1x2x672xf32> to vector<2x672xf32>
    %c18_128 = arith.constant 18 : index
    %214 = memref.load %arg1[%c18_128] : memref<225xf32, #tpu.memory_space<smem>>
    %215 = vector.broadcast %214 : f32 to vector<2x672xf32>
    %216 = arith.mulf %213, %215 : vector<2x672xf32>
    %217 = arith.addf %211, %216 : vector<2x672xf32>
    %c19_129 = arith.constant 19 : index
    %c0_130 = arith.constant 0 : index
    %c0_131 = arith.constant 0 : index
    %218 = vector.load %arg6[%c19_129, %c0_130, %c0_131] : memref<25x2x672xf32, #tpu.memory_space<vmem>>, vector<1x2x672xf32>
    %219 = vector.shape_cast %218 : vector<1x2x672xf32> to vector<2x672xf32>
    %c19_132 = arith.constant 19 : index
    %220 = memref.load %arg1[%c19_132] : memref<225xf32, #tpu.memory_space<smem>>
    %221 = vector.broadcast %220 : f32 to vector<2x672xf32>
    %222 = arith.mulf %219, %221 : vector<2x672xf32>
    %223 = arith.addf %217, %222 : vector<2x672xf32>
    %c20_133 = arith.constant 20 : index
    %c0_134 = arith.constant 0 : index
    %c0_135 = arith.constant 0 : index
    %224 = vector.load %arg6[%c20_133, %c0_134, %c0_135] : memref<25x2x672xf32, #tpu.memory_space<vmem>>, vector<1x2x672xf32>
    %225 = vector.shape_cast %224 : vector<1x2x672xf32> to vector<2x672xf32>
    %c20_136 = arith.constant 20 : index
    %226 = memref.load %arg1[%c20_136] : memref<225xf32, #tpu.memory_space<smem>>
    %227 = vector.broadcast %226 : f32 to vector<2x672xf32>
    %228 = arith.mulf %225, %227 : vector<2x672xf32>
    %229 = arith.addf %223, %228 : vector<2x672xf32>
    %c21_137 = arith.constant 21 : index
    %c0_138 = arith.constant 0 : index
    %c0_139 = arith.constant 0 : index
    %230 = vector.load %arg6[%c21_137, %c0_138, %c0_139] : memref<25x2x672xf32, #tpu.memory_space<vmem>>, vector<1x2x672xf32>
    %231 = vector.shape_cast %230 : vector<1x2x672xf32> to vector<2x672xf32>
    %c21_140 = arith.constant 21 : index
    %232 = memref.load %arg1[%c21_140] : memref<225xf32, #tpu.memory_space<smem>>
    %233 = vector.broadcast %232 : f32 to vector<2x672xf32>
    %234 = arith.mulf %231, %233 : vector<2x672xf32>
    %235 = arith.addf %229, %234 : vector<2x672xf32>
    %c22_141 = arith.constant 22 : index
    %c0_142 = arith.constant 0 : index
    %c0_143 = arith.constant 0 : index
    %236 = vector.load %arg6[%c22_141, %c0_142, %c0_143] : memref<25x2x672xf32, #tpu.memory_space<vmem>>, vector<1x2x672xf32>
    %237 = vector.shape_cast %236 : vector<1x2x672xf32> to vector<2x672xf32>
    %c22_144 = arith.constant 22 : index
    %238 = memref.load %arg1[%c22_144] : memref<225xf32, #tpu.memory_space<smem>>
    %239 = vector.broadcast %238 : f32 to vector<2x672xf32>
    %240 = arith.mulf %237, %239 : vector<2x672xf32>
    %241 = arith.addf %235, %240 : vector<2x672xf32>
    %c23_145 = arith.constant 23 : index
    %c0_146 = arith.constant 0 : index
    %c0_147 = arith.constant 0 : index
    %242 = vector.load %arg6[%c23_145, %c0_146, %c0_147] : memref<25x2x672xf32, #tpu.memory_space<vmem>>, vector<1x2x672xf32>
    %243 = vector.shape_cast %242 : vector<1x2x672xf32> to vector<2x672xf32>
    %c23_148 = arith.constant 23 : index
    %244 = memref.load %arg1[%c23_148] : memref<225xf32, #tpu.memory_space<smem>>
    %245 = vector.broadcast %244 : f32 to vector<2x672xf32>
    %246 = arith.mulf %243, %245 : vector<2x672xf32>
    %247 = arith.addf %241, %246 : vector<2x672xf32>
    %c24_149 = arith.constant 24 : index
    %c0_150 = arith.constant 0 : index
    %c0_151 = arith.constant 0 : index
    %248 = vector.load %arg6[%c24_149, %c0_150, %c0_151] : memref<25x2x672xf32, #tpu.memory_space<vmem>>, vector<1x2x672xf32>
    %249 = vector.shape_cast %248 : vector<1x2x672xf32> to vector<2x672xf32>
    %c24_152 = arith.constant 24 : index
    %250 = memref.load %arg1[%c24_152] : memref<225xf32, #tpu.memory_space<smem>>
    %251 = vector.broadcast %250 : f32 to vector<2x672xf32>
    %252 = arith.mulf %249, %251 : vector<2x672xf32>
    %253 = arith.addf %247, %252 : vector<2x672xf32>
    %cst_153 = arith.constant 0.000000e+00 : f32
    %254 = vector.broadcast %cst_153 : f32 to vector<2x672xf32>
    %255 = arith.maximumf %253, %254 : vector<2x672xf32>
    %c0_154 = arith.constant 0 : index
    %c0_155 = arith.constant 0 : index
    %c0_156 = arith.constant 0 : index
    %256 = vector.load %arg3[%c0_154, %c0_155, %c0_156] : memref<9x672x10xf32, #tpu.memory_space<vmem>>, vector<1x672x10xf32>
    %257 = vector.shape_cast %256 : vector<1x672x10xf32> to vector<672x10xf32>
    %cst_157 = arith.constant dense<0.000000e+00> : vector<2x10xf32>
    %258 = tpu.matmul %255, %257, %cst_157 {dimension_numbers = #tpu.dot_dimension_numbers<[1], [0], [0], [1], [0, 0, 1, 1], [], []>} : vector<2x672xf32>, vector<672x10xf32>, vector<2x10xf32> -> vector<2x10xf32>
    %259 = arith.addf %101, %258 : vector<2x10xf32>
    %c1_158 = arith.constant 1 : index
    %260 = memref.load %arg2[%c1_158] : memref<9xf32, #tpu.memory_space<smem>>
    %261 = vector.broadcast %260 : f32 to vector<2x672xf32>
    %c0_159 = arith.constant 0 : index
    %c0_160 = arith.constant 0 : index
    %c0_161 = arith.constant 0 : index
    %262 = vector.load %arg6[%c0_159, %c0_160, %c0_161] : memref<25x2x672xf32, #tpu.memory_space<vmem>>, vector<1x2x672xf32>
    %263 = vector.shape_cast %262 : vector<1x2x672xf32> to vector<2x672xf32>
    %c25 = arith.constant 25 : index
    %264 = memref.load %arg1[%c25] : memref<225xf32, #tpu.memory_space<smem>>
    %265 = vector.broadcast %264 : f32 to vector<2x672xf32>
    %266 = arith.mulf %263, %265 : vector<2x672xf32>
    %267 = arith.addf %261, %266 : vector<2x672xf32>
    %c1_162 = arith.constant 1 : index
    %c0_163 = arith.constant 0 : index
    %c0_164 = arith.constant 0 : index
    %268 = vector.load %arg6[%c1_162, %c0_163, %c0_164] : memref<25x2x672xf32, #tpu.memory_space<vmem>>, vector<1x2x672xf32>
    %269 = vector.shape_cast %268 : vector<1x2x672xf32> to vector<2x672xf32>
    %c26 = arith.constant 26 : index
    %270 = memref.load %arg1[%c26] : memref<225xf32, #tpu.memory_space<smem>>
    %271 = vector.broadcast %270 : f32 to vector<2x672xf32>
    %272 = arith.mulf %269, %271 : vector<2x672xf32>
    %273 = arith.addf %267, %272 : vector<2x672xf32>
    %c2_165 = arith.constant 2 : index
    %c0_166 = arith.constant 0 : index
    %c0_167 = arith.constant 0 : index
    %274 = vector.load %arg6[%c2_165, %c0_166, %c0_167] : memref<25x2x672xf32, #tpu.memory_space<vmem>>, vector<1x2x672xf32>
    %275 = vector.shape_cast %274 : vector<1x2x672xf32> to vector<2x672xf32>
    %c27 = arith.constant 27 : index
    %276 = memref.load %arg1[%c27] : memref<225xf32, #tpu.memory_space<smem>>
    %277 = vector.broadcast %276 : f32 to vector<2x672xf32>
    %278 = arith.mulf %275, %277 : vector<2x672xf32>
    %279 = arith.addf %273, %278 : vector<2x672xf32>
    %c3_168 = arith.constant 3 : index
    %c0_169 = arith.constant 0 : index
    %c0_170 = arith.constant 0 : index
    %280 = vector.load %arg6[%c3_168, %c0_169, %c0_170] : memref<25x2x672xf32, #tpu.memory_space<vmem>>, vector<1x2x672xf32>
    %281 = vector.shape_cast %280 : vector<1x2x672xf32> to vector<2x672xf32>
    %c28 = arith.constant 28 : index
    %282 = memref.load %arg1[%c28] : memref<225xf32, #tpu.memory_space<smem>>
    %283 = vector.broadcast %282 : f32 to vector<2x672xf32>
    %284 = arith.mulf %281, %283 : vector<2x672xf32>
    %285 = arith.addf %279, %284 : vector<2x672xf32>
    %c4_171 = arith.constant 4 : index
    %c0_172 = arith.constant 0 : index
    %c0_173 = arith.constant 0 : index
    %286 = vector.load %arg6[%c4_171, %c0_172, %c0_173] : memref<25x2x672xf32, #tpu.memory_space<vmem>>, vector<1x2x672xf32>
    %287 = vector.shape_cast %286 : vector<1x2x672xf32> to vector<2x672xf32>
    %c29 = arith.constant 29 : index
    %288 = memref.load %arg1[%c29] : memref<225xf32, #tpu.memory_space<smem>>
    %289 = vector.broadcast %288 : f32 to vector<2x672xf32>
    %290 = arith.mulf %287, %289 : vector<2x672xf32>
    %291 = arith.addf %285, %290 : vector<2x672xf32>
    %c5_174 = arith.constant 5 : index
    %c0_175 = arith.constant 0 : index
    %c0_176 = arith.constant 0 : index
    %292 = vector.load %arg6[%c5_174, %c0_175, %c0_176] : memref<25x2x672xf32, #tpu.memory_space<vmem>>, vector<1x2x672xf32>
    %293 = vector.shape_cast %292 : vector<1x2x672xf32> to vector<2x672xf32>
    %c30 = arith.constant 30 : index
    %294 = memref.load %arg1[%c30] : memref<225xf32, #tpu.memory_space<smem>>
    %295 = vector.broadcast %294 : f32 to vector<2x672xf32>
    %296 = arith.mulf %293, %295 : vector<2x672xf32>
    %297 = arith.addf %291, %296 : vector<2x672xf32>
    %c6_177 = arith.constant 6 : index
    %c0_178 = arith.constant 0 : index
    %c0_179 = arith.constant 0 : index
    %298 = vector.load %arg6[%c6_177, %c0_178, %c0_179] : memref<25x2x672xf32, #tpu.memory_space<vmem>>, vector<1x2x672xf32>
    %299 = vector.shape_cast %298 : vector<1x2x672xf32> to vector<2x672xf32>
    %c31 = arith.constant 31 : index
    %300 = memref.load %arg1[%c31] : memref<225xf32, #tpu.memory_space<smem>>
    %301 = vector.broadcast %300 : f32 to vector<2x672xf32>
    %302 = arith.mulf %299, %301 : vector<2x672xf32>
    %303 = arith.addf %297, %302 : vector<2x672xf32>
    %c7_180 = arith.constant 7 : index
    %c0_181 = arith.constant 0 : index
    %c0_182 = arith.constant 0 : index
    %304 = vector.load %arg6[%c7_180, %c0_181, %c0_182] : memref<25x2x672xf32, #tpu.memory_space<vmem>>, vector<1x2x672xf32>
    %305 = vector.shape_cast %304 : vector<1x2x672xf32> to vector<2x672xf32>
    %c32 = arith.constant 32 : index
    %306 = memref.load %arg1[%c32] : memref<225xf32, #tpu.memory_space<smem>>
    %307 = vector.broadcast %306 : f32 to vector<2x672xf32>
    %308 = arith.mulf %305, %307 : vector<2x672xf32>
    %309 = arith.addf %303, %308 : vector<2x672xf32>
    %c8_183 = arith.constant 8 : index
    %c0_184 = arith.constant 0 : index
    %c0_185 = arith.constant 0 : index
    %310 = vector.load %arg6[%c8_183, %c0_184, %c0_185] : memref<25x2x672xf32, #tpu.memory_space<vmem>>, vector<1x2x672xf32>
    %311 = vector.shape_cast %310 : vector<1x2x672xf32> to vector<2x672xf32>
    %c33 = arith.constant 33 : index
    %312 = memref.load %arg1[%c33] : memref<225xf32, #tpu.memory_space<smem>>
    %313 = vector.broadcast %312 : f32 to vector<2x672xf32>
    %314 = arith.mulf %311, %313 : vector<2x672xf32>
    %315 = arith.addf %309, %314 : vector<2x672xf32>
    %c9_186 = arith.constant 9 : index
    %c0_187 = arith.constant 0 : index
    %c0_188 = arith.constant 0 : index
    %316 = vector.load %arg6[%c9_186, %c0_187, %c0_188] : memref<25x2x672xf32, #tpu.memory_space<vmem>>, vector<1x2x672xf32>
    %317 = vector.shape_cast %316 : vector<1x2x672xf32> to vector<2x672xf32>
    %c34 = arith.constant 34 : index
    %318 = memref.load %arg1[%c34] : memref<225xf32, #tpu.memory_space<smem>>
    %319 = vector.broadcast %318 : f32 to vector<2x672xf32>
    %320 = arith.mulf %317, %319 : vector<2x672xf32>
    %321 = arith.addf %315, %320 : vector<2x672xf32>
    %c10_189 = arith.constant 10 : index
    %c0_190 = arith.constant 0 : index
    %c0_191 = arith.constant 0 : index
    %322 = vector.load %arg6[%c10_189, %c0_190, %c0_191] : memref<25x2x672xf32, #tpu.memory_space<vmem>>, vector<1x2x672xf32>
    %323 = vector.shape_cast %322 : vector<1x2x672xf32> to vector<2x672xf32>
    %c35 = arith.constant 35 : index
    %324 = memref.load %arg1[%c35] : memref<225xf32, #tpu.memory_space<smem>>
    %325 = vector.broadcast %324 : f32 to vector<2x672xf32>
    %326 = arith.mulf %323, %325 : vector<2x672xf32>
    %327 = arith.addf %321, %326 : vector<2x672xf32>
    %c11_192 = arith.constant 11 : index
    %c0_193 = arith.constant 0 : index
    %c0_194 = arith.constant 0 : index
    %328 = vector.load %arg6[%c11_192, %c0_193, %c0_194] : memref<25x2x672xf32, #tpu.memory_space<vmem>>, vector<1x2x672xf32>
    %329 = vector.shape_cast %328 : vector<1x2x672xf32> to vector<2x672xf32>
    %c36 = arith.constant 36 : index
    %330 = memref.load %arg1[%c36] : memref<225xf32, #tpu.memory_space<smem>>
    %331 = vector.broadcast %330 : f32 to vector<2x672xf32>
    %332 = arith.mulf %329, %331 : vector<2x672xf32>
    %333 = arith.addf %327, %332 : vector<2x672xf32>
    %c12_195 = arith.constant 12 : index
    %c0_196 = arith.constant 0 : index
    %c0_197 = arith.constant 0 : index
    %334 = vector.load %arg6[%c12_195, %c0_196, %c0_197] : memref<25x2x672xf32, #tpu.memory_space<vmem>>, vector<1x2x672xf32>
    %335 = vector.shape_cast %334 : vector<1x2x672xf32> to vector<2x672xf32>
    %c37 = arith.constant 37 : index
    %336 = memref.load %arg1[%c37] : memref<225xf32, #tpu.memory_space<smem>>
    %337 = vector.broadcast %336 : f32 to vector<2x672xf32>
    %338 = arith.mulf %335, %337 : vector<2x672xf32>
    %339 = arith.addf %333, %338 : vector<2x672xf32>
    %c13_198 = arith.constant 13 : index
    %c0_199 = arith.constant 0 : index
    %c0_200 = arith.constant 0 : index
    %340 = vector.load %arg6[%c13_198, %c0_199, %c0_200] : memref<25x2x672xf32, #tpu.memory_space<vmem>>, vector<1x2x672xf32>
    %341 = vector.shape_cast %340 : vector<1x2x672xf32> to vector<2x672xf32>
    %c38 = arith.constant 38 : index
    %342 = memref.load %arg1[%c38] : memref<225xf32, #tpu.memory_space<smem>>
    %343 = vector.broadcast %342 : f32 to vector<2x672xf32>
    %344 = arith.mulf %341, %343 : vector<2x672xf32>
    %345 = arith.addf %339, %344 : vector<2x672xf32>
    %c14_201 = arith.constant 14 : index
    %c0_202 = arith.constant 0 : index
    %c0_203 = arith.constant 0 : index
    %346 = vector.load %arg6[%c14_201, %c0_202, %c0_203] : memref<25x2x672xf32, #tpu.memory_space<vmem>>, vector<1x2x672xf32>
    %347 = vector.shape_cast %346 : vector<1x2x672xf32> to vector<2x672xf32>
    %c39 = arith.constant 39 : index
    %348 = memref.load %arg1[%c39] : memref<225xf32, #tpu.memory_space<smem>>
    %349 = vector.broadcast %348 : f32 to vector<2x672xf32>
    %350 = arith.mulf %347, %349 : vector<2x672xf32>
    %351 = arith.addf %345, %350 : vector<2x672xf32>
    %c15_204 = arith.constant 15 : index
    %c0_205 = arith.constant 0 : index
    %c0_206 = arith.constant 0 : index
    %352 = vector.load %arg6[%c15_204, %c0_205, %c0_206] : memref<25x2x672xf32, #tpu.memory_space<vmem>>, vector<1x2x672xf32>
    %353 = vector.shape_cast %352 : vector<1x2x672xf32> to vector<2x672xf32>
    %c40 = arith.constant 40 : index
    %354 = memref.load %arg1[%c40] : memref<225xf32, #tpu.memory_space<smem>>
    %355 = vector.broadcast %354 : f32 to vector<2x672xf32>
    %356 = arith.mulf %353, %355 : vector<2x672xf32>
    %357 = arith.addf %351, %356 : vector<2x672xf32>
    %c16_207 = arith.constant 16 : index
    %c0_208 = arith.constant 0 : index
    %c0_209 = arith.constant 0 : index
    %358 = vector.load %arg6[%c16_207, %c0_208, %c0_209] : memref<25x2x672xf32, #tpu.memory_space<vmem>>, vector<1x2x672xf32>
    %359 = vector.shape_cast %358 : vector<1x2x672xf32> to vector<2x672xf32>
    %c41 = arith.constant 41 : index
    %360 = memref.load %arg1[%c41] : memref<225xf32, #tpu.memory_space<smem>>
    %361 = vector.broadcast %360 : f32 to vector<2x672xf32>
    %362 = arith.mulf %359, %361 : vector<2x672xf32>
    %363 = arith.addf %357, %362 : vector<2x672xf32>
    %c17_210 = arith.constant 17 : index
    %c0_211 = arith.constant 0 : index
    %c0_212 = arith.constant 0 : index
    %364 = vector.load %arg6[%c17_210, %c0_211, %c0_212] : memref<25x2x672xf32, #tpu.memory_space<vmem>>, vector<1x2x672xf32>
    %365 = vector.shape_cast %364 : vector<1x2x672xf32> to vector<2x672xf32>
    %c42 = arith.constant 42 : index
    %366 = memref.load %arg1[%c42] : memref<225xf32, #tpu.memory_space<smem>>
    %367 = vector.broadcast %366 : f32 to vector<2x672xf32>
    %368 = arith.mulf %365, %367 : vector<2x672xf32>
    %369 = arith.addf %363, %368 : vector<2x672xf32>
    %c18_213 = arith.constant 18 : index
    %c0_214 = arith.constant 0 : index
    %c0_215 = arith.constant 0 : index
    %370 = vector.load %arg6[%c18_213, %c0_214, %c0_215] : memref<25x2x672xf32, #tpu.memory_space<vmem>>, vector<1x2x672xf32>
    %371 = vector.shape_cast %370 : vector<1x2x672xf32> to vector<2x672xf32>
    %c43 = arith.constant 43 : index
    %372 = memref.load %arg1[%c43] : memref<225xf32, #tpu.memory_space<smem>>
    %373 = vector.broadcast %372 : f32 to vector<2x672xf32>
    %374 = arith.mulf %371, %373 : vector<2x672xf32>
    %375 = arith.addf %369, %374 : vector<2x672xf32>
    %c19_216 = arith.constant 19 : index
    %c0_217 = arith.constant 0 : index
    %c0_218 = arith.constant 0 : index
    %376 = vector.load %arg6[%c19_216, %c0_217, %c0_218] : memref<25x2x672xf32, #tpu.memory_space<vmem>>, vector<1x2x672xf32>
    %377 = vector.shape_cast %376 : vector<1x2x672xf32> to vector<2x672xf32>
    %c44 = arith.constant 44 : index
    %378 = memref.load %arg1[%c44] : memref<225xf32, #tpu.memory_space<smem>>
    %379 = vector.broadcast %378 : f32 to vector<2x672xf32>
    %380 = arith.mulf %377, %379 : vector<2x672xf32>
    %381 = arith.addf %375, %380 : vector<2x672xf32>
    %c20_219 = arith.constant 20 : index
    %c0_220 = arith.constant 0 : index
    %c0_221 = arith.constant 0 : index
    %382 = vector.load %arg6[%c20_219, %c0_220, %c0_221] : memref<25x2x672xf32, #tpu.memory_space<vmem>>, vector<1x2x672xf32>
    %383 = vector.shape_cast %382 : vector<1x2x672xf32> to vector<2x672xf32>
    %c45 = arith.constant 45 : index
    %384 = memref.load %arg1[%c45] : memref<225xf32, #tpu.memory_space<smem>>
    %385 = vector.broadcast %384 : f32 to vector<2x672xf32>
    %386 = arith.mulf %383, %385 : vector<2x672xf32>
    %387 = arith.addf %381, %386 : vector<2x672xf32>
    %c21_222 = arith.constant 21 : index
    %c0_223 = arith.constant 0 : index
    %c0_224 = arith.constant 0 : index
    %388 = vector.load %arg6[%c21_222, %c0_223, %c0_224] : memref<25x2x672xf32, #tpu.memory_space<vmem>>, vector<1x2x672xf32>
    %389 = vector.shape_cast %388 : vector<1x2x672xf32> to vector<2x672xf32>
    %c46 = arith.constant 46 : index
    %390 = memref.load %arg1[%c46] : memref<225xf32, #tpu.memory_space<smem>>
    %391 = vector.broadcast %390 : f32 to vector<2x672xf32>
    %392 = arith.mulf %389, %391 : vector<2x672xf32>
    %393 = arith.addf %387, %392 : vector<2x672xf32>
    %c22_225 = arith.constant 22 : index
    %c0_226 = arith.constant 0 : index
    %c0_227 = arith.constant 0 : index
    %394 = vector.load %arg6[%c22_225, %c0_226, %c0_227] : memref<25x2x672xf32, #tpu.memory_space<vmem>>, vector<1x2x672xf32>
    %395 = vector.shape_cast %394 : vector<1x2x672xf32> to vector<2x672xf32>
    %c47 = arith.constant 47 : index
    %396 = memref.load %arg1[%c47] : memref<225xf32, #tpu.memory_space<smem>>
    %397 = vector.broadcast %396 : f32 to vector<2x672xf32>
    %398 = arith.mulf %395, %397 : vector<2x672xf32>
    %399 = arith.addf %393, %398 : vector<2x672xf32>
    %c23_228 = arith.constant 23 : index
    %c0_229 = arith.constant 0 : index
    %c0_230 = arith.constant 0 : index
    %400 = vector.load %arg6[%c23_228, %c0_229, %c0_230] : memref<25x2x672xf32, #tpu.memory_space<vmem>>, vector<1x2x672xf32>
    %401 = vector.shape_cast %400 : vector<1x2x672xf32> to vector<2x672xf32>
    %c48 = arith.constant 48 : index
    %402 = memref.load %arg1[%c48] : memref<225xf32, #tpu.memory_space<smem>>
    %403 = vector.broadcast %402 : f32 to vector<2x672xf32>
    %404 = arith.mulf %401, %403 : vector<2x672xf32>
    %405 = arith.addf %399, %404 : vector<2x672xf32>
    %c24_231 = arith.constant 24 : index
    %c0_232 = arith.constant 0 : index
    %c0_233 = arith.constant 0 : index
    %406 = vector.load %arg6[%c24_231, %c0_232, %c0_233] : memref<25x2x672xf32, #tpu.memory_space<vmem>>, vector<1x2x672xf32>
    %407 = vector.shape_cast %406 : vector<1x2x672xf32> to vector<2x672xf32>
    %c49 = arith.constant 49 : index
    %408 = memref.load %arg1[%c49] : memref<225xf32, #tpu.memory_space<smem>>
    %409 = vector.broadcast %408 : f32 to vector<2x672xf32>
    %410 = arith.mulf %407, %409 : vector<2x672xf32>
    %411 = arith.addf %405, %410 : vector<2x672xf32>
    %cst_234 = arith.constant 0.000000e+00 : f32
    %412 = vector.broadcast %cst_234 : f32 to vector<2x672xf32>
    %413 = arith.maximumf %411, %412 : vector<2x672xf32>
    %c1_235 = arith.constant 1 : index
    %c0_236 = arith.constant 0 : index
    %c0_237 = arith.constant 0 : index
    %414 = vector.load %arg3[%c1_235, %c0_236, %c0_237] : memref<9x672x10xf32, #tpu.memory_space<vmem>>, vector<1x672x10xf32>
    %415 = vector.shape_cast %414 : vector<1x672x10xf32> to vector<672x10xf32>
    %cst_238 = arith.constant dense<0.000000e+00> : vector<2x10xf32>
    %416 = tpu.matmul %413, %415, %cst_238 {dimension_numbers = #tpu.dot_dimension_numbers<[1], [0], [0], [1], [0, 0, 1, 1], [], []>} : vector<2x672xf32>, vector<672x10xf32>, vector<2x10xf32> -> vector<2x10xf32>
    %417 = arith.addf %259, %416 : vector<2x10xf32>
    %c2_239 = arith.constant 2 : index
    %418 = memref.load %arg2[%c2_239] : memref<9xf32, #tpu.memory_space<smem>>
    %419 = vector.broadcast %418 : f32 to vector<2x672xf32>
    %c0_240 = arith.constant 0 : index
    %c0_241 = arith.constant 0 : index
    %c0_242 = arith.constant 0 : index
    %420 = vector.load %arg6[%c0_240, %c0_241, %c0_242] : memref<25x2x672xf32, #tpu.memory_space<vmem>>, vector<1x2x672xf32>
    %421 = vector.shape_cast %420 : vector<1x2x672xf32> to vector<2x672xf32>
    %c50 = arith.constant 50 : index
    %422 = memref.load %arg1[%c50] : memref<225xf32, #tpu.memory_space<smem>>
    %423 = vector.broadcast %422 : f32 to vector<2x672xf32>
    %424 = arith.mulf %421, %423 : vector<2x672xf32>
    %425 = arith.addf %419, %424 : vector<2x672xf32>
    %c1_243 = arith.constant 1 : index
    %c0_244 = arith.constant 0 : index
    %c0_245 = arith.constant 0 : index
    %426 = vector.load %arg6[%c1_243, %c0_244, %c0_245] : memref<25x2x672xf32, #tpu.memory_space<vmem>>, vector<1x2x672xf32>
    %427 = vector.shape_cast %426 : vector<1x2x672xf32> to vector<2x672xf32>
    %c51 = arith.constant 51 : index
    %428 = memref.load %arg1[%c51] : memref<225xf32, #tpu.memory_space<smem>>
    %429 = vector.broadcast %428 : f32 to vector<2x672xf32>
    %430 = arith.mulf %427, %429 : vector<2x672xf32>
    %431 = arith.addf %425, %430 : vector<2x672xf32>
    %c2_246 = arith.constant 2 : index
    %c0_247 = arith.constant 0 : index
    %c0_248 = arith.constant 0 : index
    %432 = vector.load %arg6[%c2_246, %c0_247, %c0_248] : memref<25x2x672xf32, #tpu.memory_space<vmem>>, vector<1x2x672xf32>
    %433 = vector.shape_cast %432 : vector<1x2x672xf32> to vector<2x672xf32>
    %c52 = arith.constant 52 : index
    %434 = memref.load %arg1[%c52] : memref<225xf32, #tpu.memory_space<smem>>
    %435 = vector.broadcast %434 : f32 to vector<2x672xf32>
    %436 = arith.mulf %433, %435 : vector<2x672xf32>
    %437 = arith.addf %431, %436 : vector<2x672xf32>
    %c3_249 = arith.constant 3 : index
    %c0_250 = arith.constant 0 : index
    %c0_251 = arith.constant 0 : index
    %438 = vector.load %arg6[%c3_249, %c0_250, %c0_251] : memref<25x2x672xf32, #tpu.memory_space<vmem>>, vector<1x2x672xf32>
    %439 = vector.shape_cast %438 : vector<1x2x672xf32> to vector<2x672xf32>
    %c53 = arith.constant 53 : index
    %440 = memref.load %arg1[%c53] : memref<225xf32, #tpu.memory_space<smem>>
    %441 = vector.broadcast %440 : f32 to vector<2x672xf32>
    %442 = arith.mulf %439, %441 : vector<2x672xf32>
    %443 = arith.addf %437, %442 : vector<2x672xf32>
    %c4_252 = arith.constant 4 : index
    %c0_253 = arith.constant 0 : index
    %c0_254 = arith.constant 0 : index
    %444 = vector.load %arg6[%c4_252, %c0_253, %c0_254] : memref<25x2x672xf32, #tpu.memory_space<vmem>>, vector<1x2x672xf32>
    %445 = vector.shape_cast %444 : vector<1x2x672xf32> to vector<2x672xf32>
    %c54 = arith.constant 54 : index
    %446 = memref.load %arg1[%c54] : memref<225xf32, #tpu.memory_space<smem>>
    %447 = vector.broadcast %446 : f32 to vector<2x672xf32>
    %448 = arith.mulf %445, %447 : vector<2x672xf32>
    %449 = arith.addf %443, %448 : vector<2x672xf32>
    %c5_255 = arith.constant 5 : index
    %c0_256 = arith.constant 0 : index
    %c0_257 = arith.constant 0 : index
    %450 = vector.load %arg6[%c5_255, %c0_256, %c0_257] : memref<25x2x672xf32, #tpu.memory_space<vmem>>, vector<1x2x672xf32>
    %451 = vector.shape_cast %450 : vector<1x2x672xf32> to vector<2x672xf32>
    %c55 = arith.constant 55 : index
    %452 = memref.load %arg1[%c55] : memref<225xf32, #tpu.memory_space<smem>>
    %453 = vector.broadcast %452 : f32 to vector<2x672xf32>
    %454 = arith.mulf %451, %453 : vector<2x672xf32>
    %455 = arith.addf %449, %454 : vector<2x672xf32>
    %c6_258 = arith.constant 6 : index
    %c0_259 = arith.constant 0 : index
    %c0_260 = arith.constant 0 : index
    %456 = vector.load %arg6[%c6_258, %c0_259, %c0_260] : memref<25x2x672xf32, #tpu.memory_space<vmem>>, vector<1x2x672xf32>
    %457 = vector.shape_cast %456 : vector<1x2x672xf32> to vector<2x672xf32>
    %c56 = arith.constant 56 : index
    %458 = memref.load %arg1[%c56] : memref<225xf32, #tpu.memory_space<smem>>
    %459 = vector.broadcast %458 : f32 to vector<2x672xf32>
    %460 = arith.mulf %457, %459 : vector<2x672xf32>
    %461 = arith.addf %455, %460 : vector<2x672xf32>
    %c7_261 = arith.constant 7 : index
    %c0_262 = arith.constant 0 : index
    %c0_263 = arith.constant 0 : index
    %462 = vector.load %arg6[%c7_261, %c0_262, %c0_263] : memref<25x2x672xf32, #tpu.memory_space<vmem>>, vector<1x2x672xf32>
    %463 = vector.shape_cast %462 : vector<1x2x672xf32> to vector<2x672xf32>
    %c57 = arith.constant 57 : index
    %464 = memref.load %arg1[%c57] : memref<225xf32, #tpu.memory_space<smem>>
    %465 = vector.broadcast %464 : f32 to vector<2x672xf32>
    %466 = arith.mulf %463, %465 : vector<2x672xf32>
    %467 = arith.addf %461, %466 : vector<2x672xf32>
    %c8_264 = arith.constant 8 : index
    %c0_265 = arith.constant 0 : index
    %c0_266 = arith.constant 0 : index
    %468 = vector.load %arg6[%c8_264, %c0_265, %c0_266] : memref<25x2x672xf32, #tpu.memory_space<vmem>>, vector<1x2x672xf32>
    %469 = vector.shape_cast %468 : vector<1x2x672xf32> to vector<2x672xf32>
    %c58 = arith.constant 58 : index
    %470 = memref.load %arg1[%c58] : memref<225xf32, #tpu.memory_space<smem>>
    %471 = vector.broadcast %470 : f32 to vector<2x672xf32>
    %472 = arith.mulf %469, %471 : vector<2x672xf32>
    %473 = arith.addf %467, %472 : vector<2x672xf32>
    %c9_267 = arith.constant 9 : index
    %c0_268 = arith.constant 0 : index
    %c0_269 = arith.constant 0 : index
    %474 = vector.load %arg6[%c9_267, %c0_268, %c0_269] : memref<25x2x672xf32, #tpu.memory_space<vmem>>, vector<1x2x672xf32>
    %475 = vector.shape_cast %474 : vector<1x2x672xf32> to vector<2x672xf32>
    %c59 = arith.constant 59 : index
    %476 = memref.load %arg1[%c59] : memref<225xf32, #tpu.memory_space<smem>>
    %477 = vector.broadcast %476 : f32 to vector<2x672xf32>
    %478 = arith.mulf %475, %477 : vector<2x672xf32>
    %479 = arith.addf %473, %478 : vector<2x672xf32>
    %c10_270 = arith.constant 10 : index
    %c0_271 = arith.constant 0 : index
    %c0_272 = arith.constant 0 : index
    %480 = vector.load %arg6[%c10_270, %c0_271, %c0_272] : memref<25x2x672xf32, #tpu.memory_space<vmem>>, vector<1x2x672xf32>
    %481 = vector.shape_cast %480 : vector<1x2x672xf32> to vector<2x672xf32>
    %c60 = arith.constant 60 : index
    %482 = memref.load %arg1[%c60] : memref<225xf32, #tpu.memory_space<smem>>
    %483 = vector.broadcast %482 : f32 to vector<2x672xf32>
    %484 = arith.mulf %481, %483 : vector<2x672xf32>
    %485 = arith.addf %479, %484 : vector<2x672xf32>
    %c11_273 = arith.constant 11 : index
    %c0_274 = arith.constant 0 : index
    %c0_275 = arith.constant 0 : index
    %486 = vector.load %arg6[%c11_273, %c0_274, %c0_275] : memref<25x2x672xf32, #tpu.memory_space<vmem>>, vector<1x2x672xf32>
    %487 = vector.shape_cast %486 : vector<1x2x672xf32> to vector<2x672xf32>
    %c61 = arith.constant 61 : index
    %488 = memref.load %arg1[%c61] : memref<225xf32, #tpu.memory_space<smem>>
    %489 = vector.broadcast %488 : f32 to vector<2x672xf32>
    %490 = arith.mulf %487, %489 : vector<2x672xf32>
    %491 = arith.addf %485, %490 : vector<2x672xf32>
    %c12_276 = arith.constant 12 : index
    %c0_277 = arith.constant 0 : index
    %c0_278 = arith.constant 0 : index
    %492 = vector.load %arg6[%c12_276, %c0_277, %c0_278] : memref<25x2x672xf32, #tpu.memory_space<vmem>>, vector<1x2x672xf32>
    %493 = vector.shape_cast %492 : vector<1x2x672xf32> to vector<2x672xf32>
    %c62 = arith.constant 62 : index
    %494 = memref.load %arg1[%c62] : memref<225xf32, #tpu.memory_space<smem>>
    %495 = vector.broadcast %494 : f32 to vector<2x672xf32>
    %496 = arith.mulf %493, %495 : vector<2x672xf32>
    %497 = arith.addf %491, %496 : vector<2x672xf32>
    %c13_279 = arith.constant 13 : index
    %c0_280 = arith.constant 0 : index
    %c0_281 = arith.constant 0 : index
    %498 = vector.load %arg6[%c13_279, %c0_280, %c0_281] : memref<25x2x672xf32, #tpu.memory_space<vmem>>, vector<1x2x672xf32>
    %499 = vector.shape_cast %498 : vector<1x2x672xf32> to vector<2x672xf32>
    %c63 = arith.constant 63 : index
    %500 = memref.load %arg1[%c63] : memref<225xf32, #tpu.memory_space<smem>>
    %501 = vector.broadcast %500 : f32 to vector<2x672xf32>
    %502 = arith.mulf %499, %501 : vector<2x672xf32>
    %503 = arith.addf %497, %502 : vector<2x672xf32>
    %c14_282 = arith.constant 14 : index
    %c0_283 = arith.constant 0 : index
    %c0_284 = arith.constant 0 : index
    %504 = vector.load %arg6[%c14_282, %c0_283, %c0_284] : memref<25x2x672xf32, #tpu.memory_space<vmem>>, vector<1x2x672xf32>
    %505 = vector.shape_cast %504 : vector<1x2x672xf32> to vector<2x672xf32>
    %c64 = arith.constant 64 : index
    %506 = memref.load %arg1[%c64] : memref<225xf32, #tpu.memory_space<smem>>
    %507 = vector.broadcast %506 : f32 to vector<2x672xf32>
    %508 = arith.mulf %505, %507 : vector<2x672xf32>
    %509 = arith.addf %503, %508 : vector<2x672xf32>
    %c15_285 = arith.constant 15 : index
    %c0_286 = arith.constant 0 : index
    %c0_287 = arith.constant 0 : index
    %510 = vector.load %arg6[%c15_285, %c0_286, %c0_287] : memref<25x2x672xf32, #tpu.memory_space<vmem>>, vector<1x2x672xf32>
    %511 = vector.shape_cast %510 : vector<1x2x672xf32> to vector<2x672xf32>
    %c65 = arith.constant 65 : index
    %512 = memref.load %arg1[%c65] : memref<225xf32, #tpu.memory_space<smem>>
    %513 = vector.broadcast %512 : f32 to vector<2x672xf32>
    %514 = arith.mulf %511, %513 : vector<2x672xf32>
    %515 = arith.addf %509, %514 : vector<2x672xf32>
    %c16_288 = arith.constant 16 : index
    %c0_289 = arith.constant 0 : index
    %c0_290 = arith.constant 0 : index
    %516 = vector.load %arg6[%c16_288, %c0_289, %c0_290] : memref<25x2x672xf32, #tpu.memory_space<vmem>>, vector<1x2x672xf32>
    %517 = vector.shape_cast %516 : vector<1x2x672xf32> to vector<2x672xf32>
    %c66 = arith.constant 66 : index
    %518 = memref.load %arg1[%c66] : memref<225xf32, #tpu.memory_space<smem>>
    %519 = vector.broadcast %518 : f32 to vector<2x672xf32>
    %520 = arith.mulf %517, %519 : vector<2x672xf32>
    %521 = arith.addf %515, %520 : vector<2x672xf32>
    %c17_291 = arith.constant 17 : index
    %c0_292 = arith.constant 0 : index
    %c0_293 = arith.constant 0 : index
    %522 = vector.load %arg6[%c17_291, %c0_292, %c0_293] : memref<25x2x672xf32, #tpu.memory_space<vmem>>, vector<1x2x672xf32>
    %523 = vector.shape_cast %522 : vector<1x2x672xf32> to vector<2x672xf32>
    %c67 = arith.constant 67 : index
    %524 = memref.load %arg1[%c67] : memref<225xf32, #tpu.memory_space<smem>>
    %525 = vector.broadcast %524 : f32 to vector<2x672xf32>
    %526 = arith.mulf %523, %525 : vector<2x672xf32>
    %527 = arith.addf %521, %526 : vector<2x672xf32>
    %c18_294 = arith.constant 18 : index
    %c0_295 = arith.constant 0 : index
    %c0_296 = arith.constant 0 : index
    %528 = vector.load %arg6[%c18_294, %c0_295, %c0_296] : memref<25x2x672xf32, #tpu.memory_space<vmem>>, vector<1x2x672xf32>
    %529 = vector.shape_cast %528 : vector<1x2x672xf32> to vector<2x672xf32>
    %c68 = arith.constant 68 : index
    %530 = memref.load %arg1[%c68] : memref<225xf32, #tpu.memory_space<smem>>
    %531 = vector.broadcast %530 : f32 to vector<2x672xf32>
    %532 = arith.mulf %529, %531 : vector<2x672xf32>
    %533 = arith.addf %527, %532 : vector<2x672xf32>
    %c19_297 = arith.constant 19 : index
    %c0_298 = arith.constant 0 : index
    %c0_299 = arith.constant 0 : index
    %534 = vector.load %arg6[%c19_297, %c0_298, %c0_299] : memref<25x2x672xf32, #tpu.memory_space<vmem>>, vector<1x2x672xf32>
    %535 = vector.shape_cast %534 : vector<1x2x672xf32> to vector<2x672xf32>
    %c69 = arith.constant 69 : index
    %536 = memref.load %arg1[%c69] : memref<225xf32, #tpu.memory_space<smem>>
    %537 = vector.broadcast %536 : f32 to vector<2x672xf32>
    %538 = arith.mulf %535, %537 : vector<2x672xf32>
    %539 = arith.addf %533, %538 : vector<2x672xf32>
    %c20_300 = arith.constant 20 : index
    %c0_301 = arith.constant 0 : index
    %c0_302 = arith.constant 0 : index
    %540 = vector.load %arg6[%c20_300, %c0_301, %c0_302] : memref<25x2x672xf32, #tpu.memory_space<vmem>>, vector<1x2x672xf32>
    %541 = vector.shape_cast %540 : vector<1x2x672xf32> to vector<2x672xf32>
    %c70 = arith.constant 70 : index
    %542 = memref.load %arg1[%c70] : memref<225xf32, #tpu.memory_space<smem>>
    %543 = vector.broadcast %542 : f32 to vector<2x672xf32>
    %544 = arith.mulf %541, %543 : vector<2x672xf32>
    %545 = arith.addf %539, %544 : vector<2x672xf32>
    %c21_303 = arith.constant 21 : index
    %c0_304 = arith.constant 0 : index
    %c0_305 = arith.constant 0 : index
    %546 = vector.load %arg6[%c21_303, %c0_304, %c0_305] : memref<25x2x672xf32, #tpu.memory_space<vmem>>, vector<1x2x672xf32>
    %547 = vector.shape_cast %546 : vector<1x2x672xf32> to vector<2x672xf32>
    %c71 = arith.constant 71 : index
    %548 = memref.load %arg1[%c71] : memref<225xf32, #tpu.memory_space<smem>>
    %549 = vector.broadcast %548 : f32 to vector<2x672xf32>
    %550 = arith.mulf %547, %549 : vector<2x672xf32>
    %551 = arith.addf %545, %550 : vector<2x672xf32>
    %c22_306 = arith.constant 22 : index
    %c0_307 = arith.constant 0 : index
    %c0_308 = arith.constant 0 : index
    %552 = vector.load %arg6[%c22_306, %c0_307, %c0_308] : memref<25x2x672xf32, #tpu.memory_space<vmem>>, vector<1x2x672xf32>
    %553 = vector.shape_cast %552 : vector<1x2x672xf32> to vector<2x672xf32>
    %c72 = arith.constant 72 : index
    %554 = memref.load %arg1[%c72] : memref<225xf32, #tpu.memory_space<smem>>
    %555 = vector.broadcast %554 : f32 to vector<2x672xf32>
    %556 = arith.mulf %553, %555 : vector<2x672xf32>
    %557 = arith.addf %551, %556 : vector<2x672xf32>
    %c23_309 = arith.constant 23 : index
    %c0_310 = arith.constant 0 : index
    %c0_311 = arith.constant 0 : index
    %558 = vector.load %arg6[%c23_309, %c0_310, %c0_311] : memref<25x2x672xf32, #tpu.memory_space<vmem>>, vector<1x2x672xf32>
    %559 = vector.shape_cast %558 : vector<1x2x672xf32> to vector<2x672xf32>
    %c73 = arith.constant 73 : index
    %560 = memref.load %arg1[%c73] : memref<225xf32, #tpu.memory_space<smem>>
    %561 = vector.broadcast %560 : f32 to vector<2x672xf32>
    %562 = arith.mulf %559, %561 : vector<2x672xf32>
    %563 = arith.addf %557, %562 : vector<2x672xf32>
    %c24_312 = arith.constant 24 : index
    %c0_313 = arith.constant 0 : index
    %c0_314 = arith.constant 0 : index
    %564 = vector.load %arg6[%c24_312, %c0_313, %c0_314] : memref<25x2x672xf32, #tpu.memory_space<vmem>>, vector<1x2x672xf32>
    %565 = vector.shape_cast %564 : vector<1x2x672xf32> to vector<2x672xf32>
    %c74 = arith.constant 74 : index
    %566 = memref.load %arg1[%c74] : memref<225xf32, #tpu.memory_space<smem>>
    %567 = vector.broadcast %566 : f32 to vector<2x672xf32>
    %568 = arith.mulf %565, %567 : vector<2x672xf32>
    %569 = arith.addf %563, %568 : vector<2x672xf32>
    %cst_315 = arith.constant 0.000000e+00 : f32
    %570 = vector.broadcast %cst_315 : f32 to vector<2x672xf32>
    %571 = arith.maximumf %569, %570 : vector<2x672xf32>
    %c2_316 = arith.constant 2 : index
    %c0_317 = arith.constant 0 : index
    %c0_318 = arith.constant 0 : index
    %572 = vector.load %arg3[%c2_316, %c0_317, %c0_318] : memref<9x672x10xf32, #tpu.memory_space<vmem>>, vector<1x672x10xf32>
    %573 = vector.shape_cast %572 : vector<1x672x10xf32> to vector<672x10xf32>
    %cst_319 = arith.constant dense<0.000000e+00> : vector<2x10xf32>
    %574 = tpu.matmul %571, %573, %cst_319 {dimension_numbers = #tpu.dot_dimension_numbers<[1], [0], [0], [1], [0, 0, 1, 1], [], []>} : vector<2x672xf32>, vector<672x10xf32>, vector<2x10xf32> -> vector<2x10xf32>
    %575 = arith.addf %417, %574 : vector<2x10xf32>
    %c3_320 = arith.constant 3 : index
    %576 = memref.load %arg2[%c3_320] : memref<9xf32, #tpu.memory_space<smem>>
    %577 = vector.broadcast %576 : f32 to vector<2x672xf32>
    %c0_321 = arith.constant 0 : index
    %c0_322 = arith.constant 0 : index
    %c0_323 = arith.constant 0 : index
    %578 = vector.load %arg6[%c0_321, %c0_322, %c0_323] : memref<25x2x672xf32, #tpu.memory_space<vmem>>, vector<1x2x672xf32>
    %579 = vector.shape_cast %578 : vector<1x2x672xf32> to vector<2x672xf32>
    %c75 = arith.constant 75 : index
    %580 = memref.load %arg1[%c75] : memref<225xf32, #tpu.memory_space<smem>>
    %581 = vector.broadcast %580 : f32 to vector<2x672xf32>
    %582 = arith.mulf %579, %581 : vector<2x672xf32>
    %583 = arith.addf %577, %582 : vector<2x672xf32>
    %c1_324 = arith.constant 1 : index
    %c0_325 = arith.constant 0 : index
    %c0_326 = arith.constant 0 : index
    %584 = vector.load %arg6[%c1_324, %c0_325, %c0_326] : memref<25x2x672xf32, #tpu.memory_space<vmem>>, vector<1x2x672xf32>
    %585 = vector.shape_cast %584 : vector<1x2x672xf32> to vector<2x672xf32>
    %c76 = arith.constant 76 : index
    %586 = memref.load %arg1[%c76] : memref<225xf32, #tpu.memory_space<smem>>
    %587 = vector.broadcast %586 : f32 to vector<2x672xf32>
    %588 = arith.mulf %585, %587 : vector<2x672xf32>
    %589 = arith.addf %583, %588 : vector<2x672xf32>
    %c2_327 = arith.constant 2 : index
    %c0_328 = arith.constant 0 : index
    %c0_329 = arith.constant 0 : index
    %590 = vector.load %arg6[%c2_327, %c0_328, %c0_329] : memref<25x2x672xf32, #tpu.memory_space<vmem>>, vector<1x2x672xf32>
    %591 = vector.shape_cast %590 : vector<1x2x672xf32> to vector<2x672xf32>
    %c77 = arith.constant 77 : index
    %592 = memref.load %arg1[%c77] : memref<225xf32, #tpu.memory_space<smem>>
    %593 = vector.broadcast %592 : f32 to vector<2x672xf32>
    %594 = arith.mulf %591, %593 : vector<2x672xf32>
    %595 = arith.addf %589, %594 : vector<2x672xf32>
    %c3_330 = arith.constant 3 : index
    %c0_331 = arith.constant 0 : index
    %c0_332 = arith.constant 0 : index
    %596 = vector.load %arg6[%c3_330, %c0_331, %c0_332] : memref<25x2x672xf32, #tpu.memory_space<vmem>>, vector<1x2x672xf32>
    %597 = vector.shape_cast %596 : vector<1x2x672xf32> to vector<2x672xf32>
    %c78 = arith.constant 78 : index
    %598 = memref.load %arg1[%c78] : memref<225xf32, #tpu.memory_space<smem>>
    %599 = vector.broadcast %598 : f32 to vector<2x672xf32>
    %600 = arith.mulf %597, %599 : vector<2x672xf32>
    %601 = arith.addf %595, %600 : vector<2x672xf32>
    %c4_333 = arith.constant 4 : index
    %c0_334 = arith.constant 0 : index
    %c0_335 = arith.constant 0 : index
    %602 = vector.load %arg6[%c4_333, %c0_334, %c0_335] : memref<25x2x672xf32, #tpu.memory_space<vmem>>, vector<1x2x672xf32>
    %603 = vector.shape_cast %602 : vector<1x2x672xf32> to vector<2x672xf32>
    %c79 = arith.constant 79 : index
    %604 = memref.load %arg1[%c79] : memref<225xf32, #tpu.memory_space<smem>>
    %605 = vector.broadcast %604 : f32 to vector<2x672xf32>
    %606 = arith.mulf %603, %605 : vector<2x672xf32>
    %607 = arith.addf %601, %606 : vector<2x672xf32>
    %c5_336 = arith.constant 5 : index
    %c0_337 = arith.constant 0 : index
    %c0_338 = arith.constant 0 : index
    %608 = vector.load %arg6[%c5_336, %c0_337, %c0_338] : memref<25x2x672xf32, #tpu.memory_space<vmem>>, vector<1x2x672xf32>
    %609 = vector.shape_cast %608 : vector<1x2x672xf32> to vector<2x672xf32>
    %c80 = arith.constant 80 : index
    %610 = memref.load %arg1[%c80] : memref<225xf32, #tpu.memory_space<smem>>
    %611 = vector.broadcast %610 : f32 to vector<2x672xf32>
    %612 = arith.mulf %609, %611 : vector<2x672xf32>
    %613 = arith.addf %607, %612 : vector<2x672xf32>
    %c6_339 = arith.constant 6 : index
    %c0_340 = arith.constant 0 : index
    %c0_341 = arith.constant 0 : index
    %614 = vector.load %arg6[%c6_339, %c0_340, %c0_341] : memref<25x2x672xf32, #tpu.memory_space<vmem>>, vector<1x2x672xf32>
    %615 = vector.shape_cast %614 : vector<1x2x672xf32> to vector<2x672xf32>
    %c81 = arith.constant 81 : index
    %616 = memref.load %arg1[%c81] : memref<225xf32, #tpu.memory_space<smem>>
    %617 = vector.broadcast %616 : f32 to vector<2x672xf32>
    %618 = arith.mulf %615, %617 : vector<2x672xf32>
    %619 = arith.addf %613, %618 : vector<2x672xf32>
    %c7_342 = arith.constant 7 : index
    %c0_343 = arith.constant 0 : index
    %c0_344 = arith.constant 0 : index
    %620 = vector.load %arg6[%c7_342, %c0_343, %c0_344] : memref<25x2x672xf32, #tpu.memory_space<vmem>>, vector<1x2x672xf32>
    %621 = vector.shape_cast %620 : vector<1x2x672xf32> to vector<2x672xf32>
    %c82 = arith.constant 82 : index
    %622 = memref.load %arg1[%c82] : memref<225xf32, #tpu.memory_space<smem>>
    %623 = vector.broadcast %622 : f32 to vector<2x672xf32>
    %624 = arith.mulf %621, %623 : vector<2x672xf32>
    %625 = arith.addf %619, %624 : vector<2x672xf32>
    %c8_345 = arith.constant 8 : index
    %c0_346 = arith.constant 0 : index
    %c0_347 = arith.constant 0 : index
    %626 = vector.load %arg6[%c8_345, %c0_346, %c0_347] : memref<25x2x672xf32, #tpu.memory_space<vmem>>, vector<1x2x672xf32>
    %627 = vector.shape_cast %626 : vector<1x2x672xf32> to vector<2x672xf32>
    %c83 = arith.constant 83 : index
    %628 = memref.load %arg1[%c83] : memref<225xf32, #tpu.memory_space<smem>>
    %629 = vector.broadcast %628 : f32 to vector<2x672xf32>
    %630 = arith.mulf %627, %629 : vector<2x672xf32>
    %631 = arith.addf %625, %630 : vector<2x672xf32>
    %c9_348 = arith.constant 9 : index
    %c0_349 = arith.constant 0 : index
    %c0_350 = arith.constant 0 : index
    %632 = vector.load %arg6[%c9_348, %c0_349, %c0_350] : memref<25x2x672xf32, #tpu.memory_space<vmem>>, vector<1x2x672xf32>
    %633 = vector.shape_cast %632 : vector<1x2x672xf32> to vector<2x672xf32>
    %c84 = arith.constant 84 : index
    %634 = memref.load %arg1[%c84] : memref<225xf32, #tpu.memory_space<smem>>
    %635 = vector.broadcast %634 : f32 to vector<2x672xf32>
    %636 = arith.mulf %633, %635 : vector<2x672xf32>
    %637 = arith.addf %631, %636 : vector<2x672xf32>
    %c10_351 = arith.constant 10 : index
    %c0_352 = arith.constant 0 : index
    %c0_353 = arith.constant 0 : index
    %638 = vector.load %arg6[%c10_351, %c0_352, %c0_353] : memref<25x2x672xf32, #tpu.memory_space<vmem>>, vector<1x2x672xf32>
    %639 = vector.shape_cast %638 : vector<1x2x672xf32> to vector<2x672xf32>
    %c85 = arith.constant 85 : index
    %640 = memref.load %arg1[%c85] : memref<225xf32, #tpu.memory_space<smem>>
    %641 = vector.broadcast %640 : f32 to vector<2x672xf32>
    %642 = arith.mulf %639, %641 : vector<2x672xf32>
    %643 = arith.addf %637, %642 : vector<2x672xf32>
    %c11_354 = arith.constant 11 : index
    %c0_355 = arith.constant 0 : index
    %c0_356 = arith.constant 0 : index
    %644 = vector.load %arg6[%c11_354, %c0_355, %c0_356] : memref<25x2x672xf32, #tpu.memory_space<vmem>>, vector<1x2x672xf32>
    %645 = vector.shape_cast %644 : vector<1x2x672xf32> to vector<2x672xf32>
    %c86 = arith.constant 86 : index
    %646 = memref.load %arg1[%c86] : memref<225xf32, #tpu.memory_space<smem>>
    %647 = vector.broadcast %646 : f32 to vector<2x672xf32>
    %648 = arith.mulf %645, %647 : vector<2x672xf32>
    %649 = arith.addf %643, %648 : vector<2x672xf32>
    %c12_357 = arith.constant 12 : index
    %c0_358 = arith.constant 0 : index
    %c0_359 = arith.constant 0 : index
    %650 = vector.load %arg6[%c12_357, %c0_358, %c0_359] : memref<25x2x672xf32, #tpu.memory_space<vmem>>, vector<1x2x672xf32>
    %651 = vector.shape_cast %650 : vector<1x2x672xf32> to vector<2x672xf32>
    %c87 = arith.constant 87 : index
    %652 = memref.load %arg1[%c87] : memref<225xf32, #tpu.memory_space<smem>>
    %653 = vector.broadcast %652 : f32 to vector<2x672xf32>
    %654 = arith.mulf %651, %653 : vector<2x672xf32>
    %655 = arith.addf %649, %654 : vector<2x672xf32>
    %c13_360 = arith.constant 13 : index
    %c0_361 = arith.constant 0 : index
    %c0_362 = arith.constant 0 : index
    %656 = vector.load %arg6[%c13_360, %c0_361, %c0_362] : memref<25x2x672xf32, #tpu.memory_space<vmem>>, vector<1x2x672xf32>
    %657 = vector.shape_cast %656 : vector<1x2x672xf32> to vector<2x672xf32>
    %c88 = arith.constant 88 : index
    %658 = memref.load %arg1[%c88] : memref<225xf32, #tpu.memory_space<smem>>
    %659 = vector.broadcast %658 : f32 to vector<2x672xf32>
    %660 = arith.mulf %657, %659 : vector<2x672xf32>
    %661 = arith.addf %655, %660 : vector<2x672xf32>
    %c14_363 = arith.constant 14 : index
    %c0_364 = arith.constant 0 : index
    %c0_365 = arith.constant 0 : index
    %662 = vector.load %arg6[%c14_363, %c0_364, %c0_365] : memref<25x2x672xf32, #tpu.memory_space<vmem>>, vector<1x2x672xf32>
    %663 = vector.shape_cast %662 : vector<1x2x672xf32> to vector<2x672xf32>
    %c89 = arith.constant 89 : index
    %664 = memref.load %arg1[%c89] : memref<225xf32, #tpu.memory_space<smem>>
    %665 = vector.broadcast %664 : f32 to vector<2x672xf32>
    %666 = arith.mulf %663, %665 : vector<2x672xf32>
    %667 = arith.addf %661, %666 : vector<2x672xf32>
    %c15_366 = arith.constant 15 : index
    %c0_367 = arith.constant 0 : index
    %c0_368 = arith.constant 0 : index
    %668 = vector.load %arg6[%c15_366, %c0_367, %c0_368] : memref<25x2x672xf32, #tpu.memory_space<vmem>>, vector<1x2x672xf32>
    %669 = vector.shape_cast %668 : vector<1x2x672xf32> to vector<2x672xf32>
    %c90 = arith.constant 90 : index
    %670 = memref.load %arg1[%c90] : memref<225xf32, #tpu.memory_space<smem>>
    %671 = vector.broadcast %670 : f32 to vector<2x672xf32>
    %672 = arith.mulf %669, %671 : vector<2x672xf32>
    %673 = arith.addf %667, %672 : vector<2x672xf32>
    %c16_369 = arith.constant 16 : index
    %c0_370 = arith.constant 0 : index
    %c0_371 = arith.constant 0 : index
    %674 = vector.load %arg6[%c16_369, %c0_370, %c0_371] : memref<25x2x672xf32, #tpu.memory_space<vmem>>, vector<1x2x672xf32>
    %675 = vector.shape_cast %674 : vector<1x2x672xf32> to vector<2x672xf32>
    %c91 = arith.constant 91 : index
    %676 = memref.load %arg1[%c91] : memref<225xf32, #tpu.memory_space<smem>>
    %677 = vector.broadcast %676 : f32 to vector<2x672xf32>
    %678 = arith.mulf %675, %677 : vector<2x672xf32>
    %679 = arith.addf %673, %678 : vector<2x672xf32>
    %c17_372 = arith.constant 17 : index
    %c0_373 = arith.constant 0 : index
    %c0_374 = arith.constant 0 : index
    %680 = vector.load %arg6[%c17_372, %c0_373, %c0_374] : memref<25x2x672xf32, #tpu.memory_space<vmem>>, vector<1x2x672xf32>
    %681 = vector.shape_cast %680 : vector<1x2x672xf32> to vector<2x672xf32>
    %c92 = arith.constant 92 : index
    %682 = memref.load %arg1[%c92] : memref<225xf32, #tpu.memory_space<smem>>
    %683 = vector.broadcast %682 : f32 to vector<2x672xf32>
    %684 = arith.mulf %681, %683 : vector<2x672xf32>
    %685 = arith.addf %679, %684 : vector<2x672xf32>
    %c18_375 = arith.constant 18 : index
    %c0_376 = arith.constant 0 : index
    %c0_377 = arith.constant 0 : index
    %686 = vector.load %arg6[%c18_375, %c0_376, %c0_377] : memref<25x2x672xf32, #tpu.memory_space<vmem>>, vector<1x2x672xf32>
    %687 = vector.shape_cast %686 : vector<1x2x672xf32> to vector<2x672xf32>
    %c93 = arith.constant 93 : index
    %688 = memref.load %arg1[%c93] : memref<225xf32, #tpu.memory_space<smem>>
    %689 = vector.broadcast %688 : f32 to vector<2x672xf32>
    %690 = arith.mulf %687, %689 : vector<2x672xf32>
    %691 = arith.addf %685, %690 : vector<2x672xf32>
    %c19_378 = arith.constant 19 : index
    %c0_379 = arith.constant 0 : index
    %c0_380 = arith.constant 0 : index
    %692 = vector.load %arg6[%c19_378, %c0_379, %c0_380] : memref<25x2x672xf32, #tpu.memory_space<vmem>>, vector<1x2x672xf32>
    %693 = vector.shape_cast %692 : vector<1x2x672xf32> to vector<2x672xf32>
    %c94 = arith.constant 94 : index
    %694 = memref.load %arg1[%c94] : memref<225xf32, #tpu.memory_space<smem>>
    %695 = vector.broadcast %694 : f32 to vector<2x672xf32>
    %696 = arith.mulf %693, %695 : vector<2x672xf32>
    %697 = arith.addf %691, %696 : vector<2x672xf32>
    %c20_381 = arith.constant 20 : index
    %c0_382 = arith.constant 0 : index
    %c0_383 = arith.constant 0 : index
    %698 = vector.load %arg6[%c20_381, %c0_382, %c0_383] : memref<25x2x672xf32, #tpu.memory_space<vmem>>, vector<1x2x672xf32>
    %699 = vector.shape_cast %698 : vector<1x2x672xf32> to vector<2x672xf32>
    %c95 = arith.constant 95 : index
    %700 = memref.load %arg1[%c95] : memref<225xf32, #tpu.memory_space<smem>>
    %701 = vector.broadcast %700 : f32 to vector<2x672xf32>
    %702 = arith.mulf %699, %701 : vector<2x672xf32>
    %703 = arith.addf %697, %702 : vector<2x672xf32>
    %c21_384 = arith.constant 21 : index
    %c0_385 = arith.constant 0 : index
    %c0_386 = arith.constant 0 : index
    %704 = vector.load %arg6[%c21_384, %c0_385, %c0_386] : memref<25x2x672xf32, #tpu.memory_space<vmem>>, vector<1x2x672xf32>
    %705 = vector.shape_cast %704 : vector<1x2x672xf32> to vector<2x672xf32>
    %c96 = arith.constant 96 : index
    %706 = memref.load %arg1[%c96] : memref<225xf32, #tpu.memory_space<smem>>
    %707 = vector.broadcast %706 : f32 to vector<2x672xf32>
    %708 = arith.mulf %705, %707 : vector<2x672xf32>
    %709 = arith.addf %703, %708 : vector<2x672xf32>
    %c22_387 = arith.constant 22 : index
    %c0_388 = arith.constant 0 : index
    %c0_389 = arith.constant 0 : index
    %710 = vector.load %arg6[%c22_387, %c0_388, %c0_389] : memref<25x2x672xf32, #tpu.memory_space<vmem>>, vector<1x2x672xf32>
    %711 = vector.shape_cast %710 : vector<1x2x672xf32> to vector<2x672xf32>
    %c97 = arith.constant 97 : index
    %712 = memref.load %arg1[%c97] : memref<225xf32, #tpu.memory_space<smem>>
    %713 = vector.broadcast %712 : f32 to vector<2x672xf32>
    %714 = arith.mulf %711, %713 : vector<2x672xf32>
    %715 = arith.addf %709, %714 : vector<2x672xf32>
    %c23_390 = arith.constant 23 : index
    %c0_391 = arith.constant 0 : index
    %c0_392 = arith.constant 0 : index
    %716 = vector.load %arg6[%c23_390, %c0_391, %c0_392] : memref<25x2x672xf32, #tpu.memory_space<vmem>>, vector<1x2x672xf32>
    %717 = vector.shape_cast %716 : vector<1x2x672xf32> to vector<2x672xf32>
    %c98 = arith.constant 98 : index
    %718 = memref.load %arg1[%c98] : memref<225xf32, #tpu.memory_space<smem>>
    %719 = vector.broadcast %718 : f32 to vector<2x672xf32>
    %720 = arith.mulf %717, %719 : vector<2x672xf32>
    %721 = arith.addf %715, %720 : vector<2x672xf32>
    %c24_393 = arith.constant 24 : index
    %c0_394 = arith.constant 0 : index
    %c0_395 = arith.constant 0 : index
    %722 = vector.load %arg6[%c24_393, %c0_394, %c0_395] : memref<25x2x672xf32, #tpu.memory_space<vmem>>, vector<1x2x672xf32>
    %723 = vector.shape_cast %722 : vector<1x2x672xf32> to vector<2x672xf32>
    %c99 = arith.constant 99 : index
    %724 = memref.load %arg1[%c99] : memref<225xf32, #tpu.memory_space<smem>>
    %725 = vector.broadcast %724 : f32 to vector<2x672xf32>
    %726 = arith.mulf %723, %725 : vector<2x672xf32>
    %727 = arith.addf %721, %726 : vector<2x672xf32>
    %cst_396 = arith.constant 0.000000e+00 : f32
    %728 = vector.broadcast %cst_396 : f32 to vector<2x672xf32>
    %729 = arith.maximumf %727, %728 : vector<2x672xf32>
    %c3_397 = arith.constant 3 : index
    %c0_398 = arith.constant 0 : index
    %c0_399 = arith.constant 0 : index
    %730 = vector.load %arg3[%c3_397, %c0_398, %c0_399] : memref<9x672x10xf32, #tpu.memory_space<vmem>>, vector<1x672x10xf32>
    %731 = vector.shape_cast %730 : vector<1x672x10xf32> to vector<672x10xf32>
    %cst_400 = arith.constant dense<0.000000e+00> : vector<2x10xf32>
    %732 = tpu.matmul %729, %731, %cst_400 {dimension_numbers = #tpu.dot_dimension_numbers<[1], [0], [0], [1], [0, 0, 1, 1], [], []>} : vector<2x672xf32>, vector<672x10xf32>, vector<2x10xf32> -> vector<2x10xf32>
    %733 = arith.addf %575, %732 : vector<2x10xf32>
    %c4_401 = arith.constant 4 : index
    %734 = memref.load %arg2[%c4_401] : memref<9xf32, #tpu.memory_space<smem>>
    %735 = vector.broadcast %734 : f32 to vector<2x672xf32>
    %c0_402 = arith.constant 0 : index
    %c0_403 = arith.constant 0 : index
    %c0_404 = arith.constant 0 : index
    %736 = vector.load %arg6[%c0_402, %c0_403, %c0_404] : memref<25x2x672xf32, #tpu.memory_space<vmem>>, vector<1x2x672xf32>
    %737 = vector.shape_cast %736 : vector<1x2x672xf32> to vector<2x672xf32>
    %c100 = arith.constant 100 : index
    %738 = memref.load %arg1[%c100] : memref<225xf32, #tpu.memory_space<smem>>
    %739 = vector.broadcast %738 : f32 to vector<2x672xf32>
    %740 = arith.mulf %737, %739 : vector<2x672xf32>
    %741 = arith.addf %735, %740 : vector<2x672xf32>
    %c1_405 = arith.constant 1 : index
    %c0_406 = arith.constant 0 : index
    %c0_407 = arith.constant 0 : index
    %742 = vector.load %arg6[%c1_405, %c0_406, %c0_407] : memref<25x2x672xf32, #tpu.memory_space<vmem>>, vector<1x2x672xf32>
    %743 = vector.shape_cast %742 : vector<1x2x672xf32> to vector<2x672xf32>
    %c101 = arith.constant 101 : index
    %744 = memref.load %arg1[%c101] : memref<225xf32, #tpu.memory_space<smem>>
    %745 = vector.broadcast %744 : f32 to vector<2x672xf32>
    %746 = arith.mulf %743, %745 : vector<2x672xf32>
    %747 = arith.addf %741, %746 : vector<2x672xf32>
    %c2_408 = arith.constant 2 : index
    %c0_409 = arith.constant 0 : index
    %c0_410 = arith.constant 0 : index
    %748 = vector.load %arg6[%c2_408, %c0_409, %c0_410] : memref<25x2x672xf32, #tpu.memory_space<vmem>>, vector<1x2x672xf32>
    %749 = vector.shape_cast %748 : vector<1x2x672xf32> to vector<2x672xf32>
    %c102 = arith.constant 102 : index
    %750 = memref.load %arg1[%c102] : memref<225xf32, #tpu.memory_space<smem>>
    %751 = vector.broadcast %750 : f32 to vector<2x672xf32>
    %752 = arith.mulf %749, %751 : vector<2x672xf32>
    %753 = arith.addf %747, %752 : vector<2x672xf32>
    %c3_411 = arith.constant 3 : index
    %c0_412 = arith.constant 0 : index
    %c0_413 = arith.constant 0 : index
    %754 = vector.load %arg6[%c3_411, %c0_412, %c0_413] : memref<25x2x672xf32, #tpu.memory_space<vmem>>, vector<1x2x672xf32>
    %755 = vector.shape_cast %754 : vector<1x2x672xf32> to vector<2x672xf32>
    %c103 = arith.constant 103 : index
    %756 = memref.load %arg1[%c103] : memref<225xf32, #tpu.memory_space<smem>>
    %757 = vector.broadcast %756 : f32 to vector<2x672xf32>
    %758 = arith.mulf %755, %757 : vector<2x672xf32>
    %759 = arith.addf %753, %758 : vector<2x672xf32>
    %c4_414 = arith.constant 4 : index
    %c0_415 = arith.constant 0 : index
    %c0_416 = arith.constant 0 : index
    %760 = vector.load %arg6[%c4_414, %c0_415, %c0_416] : memref<25x2x672xf32, #tpu.memory_space<vmem>>, vector<1x2x672xf32>
    %761 = vector.shape_cast %760 : vector<1x2x672xf32> to vector<2x672xf32>
    %c104 = arith.constant 104 : index
    %762 = memref.load %arg1[%c104] : memref<225xf32, #tpu.memory_space<smem>>
    %763 = vector.broadcast %762 : f32 to vector<2x672xf32>
    %764 = arith.mulf %761, %763 : vector<2x672xf32>
    %765 = arith.addf %759, %764 : vector<2x672xf32>
    %c5_417 = arith.constant 5 : index
    %c0_418 = arith.constant 0 : index
    %c0_419 = arith.constant 0 : index
    %766 = vector.load %arg6[%c5_417, %c0_418, %c0_419] : memref<25x2x672xf32, #tpu.memory_space<vmem>>, vector<1x2x672xf32>
    %767 = vector.shape_cast %766 : vector<1x2x672xf32> to vector<2x672xf32>
    %c105 = arith.constant 105 : index
    %768 = memref.load %arg1[%c105] : memref<225xf32, #tpu.memory_space<smem>>
    %769 = vector.broadcast %768 : f32 to vector<2x672xf32>
    %770 = arith.mulf %767, %769 : vector<2x672xf32>
    %771 = arith.addf %765, %770 : vector<2x672xf32>
    %c6_420 = arith.constant 6 : index
    %c0_421 = arith.constant 0 : index
    %c0_422 = arith.constant 0 : index
    %772 = vector.load %arg6[%c6_420, %c0_421, %c0_422] : memref<25x2x672xf32, #tpu.memory_space<vmem>>, vector<1x2x672xf32>
    %773 = vector.shape_cast %772 : vector<1x2x672xf32> to vector<2x672xf32>
    %c106 = arith.constant 106 : index
    %774 = memref.load %arg1[%c106] : memref<225xf32, #tpu.memory_space<smem>>
    %775 = vector.broadcast %774 : f32 to vector<2x672xf32>
    %776 = arith.mulf %773, %775 : vector<2x672xf32>
    %777 = arith.addf %771, %776 : vector<2x672xf32>
    %c7_423 = arith.constant 7 : index
    %c0_424 = arith.constant 0 : index
    %c0_425 = arith.constant 0 : index
    %778 = vector.load %arg6[%c7_423, %c0_424, %c0_425] : memref<25x2x672xf32, #tpu.memory_space<vmem>>, vector<1x2x672xf32>
    %779 = vector.shape_cast %778 : vector<1x2x672xf32> to vector<2x672xf32>
    %c107 = arith.constant 107 : index
    %780 = memref.load %arg1[%c107] : memref<225xf32, #tpu.memory_space<smem>>
    %781 = vector.broadcast %780 : f32 to vector<2x672xf32>
    %782 = arith.mulf %779, %781 : vector<2x672xf32>
    %783 = arith.addf %777, %782 : vector<2x672xf32>
    %c8_426 = arith.constant 8 : index
    %c0_427 = arith.constant 0 : index
    %c0_428 = arith.constant 0 : index
    %784 = vector.load %arg6[%c8_426, %c0_427, %c0_428] : memref<25x2x672xf32, #tpu.memory_space<vmem>>, vector<1x2x672xf32>
    %785 = vector.shape_cast %784 : vector<1x2x672xf32> to vector<2x672xf32>
    %c108 = arith.constant 108 : index
    %786 = memref.load %arg1[%c108] : memref<225xf32, #tpu.memory_space<smem>>
    %787 = vector.broadcast %786 : f32 to vector<2x672xf32>
    %788 = arith.mulf %785, %787 : vector<2x672xf32>
    %789 = arith.addf %783, %788 : vector<2x672xf32>
    %c9_429 = arith.constant 9 : index
    %c0_430 = arith.constant 0 : index
    %c0_431 = arith.constant 0 : index
    %790 = vector.load %arg6[%c9_429, %c0_430, %c0_431] : memref<25x2x672xf32, #tpu.memory_space<vmem>>, vector<1x2x672xf32>
    %791 = vector.shape_cast %790 : vector<1x2x672xf32> to vector<2x672xf32>
    %c109 = arith.constant 109 : index
    %792 = memref.load %arg1[%c109] : memref<225xf32, #tpu.memory_space<smem>>
    %793 = vector.broadcast %792 : f32 to vector<2x672xf32>
    %794 = arith.mulf %791, %793 : vector<2x672xf32>
    %795 = arith.addf %789, %794 : vector<2x672xf32>
    %c10_432 = arith.constant 10 : index
    %c0_433 = arith.constant 0 : index
    %c0_434 = arith.constant 0 : index
    %796 = vector.load %arg6[%c10_432, %c0_433, %c0_434] : memref<25x2x672xf32, #tpu.memory_space<vmem>>, vector<1x2x672xf32>
    %797 = vector.shape_cast %796 : vector<1x2x672xf32> to vector<2x672xf32>
    %c110 = arith.constant 110 : index
    %798 = memref.load %arg1[%c110] : memref<225xf32, #tpu.memory_space<smem>>
    %799 = vector.broadcast %798 : f32 to vector<2x672xf32>
    %800 = arith.mulf %797, %799 : vector<2x672xf32>
    %801 = arith.addf %795, %800 : vector<2x672xf32>
    %c11_435 = arith.constant 11 : index
    %c0_436 = arith.constant 0 : index
    %c0_437 = arith.constant 0 : index
    %802 = vector.load %arg6[%c11_435, %c0_436, %c0_437] : memref<25x2x672xf32, #tpu.memory_space<vmem>>, vector<1x2x672xf32>
    %803 = vector.shape_cast %802 : vector<1x2x672xf32> to vector<2x672xf32>
    %c111 = arith.constant 111 : index
    %804 = memref.load %arg1[%c111] : memref<225xf32, #tpu.memory_space<smem>>
    %805 = vector.broadcast %804 : f32 to vector<2x672xf32>
    %806 = arith.mulf %803, %805 : vector<2x672xf32>
    %807 = arith.addf %801, %806 : vector<2x672xf32>
    %c12_438 = arith.constant 12 : index
    %c0_439 = arith.constant 0 : index
    %c0_440 = arith.constant 0 : index
    %808 = vector.load %arg6[%c12_438, %c0_439, %c0_440] : memref<25x2x672xf32, #tpu.memory_space<vmem>>, vector<1x2x672xf32>
    %809 = vector.shape_cast %808 : vector<1x2x672xf32> to vector<2x672xf32>
    %c112 = arith.constant 112 : index
    %810 = memref.load %arg1[%c112] : memref<225xf32, #tpu.memory_space<smem>>
    %811 = vector.broadcast %810 : f32 to vector<2x672xf32>
    %812 = arith.mulf %809, %811 : vector<2x672xf32>
    %813 = arith.addf %807, %812 : vector<2x672xf32>
    %c13_441 = arith.constant 13 : index
    %c0_442 = arith.constant 0 : index
    %c0_443 = arith.constant 0 : index
    %814 = vector.load %arg6[%c13_441, %c0_442, %c0_443] : memref<25x2x672xf32, #tpu.memory_space<vmem>>, vector<1x2x672xf32>
    %815 = vector.shape_cast %814 : vector<1x2x672xf32> to vector<2x672xf32>
    %c113 = arith.constant 113 : index
    %816 = memref.load %arg1[%c113] : memref<225xf32, #tpu.memory_space<smem>>
    %817 = vector.broadcast %816 : f32 to vector<2x672xf32>
    %818 = arith.mulf %815, %817 : vector<2x672xf32>
    %819 = arith.addf %813, %818 : vector<2x672xf32>
    %c14_444 = arith.constant 14 : index
    %c0_445 = arith.constant 0 : index
    %c0_446 = arith.constant 0 : index
    %820 = vector.load %arg6[%c14_444, %c0_445, %c0_446] : memref<25x2x672xf32, #tpu.memory_space<vmem>>, vector<1x2x672xf32>
    %821 = vector.shape_cast %820 : vector<1x2x672xf32> to vector<2x672xf32>
    %c114 = arith.constant 114 : index
    %822 = memref.load %arg1[%c114] : memref<225xf32, #tpu.memory_space<smem>>
    %823 = vector.broadcast %822 : f32 to vector<2x672xf32>
    %824 = arith.mulf %821, %823 : vector<2x672xf32>
    %825 = arith.addf %819, %824 : vector<2x672xf32>
    %c15_447 = arith.constant 15 : index
    %c0_448 = arith.constant 0 : index
    %c0_449 = arith.constant 0 : index
    %826 = vector.load %arg6[%c15_447, %c0_448, %c0_449] : memref<25x2x672xf32, #tpu.memory_space<vmem>>, vector<1x2x672xf32>
    %827 = vector.shape_cast %826 : vector<1x2x672xf32> to vector<2x672xf32>
    %c115 = arith.constant 115 : index
    %828 = memref.load %arg1[%c115] : memref<225xf32, #tpu.memory_space<smem>>
    %829 = vector.broadcast %828 : f32 to vector<2x672xf32>
    %830 = arith.mulf %827, %829 : vector<2x672xf32>
    %831 = arith.addf %825, %830 : vector<2x672xf32>
    %c16_450 = arith.constant 16 : index
    %c0_451 = arith.constant 0 : index
    %c0_452 = arith.constant 0 : index
    %832 = vector.load %arg6[%c16_450, %c0_451, %c0_452] : memref<25x2x672xf32, #tpu.memory_space<vmem>>, vector<1x2x672xf32>
    %833 = vector.shape_cast %832 : vector<1x2x672xf32> to vector<2x672xf32>
    %c116 = arith.constant 116 : index
    %834 = memref.load %arg1[%c116] : memref<225xf32, #tpu.memory_space<smem>>
    %835 = vector.broadcast %834 : f32 to vector<2x672xf32>
    %836 = arith.mulf %833, %835 : vector<2x672xf32>
    %837 = arith.addf %831, %836 : vector<2x672xf32>
    %c17_453 = arith.constant 17 : index
    %c0_454 = arith.constant 0 : index
    %c0_455 = arith.constant 0 : index
    %838 = vector.load %arg6[%c17_453, %c0_454, %c0_455] : memref<25x2x672xf32, #tpu.memory_space<vmem>>, vector<1x2x672xf32>
    %839 = vector.shape_cast %838 : vector<1x2x672xf32> to vector<2x672xf32>
    %c117 = arith.constant 117 : index
    %840 = memref.load %arg1[%c117] : memref<225xf32, #tpu.memory_space<smem>>
    %841 = vector.broadcast %840 : f32 to vector<2x672xf32>
    %842 = arith.mulf %839, %841 : vector<2x672xf32>
    %843 = arith.addf %837, %842 : vector<2x672xf32>
    %c18_456 = arith.constant 18 : index
    %c0_457 = arith.constant 0 : index
    %c0_458 = arith.constant 0 : index
    %844 = vector.load %arg6[%c18_456, %c0_457, %c0_458] : memref<25x2x672xf32, #tpu.memory_space<vmem>>, vector<1x2x672xf32>
    %845 = vector.shape_cast %844 : vector<1x2x672xf32> to vector<2x672xf32>
    %c118 = arith.constant 118 : index
    %846 = memref.load %arg1[%c118] : memref<225xf32, #tpu.memory_space<smem>>
    %847 = vector.broadcast %846 : f32 to vector<2x672xf32>
    %848 = arith.mulf %845, %847 : vector<2x672xf32>
    %849 = arith.addf %843, %848 : vector<2x672xf32>
    %c19_459 = arith.constant 19 : index
    %c0_460 = arith.constant 0 : index
    %c0_461 = arith.constant 0 : index
    %850 = vector.load %arg6[%c19_459, %c0_460, %c0_461] : memref<25x2x672xf32, #tpu.memory_space<vmem>>, vector<1x2x672xf32>
    %851 = vector.shape_cast %850 : vector<1x2x672xf32> to vector<2x672xf32>
    %c119 = arith.constant 119 : index
    %852 = memref.load %arg1[%c119] : memref<225xf32, #tpu.memory_space<smem>>
    %853 = vector.broadcast %852 : f32 to vector<2x672xf32>
    %854 = arith.mulf %851, %853 : vector<2x672xf32>
    %855 = arith.addf %849, %854 : vector<2x672xf32>
    %c20_462 = arith.constant 20 : index
    %c0_463 = arith.constant 0 : index
    %c0_464 = arith.constant 0 : index
    %856 = vector.load %arg6[%c20_462, %c0_463, %c0_464] : memref<25x2x672xf32, #tpu.memory_space<vmem>>, vector<1x2x672xf32>
    %857 = vector.shape_cast %856 : vector<1x2x672xf32> to vector<2x672xf32>
    %c120 = arith.constant 120 : index
    %858 = memref.load %arg1[%c120] : memref<225xf32, #tpu.memory_space<smem>>
    %859 = vector.broadcast %858 : f32 to vector<2x672xf32>
    %860 = arith.mulf %857, %859 : vector<2x672xf32>
    %861 = arith.addf %855, %860 : vector<2x672xf32>
    %c21_465 = arith.constant 21 : index
    %c0_466 = arith.constant 0 : index
    %c0_467 = arith.constant 0 : index
    %862 = vector.load %arg6[%c21_465, %c0_466, %c0_467] : memref<25x2x672xf32, #tpu.memory_space<vmem>>, vector<1x2x672xf32>
    %863 = vector.shape_cast %862 : vector<1x2x672xf32> to vector<2x672xf32>
    %c121 = arith.constant 121 : index
    %864 = memref.load %arg1[%c121] : memref<225xf32, #tpu.memory_space<smem>>
    %865 = vector.broadcast %864 : f32 to vector<2x672xf32>
    %866 = arith.mulf %863, %865 : vector<2x672xf32>
    %867 = arith.addf %861, %866 : vector<2x672xf32>
    %c22_468 = arith.constant 22 : index
    %c0_469 = arith.constant 0 : index
    %c0_470 = arith.constant 0 : index
    %868 = vector.load %arg6[%c22_468, %c0_469, %c0_470] : memref<25x2x672xf32, #tpu.memory_space<vmem>>, vector<1x2x672xf32>
    %869 = vector.shape_cast %868 : vector<1x2x672xf32> to vector<2x672xf32>
    %c122 = arith.constant 122 : index
    %870 = memref.load %arg1[%c122] : memref<225xf32, #tpu.memory_space<smem>>
    %871 = vector.broadcast %870 : f32 to vector<2x672xf32>
    %872 = arith.mulf %869, %871 : vector<2x672xf32>
    %873 = arith.addf %867, %872 : vector<2x672xf32>
    %c23_471 = arith.constant 23 : index
    %c0_472 = arith.constant 0 : index
    %c0_473 = arith.constant 0 : index
    %874 = vector.load %arg6[%c23_471, %c0_472, %c0_473] : memref<25x2x672xf32, #tpu.memory_space<vmem>>, vector<1x2x672xf32>
    %875 = vector.shape_cast %874 : vector<1x2x672xf32> to vector<2x672xf32>
    %c123 = arith.constant 123 : index
    %876 = memref.load %arg1[%c123] : memref<225xf32, #tpu.memory_space<smem>>
    %877 = vector.broadcast %876 : f32 to vector<2x672xf32>
    %878 = arith.mulf %875, %877 : vector<2x672xf32>
    %879 = arith.addf %873, %878 : vector<2x672xf32>
    %c24_474 = arith.constant 24 : index
    %c0_475 = arith.constant 0 : index
    %c0_476 = arith.constant 0 : index
    %880 = vector.load %arg6[%c24_474, %c0_475, %c0_476] : memref<25x2x672xf32, #tpu.memory_space<vmem>>, vector<1x2x672xf32>
    %881 = vector.shape_cast %880 : vector<1x2x672xf32> to vector<2x672xf32>
    %c124 = arith.constant 124 : index
    %882 = memref.load %arg1[%c124] : memref<225xf32, #tpu.memory_space<smem>>
    %883 = vector.broadcast %882 : f32 to vector<2x672xf32>
    %884 = arith.mulf %881, %883 : vector<2x672xf32>
    %885 = arith.addf %879, %884 : vector<2x672xf32>
    %cst_477 = arith.constant 0.000000e+00 : f32
    %886 = vector.broadcast %cst_477 : f32 to vector<2x672xf32>
    %887 = arith.maximumf %885, %886 : vector<2x672xf32>
    %c4_478 = arith.constant 4 : index
    %c0_479 = arith.constant 0 : index
    %c0_480 = arith.constant 0 : index
    %888 = vector.load %arg3[%c4_478, %c0_479, %c0_480] : memref<9x672x10xf32, #tpu.memory_space<vmem>>, vector<1x672x10xf32>
    %889 = vector.shape_cast %888 : vector<1x672x10xf32> to vector<672x10xf32>
    %cst_481 = arith.constant dense<0.000000e+00> : vector<2x10xf32>
    %890 = tpu.matmul %887, %889, %cst_481 {dimension_numbers = #tpu.dot_dimension_numbers<[1], [0], [0], [1], [0, 0, 1, 1], [], []>} : vector<2x672xf32>, vector<672x10xf32>, vector<2x10xf32> -> vector<2x10xf32>
    %891 = arith.addf %733, %890 : vector<2x10xf32>
    %c5_482 = arith.constant 5 : index
    %892 = memref.load %arg2[%c5_482] : memref<9xf32, #tpu.memory_space<smem>>
    %893 = vector.broadcast %892 : f32 to vector<2x672xf32>
    %c0_483 = arith.constant 0 : index
    %c0_484 = arith.constant 0 : index
    %c0_485 = arith.constant 0 : index
    %894 = vector.load %arg6[%c0_483, %c0_484, %c0_485] : memref<25x2x672xf32, #tpu.memory_space<vmem>>, vector<1x2x672xf32>
    %895 = vector.shape_cast %894 : vector<1x2x672xf32> to vector<2x672xf32>
    %c125 = arith.constant 125 : index
    %896 = memref.load %arg1[%c125] : memref<225xf32, #tpu.memory_space<smem>>
    %897 = vector.broadcast %896 : f32 to vector<2x672xf32>
    %898 = arith.mulf %895, %897 : vector<2x672xf32>
    %899 = arith.addf %893, %898 : vector<2x672xf32>
    %c1_486 = arith.constant 1 : index
    %c0_487 = arith.constant 0 : index
    %c0_488 = arith.constant 0 : index
    %900 = vector.load %arg6[%c1_486, %c0_487, %c0_488] : memref<25x2x672xf32, #tpu.memory_space<vmem>>, vector<1x2x672xf32>
    %901 = vector.shape_cast %900 : vector<1x2x672xf32> to vector<2x672xf32>
    %c126 = arith.constant 126 : index
    %902 = memref.load %arg1[%c126] : memref<225xf32, #tpu.memory_space<smem>>
    %903 = vector.broadcast %902 : f32 to vector<2x672xf32>
    %904 = arith.mulf %901, %903 : vector<2x672xf32>
    %905 = arith.addf %899, %904 : vector<2x672xf32>
    %c2_489 = arith.constant 2 : index
    %c0_490 = arith.constant 0 : index
    %c0_491 = arith.constant 0 : index
    %906 = vector.load %arg6[%c2_489, %c0_490, %c0_491] : memref<25x2x672xf32, #tpu.memory_space<vmem>>, vector<1x2x672xf32>
    %907 = vector.shape_cast %906 : vector<1x2x672xf32> to vector<2x672xf32>
    %c127 = arith.constant 127 : index
    %908 = memref.load %arg1[%c127] : memref<225xf32, #tpu.memory_space<smem>>
    %909 = vector.broadcast %908 : f32 to vector<2x672xf32>
    %910 = arith.mulf %907, %909 : vector<2x672xf32>
    %911 = arith.addf %905, %910 : vector<2x672xf32>
    %c3_492 = arith.constant 3 : index
    %c0_493 = arith.constant 0 : index
    %c0_494 = arith.constant 0 : index
    %912 = vector.load %arg6[%c3_492, %c0_493, %c0_494] : memref<25x2x672xf32, #tpu.memory_space<vmem>>, vector<1x2x672xf32>
    %913 = vector.shape_cast %912 : vector<1x2x672xf32> to vector<2x672xf32>
    %c128 = arith.constant 128 : index
    %914 = memref.load %arg1[%c128] : memref<225xf32, #tpu.memory_space<smem>>
    %915 = vector.broadcast %914 : f32 to vector<2x672xf32>
    %916 = arith.mulf %913, %915 : vector<2x672xf32>
    %917 = arith.addf %911, %916 : vector<2x672xf32>
    %c4_495 = arith.constant 4 : index
    %c0_496 = arith.constant 0 : index
    %c0_497 = arith.constant 0 : index
    %918 = vector.load %arg6[%c4_495, %c0_496, %c0_497] : memref<25x2x672xf32, #tpu.memory_space<vmem>>, vector<1x2x672xf32>
    %919 = vector.shape_cast %918 : vector<1x2x672xf32> to vector<2x672xf32>
    %c129 = arith.constant 129 : index
    %920 = memref.load %arg1[%c129] : memref<225xf32, #tpu.memory_space<smem>>
    %921 = vector.broadcast %920 : f32 to vector<2x672xf32>
    %922 = arith.mulf %919, %921 : vector<2x672xf32>
    %923 = arith.addf %917, %922 : vector<2x672xf32>
    %c5_498 = arith.constant 5 : index
    %c0_499 = arith.constant 0 : index
    %c0_500 = arith.constant 0 : index
    %924 = vector.load %arg6[%c5_498, %c0_499, %c0_500] : memref<25x2x672xf32, #tpu.memory_space<vmem>>, vector<1x2x672xf32>
    %925 = vector.shape_cast %924 : vector<1x2x672xf32> to vector<2x672xf32>
    %c130 = arith.constant 130 : index
    %926 = memref.load %arg1[%c130] : memref<225xf32, #tpu.memory_space<smem>>
    %927 = vector.broadcast %926 : f32 to vector<2x672xf32>
    %928 = arith.mulf %925, %927 : vector<2x672xf32>
    %929 = arith.addf %923, %928 : vector<2x672xf32>
    %c6_501 = arith.constant 6 : index
    %c0_502 = arith.constant 0 : index
    %c0_503 = arith.constant 0 : index
    %930 = vector.load %arg6[%c6_501, %c0_502, %c0_503] : memref<25x2x672xf32, #tpu.memory_space<vmem>>, vector<1x2x672xf32>
    %931 = vector.shape_cast %930 : vector<1x2x672xf32> to vector<2x672xf32>
    %c131 = arith.constant 131 : index
    %932 = memref.load %arg1[%c131] : memref<225xf32, #tpu.memory_space<smem>>
    %933 = vector.broadcast %932 : f32 to vector<2x672xf32>
    %934 = arith.mulf %931, %933 : vector<2x672xf32>
    %935 = arith.addf %929, %934 : vector<2x672xf32>
    %c7_504 = arith.constant 7 : index
    %c0_505 = arith.constant 0 : index
    %c0_506 = arith.constant 0 : index
    %936 = vector.load %arg6[%c7_504, %c0_505, %c0_506] : memref<25x2x672xf32, #tpu.memory_space<vmem>>, vector<1x2x672xf32>
    %937 = vector.shape_cast %936 : vector<1x2x672xf32> to vector<2x672xf32>
    %c132 = arith.constant 132 : index
    %938 = memref.load %arg1[%c132] : memref<225xf32, #tpu.memory_space<smem>>
    %939 = vector.broadcast %938 : f32 to vector<2x672xf32>
    %940 = arith.mulf %937, %939 : vector<2x672xf32>
    %941 = arith.addf %935, %940 : vector<2x672xf32>
    %c8_507 = arith.constant 8 : index
    %c0_508 = arith.constant 0 : index
    %c0_509 = arith.constant 0 : index
    %942 = vector.load %arg6[%c8_507, %c0_508, %c0_509] : memref<25x2x672xf32, #tpu.memory_space<vmem>>, vector<1x2x672xf32>
    %943 = vector.shape_cast %942 : vector<1x2x672xf32> to vector<2x672xf32>
    %c133 = arith.constant 133 : index
    %944 = memref.load %arg1[%c133] : memref<225xf32, #tpu.memory_space<smem>>
    %945 = vector.broadcast %944 : f32 to vector<2x672xf32>
    %946 = arith.mulf %943, %945 : vector<2x672xf32>
    %947 = arith.addf %941, %946 : vector<2x672xf32>
    %c9_510 = arith.constant 9 : index
    %c0_511 = arith.constant 0 : index
    %c0_512 = arith.constant 0 : index
    %948 = vector.load %arg6[%c9_510, %c0_511, %c0_512] : memref<25x2x672xf32, #tpu.memory_space<vmem>>, vector<1x2x672xf32>
    %949 = vector.shape_cast %948 : vector<1x2x672xf32> to vector<2x672xf32>
    %c134 = arith.constant 134 : index
    %950 = memref.load %arg1[%c134] : memref<225xf32, #tpu.memory_space<smem>>
    %951 = vector.broadcast %950 : f32 to vector<2x672xf32>
    %952 = arith.mulf %949, %951 : vector<2x672xf32>
    %953 = arith.addf %947, %952 : vector<2x672xf32>
    %c10_513 = arith.constant 10 : index
    %c0_514 = arith.constant 0 : index
    %c0_515 = arith.constant 0 : index
    %954 = vector.load %arg6[%c10_513, %c0_514, %c0_515] : memref<25x2x672xf32, #tpu.memory_space<vmem>>, vector<1x2x672xf32>
    %955 = vector.shape_cast %954 : vector<1x2x672xf32> to vector<2x672xf32>
    %c135 = arith.constant 135 : index
    %956 = memref.load %arg1[%c135] : memref<225xf32, #tpu.memory_space<smem>>
    %957 = vector.broadcast %956 : f32 to vector<2x672xf32>
    %958 = arith.mulf %955, %957 : vector<2x672xf32>
    %959 = arith.addf %953, %958 : vector<2x672xf32>
    %c11_516 = arith.constant 11 : index
    %c0_517 = arith.constant 0 : index
    %c0_518 = arith.constant 0 : index
    %960 = vector.load %arg6[%c11_516, %c0_517, %c0_518] : memref<25x2x672xf32, #tpu.memory_space<vmem>>, vector<1x2x672xf32>
    %961 = vector.shape_cast %960 : vector<1x2x672xf32> to vector<2x672xf32>
    %c136 = arith.constant 136 : index
    %962 = memref.load %arg1[%c136] : memref<225xf32, #tpu.memory_space<smem>>
    %963 = vector.broadcast %962 : f32 to vector<2x672xf32>
    %964 = arith.mulf %961, %963 : vector<2x672xf32>
    %965 = arith.addf %959, %964 : vector<2x672xf32>
    %c12_519 = arith.constant 12 : index
    %c0_520 = arith.constant 0 : index
    %c0_521 = arith.constant 0 : index
    %966 = vector.load %arg6[%c12_519, %c0_520, %c0_521] : memref<25x2x672xf32, #tpu.memory_space<vmem>>, vector<1x2x672xf32>
    %967 = vector.shape_cast %966 : vector<1x2x672xf32> to vector<2x672xf32>
    %c137 = arith.constant 137 : index
    %968 = memref.load %arg1[%c137] : memref<225xf32, #tpu.memory_space<smem>>
    %969 = vector.broadcast %968 : f32 to vector<2x672xf32>
    %970 = arith.mulf %967, %969 : vector<2x672xf32>
    %971 = arith.addf %965, %970 : vector<2x672xf32>
    %c13_522 = arith.constant 13 : index
    %c0_523 = arith.constant 0 : index
    %c0_524 = arith.constant 0 : index
    %972 = vector.load %arg6[%c13_522, %c0_523, %c0_524] : memref<25x2x672xf32, #tpu.memory_space<vmem>>, vector<1x2x672xf32>
    %973 = vector.shape_cast %972 : vector<1x2x672xf32> to vector<2x672xf32>
    %c138 = arith.constant 138 : index
    %974 = memref.load %arg1[%c138] : memref<225xf32, #tpu.memory_space<smem>>
    %975 = vector.broadcast %974 : f32 to vector<2x672xf32>
    %976 = arith.mulf %973, %975 : vector<2x672xf32>
    %977 = arith.addf %971, %976 : vector<2x672xf32>
    %c14_525 = arith.constant 14 : index
    %c0_526 = arith.constant 0 : index
    %c0_527 = arith.constant 0 : index
    %978 = vector.load %arg6[%c14_525, %c0_526, %c0_527] : memref<25x2x672xf32, #tpu.memory_space<vmem>>, vector<1x2x672xf32>
    %979 = vector.shape_cast %978 : vector<1x2x672xf32> to vector<2x672xf32>
    %c139 = arith.constant 139 : index
    %980 = memref.load %arg1[%c139] : memref<225xf32, #tpu.memory_space<smem>>
    %981 = vector.broadcast %980 : f32 to vector<2x672xf32>
    %982 = arith.mulf %979, %981 : vector<2x672xf32>
    %983 = arith.addf %977, %982 : vector<2x672xf32>
    %c15_528 = arith.constant 15 : index
    %c0_529 = arith.constant 0 : index
    %c0_530 = arith.constant 0 : index
    %984 = vector.load %arg6[%c15_528, %c0_529, %c0_530] : memref<25x2x672xf32, #tpu.memory_space<vmem>>, vector<1x2x672xf32>
    %985 = vector.shape_cast %984 : vector<1x2x672xf32> to vector<2x672xf32>
    %c140 = arith.constant 140 : index
    %986 = memref.load %arg1[%c140] : memref<225xf32, #tpu.memory_space<smem>>
    %987 = vector.broadcast %986 : f32 to vector<2x672xf32>
    %988 = arith.mulf %985, %987 : vector<2x672xf32>
    %989 = arith.addf %983, %988 : vector<2x672xf32>
    %c16_531 = arith.constant 16 : index
    %c0_532 = arith.constant 0 : index
    %c0_533 = arith.constant 0 : index
    %990 = vector.load %arg6[%c16_531, %c0_532, %c0_533] : memref<25x2x672xf32, #tpu.memory_space<vmem>>, vector<1x2x672xf32>
    %991 = vector.shape_cast %990 : vector<1x2x672xf32> to vector<2x672xf32>
    %c141 = arith.constant 141 : index
    %992 = memref.load %arg1[%c141] : memref<225xf32, #tpu.memory_space<smem>>
    %993 = vector.broadcast %992 : f32 to vector<2x672xf32>
    %994 = arith.mulf %991, %993 : vector<2x672xf32>
    %995 = arith.addf %989, %994 : vector<2x672xf32>
    %c17_534 = arith.constant 17 : index
    %c0_535 = arith.constant 0 : index
    %c0_536 = arith.constant 0 : index
    %996 = vector.load %arg6[%c17_534, %c0_535, %c0_536] : memref<25x2x672xf32, #tpu.memory_space<vmem>>, vector<1x2x672xf32>
    %997 = vector.shape_cast %996 : vector<1x2x672xf32> to vector<2x672xf32>
    %c142 = arith.constant 142 : index
    %998 = memref.load %arg1[%c142] : memref<225xf32, #tpu.memory_space<smem>>
    %999 = vector.broadcast %998 : f32 to vector<2x672xf32>
    %1000 = arith.mulf %997, %999 : vector<2x672xf32>
    %1001 = arith.addf %995, %1000 : vector<2x672xf32>
    %c18_537 = arith.constant 18 : index
    %c0_538 = arith.constant 0 : index
    %c0_539 = arith.constant 0 : index
    %1002 = vector.load %arg6[%c18_537, %c0_538, %c0_539] : memref<25x2x672xf32, #tpu.memory_space<vmem>>, vector<1x2x672xf32>
    %1003 = vector.shape_cast %1002 : vector<1x2x672xf32> to vector<2x672xf32>
    %c143 = arith.constant 143 : index
    %1004 = memref.load %arg1[%c143] : memref<225xf32, #tpu.memory_space<smem>>
    %1005 = vector.broadcast %1004 : f32 to vector<2x672xf32>
    %1006 = arith.mulf %1003, %1005 : vector<2x672xf32>
    %1007 = arith.addf %1001, %1006 : vector<2x672xf32>
    %c19_540 = arith.constant 19 : index
    %c0_541 = arith.constant 0 : index
    %c0_542 = arith.constant 0 : index
    %1008 = vector.load %arg6[%c19_540, %c0_541, %c0_542] : memref<25x2x672xf32, #tpu.memory_space<vmem>>, vector<1x2x672xf32>
    %1009 = vector.shape_cast %1008 : vector<1x2x672xf32> to vector<2x672xf32>
    %c144 = arith.constant 144 : index
    %1010 = memref.load %arg1[%c144] : memref<225xf32, #tpu.memory_space<smem>>
    %1011 = vector.broadcast %1010 : f32 to vector<2x672xf32>
    %1012 = arith.mulf %1009, %1011 : vector<2x672xf32>
    %1013 = arith.addf %1007, %1012 : vector<2x672xf32>
    %c20_543 = arith.constant 20 : index
    %c0_544 = arith.constant 0 : index
    %c0_545 = arith.constant 0 : index
    %1014 = vector.load %arg6[%c20_543, %c0_544, %c0_545] : memref<25x2x672xf32, #tpu.memory_space<vmem>>, vector<1x2x672xf32>
    %1015 = vector.shape_cast %1014 : vector<1x2x672xf32> to vector<2x672xf32>
    %c145 = arith.constant 145 : index
    %1016 = memref.load %arg1[%c145] : memref<225xf32, #tpu.memory_space<smem>>
    %1017 = vector.broadcast %1016 : f32 to vector<2x672xf32>
    %1018 = arith.mulf %1015, %1017 : vector<2x672xf32>
    %1019 = arith.addf %1013, %1018 : vector<2x672xf32>
    %c21_546 = arith.constant 21 : index
    %c0_547 = arith.constant 0 : index
    %c0_548 = arith.constant 0 : index
    %1020 = vector.load %arg6[%c21_546, %c0_547, %c0_548] : memref<25x2x672xf32, #tpu.memory_space<vmem>>, vector<1x2x672xf32>
    %1021 = vector.shape_cast %1020 : vector<1x2x672xf32> to vector<2x672xf32>
    %c146 = arith.constant 146 : index
    %1022 = memref.load %arg1[%c146] : memref<225xf32, #tpu.memory_space<smem>>
    %1023 = vector.broadcast %1022 : f32 to vector<2x672xf32>
    %1024 = arith.mulf %1021, %1023 : vector<2x672xf32>
    %1025 = arith.addf %1019, %1024 : vector<2x672xf32>
    %c22_549 = arith.constant 22 : index
    %c0_550 = arith.constant 0 : index
    %c0_551 = arith.constant 0 : index
    %1026 = vector.load %arg6[%c22_549, %c0_550, %c0_551] : memref<25x2x672xf32, #tpu.memory_space<vmem>>, vector<1x2x672xf32>
    %1027 = vector.shape_cast %1026 : vector<1x2x672xf32> to vector<2x672xf32>
    %c147 = arith.constant 147 : index
    %1028 = memref.load %arg1[%c147] : memref<225xf32, #tpu.memory_space<smem>>
    %1029 = vector.broadcast %1028 : f32 to vector<2x672xf32>
    %1030 = arith.mulf %1027, %1029 : vector<2x672xf32>
    %1031 = arith.addf %1025, %1030 : vector<2x672xf32>
    %c23_552 = arith.constant 23 : index
    %c0_553 = arith.constant 0 : index
    %c0_554 = arith.constant 0 : index
    %1032 = vector.load %arg6[%c23_552, %c0_553, %c0_554] : memref<25x2x672xf32, #tpu.memory_space<vmem>>, vector<1x2x672xf32>
    %1033 = vector.shape_cast %1032 : vector<1x2x672xf32> to vector<2x672xf32>
    %c148 = arith.constant 148 : index
    %1034 = memref.load %arg1[%c148] : memref<225xf32, #tpu.memory_space<smem>>
    %1035 = vector.broadcast %1034 : f32 to vector<2x672xf32>
    %1036 = arith.mulf %1033, %1035 : vector<2x672xf32>
    %1037 = arith.addf %1031, %1036 : vector<2x672xf32>
    %c24_555 = arith.constant 24 : index
    %c0_556 = arith.constant 0 : index
    %c0_557 = arith.constant 0 : index
    %1038 = vector.load %arg6[%c24_555, %c0_556, %c0_557] : memref<25x2x672xf32, #tpu.memory_space<vmem>>, vector<1x2x672xf32>
    %1039 = vector.shape_cast %1038 : vector<1x2x672xf32> to vector<2x672xf32>
    %c149 = arith.constant 149 : index
    %1040 = memref.load %arg1[%c149] : memref<225xf32, #tpu.memory_space<smem>>
    %1041 = vector.broadcast %1040 : f32 to vector<2x672xf32>
    %1042 = arith.mulf %1039, %1041 : vector<2x672xf32>
    %1043 = arith.addf %1037, %1042 : vector<2x672xf32>
    %cst_558 = arith.constant 0.000000e+00 : f32
    %1044 = vector.broadcast %cst_558 : f32 to vector<2x672xf32>
    %1045 = arith.maximumf %1043, %1044 : vector<2x672xf32>
    %c5_559 = arith.constant 5 : index
    %c0_560 = arith.constant 0 : index
    %c0_561 = arith.constant 0 : index
    %1046 = vector.load %arg3[%c5_559, %c0_560, %c0_561] : memref<9x672x10xf32, #tpu.memory_space<vmem>>, vector<1x672x10xf32>
    %1047 = vector.shape_cast %1046 : vector<1x672x10xf32> to vector<672x10xf32>
    %cst_562 = arith.constant dense<0.000000e+00> : vector<2x10xf32>
    %1048 = tpu.matmul %1045, %1047, %cst_562 {dimension_numbers = #tpu.dot_dimension_numbers<[1], [0], [0], [1], [0, 0, 1, 1], [], []>} : vector<2x672xf32>, vector<672x10xf32>, vector<2x10xf32> -> vector<2x10xf32>
    %1049 = arith.addf %891, %1048 : vector<2x10xf32>
    %c6_563 = arith.constant 6 : index
    %1050 = memref.load %arg2[%c6_563] : memref<9xf32, #tpu.memory_space<smem>>
    %1051 = vector.broadcast %1050 : f32 to vector<2x672xf32>
    %c0_564 = arith.constant 0 : index
    %c0_565 = arith.constant 0 : index
    %c0_566 = arith.constant 0 : index
    %1052 = vector.load %arg6[%c0_564, %c0_565, %c0_566] : memref<25x2x672xf32, #tpu.memory_space<vmem>>, vector<1x2x672xf32>
    %1053 = vector.shape_cast %1052 : vector<1x2x672xf32> to vector<2x672xf32>
    %c150 = arith.constant 150 : index
    %1054 = memref.load %arg1[%c150] : memref<225xf32, #tpu.memory_space<smem>>
    %1055 = vector.broadcast %1054 : f32 to vector<2x672xf32>
    %1056 = arith.mulf %1053, %1055 : vector<2x672xf32>
    %1057 = arith.addf %1051, %1056 : vector<2x672xf32>
    %c1_567 = arith.constant 1 : index
    %c0_568 = arith.constant 0 : index
    %c0_569 = arith.constant 0 : index
    %1058 = vector.load %arg6[%c1_567, %c0_568, %c0_569] : memref<25x2x672xf32, #tpu.memory_space<vmem>>, vector<1x2x672xf32>
    %1059 = vector.shape_cast %1058 : vector<1x2x672xf32> to vector<2x672xf32>
    %c151 = arith.constant 151 : index
    %1060 = memref.load %arg1[%c151] : memref<225xf32, #tpu.memory_space<smem>>
    %1061 = vector.broadcast %1060 : f32 to vector<2x672xf32>
    %1062 = arith.mulf %1059, %1061 : vector<2x672xf32>
    %1063 = arith.addf %1057, %1062 : vector<2x672xf32>
    %c2_570 = arith.constant 2 : index
    %c0_571 = arith.constant 0 : index
    %c0_572 = arith.constant 0 : index
    %1064 = vector.load %arg6[%c2_570, %c0_571, %c0_572] : memref<25x2x672xf32, #tpu.memory_space<vmem>>, vector<1x2x672xf32>
    %1065 = vector.shape_cast %1064 : vector<1x2x672xf32> to vector<2x672xf32>
    %c152 = arith.constant 152 : index
    %1066 = memref.load %arg1[%c152] : memref<225xf32, #tpu.memory_space<smem>>
    %1067 = vector.broadcast %1066 : f32 to vector<2x672xf32>
    %1068 = arith.mulf %1065, %1067 : vector<2x672xf32>
    %1069 = arith.addf %1063, %1068 : vector<2x672xf32>
    %c3_573 = arith.constant 3 : index
    %c0_574 = arith.constant 0 : index
    %c0_575 = arith.constant 0 : index
    %1070 = vector.load %arg6[%c3_573, %c0_574, %c0_575] : memref<25x2x672xf32, #tpu.memory_space<vmem>>, vector<1x2x672xf32>
    %1071 = vector.shape_cast %1070 : vector<1x2x672xf32> to vector<2x672xf32>
    %c153 = arith.constant 153 : index
    %1072 = memref.load %arg1[%c153] : memref<225xf32, #tpu.memory_space<smem>>
    %1073 = vector.broadcast %1072 : f32 to vector<2x672xf32>
    %1074 = arith.mulf %1071, %1073 : vector<2x672xf32>
    %1075 = arith.addf %1069, %1074 : vector<2x672xf32>
    %c4_576 = arith.constant 4 : index
    %c0_577 = arith.constant 0 : index
    %c0_578 = arith.constant 0 : index
    %1076 = vector.load %arg6[%c4_576, %c0_577, %c0_578] : memref<25x2x672xf32, #tpu.memory_space<vmem>>, vector<1x2x672xf32>
    %1077 = vector.shape_cast %1076 : vector<1x2x672xf32> to vector<2x672xf32>
    %c154 = arith.constant 154 : index
    %1078 = memref.load %arg1[%c154] : memref<225xf32, #tpu.memory_space<smem>>
    %1079 = vector.broadcast %1078 : f32 to vector<2x672xf32>
    %1080 = arith.mulf %1077, %1079 : vector<2x672xf32>
    %1081 = arith.addf %1075, %1080 : vector<2x672xf32>
    %c5_579 = arith.constant 5 : index
    %c0_580 = arith.constant 0 : index
    %c0_581 = arith.constant 0 : index
    %1082 = vector.load %arg6[%c5_579, %c0_580, %c0_581] : memref<25x2x672xf32, #tpu.memory_space<vmem>>, vector<1x2x672xf32>
    %1083 = vector.shape_cast %1082 : vector<1x2x672xf32> to vector<2x672xf32>
    %c155 = arith.constant 155 : index
    %1084 = memref.load %arg1[%c155] : memref<225xf32, #tpu.memory_space<smem>>
    %1085 = vector.broadcast %1084 : f32 to vector<2x672xf32>
    %1086 = arith.mulf %1083, %1085 : vector<2x672xf32>
    %1087 = arith.addf %1081, %1086 : vector<2x672xf32>
    %c6_582 = arith.constant 6 : index
    %c0_583 = arith.constant 0 : index
    %c0_584 = arith.constant 0 : index
    %1088 = vector.load %arg6[%c6_582, %c0_583, %c0_584] : memref<25x2x672xf32, #tpu.memory_space<vmem>>, vector<1x2x672xf32>
    %1089 = vector.shape_cast %1088 : vector<1x2x672xf32> to vector<2x672xf32>
    %c156 = arith.constant 156 : index
    %1090 = memref.load %arg1[%c156] : memref<225xf32, #tpu.memory_space<smem>>
    %1091 = vector.broadcast %1090 : f32 to vector<2x672xf32>
    %1092 = arith.mulf %1089, %1091 : vector<2x672xf32>
    %1093 = arith.addf %1087, %1092 : vector<2x672xf32>
    %c7_585 = arith.constant 7 : index
    %c0_586 = arith.constant 0 : index
    %c0_587 = arith.constant 0 : index
    %1094 = vector.load %arg6[%c7_585, %c0_586, %c0_587] : memref<25x2x672xf32, #tpu.memory_space<vmem>>, vector<1x2x672xf32>
    %1095 = vector.shape_cast %1094 : vector<1x2x672xf32> to vector<2x672xf32>
    %c157 = arith.constant 157 : index
    %1096 = memref.load %arg1[%c157] : memref<225xf32, #tpu.memory_space<smem>>
    %1097 = vector.broadcast %1096 : f32 to vector<2x672xf32>
    %1098 = arith.mulf %1095, %1097 : vector<2x672xf32>
    %1099 = arith.addf %1093, %1098 : vector<2x672xf32>
    %c8_588 = arith.constant 8 : index
    %c0_589 = arith.constant 0 : index
    %c0_590 = arith.constant 0 : index
    %1100 = vector.load %arg6[%c8_588, %c0_589, %c0_590] : memref<25x2x672xf32, #tpu.memory_space<vmem>>, vector<1x2x672xf32>
    %1101 = vector.shape_cast %1100 : vector<1x2x672xf32> to vector<2x672xf32>
    %c158 = arith.constant 158 : index
    %1102 = memref.load %arg1[%c158] : memref<225xf32, #tpu.memory_space<smem>>
    %1103 = vector.broadcast %1102 : f32 to vector<2x672xf32>
    %1104 = arith.mulf %1101, %1103 : vector<2x672xf32>
    %1105 = arith.addf %1099, %1104 : vector<2x672xf32>
    %c9_591 = arith.constant 9 : index
    %c0_592 = arith.constant 0 : index
    %c0_593 = arith.constant 0 : index
    %1106 = vector.load %arg6[%c9_591, %c0_592, %c0_593] : memref<25x2x672xf32, #tpu.memory_space<vmem>>, vector<1x2x672xf32>
    %1107 = vector.shape_cast %1106 : vector<1x2x672xf32> to vector<2x672xf32>
    %c159 = arith.constant 159 : index
    %1108 = memref.load %arg1[%c159] : memref<225xf32, #tpu.memory_space<smem>>
    %1109 = vector.broadcast %1108 : f32 to vector<2x672xf32>
    %1110 = arith.mulf %1107, %1109 : vector<2x672xf32>
    %1111 = arith.addf %1105, %1110 : vector<2x672xf32>
    %c10_594 = arith.constant 10 : index
    %c0_595 = arith.constant 0 : index
    %c0_596 = arith.constant 0 : index
    %1112 = vector.load %arg6[%c10_594, %c0_595, %c0_596] : memref<25x2x672xf32, #tpu.memory_space<vmem>>, vector<1x2x672xf32>
    %1113 = vector.shape_cast %1112 : vector<1x2x672xf32> to vector<2x672xf32>
    %c160 = arith.constant 160 : index
    %1114 = memref.load %arg1[%c160] : memref<225xf32, #tpu.memory_space<smem>>
    %1115 = vector.broadcast %1114 : f32 to vector<2x672xf32>
    %1116 = arith.mulf %1113, %1115 : vector<2x672xf32>
    %1117 = arith.addf %1111, %1116 : vector<2x672xf32>
    %c11_597 = arith.constant 11 : index
    %c0_598 = arith.constant 0 : index
    %c0_599 = arith.constant 0 : index
    %1118 = vector.load %arg6[%c11_597, %c0_598, %c0_599] : memref<25x2x672xf32, #tpu.memory_space<vmem>>, vector<1x2x672xf32>
    %1119 = vector.shape_cast %1118 : vector<1x2x672xf32> to vector<2x672xf32>
    %c161 = arith.constant 161 : index
    %1120 = memref.load %arg1[%c161] : memref<225xf32, #tpu.memory_space<smem>>
    %1121 = vector.broadcast %1120 : f32 to vector<2x672xf32>
    %1122 = arith.mulf %1119, %1121 : vector<2x672xf32>
    %1123 = arith.addf %1117, %1122 : vector<2x672xf32>
    %c12_600 = arith.constant 12 : index
    %c0_601 = arith.constant 0 : index
    %c0_602 = arith.constant 0 : index
    %1124 = vector.load %arg6[%c12_600, %c0_601, %c0_602] : memref<25x2x672xf32, #tpu.memory_space<vmem>>, vector<1x2x672xf32>
    %1125 = vector.shape_cast %1124 : vector<1x2x672xf32> to vector<2x672xf32>
    %c162 = arith.constant 162 : index
    %1126 = memref.load %arg1[%c162] : memref<225xf32, #tpu.memory_space<smem>>
    %1127 = vector.broadcast %1126 : f32 to vector<2x672xf32>
    %1128 = arith.mulf %1125, %1127 : vector<2x672xf32>
    %1129 = arith.addf %1123, %1128 : vector<2x672xf32>
    %c13_603 = arith.constant 13 : index
    %c0_604 = arith.constant 0 : index
    %c0_605 = arith.constant 0 : index
    %1130 = vector.load %arg6[%c13_603, %c0_604, %c0_605] : memref<25x2x672xf32, #tpu.memory_space<vmem>>, vector<1x2x672xf32>
    %1131 = vector.shape_cast %1130 : vector<1x2x672xf32> to vector<2x672xf32>
    %c163 = arith.constant 163 : index
    %1132 = memref.load %arg1[%c163] : memref<225xf32, #tpu.memory_space<smem>>
    %1133 = vector.broadcast %1132 : f32 to vector<2x672xf32>
    %1134 = arith.mulf %1131, %1133 : vector<2x672xf32>
    %1135 = arith.addf %1129, %1134 : vector<2x672xf32>
    %c14_606 = arith.constant 14 : index
    %c0_607 = arith.constant 0 : index
    %c0_608 = arith.constant 0 : index
    %1136 = vector.load %arg6[%c14_606, %c0_607, %c0_608] : memref<25x2x672xf32, #tpu.memory_space<vmem>>, vector<1x2x672xf32>
    %1137 = vector.shape_cast %1136 : vector<1x2x672xf32> to vector<2x672xf32>
    %c164 = arith.constant 164 : index
    %1138 = memref.load %arg1[%c164] : memref<225xf32, #tpu.memory_space<smem>>
    %1139 = vector.broadcast %1138 : f32 to vector<2x672xf32>
    %1140 = arith.mulf %1137, %1139 : vector<2x672xf32>
    %1141 = arith.addf %1135, %1140 : vector<2x672xf32>
    %c15_609 = arith.constant 15 : index
    %c0_610 = arith.constant 0 : index
    %c0_611 = arith.constant 0 : index
    %1142 = vector.load %arg6[%c15_609, %c0_610, %c0_611] : memref<25x2x672xf32, #tpu.memory_space<vmem>>, vector<1x2x672xf32>
    %1143 = vector.shape_cast %1142 : vector<1x2x672xf32> to vector<2x672xf32>
    %c165 = arith.constant 165 : index
    %1144 = memref.load %arg1[%c165] : memref<225xf32, #tpu.memory_space<smem>>
    %1145 = vector.broadcast %1144 : f32 to vector<2x672xf32>
    %1146 = arith.mulf %1143, %1145 : vector<2x672xf32>
    %1147 = arith.addf %1141, %1146 : vector<2x672xf32>
    %c16_612 = arith.constant 16 : index
    %c0_613 = arith.constant 0 : index
    %c0_614 = arith.constant 0 : index
    %1148 = vector.load %arg6[%c16_612, %c0_613, %c0_614] : memref<25x2x672xf32, #tpu.memory_space<vmem>>, vector<1x2x672xf32>
    %1149 = vector.shape_cast %1148 : vector<1x2x672xf32> to vector<2x672xf32>
    %c166 = arith.constant 166 : index
    %1150 = memref.load %arg1[%c166] : memref<225xf32, #tpu.memory_space<smem>>
    %1151 = vector.broadcast %1150 : f32 to vector<2x672xf32>
    %1152 = arith.mulf %1149, %1151 : vector<2x672xf32>
    %1153 = arith.addf %1147, %1152 : vector<2x672xf32>
    %c17_615 = arith.constant 17 : index
    %c0_616 = arith.constant 0 : index
    %c0_617 = arith.constant 0 : index
    %1154 = vector.load %arg6[%c17_615, %c0_616, %c0_617] : memref<25x2x672xf32, #tpu.memory_space<vmem>>, vector<1x2x672xf32>
    %1155 = vector.shape_cast %1154 : vector<1x2x672xf32> to vector<2x672xf32>
    %c167 = arith.constant 167 : index
    %1156 = memref.load %arg1[%c167] : memref<225xf32, #tpu.memory_space<smem>>
    %1157 = vector.broadcast %1156 : f32 to vector<2x672xf32>
    %1158 = arith.mulf %1155, %1157 : vector<2x672xf32>
    %1159 = arith.addf %1153, %1158 : vector<2x672xf32>
    %c18_618 = arith.constant 18 : index
    %c0_619 = arith.constant 0 : index
    %c0_620 = arith.constant 0 : index
    %1160 = vector.load %arg6[%c18_618, %c0_619, %c0_620] : memref<25x2x672xf32, #tpu.memory_space<vmem>>, vector<1x2x672xf32>
    %1161 = vector.shape_cast %1160 : vector<1x2x672xf32> to vector<2x672xf32>
    %c168 = arith.constant 168 : index
    %1162 = memref.load %arg1[%c168] : memref<225xf32, #tpu.memory_space<smem>>
    %1163 = vector.broadcast %1162 : f32 to vector<2x672xf32>
    %1164 = arith.mulf %1161, %1163 : vector<2x672xf32>
    %1165 = arith.addf %1159, %1164 : vector<2x672xf32>
    %c19_621 = arith.constant 19 : index
    %c0_622 = arith.constant 0 : index
    %c0_623 = arith.constant 0 : index
    %1166 = vector.load %arg6[%c19_621, %c0_622, %c0_623] : memref<25x2x672xf32, #tpu.memory_space<vmem>>, vector<1x2x672xf32>
    %1167 = vector.shape_cast %1166 : vector<1x2x672xf32> to vector<2x672xf32>
    %c169 = arith.constant 169 : index
    %1168 = memref.load %arg1[%c169] : memref<225xf32, #tpu.memory_space<smem>>
    %1169 = vector.broadcast %1168 : f32 to vector<2x672xf32>
    %1170 = arith.mulf %1167, %1169 : vector<2x672xf32>
    %1171 = arith.addf %1165, %1170 : vector<2x672xf32>
    %c20_624 = arith.constant 20 : index
    %c0_625 = arith.constant 0 : index
    %c0_626 = arith.constant 0 : index
    %1172 = vector.load %arg6[%c20_624, %c0_625, %c0_626] : memref<25x2x672xf32, #tpu.memory_space<vmem>>, vector<1x2x672xf32>
    %1173 = vector.shape_cast %1172 : vector<1x2x672xf32> to vector<2x672xf32>
    %c170 = arith.constant 170 : index
    %1174 = memref.load %arg1[%c170] : memref<225xf32, #tpu.memory_space<smem>>
    %1175 = vector.broadcast %1174 : f32 to vector<2x672xf32>
    %1176 = arith.mulf %1173, %1175 : vector<2x672xf32>
    %1177 = arith.addf %1171, %1176 : vector<2x672xf32>
    %c21_627 = arith.constant 21 : index
    %c0_628 = arith.constant 0 : index
    %c0_629 = arith.constant 0 : index
    %1178 = vector.load %arg6[%c21_627, %c0_628, %c0_629] : memref<25x2x672xf32, #tpu.memory_space<vmem>>, vector<1x2x672xf32>
    %1179 = vector.shape_cast %1178 : vector<1x2x672xf32> to vector<2x672xf32>
    %c171 = arith.constant 171 : index
    %1180 = memref.load %arg1[%c171] : memref<225xf32, #tpu.memory_space<smem>>
    %1181 = vector.broadcast %1180 : f32 to vector<2x672xf32>
    %1182 = arith.mulf %1179, %1181 : vector<2x672xf32>
    %1183 = arith.addf %1177, %1182 : vector<2x672xf32>
    %c22_630 = arith.constant 22 : index
    %c0_631 = arith.constant 0 : index
    %c0_632 = arith.constant 0 : index
    %1184 = vector.load %arg6[%c22_630, %c0_631, %c0_632] : memref<25x2x672xf32, #tpu.memory_space<vmem>>, vector<1x2x672xf32>
    %1185 = vector.shape_cast %1184 : vector<1x2x672xf32> to vector<2x672xf32>
    %c172 = arith.constant 172 : index
    %1186 = memref.load %arg1[%c172] : memref<225xf32, #tpu.memory_space<smem>>
    %1187 = vector.broadcast %1186 : f32 to vector<2x672xf32>
    %1188 = arith.mulf %1185, %1187 : vector<2x672xf32>
    %1189 = arith.addf %1183, %1188 : vector<2x672xf32>
    %c23_633 = arith.constant 23 : index
    %c0_634 = arith.constant 0 : index
    %c0_635 = arith.constant 0 : index
    %1190 = vector.load %arg6[%c23_633, %c0_634, %c0_635] : memref<25x2x672xf32, #tpu.memory_space<vmem>>, vector<1x2x672xf32>
    %1191 = vector.shape_cast %1190 : vector<1x2x672xf32> to vector<2x672xf32>
    %c173 = arith.constant 173 : index
    %1192 = memref.load %arg1[%c173] : memref<225xf32, #tpu.memory_space<smem>>
    %1193 = vector.broadcast %1192 : f32 to vector<2x672xf32>
    %1194 = arith.mulf %1191, %1193 : vector<2x672xf32>
    %1195 = arith.addf %1189, %1194 : vector<2x672xf32>
    %c24_636 = arith.constant 24 : index
    %c0_637 = arith.constant 0 : index
    %c0_638 = arith.constant 0 : index
    %1196 = vector.load %arg6[%c24_636, %c0_637, %c0_638] : memref<25x2x672xf32, #tpu.memory_space<vmem>>, vector<1x2x672xf32>
    %1197 = vector.shape_cast %1196 : vector<1x2x672xf32> to vector<2x672xf32>
    %c174 = arith.constant 174 : index
    %1198 = memref.load %arg1[%c174] : memref<225xf32, #tpu.memory_space<smem>>
    %1199 = vector.broadcast %1198 : f32 to vector<2x672xf32>
    %1200 = arith.mulf %1197, %1199 : vector<2x672xf32>
    %1201 = arith.addf %1195, %1200 : vector<2x672xf32>
    %cst_639 = arith.constant 0.000000e+00 : f32
    %1202 = vector.broadcast %cst_639 : f32 to vector<2x672xf32>
    %1203 = arith.maximumf %1201, %1202 : vector<2x672xf32>
    %c6_640 = arith.constant 6 : index
    %c0_641 = arith.constant 0 : index
    %c0_642 = arith.constant 0 : index
    %1204 = vector.load %arg3[%c6_640, %c0_641, %c0_642] : memref<9x672x10xf32, #tpu.memory_space<vmem>>, vector<1x672x10xf32>
    %1205 = vector.shape_cast %1204 : vector<1x672x10xf32> to vector<672x10xf32>
    %cst_643 = arith.constant dense<0.000000e+00> : vector<2x10xf32>
    %1206 = tpu.matmul %1203, %1205, %cst_643 {dimension_numbers = #tpu.dot_dimension_numbers<[1], [0], [0], [1], [0, 0, 1, 1], [], []>} : vector<2x672xf32>, vector<672x10xf32>, vector<2x10xf32> -> vector<2x10xf32>
    %1207 = arith.addf %1049, %1206 : vector<2x10xf32>
    %c7_644 = arith.constant 7 : index
    %1208 = memref.load %arg2[%c7_644] : memref<9xf32, #tpu.memory_space<smem>>
    %1209 = vector.broadcast %1208 : f32 to vector<2x672xf32>
    %c0_645 = arith.constant 0 : index
    %c0_646 = arith.constant 0 : index
    %c0_647 = arith.constant 0 : index
    %1210 = vector.load %arg6[%c0_645, %c0_646, %c0_647] : memref<25x2x672xf32, #tpu.memory_space<vmem>>, vector<1x2x672xf32>
    %1211 = vector.shape_cast %1210 : vector<1x2x672xf32> to vector<2x672xf32>
    %c175 = arith.constant 175 : index
    %1212 = memref.load %arg1[%c175] : memref<225xf32, #tpu.memory_space<smem>>
    %1213 = vector.broadcast %1212 : f32 to vector<2x672xf32>
    %1214 = arith.mulf %1211, %1213 : vector<2x672xf32>
    %1215 = arith.addf %1209, %1214 : vector<2x672xf32>
    %c1_648 = arith.constant 1 : index
    %c0_649 = arith.constant 0 : index
    %c0_650 = arith.constant 0 : index
    %1216 = vector.load %arg6[%c1_648, %c0_649, %c0_650] : memref<25x2x672xf32, #tpu.memory_space<vmem>>, vector<1x2x672xf32>
    %1217 = vector.shape_cast %1216 : vector<1x2x672xf32> to vector<2x672xf32>
    %c176 = arith.constant 176 : index
    %1218 = memref.load %arg1[%c176] : memref<225xf32, #tpu.memory_space<smem>>
    %1219 = vector.broadcast %1218 : f32 to vector<2x672xf32>
    %1220 = arith.mulf %1217, %1219 : vector<2x672xf32>
    %1221 = arith.addf %1215, %1220 : vector<2x672xf32>
    %c2_651 = arith.constant 2 : index
    %c0_652 = arith.constant 0 : index
    %c0_653 = arith.constant 0 : index
    %1222 = vector.load %arg6[%c2_651, %c0_652, %c0_653] : memref<25x2x672xf32, #tpu.memory_space<vmem>>, vector<1x2x672xf32>
    %1223 = vector.shape_cast %1222 : vector<1x2x672xf32> to vector<2x672xf32>
    %c177 = arith.constant 177 : index
    %1224 = memref.load %arg1[%c177] : memref<225xf32, #tpu.memory_space<smem>>
    %1225 = vector.broadcast %1224 : f32 to vector<2x672xf32>
    %1226 = arith.mulf %1223, %1225 : vector<2x672xf32>
    %1227 = arith.addf %1221, %1226 : vector<2x672xf32>
    %c3_654 = arith.constant 3 : index
    %c0_655 = arith.constant 0 : index
    %c0_656 = arith.constant 0 : index
    %1228 = vector.load %arg6[%c3_654, %c0_655, %c0_656] : memref<25x2x672xf32, #tpu.memory_space<vmem>>, vector<1x2x672xf32>
    %1229 = vector.shape_cast %1228 : vector<1x2x672xf32> to vector<2x672xf32>
    %c178 = arith.constant 178 : index
    %1230 = memref.load %arg1[%c178] : memref<225xf32, #tpu.memory_space<smem>>
    %1231 = vector.broadcast %1230 : f32 to vector<2x672xf32>
    %1232 = arith.mulf %1229, %1231 : vector<2x672xf32>
    %1233 = arith.addf %1227, %1232 : vector<2x672xf32>
    %c4_657 = arith.constant 4 : index
    %c0_658 = arith.constant 0 : index
    %c0_659 = arith.constant 0 : index
    %1234 = vector.load %arg6[%c4_657, %c0_658, %c0_659] : memref<25x2x672xf32, #tpu.memory_space<vmem>>, vector<1x2x672xf32>
    %1235 = vector.shape_cast %1234 : vector<1x2x672xf32> to vector<2x672xf32>
    %c179 = arith.constant 179 : index
    %1236 = memref.load %arg1[%c179] : memref<225xf32, #tpu.memory_space<smem>>
    %1237 = vector.broadcast %1236 : f32 to vector<2x672xf32>
    %1238 = arith.mulf %1235, %1237 : vector<2x672xf32>
    %1239 = arith.addf %1233, %1238 : vector<2x672xf32>
    %c5_660 = arith.constant 5 : index
    %c0_661 = arith.constant 0 : index
    %c0_662 = arith.constant 0 : index
    %1240 = vector.load %arg6[%c5_660, %c0_661, %c0_662] : memref<25x2x672xf32, #tpu.memory_space<vmem>>, vector<1x2x672xf32>
    %1241 = vector.shape_cast %1240 : vector<1x2x672xf32> to vector<2x672xf32>
    %c180 = arith.constant 180 : index
    %1242 = memref.load %arg1[%c180] : memref<225xf32, #tpu.memory_space<smem>>
    %1243 = vector.broadcast %1242 : f32 to vector<2x672xf32>
    %1244 = arith.mulf %1241, %1243 : vector<2x672xf32>
    %1245 = arith.addf %1239, %1244 : vector<2x672xf32>
    %c6_663 = arith.constant 6 : index
    %c0_664 = arith.constant 0 : index
    %c0_665 = arith.constant 0 : index
    %1246 = vector.load %arg6[%c6_663, %c0_664, %c0_665] : memref<25x2x672xf32, #tpu.memory_space<vmem>>, vector<1x2x672xf32>
    %1247 = vector.shape_cast %1246 : vector<1x2x672xf32> to vector<2x672xf32>
    %c181 = arith.constant 181 : index
    %1248 = memref.load %arg1[%c181] : memref<225xf32, #tpu.memory_space<smem>>
    %1249 = vector.broadcast %1248 : f32 to vector<2x672xf32>
    %1250 = arith.mulf %1247, %1249 : vector<2x672xf32>
    %1251 = arith.addf %1245, %1250 : vector<2x672xf32>
    %c7_666 = arith.constant 7 : index
    %c0_667 = arith.constant 0 : index
    %c0_668 = arith.constant 0 : index
    %1252 = vector.load %arg6[%c7_666, %c0_667, %c0_668] : memref<25x2x672xf32, #tpu.memory_space<vmem>>, vector<1x2x672xf32>
    %1253 = vector.shape_cast %1252 : vector<1x2x672xf32> to vector<2x672xf32>
    %c182 = arith.constant 182 : index
    %1254 = memref.load %arg1[%c182] : memref<225xf32, #tpu.memory_space<smem>>
    %1255 = vector.broadcast %1254 : f32 to vector<2x672xf32>
    %1256 = arith.mulf %1253, %1255 : vector<2x672xf32>
    %1257 = arith.addf %1251, %1256 : vector<2x672xf32>
    %c8_669 = arith.constant 8 : index
    %c0_670 = arith.constant 0 : index
    %c0_671 = arith.constant 0 : index
    %1258 = vector.load %arg6[%c8_669, %c0_670, %c0_671] : memref<25x2x672xf32, #tpu.memory_space<vmem>>, vector<1x2x672xf32>
    %1259 = vector.shape_cast %1258 : vector<1x2x672xf32> to vector<2x672xf32>
    %c183 = arith.constant 183 : index
    %1260 = memref.load %arg1[%c183] : memref<225xf32, #tpu.memory_space<smem>>
    %1261 = vector.broadcast %1260 : f32 to vector<2x672xf32>
    %1262 = arith.mulf %1259, %1261 : vector<2x672xf32>
    %1263 = arith.addf %1257, %1262 : vector<2x672xf32>
    %c9_672 = arith.constant 9 : index
    %c0_673 = arith.constant 0 : index
    %c0_674 = arith.constant 0 : index
    %1264 = vector.load %arg6[%c9_672, %c0_673, %c0_674] : memref<25x2x672xf32, #tpu.memory_space<vmem>>, vector<1x2x672xf32>
    %1265 = vector.shape_cast %1264 : vector<1x2x672xf32> to vector<2x672xf32>
    %c184 = arith.constant 184 : index
    %1266 = memref.load %arg1[%c184] : memref<225xf32, #tpu.memory_space<smem>>
    %1267 = vector.broadcast %1266 : f32 to vector<2x672xf32>
    %1268 = arith.mulf %1265, %1267 : vector<2x672xf32>
    %1269 = arith.addf %1263, %1268 : vector<2x672xf32>
    %c10_675 = arith.constant 10 : index
    %c0_676 = arith.constant 0 : index
    %c0_677 = arith.constant 0 : index
    %1270 = vector.load %arg6[%c10_675, %c0_676, %c0_677] : memref<25x2x672xf32, #tpu.memory_space<vmem>>, vector<1x2x672xf32>
    %1271 = vector.shape_cast %1270 : vector<1x2x672xf32> to vector<2x672xf32>
    %c185 = arith.constant 185 : index
    %1272 = memref.load %arg1[%c185] : memref<225xf32, #tpu.memory_space<smem>>
    %1273 = vector.broadcast %1272 : f32 to vector<2x672xf32>
    %1274 = arith.mulf %1271, %1273 : vector<2x672xf32>
    %1275 = arith.addf %1269, %1274 : vector<2x672xf32>
    %c11_678 = arith.constant 11 : index
    %c0_679 = arith.constant 0 : index
    %c0_680 = arith.constant 0 : index
    %1276 = vector.load %arg6[%c11_678, %c0_679, %c0_680] : memref<25x2x672xf32, #tpu.memory_space<vmem>>, vector<1x2x672xf32>
    %1277 = vector.shape_cast %1276 : vector<1x2x672xf32> to vector<2x672xf32>
    %c186 = arith.constant 186 : index
    %1278 = memref.load %arg1[%c186] : memref<225xf32, #tpu.memory_space<smem>>
    %1279 = vector.broadcast %1278 : f32 to vector<2x672xf32>
    %1280 = arith.mulf %1277, %1279 : vector<2x672xf32>
    %1281 = arith.addf %1275, %1280 : vector<2x672xf32>
    %c12_681 = arith.constant 12 : index
    %c0_682 = arith.constant 0 : index
    %c0_683 = arith.constant 0 : index
    %1282 = vector.load %arg6[%c12_681, %c0_682, %c0_683] : memref<25x2x672xf32, #tpu.memory_space<vmem>>, vector<1x2x672xf32>
    %1283 = vector.shape_cast %1282 : vector<1x2x672xf32> to vector<2x672xf32>
    %c187 = arith.constant 187 : index
    %1284 = memref.load %arg1[%c187] : memref<225xf32, #tpu.memory_space<smem>>
    %1285 = vector.broadcast %1284 : f32 to vector<2x672xf32>
    %1286 = arith.mulf %1283, %1285 : vector<2x672xf32>
    %1287 = arith.addf %1281, %1286 : vector<2x672xf32>
    %c13_684 = arith.constant 13 : index
    %c0_685 = arith.constant 0 : index
    %c0_686 = arith.constant 0 : index
    %1288 = vector.load %arg6[%c13_684, %c0_685, %c0_686] : memref<25x2x672xf32, #tpu.memory_space<vmem>>, vector<1x2x672xf32>
    %1289 = vector.shape_cast %1288 : vector<1x2x672xf32> to vector<2x672xf32>
    %c188 = arith.constant 188 : index
    %1290 = memref.load %arg1[%c188] : memref<225xf32, #tpu.memory_space<smem>>
    %1291 = vector.broadcast %1290 : f32 to vector<2x672xf32>
    %1292 = arith.mulf %1289, %1291 : vector<2x672xf32>
    %1293 = arith.addf %1287, %1292 : vector<2x672xf32>
    %c14_687 = arith.constant 14 : index
    %c0_688 = arith.constant 0 : index
    %c0_689 = arith.constant 0 : index
    %1294 = vector.load %arg6[%c14_687, %c0_688, %c0_689] : memref<25x2x672xf32, #tpu.memory_space<vmem>>, vector<1x2x672xf32>
    %1295 = vector.shape_cast %1294 : vector<1x2x672xf32> to vector<2x672xf32>
    %c189 = arith.constant 189 : index
    %1296 = memref.load %arg1[%c189] : memref<225xf32, #tpu.memory_space<smem>>
    %1297 = vector.broadcast %1296 : f32 to vector<2x672xf32>
    %1298 = arith.mulf %1295, %1297 : vector<2x672xf32>
    %1299 = arith.addf %1293, %1298 : vector<2x672xf32>
    %c15_690 = arith.constant 15 : index
    %c0_691 = arith.constant 0 : index
    %c0_692 = arith.constant 0 : index
    %1300 = vector.load %arg6[%c15_690, %c0_691, %c0_692] : memref<25x2x672xf32, #tpu.memory_space<vmem>>, vector<1x2x672xf32>
    %1301 = vector.shape_cast %1300 : vector<1x2x672xf32> to vector<2x672xf32>
    %c190 = arith.constant 190 : index
    %1302 = memref.load %arg1[%c190] : memref<225xf32, #tpu.memory_space<smem>>
    %1303 = vector.broadcast %1302 : f32 to vector<2x672xf32>
    %1304 = arith.mulf %1301, %1303 : vector<2x672xf32>
    %1305 = arith.addf %1299, %1304 : vector<2x672xf32>
    %c16_693 = arith.constant 16 : index
    %c0_694 = arith.constant 0 : index
    %c0_695 = arith.constant 0 : index
    %1306 = vector.load %arg6[%c16_693, %c0_694, %c0_695] : memref<25x2x672xf32, #tpu.memory_space<vmem>>, vector<1x2x672xf32>
    %1307 = vector.shape_cast %1306 : vector<1x2x672xf32> to vector<2x672xf32>
    %c191 = arith.constant 191 : index
    %1308 = memref.load %arg1[%c191] : memref<225xf32, #tpu.memory_space<smem>>
    %1309 = vector.broadcast %1308 : f32 to vector<2x672xf32>
    %1310 = arith.mulf %1307, %1309 : vector<2x672xf32>
    %1311 = arith.addf %1305, %1310 : vector<2x672xf32>
    %c17_696 = arith.constant 17 : index
    %c0_697 = arith.constant 0 : index
    %c0_698 = arith.constant 0 : index
    %1312 = vector.load %arg6[%c17_696, %c0_697, %c0_698] : memref<25x2x672xf32, #tpu.memory_space<vmem>>, vector<1x2x672xf32>
    %1313 = vector.shape_cast %1312 : vector<1x2x672xf32> to vector<2x672xf32>
    %c192 = arith.constant 192 : index
    %1314 = memref.load %arg1[%c192] : memref<225xf32, #tpu.memory_space<smem>>
    %1315 = vector.broadcast %1314 : f32 to vector<2x672xf32>
    %1316 = arith.mulf %1313, %1315 : vector<2x672xf32>
    %1317 = arith.addf %1311, %1316 : vector<2x672xf32>
    %c18_699 = arith.constant 18 : index
    %c0_700 = arith.constant 0 : index
    %c0_701 = arith.constant 0 : index
    %1318 = vector.load %arg6[%c18_699, %c0_700, %c0_701] : memref<25x2x672xf32, #tpu.memory_space<vmem>>, vector<1x2x672xf32>
    %1319 = vector.shape_cast %1318 : vector<1x2x672xf32> to vector<2x672xf32>
    %c193 = arith.constant 193 : index
    %1320 = memref.load %arg1[%c193] : memref<225xf32, #tpu.memory_space<smem>>
    %1321 = vector.broadcast %1320 : f32 to vector<2x672xf32>
    %1322 = arith.mulf %1319, %1321 : vector<2x672xf32>
    %1323 = arith.addf %1317, %1322 : vector<2x672xf32>
    %c19_702 = arith.constant 19 : index
    %c0_703 = arith.constant 0 : index
    %c0_704 = arith.constant 0 : index
    %1324 = vector.load %arg6[%c19_702, %c0_703, %c0_704] : memref<25x2x672xf32, #tpu.memory_space<vmem>>, vector<1x2x672xf32>
    %1325 = vector.shape_cast %1324 : vector<1x2x672xf32> to vector<2x672xf32>
    %c194 = arith.constant 194 : index
    %1326 = memref.load %arg1[%c194] : memref<225xf32, #tpu.memory_space<smem>>
    %1327 = vector.broadcast %1326 : f32 to vector<2x672xf32>
    %1328 = arith.mulf %1325, %1327 : vector<2x672xf32>
    %1329 = arith.addf %1323, %1328 : vector<2x672xf32>
    %c20_705 = arith.constant 20 : index
    %c0_706 = arith.constant 0 : index
    %c0_707 = arith.constant 0 : index
    %1330 = vector.load %arg6[%c20_705, %c0_706, %c0_707] : memref<25x2x672xf32, #tpu.memory_space<vmem>>, vector<1x2x672xf32>
    %1331 = vector.shape_cast %1330 : vector<1x2x672xf32> to vector<2x672xf32>
    %c195 = arith.constant 195 : index
    %1332 = memref.load %arg1[%c195] : memref<225xf32, #tpu.memory_space<smem>>
    %1333 = vector.broadcast %1332 : f32 to vector<2x672xf32>
    %1334 = arith.mulf %1331, %1333 : vector<2x672xf32>
    %1335 = arith.addf %1329, %1334 : vector<2x672xf32>
    %c21_708 = arith.constant 21 : index
    %c0_709 = arith.constant 0 : index
    %c0_710 = arith.constant 0 : index
    %1336 = vector.load %arg6[%c21_708, %c0_709, %c0_710] : memref<25x2x672xf32, #tpu.memory_space<vmem>>, vector<1x2x672xf32>
    %1337 = vector.shape_cast %1336 : vector<1x2x672xf32> to vector<2x672xf32>
    %c196 = arith.constant 196 : index
    %1338 = memref.load %arg1[%c196] : memref<225xf32, #tpu.memory_space<smem>>
    %1339 = vector.broadcast %1338 : f32 to vector<2x672xf32>
    %1340 = arith.mulf %1337, %1339 : vector<2x672xf32>
    %1341 = arith.addf %1335, %1340 : vector<2x672xf32>
    %c22_711 = arith.constant 22 : index
    %c0_712 = arith.constant 0 : index
    %c0_713 = arith.constant 0 : index
    %1342 = vector.load %arg6[%c22_711, %c0_712, %c0_713] : memref<25x2x672xf32, #tpu.memory_space<vmem>>, vector<1x2x672xf32>
    %1343 = vector.shape_cast %1342 : vector<1x2x672xf32> to vector<2x672xf32>
    %c197 = arith.constant 197 : index
    %1344 = memref.load %arg1[%c197] : memref<225xf32, #tpu.memory_space<smem>>
    %1345 = vector.broadcast %1344 : f32 to vector<2x672xf32>
    %1346 = arith.mulf %1343, %1345 : vector<2x672xf32>
    %1347 = arith.addf %1341, %1346 : vector<2x672xf32>
    %c23_714 = arith.constant 23 : index
    %c0_715 = arith.constant 0 : index
    %c0_716 = arith.constant 0 : index
    %1348 = vector.load %arg6[%c23_714, %c0_715, %c0_716] : memref<25x2x672xf32, #tpu.memory_space<vmem>>, vector<1x2x672xf32>
    %1349 = vector.shape_cast %1348 : vector<1x2x672xf32> to vector<2x672xf32>
    %c198 = arith.constant 198 : index
    %1350 = memref.load %arg1[%c198] : memref<225xf32, #tpu.memory_space<smem>>
    %1351 = vector.broadcast %1350 : f32 to vector<2x672xf32>
    %1352 = arith.mulf %1349, %1351 : vector<2x672xf32>
    %1353 = arith.addf %1347, %1352 : vector<2x672xf32>
    %c24_717 = arith.constant 24 : index
    %c0_718 = arith.constant 0 : index
    %c0_719 = arith.constant 0 : index
    %1354 = vector.load %arg6[%c24_717, %c0_718, %c0_719] : memref<25x2x672xf32, #tpu.memory_space<vmem>>, vector<1x2x672xf32>
    %1355 = vector.shape_cast %1354 : vector<1x2x672xf32> to vector<2x672xf32>
    %c199 = arith.constant 199 : index
    %1356 = memref.load %arg1[%c199] : memref<225xf32, #tpu.memory_space<smem>>
    %1357 = vector.broadcast %1356 : f32 to vector<2x672xf32>
    %1358 = arith.mulf %1355, %1357 : vector<2x672xf32>
    %1359 = arith.addf %1353, %1358 : vector<2x672xf32>
    %cst_720 = arith.constant 0.000000e+00 : f32
    %1360 = vector.broadcast %cst_720 : f32 to vector<2x672xf32>
    %1361 = arith.maximumf %1359, %1360 : vector<2x672xf32>
    %c7_721 = arith.constant 7 : index
    %c0_722 = arith.constant 0 : index
    %c0_723 = arith.constant 0 : index
    %1362 = vector.load %arg3[%c7_721, %c0_722, %c0_723] : memref<9x672x10xf32, #tpu.memory_space<vmem>>, vector<1x672x10xf32>
    %1363 = vector.shape_cast %1362 : vector<1x672x10xf32> to vector<672x10xf32>
    %cst_724 = arith.constant dense<0.000000e+00> : vector<2x10xf32>
    %1364 = tpu.matmul %1361, %1363, %cst_724 {dimension_numbers = #tpu.dot_dimension_numbers<[1], [0], [0], [1], [0, 0, 1, 1], [], []>} : vector<2x672xf32>, vector<672x10xf32>, vector<2x10xf32> -> vector<2x10xf32>
    %1365 = arith.addf %1207, %1364 : vector<2x10xf32>
    %c8_725 = arith.constant 8 : index
    %1366 = memref.load %arg2[%c8_725] : memref<9xf32, #tpu.memory_space<smem>>
    %1367 = vector.broadcast %1366 : f32 to vector<2x672xf32>
    %c0_726 = arith.constant 0 : index
    %c0_727 = arith.constant 0 : index
    %c0_728 = arith.constant 0 : index
    %1368 = vector.load %arg6[%c0_726, %c0_727, %c0_728] : memref<25x2x672xf32, #tpu.memory_space<vmem>>, vector<1x2x672xf32>
    %1369 = vector.shape_cast %1368 : vector<1x2x672xf32> to vector<2x672xf32>
    %c200 = arith.constant 200 : index
    %1370 = memref.load %arg1[%c200] : memref<225xf32, #tpu.memory_space<smem>>
    %1371 = vector.broadcast %1370 : f32 to vector<2x672xf32>
    %1372 = arith.mulf %1369, %1371 : vector<2x672xf32>
    %1373 = arith.addf %1367, %1372 : vector<2x672xf32>
    %c1_729 = arith.constant 1 : index
    %c0_730 = arith.constant 0 : index
    %c0_731 = arith.constant 0 : index
    %1374 = vector.load %arg6[%c1_729, %c0_730, %c0_731] : memref<25x2x672xf32, #tpu.memory_space<vmem>>, vector<1x2x672xf32>
    %1375 = vector.shape_cast %1374 : vector<1x2x672xf32> to vector<2x672xf32>
    %c201 = arith.constant 201 : index
    %1376 = memref.load %arg1[%c201] : memref<225xf32, #tpu.memory_space<smem>>
    %1377 = vector.broadcast %1376 : f32 to vector<2x672xf32>
    %1378 = arith.mulf %1375, %1377 : vector<2x672xf32>
    %1379 = arith.addf %1373, %1378 : vector<2x672xf32>
    %c2_732 = arith.constant 2 : index
    %c0_733 = arith.constant 0 : index
    %c0_734 = arith.constant 0 : index
    %1380 = vector.load %arg6[%c2_732, %c0_733, %c0_734] : memref<25x2x672xf32, #tpu.memory_space<vmem>>, vector<1x2x672xf32>
    %1381 = vector.shape_cast %1380 : vector<1x2x672xf32> to vector<2x672xf32>
    %c202 = arith.constant 202 : index
    %1382 = memref.load %arg1[%c202] : memref<225xf32, #tpu.memory_space<smem>>
    %1383 = vector.broadcast %1382 : f32 to vector<2x672xf32>
    %1384 = arith.mulf %1381, %1383 : vector<2x672xf32>
    %1385 = arith.addf %1379, %1384 : vector<2x672xf32>
    %c3_735 = arith.constant 3 : index
    %c0_736 = arith.constant 0 : index
    %c0_737 = arith.constant 0 : index
    %1386 = vector.load %arg6[%c3_735, %c0_736, %c0_737] : memref<25x2x672xf32, #tpu.memory_space<vmem>>, vector<1x2x672xf32>
    %1387 = vector.shape_cast %1386 : vector<1x2x672xf32> to vector<2x672xf32>
    %c203 = arith.constant 203 : index
    %1388 = memref.load %arg1[%c203] : memref<225xf32, #tpu.memory_space<smem>>
    %1389 = vector.broadcast %1388 : f32 to vector<2x672xf32>
    %1390 = arith.mulf %1387, %1389 : vector<2x672xf32>
    %1391 = arith.addf %1385, %1390 : vector<2x672xf32>
    %c4_738 = arith.constant 4 : index
    %c0_739 = arith.constant 0 : index
    %c0_740 = arith.constant 0 : index
    %1392 = vector.load %arg6[%c4_738, %c0_739, %c0_740] : memref<25x2x672xf32, #tpu.memory_space<vmem>>, vector<1x2x672xf32>
    %1393 = vector.shape_cast %1392 : vector<1x2x672xf32> to vector<2x672xf32>
    %c204 = arith.constant 204 : index
    %1394 = memref.load %arg1[%c204] : memref<225xf32, #tpu.memory_space<smem>>
    %1395 = vector.broadcast %1394 : f32 to vector<2x672xf32>
    %1396 = arith.mulf %1393, %1395 : vector<2x672xf32>
    %1397 = arith.addf %1391, %1396 : vector<2x672xf32>
    %c5_741 = arith.constant 5 : index
    %c0_742 = arith.constant 0 : index
    %c0_743 = arith.constant 0 : index
    %1398 = vector.load %arg6[%c5_741, %c0_742, %c0_743] : memref<25x2x672xf32, #tpu.memory_space<vmem>>, vector<1x2x672xf32>
    %1399 = vector.shape_cast %1398 : vector<1x2x672xf32> to vector<2x672xf32>
    %c205 = arith.constant 205 : index
    %1400 = memref.load %arg1[%c205] : memref<225xf32, #tpu.memory_space<smem>>
    %1401 = vector.broadcast %1400 : f32 to vector<2x672xf32>
    %1402 = arith.mulf %1399, %1401 : vector<2x672xf32>
    %1403 = arith.addf %1397, %1402 : vector<2x672xf32>
    %c6_744 = arith.constant 6 : index
    %c0_745 = arith.constant 0 : index
    %c0_746 = arith.constant 0 : index
    %1404 = vector.load %arg6[%c6_744, %c0_745, %c0_746] : memref<25x2x672xf32, #tpu.memory_space<vmem>>, vector<1x2x672xf32>
    %1405 = vector.shape_cast %1404 : vector<1x2x672xf32> to vector<2x672xf32>
    %c206 = arith.constant 206 : index
    %1406 = memref.load %arg1[%c206] : memref<225xf32, #tpu.memory_space<smem>>
    %1407 = vector.broadcast %1406 : f32 to vector<2x672xf32>
    %1408 = arith.mulf %1405, %1407 : vector<2x672xf32>
    %1409 = arith.addf %1403, %1408 : vector<2x672xf32>
    %c7_747 = arith.constant 7 : index
    %c0_748 = arith.constant 0 : index
    %c0_749 = arith.constant 0 : index
    %1410 = vector.load %arg6[%c7_747, %c0_748, %c0_749] : memref<25x2x672xf32, #tpu.memory_space<vmem>>, vector<1x2x672xf32>
    %1411 = vector.shape_cast %1410 : vector<1x2x672xf32> to vector<2x672xf32>
    %c207 = arith.constant 207 : index
    %1412 = memref.load %arg1[%c207] : memref<225xf32, #tpu.memory_space<smem>>
    %1413 = vector.broadcast %1412 : f32 to vector<2x672xf32>
    %1414 = arith.mulf %1411, %1413 : vector<2x672xf32>
    %1415 = arith.addf %1409, %1414 : vector<2x672xf32>
    %c8_750 = arith.constant 8 : index
    %c0_751 = arith.constant 0 : index
    %c0_752 = arith.constant 0 : index
    %1416 = vector.load %arg6[%c8_750, %c0_751, %c0_752] : memref<25x2x672xf32, #tpu.memory_space<vmem>>, vector<1x2x672xf32>
    %1417 = vector.shape_cast %1416 : vector<1x2x672xf32> to vector<2x672xf32>
    %c208 = arith.constant 208 : index
    %1418 = memref.load %arg1[%c208] : memref<225xf32, #tpu.memory_space<smem>>
    %1419 = vector.broadcast %1418 : f32 to vector<2x672xf32>
    %1420 = arith.mulf %1417, %1419 : vector<2x672xf32>
    %1421 = arith.addf %1415, %1420 : vector<2x672xf32>
    %c9_753 = arith.constant 9 : index
    %c0_754 = arith.constant 0 : index
    %c0_755 = arith.constant 0 : index
    %1422 = vector.load %arg6[%c9_753, %c0_754, %c0_755] : memref<25x2x672xf32, #tpu.memory_space<vmem>>, vector<1x2x672xf32>
    %1423 = vector.shape_cast %1422 : vector<1x2x672xf32> to vector<2x672xf32>
    %c209 = arith.constant 209 : index
    %1424 = memref.load %arg1[%c209] : memref<225xf32, #tpu.memory_space<smem>>
    %1425 = vector.broadcast %1424 : f32 to vector<2x672xf32>
    %1426 = arith.mulf %1423, %1425 : vector<2x672xf32>
    %1427 = arith.addf %1421, %1426 : vector<2x672xf32>
    %c10_756 = arith.constant 10 : index
    %c0_757 = arith.constant 0 : index
    %c0_758 = arith.constant 0 : index
    %1428 = vector.load %arg6[%c10_756, %c0_757, %c0_758] : memref<25x2x672xf32, #tpu.memory_space<vmem>>, vector<1x2x672xf32>
    %1429 = vector.shape_cast %1428 : vector<1x2x672xf32> to vector<2x672xf32>
    %c210 = arith.constant 210 : index
    %1430 = memref.load %arg1[%c210] : memref<225xf32, #tpu.memory_space<smem>>
    %1431 = vector.broadcast %1430 : f32 to vector<2x672xf32>
    %1432 = arith.mulf %1429, %1431 : vector<2x672xf32>
    %1433 = arith.addf %1427, %1432 : vector<2x672xf32>
    %c11_759 = arith.constant 11 : index
    %c0_760 = arith.constant 0 : index
    %c0_761 = arith.constant 0 : index
    %1434 = vector.load %arg6[%c11_759, %c0_760, %c0_761] : memref<25x2x672xf32, #tpu.memory_space<vmem>>, vector<1x2x672xf32>
    %1435 = vector.shape_cast %1434 : vector<1x2x672xf32> to vector<2x672xf32>
    %c211 = arith.constant 211 : index
    %1436 = memref.load %arg1[%c211] : memref<225xf32, #tpu.memory_space<smem>>
    %1437 = vector.broadcast %1436 : f32 to vector<2x672xf32>
    %1438 = arith.mulf %1435, %1437 : vector<2x672xf32>
    %1439 = arith.addf %1433, %1438 : vector<2x672xf32>
    %c12_762 = arith.constant 12 : index
    %c0_763 = arith.constant 0 : index
    %c0_764 = arith.constant 0 : index
    %1440 = vector.load %arg6[%c12_762, %c0_763, %c0_764] : memref<25x2x672xf32, #tpu.memory_space<vmem>>, vector<1x2x672xf32>
    %1441 = vector.shape_cast %1440 : vector<1x2x672xf32> to vector<2x672xf32>
    %c212 = arith.constant 212 : index
    %1442 = memref.load %arg1[%c212] : memref<225xf32, #tpu.memory_space<smem>>
    %1443 = vector.broadcast %1442 : f32 to vector<2x672xf32>
    %1444 = arith.mulf %1441, %1443 : vector<2x672xf32>
    %1445 = arith.addf %1439, %1444 : vector<2x672xf32>
    %c13_765 = arith.constant 13 : index
    %c0_766 = arith.constant 0 : index
    %c0_767 = arith.constant 0 : index
    %1446 = vector.load %arg6[%c13_765, %c0_766, %c0_767] : memref<25x2x672xf32, #tpu.memory_space<vmem>>, vector<1x2x672xf32>
    %1447 = vector.shape_cast %1446 : vector<1x2x672xf32> to vector<2x672xf32>
    %c213 = arith.constant 213 : index
    %1448 = memref.load %arg1[%c213] : memref<225xf32, #tpu.memory_space<smem>>
    %1449 = vector.broadcast %1448 : f32 to vector<2x672xf32>
    %1450 = arith.mulf %1447, %1449 : vector<2x672xf32>
    %1451 = arith.addf %1445, %1450 : vector<2x672xf32>
    %c14_768 = arith.constant 14 : index
    %c0_769 = arith.constant 0 : index
    %c0_770 = arith.constant 0 : index
    %1452 = vector.load %arg6[%c14_768, %c0_769, %c0_770] : memref<25x2x672xf32, #tpu.memory_space<vmem>>, vector<1x2x672xf32>
    %1453 = vector.shape_cast %1452 : vector<1x2x672xf32> to vector<2x672xf32>
    %c214 = arith.constant 214 : index
    %1454 = memref.load %arg1[%c214] : memref<225xf32, #tpu.memory_space<smem>>
    %1455 = vector.broadcast %1454 : f32 to vector<2x672xf32>
    %1456 = arith.mulf %1453, %1455 : vector<2x672xf32>
    %1457 = arith.addf %1451, %1456 : vector<2x672xf32>
    %c15_771 = arith.constant 15 : index
    %c0_772 = arith.constant 0 : index
    %c0_773 = arith.constant 0 : index
    %1458 = vector.load %arg6[%c15_771, %c0_772, %c0_773] : memref<25x2x672xf32, #tpu.memory_space<vmem>>, vector<1x2x672xf32>
    %1459 = vector.shape_cast %1458 : vector<1x2x672xf32> to vector<2x672xf32>
    %c215 = arith.constant 215 : index
    %1460 = memref.load %arg1[%c215] : memref<225xf32, #tpu.memory_space<smem>>
    %1461 = vector.broadcast %1460 : f32 to vector<2x672xf32>
    %1462 = arith.mulf %1459, %1461 : vector<2x672xf32>
    %1463 = arith.addf %1457, %1462 : vector<2x672xf32>
    %c16_774 = arith.constant 16 : index
    %c0_775 = arith.constant 0 : index
    %c0_776 = arith.constant 0 : index
    %1464 = vector.load %arg6[%c16_774, %c0_775, %c0_776] : memref<25x2x672xf32, #tpu.memory_space<vmem>>, vector<1x2x672xf32>
    %1465 = vector.shape_cast %1464 : vector<1x2x672xf32> to vector<2x672xf32>
    %c216 = arith.constant 216 : index
    %1466 = memref.load %arg1[%c216] : memref<225xf32, #tpu.memory_space<smem>>
    %1467 = vector.broadcast %1466 : f32 to vector<2x672xf32>
    %1468 = arith.mulf %1465, %1467 : vector<2x672xf32>
    %1469 = arith.addf %1463, %1468 : vector<2x672xf32>
    %c17_777 = arith.constant 17 : index
    %c0_778 = arith.constant 0 : index
    %c0_779 = arith.constant 0 : index
    %1470 = vector.load %arg6[%c17_777, %c0_778, %c0_779] : memref<25x2x672xf32, #tpu.memory_space<vmem>>, vector<1x2x672xf32>
    %1471 = vector.shape_cast %1470 : vector<1x2x672xf32> to vector<2x672xf32>
    %c217 = arith.constant 217 : index
    %1472 = memref.load %arg1[%c217] : memref<225xf32, #tpu.memory_space<smem>>
    %1473 = vector.broadcast %1472 : f32 to vector<2x672xf32>
    %1474 = arith.mulf %1471, %1473 : vector<2x672xf32>
    %1475 = arith.addf %1469, %1474 : vector<2x672xf32>
    %c18_780 = arith.constant 18 : index
    %c0_781 = arith.constant 0 : index
    %c0_782 = arith.constant 0 : index
    %1476 = vector.load %arg6[%c18_780, %c0_781, %c0_782] : memref<25x2x672xf32, #tpu.memory_space<vmem>>, vector<1x2x672xf32>
    %1477 = vector.shape_cast %1476 : vector<1x2x672xf32> to vector<2x672xf32>
    %c218 = arith.constant 218 : index
    %1478 = memref.load %arg1[%c218] : memref<225xf32, #tpu.memory_space<smem>>
    %1479 = vector.broadcast %1478 : f32 to vector<2x672xf32>
    %1480 = arith.mulf %1477, %1479 : vector<2x672xf32>
    %1481 = arith.addf %1475, %1480 : vector<2x672xf32>
    %c19_783 = arith.constant 19 : index
    %c0_784 = arith.constant 0 : index
    %c0_785 = arith.constant 0 : index
    %1482 = vector.load %arg6[%c19_783, %c0_784, %c0_785] : memref<25x2x672xf32, #tpu.memory_space<vmem>>, vector<1x2x672xf32>
    %1483 = vector.shape_cast %1482 : vector<1x2x672xf32> to vector<2x672xf32>
    %c219 = arith.constant 219 : index
    %1484 = memref.load %arg1[%c219] : memref<225xf32, #tpu.memory_space<smem>>
    %1485 = vector.broadcast %1484 : f32 to vector<2x672xf32>
    %1486 = arith.mulf %1483, %1485 : vector<2x672xf32>
    %1487 = arith.addf %1481, %1486 : vector<2x672xf32>
    %c20_786 = arith.constant 20 : index
    %c0_787 = arith.constant 0 : index
    %c0_788 = arith.constant 0 : index
    %1488 = vector.load %arg6[%c20_786, %c0_787, %c0_788] : memref<25x2x672xf32, #tpu.memory_space<vmem>>, vector<1x2x672xf32>
    %1489 = vector.shape_cast %1488 : vector<1x2x672xf32> to vector<2x672xf32>
    %c220 = arith.constant 220 : index
    %1490 = memref.load %arg1[%c220] : memref<225xf32, #tpu.memory_space<smem>>
    %1491 = vector.broadcast %1490 : f32 to vector<2x672xf32>
    %1492 = arith.mulf %1489, %1491 : vector<2x672xf32>
    %1493 = arith.addf %1487, %1492 : vector<2x672xf32>
    %c21_789 = arith.constant 21 : index
    %c0_790 = arith.constant 0 : index
    %c0_791 = arith.constant 0 : index
    %1494 = vector.load %arg6[%c21_789, %c0_790, %c0_791] : memref<25x2x672xf32, #tpu.memory_space<vmem>>, vector<1x2x672xf32>
    %1495 = vector.shape_cast %1494 : vector<1x2x672xf32> to vector<2x672xf32>
    %c221 = arith.constant 221 : index
    %1496 = memref.load %arg1[%c221] : memref<225xf32, #tpu.memory_space<smem>>
    %1497 = vector.broadcast %1496 : f32 to vector<2x672xf32>
    %1498 = arith.mulf %1495, %1497 : vector<2x672xf32>
    %1499 = arith.addf %1493, %1498 : vector<2x672xf32>
    %c22_792 = arith.constant 22 : index
    %c0_793 = arith.constant 0 : index
    %c0_794 = arith.constant 0 : index
    %1500 = vector.load %arg6[%c22_792, %c0_793, %c0_794] : memref<25x2x672xf32, #tpu.memory_space<vmem>>, vector<1x2x672xf32>
    %1501 = vector.shape_cast %1500 : vector<1x2x672xf32> to vector<2x672xf32>
    %c222 = arith.constant 222 : index
    %1502 = memref.load %arg1[%c222] : memref<225xf32, #tpu.memory_space<smem>>
    %1503 = vector.broadcast %1502 : f32 to vector<2x672xf32>
    %1504 = arith.mulf %1501, %1503 : vector<2x672xf32>
    %1505 = arith.addf %1499, %1504 : vector<2x672xf32>
    %c23_795 = arith.constant 23 : index
    %c0_796 = arith.constant 0 : index
    %c0_797 = arith.constant 0 : index
    %1506 = vector.load %arg6[%c23_795, %c0_796, %c0_797] : memref<25x2x672xf32, #tpu.memory_space<vmem>>, vector<1x2x672xf32>
    %1507 = vector.shape_cast %1506 : vector<1x2x672xf32> to vector<2x672xf32>
    %c223 = arith.constant 223 : index
    %1508 = memref.load %arg1[%c223] : memref<225xf32, #tpu.memory_space<smem>>
    %1509 = vector.broadcast %1508 : f32 to vector<2x672xf32>
    %1510 = arith.mulf %1507, %1509 : vector<2x672xf32>
    %1511 = arith.addf %1505, %1510 : vector<2x672xf32>
    %c24_798 = arith.constant 24 : index
    %c0_799 = arith.constant 0 : index
    %c0_800 = arith.constant 0 : index
    %1512 = vector.load %arg6[%c24_798, %c0_799, %c0_800] : memref<25x2x672xf32, #tpu.memory_space<vmem>>, vector<1x2x672xf32>
    %1513 = vector.shape_cast %1512 : vector<1x2x672xf32> to vector<2x672xf32>
    %c224 = arith.constant 224 : index
    %1514 = memref.load %arg1[%c224] : memref<225xf32, #tpu.memory_space<smem>>
    %1515 = vector.broadcast %1514 : f32 to vector<2x672xf32>
    %1516 = arith.mulf %1513, %1515 : vector<2x672xf32>
    %1517 = arith.addf %1511, %1516 : vector<2x672xf32>
    %cst_801 = arith.constant 0.000000e+00 : f32
    %1518 = vector.broadcast %cst_801 : f32 to vector<2x672xf32>
    %1519 = arith.maximumf %1517, %1518 : vector<2x672xf32>
    %c8_802 = arith.constant 8 : index
    %c0_803 = arith.constant 0 : index
    %c0_804 = arith.constant 0 : index
    %1520 = vector.load %arg3[%c8_802, %c0_803, %c0_804] : memref<9x672x10xf32, #tpu.memory_space<vmem>>, vector<1x672x10xf32>
    %1521 = vector.shape_cast %1520 : vector<1x672x10xf32> to vector<672x10xf32>
    %cst_805 = arith.constant dense<0.000000e+00> : vector<2x10xf32>
    %1522 = tpu.matmul %1519, %1521, %cst_805 {dimension_numbers = #tpu.dot_dimension_numbers<[1], [0], [0], [1], [0, 0, 1, 1], [], []>} : vector<2x672xf32>, vector<672x10xf32>, vector<2x10xf32> -> vector<2x10xf32>
    %1523 = arith.addf %1365, %1522 : vector<2x10xf32>
    %c0_806 = arith.constant 0 : index
    %c0_807 = arith.constant 0 : index
    %1524 = vector.load %arg4[%c0_806, %c0_807] : memref<1x10xf32, #tpu.memory_space<vmem>>, vector<1x10xf32>
    %1525 = vector.broadcast %1524 : vector<1x10xf32> to vector<2x10xf32>
    %1526 = arith.addf %1523, %1525 : vector<2x10xf32>
    %cst_808 = arith.constant dense<0xFF800000> : vector<2xf32>
    %1527 = vector.multi_reduction <maximumf>, %1526, %cst_808 [1] : vector<2x10xf32> to vector<2xf32>
    %1528 = vector.shape_cast %1527 : vector<2xf32> to vector<2x1xf32>
    %1529 = vector.broadcast %1528 : vector<2x1xf32> to vector<2x10xf32>
    %1530 = arith.subf %1526, %1529 : vector<2x10xf32>
    %1531 = math.exp %1530 : vector<2x10xf32>
    %cst_809 = arith.constant dense<0.000000e+00> : vector<2xf32>
    %1532 = vector.multi_reduction <add>, %1531, %cst_809 [1] : vector<2x10xf32> to vector<2xf32>
    %1533 = vector.shape_cast %1532 : vector<2xf32> to vector<2x1xf32>
    %1534 = math.log %1533 : vector<2x1xf32>
    %1535 = vector.broadcast %1534 : vector<2x1xf32> to vector<2x10xf32>
    %1536 = arith.subf %1530, %1535 : vector<2x10xf32>
    %c0_810 = arith.constant 0 : index
    %c0_811 = arith.constant 0 : index
    %1537 = vector.load %arg5[%c0_810, %c0_811] : memref<2x10xf32, #tpu.memory_space<vmem>>, vector<2x10xf32>
    tpu.vector_store %arg5[%c0_810, %c0_811], %1536 {strides = array<i32>} : memref<2x10xf32, #tpu.memory_space<vmem>>, vector<2x10xf32>,
    return
  }
}

</mosaic_0001>

<bundles_post_ra>
// kernel: one_conv_forward.1
= control target key start
LH: loop header
LB: loop body
LE: loop exit
PB: predicated region body
PF: predicated region fallthrough
CT: control target
= control target key end

     0   :  { %s13016_s0 = inlined_call_operand.vmem [shape: f32[2,896], index: 0, kind: input, shape index: {}]   ;;  %s13017_s1 = inlined_call_operand.vmem [shape: f32[225], index: 1, kind: input, shape index: {}]   ;;  %s13018_s2 = inlined_call_operand.vmem [shape: f32[9], index: 2, kind: input, shape index: {}]   ;;  %s13019_s3 = inlined_call_operand.vmem [shape: f32[9,672,10], index: 3, kind: input, shape index: {}]   ;;  %s13020_s4 = inlined_call_operand.vmem [shape: f32[1,10], index: 4, kind: input, shape index: {}]   ;;  %s13021_s5 = inlined_call_operand.hbm [shape: f32[2,10], index: 5, kind: output, shape index: {}]  }
   0x1   :  { %13192 = sst [smem:[#allocation60_spill]] %s13019_s3 }
   0x2   :  { %13193 = sst [smem:[#allocation61_spill]] %s13020_s4 }
   0x3   :  { %13194 = sst [smem:[#allocation62_spill]] %s13021_s5 }
   0x4   :  { %10 = vsyncpa [#allocation5], 0 }
   0x5   :  { %11 = vsyncpa [#allocation7], 0 }
   0x6   :  { %12 = vsyncpa [#allocation4], 0  ;;  %s21_s20 = sshll.u32 %s13017_s1, 4  ;;  %s31_s23 = sshll.u32 %s13018_s2, 4  ;;  %s22_s20 = int_to_ptr.vmem [resolvable:$true] %s21_s20  ;;  %s32_s23 = int_to_ptr.vmem [resolvable:$true] %s31_s23 }
   0x7   :  { %s7457_s24 = scalar_lea.vmem %s22_s20, 32  ;;  %p7462_p1 = scmp.lt.s32.totalorder %s22_s20, %s22_s20 }
   0x8   :  { %p7458_p0 = scmp.ne.s32.totalorder %s22_s20, %s7457_s24  ;;  %p7463_p2 = scmp.lt.s32.totalorder %s7457_s24, %s7457_s24 }
   0xa   :  { %p7464_p3 = por %p7463_p2, %p7462_p1 }
   0xc   :  { %p7465_p4 = pnand %p7464_p3, %p7458_p0 }
   0xe   :  { %7468 = shalt.err (!%p7465_p4)
}
   0xf   :  { %s7509_s25 = smov [#allocation3]   ;;  %s7469_s26 = scalar_lea.vmem %s32_s23, 16 }
  0x10   :  { %24 = dma.vmem_to_smem %s22_s20, 32, %s7509_s25, [#allocation5]  }
  0x11   :  { %p7470_p5 = scmp.ne.s32.totalorder %s32_s23, %s7469_s26  ;;  %p7474_p6 = scmp.lt.s32.totalorder %s32_s23, %s32_s23 }
  0x12   :  { %p7475_p7 = scmp.lt.s32.totalorder %s7469_s26, %s7469_s26 }
  0x14   :  { %p7476_p8 = por %p7475_p7, %p7474_p6 }
  0x16   :  { %p7477_p9 = pnand %p7476_p8, %p7470_p5 }
  0x18   :  { %7480 = shalt.err (!%p7477_p9)
}
  0x19   :  { %s7510_s1 = smov [#allocation6]  }
  0x1a   :  { %34 = dma.vmem_to_smem %s32_s23, 16, %s7510_s1, [#allocation7]  }
  0x1b   :  { %7503 = dma.done.wait [#allocation5], 32  }
  0x1c   :  { %7504 = vsyncadd [#allocation5], 4294967264 }
  0x1d   :  { %7505 = dma.done.wait [#allocation7], 16  }
  0x1e   :  { %7506 = vsyncadd [#allocation7], 4294967280 }
  0x1f   :  { %45 = sfence }
  0x20   :  { %v7577_v0 = vld [vmem:[%s13016_s0] sm:$0xff]  ;;  %vm49_vm0 = vcmask 1041408   ;;  %s7511_s28 = smov 126   ;;  %s7512_s29 = smov 127   ;;  %vm50_vm1 = vcmask 257026   ;;  %v4925_v4 = vld [vmem:[%s13019_s3 + $0x328] sm:$0xff] }
  0x21   :  { %71 = vrot.lane.b32.xlu1 %v7577_v0, %s7511_s28  ;;  %48 = vst [vmem:[#allocation2] sm:$0xff] %v7577_v0  ;;  %55 = vrot.lane.b32.xlu0 %v7577_v0, %s7512_s29  ;;  %v7585_v1 = vld [vmem:[%s13016_s0 + $0x8] sm:$0x3f]  ;;  %vm7587_vm2 = vmor %vm50_vm1, %vm49_vm0  ;;  %s7513_s7 = smov 125   ;;  %s7514_s8 = smov 124   ;;  %v4924_v3 = vld [vmem:[%s13019_s3 + $0x320] sm:$0xff] }
  0x22   :  { %52 = vst.msk [vmem:[#allocation2 + $0x8] sm:$0xf] %vm7587_vm2, %v7585_v1  ;;  %s7515_s0 = smov 100   ;;  %s7516_s9 = smov 99   ;;  %v6402_v5 = vpack.c.bf16 %v4925_v4, %v4924_v3  ;;  %v4908_v6 = vld [vmem:[%s13019_s3 + $0x2a0] sm:$0xff]  ;;  %v4909_v7 = vld [vmem:[%s13019_s3 + $0x2a8] sm:$0xff] }
  0x23   :  { %s7517_s10 = smov 98   ;;  %s7518_s11 = smov 97   ;;  %v6404_v8 = vpack.c.bf16 %v4909_v7, %v4908_v6  ;;  %v4956_v9 = vld [vmem:[%s13019_s3 + $0x420] sm:$0xff]  ;;  %v4957_v10 = vld [vmem:[%s13019_s3 + $0x428] sm:$0xff]  ;;  %v4926_v15 = vld [vmem:[%s13019_s3 + $0x330] sm:$0xff]  ;;  %vm61_vm3 = vcmask 1045504  }
  0x24   :  { %s7519_s12 = smov 96   ;;  %s7520_s13 = smov 72   ;;  %6403 = vmatprep.subr.bf16.mxu0 %v6402_v5  ;;  %v6434_v11 = vpack.c.bf16 %v4957_v10, %v4956_v9  ;;  %v4940_v12 = vld [vmem:[%s13019_s3 + $0x3a0] sm:$0xff]  ;;  %v4941_v13 = vld [vmem:[%s13019_s3 + $0x3a8] sm:$0xff]  ;;  %v4927_v16 = vld [vmem:[%s13019_s3 + $0x338] sm:$0xff]  ;;  %vm78_vm4 = vcmask 1031168  }
  0x25   :  { %73 = vrot.lane.b32.xlu1 %v7585_v1, %s7511_s28  ;;  %57 = vrot.lane.b32.xlu0 %v7585_v1, %s7512_s29  ;;  %s7521_s14 = smov 71   ;;  %s7522_s15 = smov 70   ;;  %v6436_v14 = vpack.c.bf16 %v4941_v13, %v4940_v12  ;;  %v6406_v17 = vpack.c.bf16 %v4927_v16, %v4926_v15  ;;  %v4910_v18 = vld [vmem:[%s13019_s3 + $0x2b0] sm:$0xff]  ;;  %v4911_v19 = vld [vmem:[%s13019_s3 + $0x2b8] sm:$0xff]  ;;  %vm63_vm5 = vcmask 1039360   ;;  %vm93_vm6 = vcmask 1022976  }
  0x26   :  { %s7523_s16 = smov 69   ;;  %s7524_s17 = smov 68   ;;  %6405 = vmatpush3.bf16.msra.mxu0 %v6404_v8  ;;  %6435 = vmatprep.subr.bf16.mxu1 %v6434_v11  ;;  %v6408_v20 = vpack.c.bf16 %v4911_v19, %v4910_v18  ;;  %v4958_v21 = vld [vmem:[%s13019_s3 + $0x430] sm:$0xff]  ;;  %v4959_v22 = vld [vmem:[%s13019_s3 + $0x438] sm:$0xff]  ;;  %v4928_v27 = vld [vmem:[%s13019_s3 + $0x340] sm:$0xff]  ;;  %vm108_vm7 = vcmask 1014784  }
  0x27   :  { %s7525_s18 = smov 44   ;;  %s7526_s19 = smov 43   ;;  %6437 = vmatpush3.bf16.msra.mxu1 %v6436_v14  ;;  %6407 = vmatprep.subr.bf16.mxu0 %v6406_v17  ;;  %v6438_v23 = vpack.c.bf16 %v4959_v22, %v4958_v21  ;;  %v4942_v24 = vld [vmem:[%s13019_s3 + $0x3b0] sm:$0xff]  ;;  %v4943_v25 = vld [vmem:[%s13019_s3 + $0x3b8] sm:$0xff]  ;;  %v4929_v28 = vld [vmem:[%s13019_s3 + $0x348] sm:$0xff]  ;;  %vm123_vm8 = vcmask 818176  }
  0x28   :  { %s7527_s20 = smov 42   ;;  %s7529_s26 = smov 40   ;;  %v6440_v26 = vpack.c.bf16 %v4943_v25, %v4942_v24  ;;  %v6410_v29 = vpack.c.bf16 %v4929_v28, %v4928_v27  ;;  %v4912_v30 = vld [vmem:[%s13019_s3 + $0x2c0] sm:$0xff]  ;;  %v4913_v31 = vld [vmem:[%s13019_s3 + $0x2c8] sm:$0xff]  ;;  %v4930_v39 = vld [vmem:[%s13019_s3 + $0x350] sm:$0xff]  ;;  %vm138_vm9 = vcmask 809984  }
  0x29   :  { %88 = vrot.lane.b32.xlu1 %v7585_v1, %s7513_s7  ;;  %86 = vrot.lane.b32.xlu0 %v7577_v0, %s7513_s7  ;;  %v6412_v32 = vpack.c.bf16 %v4913_v31, %v4912_v30  ;;  %v4960_v33 = vld [vmem:[%s13019_s3 + $0x440] sm:$0xff]  ;;  %v4961_v34 = vld [vmem:[%s13019_s3 + $0x448] sm:$0xff]  ;;  %s7531_s30 = smov 15   ;;  %s7532_s23 = smov 14   ;;  %vm153_vm10 = vcmask 801792   ;;  %vm168_vm11 = vcmask 793600  }
  0x2a   :  { %6409 = vmatpush3.bf16.msra.mxu0 %v6408_v20  ;;  %6439 = vmatprep.subr.bf16.mxu1 %v6438_v23  ;;  %v6442_v35 = vpack.c.bf16 %v4961_v34, %v4960_v33  ;;  %v4944_v36 = vld [vmem:[%s13019_s3 + $0x3c0] sm:$0xff]  ;;  %v4945_v37 = vld [vmem:[%s13019_s3 + $0x3c8] sm:$0xff]  ;;  %v4931_v40 = vld [vmem:[%s13019_s3 + $0x358] sm:$0xff]  ;;  %s7841_s21 = sld [smem:[#allocation3 + $0x2]]  ;;  %s7843_s22 = sld [smem:[#allocation6]]  ;;  %vm183_vm12 = vcmask 785408  }
  0x2b   :  { %6441 = vmatpush3.bf16.msra.mxu1 %v6440_v26  ;;  %6411 = vmatprep.subr.bf16.mxu0 %v6410_v29  ;;  %v6444_v38 = vpack.c.bf16 %v4945_v37, %v4944_v36  ;;  %v6414_v41 = vpack.c.bf16 %v4931_v40, %v4930_v39  ;;  %v4914_v42 = vld [vmem:[%s13019_s3 + $0x2d0] sm:$0xff]  ;;  %v4915_v43 = vld [vmem:[%s13019_s3 + $0x2d8] sm:$0xff]  ;;  %v4932_v51 = vld [vmem:[%s13019_s3 + $0x360] sm:$0xff]  ;;  %s7847_s24 = sld [smem:[#allocation6 + $0x2]]  ;;  %s7853_s1 = sld [smem:[#allocation3 + $0x4b]]  ;;  %vm198_vm13 = vcmask 588800  }
  0x2c   :  { %6443 = vmatprep.subr.bf16.mxu1 %v6442_v35  ;;  %v6416_v44 = vpack.c.bf16 %v4915_v43, %v4914_v42  ;;  %v4962_v45 = vld [vmem:[%s13019_s3 + $0x450] sm:$0xff]  ;;  %v4963_v46 = vld [vmem:[%s13019_s3 + $0x458] sm:$0xff]  ;;  %v4933_v52 = vld [vmem:[%s13019_s3 + $0x368] sm:$0xff]  ;;  %s7849_s25 = sld [smem:[#allocation3 + $0x32]]  ;;  %s7857_s2 = sld [smem:[#allocation6 + $0x3]]  ;;  %vm213_vm14 = vcmask 580608  }
  0x2d   :  { %103 = vrot.lane.b32.xlu1 %v7585_v1, %s7514_s8  ;;  %101 = vrot.lane.b32.xlu0 %v7577_v0, %s7514_s8  ;;  %v6446_v47 = vpack.c.bf16 %v4963_v46, %v4962_v45  ;;  %v4946_v48 = vld [vmem:[%s13019_s3 + $0x3d0] sm:$0xff]  ;;  %v4947_v49 = vld [vmem:[%s13019_s3 + $0x3d8] sm:$0xff]  ;;  %v6418_v53 = vpack.c.bf16 %v4933_v52, %v4932_v51  ;;  %v7855_v40 = vld [vmem:[#allocation2 + $0x8] sm:$0xf]  ;;  %s7859_s27 = sld [smem:[#allocation3 + $0x4c]]  ;;  %s7871_s6 = sld [smem:[#allocation3 + $0x7d]] }
  0x2e   :  { %6413 = vmatpush3.bf16.msra.mxu0 %v6412_v32  ;;  %v6448_v50 = vpack.c.bf16 %v4947_v49, %v4946_v48  ;;  %v4916_v54 = vld [vmem:[%s13019_s3 + $0x2e0] sm:$0xff]  ;;  %v4917_v55 = vld [vmem:[%s13019_s3 + $0x2e8] sm:$0xff]  ;;  %v4934_v62 = vld [vmem:[%s13019_s3 + $0x370] sm:$0xff]  ;;  %s7862_s28 = sld [smem:[#allocation6 + $0x4]]  ;;  %s7875_s7 = sld [smem:[#allocation3 + $0x96]]  ;;  %vm228_vm15 = vcmask 572416  }
  0x2f   :  { %6445 = vmatpush3.bf16.msra.mxu1 %v6444_v38  ;;  %6415 = vmatprep.subr.bf16.mxu0 %v6414_v41  ;;  %v6420_v56 = vpack.c.bf16 %v4917_v55, %v4916_v54  ;;  %v4964_v57 = vld [vmem:[%s13019_s3 + $0x460] sm:$0xff]  ;;  %v4965_v58 = vld [vmem:[%s13019_s3 + $0x468] sm:$0xff]  ;;  %v4935_v3 = vld [vmem:[%s13019_s3 + $0x378] sm:$0xff]  ;;  %v13094_v38 = vmov 0.0|0.0   ;;  %s7864_s29 = sld [smem:[#allocation3 + $0x64]]  ;;  %s7880_s8 = sld [smem:[#allocation3 + $0xaf]] }
  0x30   :  { %6447 = vmatprep.subr.bf16.mxu1 %v6446_v47  ;;  %v6450_v59 = vpack.c.bf16 %v4965_v58, %v4964_v57  ;;  %v4948_v60 = vld [vmem:[%s13019_s3 + $0x3e0] sm:$0xff]  ;;  %v4949_v61 = vld [vmem:[%s13019_s3 + $0x3e8] sm:$0xff]  ;;  %v4918_v4 = vld [vmem:[%s13019_s3 + $0x2f0] sm:$0xff]  ;;  %v6422_v5 = vpack.c.bf16 %v4935_v3, %v4934_v62  ;;  %13197 = sst [smem:[#allocation12_spill]] %s7841_s21  ;;  %v437_v46 = vstv %s7841_s21  ;;  %s7989_s5 = sld [smem:[#allocation3 + $0x1c]]  ;;  %vm243_vm0 = vcmask 564224  }
  0x31   :  { %118 = vrot.lane.b32.xlu1 %v7585_v1, %s7515_s0  ;;  %116 = vrot.lane.b32.xlu0 %v7577_v0, %s7515_s0  ;;  %v6452_v63 = vpack.c.bf16 %v4949_v61, %v4948_v60  ;;  %v4919_v6 = vld [vmem:[%s13019_s3 + $0x2f8] sm:$0xff]  ;;  %v4966_v7 = vld [vmem:[%s13019_s3 + $0x470] sm:$0xff]  ;;  %13198 = sst [smem:[#allocation13_spill]] %s7847_s24  ;;  %s7882_s0 = sld [smem:[#allocation3 + $0xc8]]  ;;  %vm258_vm1 = vcmask 556032  }
  0x32   :  { %6417 = vmatpush3.bf16.msra.mxu0 %v6416_v44  ;;  %v4967_v8 = vld [vmem:[%s13019_s3 + $0x478] sm:$0xff]  ;;  %v6424_v9 = vpack.c.bf16 %v4919_v6, %v4918_v4  ;;  %v4950_v11 = vld [vmem:[%s13019_s3 + $0x3f0] sm:$0xff]  ;;  %v4936_v13 = vld [vmem:[%s13019_s3 + $0x380] sm:$0xff]  ;;  %13199 = sst [smem:[#allocation14_spill]] %s7849_s25  ;;  %v417_v47 = vstv %s7843_s22  ;;  %s7991_s4 = sld [smem:[#allocation3 + $0x1d]] }
  0x33   :  { %6449 = vmatpush3.bf16.msra.mxu1 %v6448_v50  ;;  %6419 = vmatprep.subr.bf16.mxu0 %v6418_v53  ;;  %v6454_v10 = vpack.c.bf16 %v4967_v8, %v4966_v7  ;;  %v4951_v12 = vld [vmem:[%s13019_s3 + $0x3f8] sm:$0xff]  ;;  %v4937_v15 = vld [vmem:[%s13019_s3 + $0x388] sm:$0xff]  ;;  %v4920_v16 = vld [vmem:[%s13019_s3 + $0x300] sm:$0xff]  ;;  %13201 = sst [smem:[#allocation16_spill]] %s7853_s1  ;;  %v13099_v50 = vstv %s7847_s24  ;;  %s8091_s22 = sld [smem:[#allocation3 + $0xa]] }
  0x34   :  { %6451 = vmatprep.subr.bf16.mxu1 %v6450_v59  ;;  %v6456_v14 = vpack.c.bf16 %v4951_v12, %v4950_v11  ;;  %v4921_v17 = vld [vmem:[%s13019_s3 + $0x308] sm:$0xff]  ;;  %v6426_v18 = vpack.c.bf16 %v4937_v15, %v4936_v13  ;;  %v4968_v19 = vld [vmem:[%s13019_s3 + $0x480] sm:$0xff]  ;;  %v4938_v25 = vld [vmem:[%s13019_s3 + $0x390] sm:$0xff]  ;;  %13202 = sst [smem:[#allocation17_spill]] %s7857_s2  ;;  %v13100_v51 = vstv %s7849_s25  ;;  %s8125_s24 = sld [smem:[#allocation3 + $0xe]] }
  0x35   :  { %133 = vrot.lane.b32.xlu1 %v7585_v1, %s7516_s9  ;;  %131 = vrot.lane.b32.xlu0 %v7577_v0, %s7516_s9  ;;  %s7528_s9 = smov 41   ;;  %v4969_v20 = vld [vmem:[%s13019_s3 + $0x488] sm:$0xff]  ;;  %v6428_v21 = vpack.c.bf16 %v4921_v17, %v4920_v16  ;;  %v4952_v23 = vld [vmem:[%s13019_s3 + $0x400] sm:$0xff]  ;;  %13203 = sst [smem:[#allocation18_spill]] %s7859_s27  ;;  %v1437_v59 = vmul.f32 %v13100_v51, %v7855_v40 }
  0x36   :  { %6421 = vmatpush3.bf16.msra.mxu0 %v6420_v56  ;;  %v6458_v22 = vpack.c.bf16 %v4969_v20, %v4968_v19  ;;  %v4953_v24 = vld [vmem:[%s13019_s3 + $0x408] sm:$0xff]  ;;  %v4939_v27 = vld [vmem:[%s13019_s3 + $0x398] sm:$0xff]  ;;  %v4922_v28 = vld [vmem:[%s13019_s3 + $0x310] sm:$0xff]  ;;  %13204 = sst [smem:[#allocation19_spill]] %s7862_s28  ;;  %v13093_v61 = vstv %s7853_s1  ;;  %s8116_s1 = sld [smem:[#allocation3 + $0xd]] }
  0x37   :  { %6453 = vmatpush3.bf16.msra.mxu1 %v6452_v63  ;;  %6423 = vmatprep.subr.bf16.mxu0 %v6422_v5  ;;  %v6460_v26 = vpack.c.bf16 %v4953_v24, %v4952_v23  ;;  %v4923_v29 = vld [vmem:[%s13019_s3 + $0x318] sm:$0xff]  ;;  %v6430_v30 = vpack.c.bf16 %v4939_v27, %v4938_v25  ;;  %v4970_v31 = vld [vmem:[%s13019_s3 + $0x490] sm:$0xff]  ;;  %13205 = sst [smem:[#allocation20_spill]] %s7864_s29  ;;  %v7866_v44 = vld [vmem:[#allocation2] sm:$0xff]  ;;  %v13088_v6 = vstv %s7857_s2  ;;  %v1921_v7 = vmul.f32 %v13093_v61, %v7855_v40  ;;  %s8114_s2 = sld [smem:[#allocation3 + $0x27]] }
  0x38   :  { %6455 = vmatprep.subr.bf16.mxu1 %v6454_v10  ;;  %v4971_v32 = vld [vmem:[%s13019_s3 + $0x498] sm:$0xff]  ;;  %v4954_v33 = vld [vmem:[%s13019_s3 + $0x410] sm:$0xff]  ;;  %v6432_v36 = vpack.c.bf16 %v4923_v29, %v4922_v28  ;;  %13207 = sst [smem:[#allocation22_spill]] %s7871_s6  ;;  %v13085_v11 = vstv %s7859_s27  ;;  %v13083_v12 = vstv %s7862_s28  ;;  %v7936_v15 = vadd.f32 %v1437_v59, %v13099_v50  ;;  %s8085_s28 = sld [smem:[#allocation3 + $0x9]] }
  0x39   :  { %148 = vrot.lane.b32.xlu1 %v7585_v1, %s7517_s10  ;;  %146 = vrot.lane.b32.xlu0 %v7577_v0, %s7517_s10  ;;  %v6462_v34 = vpack.c.bf16 %v4971_v32, %v4970_v31  ;;  %v4955_v35 = vld [vmem:[%s13019_s3 + $0x418] sm:$0xff]  ;;  %13208 = sst [smem:[#allocation23_spill]] %s7875_s7  ;;  %s7898_s10 = sld [smem:[#allocation3 + $0x7e]]  ;;  %v13084_v16 = vstv %s7864_s29 }
  0x3a   :  { %6425 = vmatpush3.bf16.msra.mxu0 %v6424_v9  ;;  %v6464_v37 = vpack.c.bf16 %v4955_v35, %v4954_v33  ;;  %13209 = sst [smem:[#allocation24_spill]] %s7880_s8  ;;  %v2405_v19 = vmul.f32 %v13084_v16, %v7855_v40  ;;  %v13078_v23 = vstv %s7875_s7  ;;  %v13073_v24 = vstv %s7880_s8  ;;  %s8002_s8 = sld [smem:[#allocation3 + $0x1f]] }
  0x3b   :  { %6457 = vmatpush3.bf16.msra.mxu1 %v6456_v14  ;;  %6427 = vmatprep.subr.bf16.mxu0 %v6426_v18  ;;  %13210 = sst [smem:[#allocation25_spill]] %s7882_s0  ;;  %v13081_v18 = vstv %s7871_s6  ;;  %v13060_v25 = vstv %s7882_s0  ;;  %v3373_v29 = vmul.f32 %v13078_v23, %v7855_v40  ;;  %v1923_v33 = vadd.f32 %v1921_v7, %v13088_v6  ;;  %s8000_s0 = sld [smem:[#allocation3 + $0x1e]] }
  0x3c   :  { %6459 = vmatprep.subr.bf16.mxu1 %v6458_v22  ;;  %v2889_v20 = vmul.f32 %v13081_v18, %v7855_v40  ;;  %v4341_v31 = vmul.f32 %v13060_v25, %v7855_v40  ;;  %13219 = sst [smem:[#allocation34_spill]] %s7991_s4  ;;  %s8011_s7 = sld [smem:[#allocation3 + $0x20]]  ;;  %v7536_v6 = vmov 1983009808  }
  0x3d   :  { %163 = vrot.lane.b32.xlu1 %v7585_v1, %s7518_s11  ;;  %161 = vrot.lane.b32.xlu0 %v7577_v0, %s7518_s11  ;;  %s7900_s11 = sld [smem:[#allocation6 + $0x6]]  ;;  %s8043_s6 = sld [smem:[#allocation3 + $0x3]] }
  0x3e   :  { %6429 = vmatpush3.bf16.msra.mxu0 %v6428_v21  ;;  %s8103_s29 = sld [smem:[#allocation3 + $0x26]]  ;;  %s8105_s27 = sld [smem:[#allocation3 + $0xc]] }
  0x3f   :  { %6461 = vmatpush3.bf16.msra.mxu1 %v6460_v26  ;;  %6431 = vmatprep.subr.bf16.mxu0 %v6430_v30  ;;  %13212 = sst [smem:[#allocation27_spill]] %s7898_s10  ;;  %v3857_v30 = vmul.f32 %v13073_v24, %v7855_v40  ;;  %v13079_v35 = vstv %s7898_s10  ;;  %s8154_s21 = sld [smem:[#allocation3 + $0x11]]  ;;  %v13109_v24 = vstv %s8091_s22 }
  0x40   :  { %6463 = vmatprep.subr.bf16.mxu1 %v6462_v34  ;;  %13221 = sst [smem:[#allocation36_spill]] %s8002_s8  ;;  %s8067_s10 = sld [smem:[#allocation3 + $0x7]] }
  0x41   :  { %178 = vrot.lane.b32.xlu1 %v7585_v1, %s7519_s12  ;;  %176 = vrot.lane.b32.xlu0 %v7577_v0, %s7519_s12  ;;  %s7904_s12 = sld [smem:[#allocation3 + $0x97]]  ;;  %13236 = sst [smem:[#allocation51_spill]] %s8114_s2 }
  0x42   :  { %6433 = vmatpush3.bf16.msra.mxu0 %v6432_v36  ;;  %13220 = sst [smem:[#allocation35_spill]] %s8000_s0  ;;  %s8207_s2 = sld [smem:[#allocation3 + $0x31]] }
  0x43   :  { %6465 = vmatpush3.bf16.msra.mxu1 %v6464_v37  ;;  %6466 = vmatprep.subr.bf16.mxu0 %v13094_v38  ;;  %13213 = sst [smem:[#allocation28_spill]] %s7900_s11  ;;  %v2407_v37 = vadd.f32 %v2405_v19, %v13083_v12  ;;  %s8139_s25 = sld [smem:[#allocation3 + $0xf]] }
  0x44   :  { %13222 = sst [smem:[#allocation37_spill]] %s8011_s7 }
  0x45   :  { %193 = vrot.lane.b32.xlu1 %v7585_v1, %s7520_s13  ;;  %191 = vrot.lane.b32.xlu0 %v7577_v0, %s7520_s13  ;;  %s7534_s13 = smov 12   ;;  %13235 = sst [smem:[#allocation50_spill]] %s8103_s29 }
  0x46   :  { %13232 = sst [smem:[#allocation47_spill]] %s8067_s10  ;;  %s8202_s29 = sld [smem:[#allocation3 + $0x30]] }
  0x47   :  { %13214 = sst [smem:[#allocation29_spill]] %s7904_s12 }
  0x48   :  { %13237 = sst [smem:[#allocation52_spill]] %s8116_s1  ;;  %s8210_s1 = sld [smem:[#allocation3 + $0x16]] }
  0x49   :  { %208 = vrot.lane.b32.xlu1 %v7585_v1, %s7521_s14  ;;  %206 = vrot.lane.b32.xlu0 %v7577_v0, %s7521_s14  ;;  %s7919_s14 = sld [smem:[#allocation3 + $0xb0]]  ;;  %13240 = sst [smem:[#allocation55_spill]] %s8207_s2 }
  0x4a   :  { %s13248_s2 = sld [smem:[#allocation47_spill]] }
  0x4d   :  { %223 = vrot.lane.b32.xlu1 %v7585_v1, %s7522_s15  ;;  %221 = vrot.lane.b32.xlu0 %v7577_v0, %s7522_s15  ;;  %s7530_s15 = smov 16  }
  0x4f   :  { %13216 = sst [smem:[#allocation31_spill]] %s7919_s14 }
  0x51   :  { %238 = vrot.lane.b32.xlu1 %v7585_v1, %s7523_s16  ;;  %236 = vrot.lane.b32.xlu0 %v7577_v0, %s7523_s16  ;;  %s7931_s16 = sld [smem:[#allocation3 + $0xc9]] }
  0x55   :  { %253 = vrot.lane.b32.xlu1 %v7585_v1, %s7524_s17  ;;  %251 = vrot.lane.b32.xlu0 %v7577_v0, %s7524_s17  ;;  %s7959_s17 = sld [smem:[#allocation3 + $0x19]] }
  0x57   :  { %13218 = sst [smem:[#allocation33_spill]] %s7931_s16  ;;  %v13059_v59 = vstv %s7931_s16 }
  0x58   :  { %s8055_s16 = sld [smem:[#allocation3 + $0x5]] }
  0x59   :  { %268 = vrot.lane.b32.xlu1 %v7585_v1, %s7525_s18  ;;  %266 = vrot.lane.b32.xlu0 %v7577_v0, %s7525_s18  ;;  %s7533_s18 = smov 13  }
  0x5d   :  { %283 = vrot.lane.b32.xlu1 %v7585_v1, %s7526_s19  ;;  %281 = vrot.lane.b32.xlu0 %v7577_v0, %s7526_s19  ;;  %s7978_s19 = sld [smem:[#allocation3 + $0x1a]] }
  0x5e   :  { %13227 = sst [smem:[#allocation42_spill]] %s8055_s16 }
  0x61   :  { %298 = vrot.lane.b32.xlu1 %v7585_v1, %s7527_s20  ;;  %296 = vrot.lane.b32.xlu0 %v7577_v0, %s7527_s20  ;;  %s7839_s20 = sld [smem:[#allocation3]] }
  0x65   :  { %313 = vrot.lane.b32.xlu1 %v7585_v1, %s7528_s9  ;;  %311 = vrot.lane.b32.xlu0 %v7577_v0, %s7528_s9  ;;  %s7887_s9 = sld [smem:[#allocation6 + $0x5]] }
  0x67   :  { %v421_v43 = vstv %s7839_s20  ;;  %s7980_s20 = sld [smem:[#allocation3 + $0x1b]] }
  0x68   :  { %v423_v45 = vmul.f32 %v421_v43, %v7855_v40  ;;  %v7885_v53 = vmul.f32 %v421_v43, %v7866_v44 }
  0x69   :  { %328 = vrot.lane.b32.xlu1 %v7585_v1, %s7529_s26  ;;  %326 = vrot.lane.b32.xlu0 %v7577_v0, %s7529_s26  ;;  %s7851_s26 = sld [smem:[#allocation3 + $0x33]] }
  0x6a   :  { %v7891_v58 = vadd.f32 %v423_v45, %v417_v47  ;;  %v13067_v45 = vstv %s7919_s14  ;;  %s8053_s14 = sld [smem:[#allocation3 + $0x4]] }
  0x6b   :  { %13211 = sst [smem:[#allocation26_spill]] %s7887_s9  ;;  %v13080_v34 = vstv %s7887_s9  ;;  %s8013_s9 = sld [smem:[#allocation3 + $0x21]] }
  0x6d   :  { %343 = vrot.lane.b32.xlu1 %v7585_v1, %s7530_s15  ;;  %341 = vrot.lane.b32.xlu0 %v7577_v0, %s7530_s15  ;;  %s7921_s15 = sld [smem:[#allocation6 + $0x8]] }
  0x6f   :  { %13200 = sst [smem:[#allocation15_spill]] %s7851_s26  ;;  %v13096_v60 = vstv %s7851_s26  ;;  %s8123_s26 = sld [smem:[#allocation3 + $0x28]] }
  0x71   :  { %358 = vrot.lane.b32.xlu1 %v7585_v1, %s7531_s30  ;;  %356 = vrot.lane.b32.xlu0 %v7577_v0, %s7531_s30  ;;  %s7869_s30 = sld [smem:[#allocation3 + $0x65]]  ;;  %13223 = sst [smem:[#allocation38_spill]] %s8013_s9 }
  0x73   :  { %13217 = sst [smem:[#allocation32_spill]] %s7921_s15 }
  0x75   :  { %373 = vrot.lane.b32.xlu1 %v7585_v1, %s7532_s23  ;;  %371 = vrot.lane.b32.xlu0 %v7577_v0, %s7532_s23  ;;  %s7845_s23 = sld [smem:[#allocation3 + $0x1]] }
  0x77   :  { %13206 = sst [smem:[#allocation21_spill]] %s7869_s30  ;;  %v13082_v17 = vstv %s7869_s30  ;;  %s8083_s30 = sld [smem:[#allocation3 + $0x8]] }
  0x79   :  { %388 = vrot.lane.b32.xlu1 %v7585_v1, %s7533_s18  ;;  %386 = vrot.lane.b32.xlu0 %v7577_v0, %s7533_s18  ;;  %s7971_s18 = sld [smem:[#allocation6 + $0x1]] }
  0x7b   :  { %v429_v49 = vstv %s7845_s23  ;;  %s13257_s23 = sld [smem:[#allocation51_spill]] }
  0x7d   :  { %403 = vrot.lane.b32.xlu1 %v7585_v1, %s7534_s13  ;;  %401 = vrot.lane.b32.xlu0 %v7577_v0, %s7534_s13  ;;  %v636_v0 = vld [vmem:[%s13019_s3 + $0x80] sm:$0xff]  ;;  %v637_v1 = vld [vmem:[%s13019_s3 + $0x88] sm:$0xff]  ;;  %s7906_s13 = sld [smem:[#allocation6 + $0x7]]  ;;  %s8137_s3 = sld [smem:[#allocation3 + $0x29]] }
  0x7e   :  { %v6496_v39 = vpack.c.bf16 %v637_v1, %v636_v0  ;;  %v13075_v0 = vstv %s7900_s11  ;;  %v13074_v1 = vstv %s7904_s12  ;;  %s8041_s11 = sld [smem:[#allocation3 + $0x24]]  ;;  %s8065_s12 = sld [smem:[#allocation3 + $0x6]] }
  0x80   :  { %6497 = vmatprep.subr.bf16.mxu1 %v6496_v39 }
  0x83   :  { %13215 = sst [smem:[#allocation30_spill]] %s7906_s13  ;;  %v13070_v43 = vstv %s7906_s13 }
  0x84   :  { %s8025_s13 = sld [smem:[#allocation3 + $0x22]]  ;;  %13226 = sst [smem:[#allocation41_spill]] %s8041_s11 }
  0x85   :  { %13238 = sst [smem:[#allocation53_spill]] %s8137_s3  ;;  %s8218_s3 = sld [smem:[#allocation3 + $0x17]] }
  0x8a   :  { %13224 = sst [smem:[#allocation39_spill]] %s8025_s13 }
  0x8b   :  { %13241 = sst [smem:[#allocation56_spill]] %s8218_s3  ;;  %s13254_s3 = sld [smem:[#allocation50_spill]] }
  0x93   :  { %v72_v41 = vpop.permute.xlu1 %71  ;;  %v56_v42 = vpop.permute.xlu0 %55 }
  0x94   :  { %v75_v54 = vrot.slane %v72_v41, 2  ;;  %v59_v55 = vrot.slane %v56_v42, 2 }
  0x97   :  { %v74_v48 = vpop.permute.xlu1 %73  ;;  %v58_v52 = vpop.permute.xlu0 %57 }
  0x98   :  { %v76_v56 = vrot.slane %v74_v48, 2  ;;  %v60_v57 = vrot.slane %v58_v52, 2 }
  0x9a   :  { %v77_v62 = vsel %vm61_vm3, %v75_v54, %v76_v56  ;;  %v80_v63 = vsel %vm78_vm4, %v74_v48, %v76_v56  ;;  %v62_v3 = vsel %vm61_vm3, %v59_v55, %v60_v57  ;;  %v65_v4 = vsel %vm63_vm5, %v58_v52, %v60_v57 }
  0x9b   :  { %v7911_v5 = vsel %vm78_vm4, %v72_v41, %v77_v62  ;;  %85 = vst.msk [vmem:[#allocation2 + $0x20] sm:$0xf] %vm7587_vm2, %v80_v63  ;;  %v7924_v8 = vsel %vm63_vm5, %v56_v42, %v62_v3  ;;  %70 = vst.msk [vmem:[#allocation2 + $0x14] sm:$0xf] %vm7587_vm2, %v65_v4  ;;  %v89_v9 = vpop.permute.xlu1 %88  ;;  %v87_v10 = vpop.permute.xlu0 %86  ;;  %v2891_v42 = vadd.f32 %v2889_v20, %v13080_v34  ;;  %v13058_v48 = vstv %s7921_s15  ;;  %s8027_s15 = sld [smem:[#allocation3 + $0x23]] }
  0x9c   :  { %84 = vst [vmem:[#allocation2 + $0x18] sm:$0xff] %v7911_v5  ;;  %69 = vst [vmem:[#allocation2 + $0xc] sm:$0xff] %v7924_v8  ;;  %v91_v13 = vrot.slane %v89_v9, 2  ;;  %v90_v14 = vrot.slane %v87_v10, 2  ;;  %v3375_v55 = vadd.f32 %v3373_v29, %v13075_v0  ;;  %v3859_v56 = vadd.f32 %v3857_v30, %v13070_v43 }
  0x9d   :  { %v4343_v57 = vadd.f32 %v4341_v31, %v13058_v48  ;;  %v8247_v34 = vunpack.c.l.s4 %v7536_v6  ;;  %vm273_vm4 = vcmask 359424   ;;  %vm288_vm5 = vcmask 351232  }
  0x9e   :  { %v95_v21 = vsel %vm93_vm6, %v89_v9, %v91_v13  ;;  %v92_v22 = vsel %vm61_vm3, %v90_v14, %v91_v13 }
  0x9f   :  { %100 = vst.msk [vmem:[#allocation2 + $0x2c] sm:$0xf] %vm7587_vm2, %v95_v21  ;;  %v7955_v26 = vsel %vm93_vm6, %v87_v10, %v92_v22  ;;  %v104_v27 = vpop.permute.xlu1 %103  ;;  %v7957_v28 = vpop.permute.xlu0 %101  ;;  %vm303_vm6 = vcmask 343040  }
  0xa0   :  { %99 = vst [vmem:[#allocation2 + $0x24] sm:$0xff] %v7955_v26  ;;  %v106_v32 = vrot.slane %v104_v27, 2  ;;  %v105_v36 = vrot.slane %v7957_v28, 2 }
  0xa1   :  { %13225 = sst [smem:[#allocation40_spill]] %s8027_s15 }
  0xa2   :  { %v7986_v39 = vld [vmem:[#allocation2 + $0x14] sm:$0xf]  ;;  %v110_v41 = vsel %vm108_vm7, %v104_v27, %v106_v32  ;;  %v107_v4 = vsel %vm61_vm3, %v105_v36, %v106_v32  ;;  %v707_v27 = vstv %s7959_s17  ;;  %s8073_s17 = sld [smem:[#allocation3 + $0x25]] }
  0xa3   :  { %115 = vst.msk [vmem:[#allocation2 + $0x38] sm:$0xf] %vm7587_vm2, %v110_v41  ;;  %v119_v52 = vpop.permute.xlu1 %118  ;;  %v117_v54 = vpop.permute.xlu0 %116  ;;  %v1443_v62 = vmul.f32 %v13096_v60, %v7986_v39  ;;  %v1927_v63 = vmul.f32 %v13085_v11, %v7986_v39  ;;  %v2411_v3 = vmul.f32 %v13082_v17, %v7986_v39  ;;  %v2895_v7 = vmul.f32 %v13079_v35, %v7986_v39 }
  0xa4   :  { %v3379_v9 = vmul.f32 %v13074_v1, %v7986_v39  ;;  %v3863_v10 = vmul.f32 %v13067_v45, %v7986_v39  ;;  %v4347_v13 = vmul.f32 %v13059_v59, %v7986_v39  ;;  %v8071_v32 = vsel %vm108_vm7, %v7957_v28, %v107_v4 }
  0xa5   :  { %v8046_v14 = vadd.f32 %v1443_v62, %v7936_v15  ;;  %v8048_v19 = vadd.f32 %v1927_v63, %v1923_v33  ;;  %v8050_v20 = vadd.f32 %v2411_v3, %v2407_v37  ;;  %v8057_v29 = vadd.f32 %v2895_v7, %v2891_v42  ;;  %114 = vst [vmem:[#allocation2 + $0x30] sm:$0xff] %v8071_v32 }
  0xa6   :  { %v8059_v30 = vadd.f32 %v3379_v9, %v3375_v55  ;;  %v8061_v15 = vadd.f32 %v3863_v10, %v3859_v56  ;;  %v8063_v31 = vadd.f32 %v4347_v13, %v4343_v57  ;;  %v121_v33 = vrot.slane %v119_v52, 2  ;;  %v8272_v0 = vld [vmem:[#allocation2 + $0x2c] sm:$0xf] }
  0xa7   :  { %v134_v21 = vpop.permute.xlu1 %133  ;;  %v132_v22 = vpop.permute.xlu0 %131  ;;  %13228 = vst [vmem:[#allocation43_spill] sm:$0xff] %v8057_v29  ;;  %v120_v36 = vrot.slane %v117_v54, 2  ;;  %v705_v42 = vstv %s7971_s18  ;;  %v708_v55 = vmul.f32 %v707_v27, %v7866_v44  ;;  %v8081_v56 = vadd.f32 %v7885_v53, %v417_v47  ;;  %s8093_s18 = sld [smem:[#allocation3 + $0xb]] }
  0xa8   :  { %13229 = vst [vmem:[#allocation44_spill] sm:$0xff] %v8059_v30  ;;  %13230 = vst [vmem:[#allocation45_spill] sm:$0xff] %v8061_v15  ;;  %v136_v37 = vrot.slane %v134_v21, 2  ;;  %13233 = sst [smem:[#allocation48_spill]] %s8073_s17  ;;  %v135_v41 = vrot.slane %v132_v22, 2  ;;  %v125_v28 = vsel %vm123_vm8, %v119_v52, %v121_v33  ;;  %v709_v44 = vmul.f32 %v707_v27, %v7855_v40 }
  0xa9   :  { %13231 = vst [vmem:[#allocation46_spill] sm:$0xff] %v8063_v31  ;;  %v122_v57 = vsel %vm61_vm3, %v120_v36, %v121_v33  ;;  %130 = vst.msk [vmem:[#allocation2 + $0x44] sm:$0xf] %vm7587_vm2, %v125_v28  ;;  %v719_v7 = vstv %s7980_s20  ;;  %v725_v9 = vstv %s7989_s5  ;;  %v737_v27 = vstv %s8000_s0  ;;  %s8144_s0 = sld [smem:[#allocation3 + $0x2a]]  ;;  %s9475_s20 = sld [smem:[#allocation3 + $0x5c]] }
  0xaa   :  { %v140_v62 = vsel %vm138_vm9, %v134_v21, %v136_v37  ;;  %v8098_v47 = vsel %vm123_vm8, %v117_v54, %v122_v57  ;;  %v137_v53 = vsel %vm61_vm3, %v135_v41, %v136_v37  ;;  %v713_v54 = vstv %s7978_s19  ;;  %s8738_s19 = sld [smem:[#allocation3 + $0x37]] }
  0xab   :  { %v149_v63 = vpop.permute.xlu1 %148  ;;  %v147_v3 = vpop.permute.xlu0 %146  ;;  %145 = vst.msk [vmem:[#allocation2 + $0x50] sm:$0xf] %vm7587_vm2, %v140_v62  ;;  %129 = vst [vmem:[#allocation2 + $0x3c] sm:$0xff] %v8098_v47  ;;  %v8109_v40 = vsel %vm138_vm9, %v132_v22, %v137_v53  ;;  %v731_v21 = vstv %s7991_s4  ;;  %v8132_v37 = vadd.f32 %v708_v55, %v705_v42  ;;  %v8134_v41 = vadd.f32 %v709_v44, %v705_v42  ;;  %s8146_s4 = sld [smem:[#allocation3 + $0x10]]  ;;  %s9978_s5 = sld [smem:[#allocation3 + $0x6f]] }
  0xac   :  { %v151_v52 = vrot.slane %v149_v63, 2  ;;  %v150_v4 = vrot.slane %v147_v3, 2  ;;  %144 = vst [vmem:[#allocation2 + $0x48] sm:$0xff] %v8109_v40  ;;  %v743_v28 = vstv %s8002_s8  ;;  %v761_v55 = vstv %s8025_s13  ;;  %s8151_s8 = sld [smem:[#allocation3 + $0x2b]]  ;;  %s8162_s13 = sld [smem:[#allocation3 + $0x12]] }
  0xad   :  { %13234 = sst [smem:[#allocation49_spill]] %s8093_s18  ;;  %v767_v42 = vstv %s8027_s15  ;;  %v773_v44 = vstv %s8041_s11  ;;  %v445_v53 = vstv %s8043_s6  ;;  %s8170_s11 = sld [smem:[#allocation3 + $0x2d]]  ;;  %v13110_v45 = vstv %s8085_s28 }
  0xae   :  { %v155_v10 = vsel %vm153_vm10, %v149_v63, %v151_v52  ;;  %v152_v13 = vsel %vm61_vm3, %v150_v4, %v151_v52  ;;  %v749_v63 = vstv %s8011_s7  ;;  %s8174_s15 = sld [smem:[#allocation3 + $0x13]]  ;;  %s8177_s7 = sld [smem:[#allocation3 + $0x2e]]  ;;  %v13108_v1 = vstv %s8093_s18 }
  0xaf   :  { %160 = vst.msk [vmem:[#allocation2 + $0x5c] sm:$0xf] %vm7587_vm2, %v155_v10  ;;  %v8130_v22 = vsel %vm153_vm10, %v147_v3, %v152_v13  ;;  %v164_v33 = vpop.permute.xlu1 %163  ;;  %v162_v36 = vpop.permute.xlu0 %161  ;;  %v755_v3 = vstv %s8013_s9  ;;  %s8158_s9 = sld [smem:[#allocation3 + $0x2c]]  ;;  %v453_v10 = vstv %s8053_s14  ;;  %v461_v13 = vstv %s8055_s16  ;;  %s13262_s6 = sld [smem:[#allocation53_spill]] }
  0xb0   :  { %159 = vst [vmem:[#allocation2 + $0x54] sm:$0xff] %v8130_v22  ;;  %v166_v57 = vrot.slane %v164_v33, 2  ;;  %v165_v62 = vrot.slane %v162_v36, 2  ;;  %s8181_s16 = sld [smem:[#allocation3 + $0x14]]  ;;  %vm318_vm7 = vcmask 334848   ;;  %vm333_vm8 = vcmask 326656  }
  0xb1   :  { %vm348_vm9 = vcmask 130048   ;;  %s13255_s18 = sld [smem:[#allocation52_spill]]  ;;  %vm363_vm10 = vcmask 121856  }
  0xb2   :  { %13239 = sst [smem:[#allocation54_spill]] %s8151_s8  ;;  %v170_v52 = vsel %vm168_vm11, %v164_v33, %v166_v57  ;;  %v167_v4 = vsel %vm61_vm3, %v165_v62, %v166_v57  ;;  %v779_v33 = vstv %s8073_s17  ;;  %v13113_v57 = vstv %s8065_s12  ;;  %s8184_s17 = sld [smem:[#allocation3 + $0x2f]] }
  0xb3   :  { %175 = vst.msk [vmem:[#allocation2 + $0x68] sm:$0xf] %vm7587_vm2, %v170_v52  ;;  %v8167_v48 = vsel %vm168_vm11, %v162_v36, %v167_v4  ;;  %v179_v59 = vpop.permute.xlu1 %178  ;;  %v177_v25 = vpop.permute.xlu0 %176  ;;  %v13112_v62 = vstv %s8067_s10  ;;  %v13111_v4 = vstv %s8083_s30  ;;  %s8189_s10 = sld [smem:[#allocation3 + $0x15]]  ;;  %s8231_s8 = sld [smem:[#allocation3 + $0x18]]  ;;  %vm378_vm11 = vcmask 113664  }
  0xb4   :  { %174 = vst [vmem:[#allocation2 + $0x60] sm:$0xff] %v8167_v48  ;;  %v181_v36 = vrot.slane %v179_v59, 2  ;;  %v180_v52 = vrot.slane %v177_v25, 2  ;;  %s13270_s14 = sld [smem:[#allocation54_spill]] }
  0xb6   :  { %v185_v23 = vsel %vm183_vm12, %v179_v59, %v181_v36  ;;  %v182_v35 = vsel %vm61_vm3, %v180_v52, %v181_v36  ;;  %v715_v36 = vmul.f32 %v713_v54, %v7986_v39  ;;  %v446_v59 = vmul.f32 %v445_v53, %v7955_v26 }
  0xb7   :  { %190 = vst.msk [vmem:[#allocation2 + $0x74] sm:$0xf] %vm7587_vm2, %v185_v23  ;;  %v8198_v17 = vsel %vm183_vm12, %v177_v25, %v182_v35  ;;  %v194_v12 = vpop.permute.xlu1 %193  ;;  %v192_v16 = vpop.permute.xlu0 %191  ;;  %v714_v35 = vmul.f32 %v713_v54, %v7924_v8  ;;  %v8261_v25 = vld [vmem:[#allocation2 + $0x20] sm:$0xf]  ;;  %vm393_vm12 = vcmask 105472  }
  0xb8   :  { %189 = vst [vmem:[#allocation2 + $0x6c] sm:$0xff] %v8198_v17  ;;  %v196_v23 = vrot.slane %v194_v12, 2  ;;  %v195_v52 = vrot.slane %v192_v16, 2  ;;  %v13286_v15 = vstv %s8184_s17 }
  0xb9   :  { %v13296_v2 = vstv %s8231_s8 }
  0xba   :  { %v200_v50 = vsel %vm198_vm13, %v194_v12, %v196_v23  ;;  %v197_v51 = vsel %vm61_vm3, %v195_v52, %v196_v23 }
  0xbb   :  { %205 = vst.msk [vmem:[#allocation2 + $0x80] sm:$0xf] %vm7587_vm2, %v200_v50  ;;  %v8227_v61 = vsel %vm198_vm13, %v192_v16, %v197_v51  ;;  %v209_v60 = vpop.permute.xlu1 %208  ;;  %v207_v38 = vpop.permute.xlu0 %206  ;;  %v716_v50 = vadd.f32 %v714_v35, %v8132_v37  ;;  %v430_v16 = vmul.f32 %v429_v49, %v7924_v8  ;;  %v720_v35 = vmul.f32 %v719_v7, %v7911_v5 }
  0xbc   :  { %204 = vst [vmem:[#allocation2 + $0x78] sm:$0xff] %v8227_v61  ;;  %v211_v23 = vrot.slane %v209_v60, 2  ;;  %v210_v52 = vrot.slane %v207_v38, 2  ;;  %v717_v51 = vadd.f32 %v715_v36, %v8134_v41  ;;  %v438_v41 = vmul.f32 %v437_v46, %v7911_v5 }
  0xbd   :  { %v732_v5 = vmul.f32 %v731_v21, %v8071_v32  ;;  %vm408_vm13 = vcmask 97280  }
  0xbe   :  { %v215_v11 = vsel %vm213_vm14, %v209_v60, %v211_v23  ;;  %v212_v12 = vsel %vm61_vm3, %v210_v52, %v211_v23  ;;  %v949_v52 = vlaneseq }
  0xbf   :  { %220 = vst.msk [vmem:[#allocation2 + $0x8c] sm:$0xf] %vm7587_vm2, %v215_v11  ;;  %v8252_v37 = vsel %vm213_vm14, %v207_v38, %v212_v12  ;;  %v224_v8 = vpop.permute.xlu1 %223  ;;  %v222_v60 = vpop.permute.xlu0 %221  ;;  %v722_v38 = vadd.f32 %v720_v35, %v716_v50  ;;  %v726_v11 = vmul.f32 %v725_v9, %v7955_v26  ;;  %v432_v12 = vadd.f32 %v430_v16, %v8081_v56 }
  0xc0   :  { %219 = vst [vmem:[#allocation2 + $0x84] sm:$0xff] %v8252_v37  ;;  %v226_v6 = vrot.slane %v224_v8, 2  ;;  %v225_v54 = vrot.slane %v222_v60, 2  ;;  %v431_v35 = vmul.f32 %v429_v49, %v7986_v39 }
  0xc2   :  { %v230_v23 = vsel %vm228_vm15, %v224_v8, %v226_v6  ;;  %v227_v43 = vsel %vm61_vm3, %v225_v54, %v226_v6  ;;  %v8279_v8 = vshrl.u32 %v949_v52, 7  ;;  %v8292_v6 = vld [vmem:[#allocation2 + $0x38] sm:$0xf]  ;;  %v728_v52 = vadd.f32 %v726_v11, %v722_v38  ;;  %v8310_v11 = vld [vmem:[#allocation2 + $0x44] sm:$0xf] }
  0xc3   :  { %235 = vst.msk [vmem:[#allocation2 + $0x98] sm:$0xf] %vm7587_vm2, %v230_v23  ;;  %v8277_v50 = vsel %vm228_vm15, %v222_v60, %v227_v43  ;;  %v239_v56 = vpop.permute.xlu1 %238  ;;  %v237_v16 = vpop.permute.xlu0 %236  ;;  %v721_v60 = vmul.f32 %v719_v7, %v8261_v25  ;;  %v440_v54 = vadd.f32 %v438_v41, %v432_v12  ;;  %v727_v7 = vmul.f32 %v725_v9, %v8272_v0 }
  0xc4   :  { %234 = vst [vmem:[#allocation2 + $0x90] sm:$0xff] %v8277_v50  ;;  %v241_v23 = vrot.slane %v239_v56, 2  ;;  %v240_v43 = vrot.slane %v237_v16, 2  ;;  %v8308_v38 = vmul.f32 %v437_v46, %v8261_v25  ;;  %v738_v9 = vmul.f32 %v737_v27, %v8098_v47 }
  0xc5   :  { %v723_v36 = vadd.f32 %v721_v60, %v717_v51  ;;  %v454_v46 = vmul.f32 %v453_v10, %v8071_v32  ;;  %v8324_v51 = vadd.f32 %v431_v35, %v7891_v58  ;;  %v744_v60 = vmul.f32 %v743_v28, %v8109_v40  ;;  %v8336_v32 = vld [vmem:[#allocation2 + $0x50] sm:$0xf] }
  0xc6   :  { %v245_v49 = vsel %vm243_vm0, %v239_v56, %v241_v23  ;;  %v242_v39 = vsel %vm61_vm3, %v240_v43, %v241_v23  ;;  %v734_v43 = vadd.f32 %v732_v5, %v728_v52 }
  0xc7   :  { %250 = vst.msk [vmem:[#allocation2 + $0xa4] sm:$0xf] %vm7587_vm2, %v245_v49  ;;  %v8315_v26 = vsel %vm243_vm0, %v237_v16, %v242_v39  ;;  %v254_v12 = vpop.permute.xlu1 %253  ;;  %v252_v56 = vpop.permute.xlu0 %251  ;;  %v733_v16 = vmul.f32 %v731_v21, %v8292_v6  ;;  %v448_v49 = vadd.f32 %v446_v59, %v440_v54  ;;  %v462_v39 = vmul.f32 %v461_v13, %v8098_v47 }
  0xc8   :  { %249 = vst [vmem:[#allocation2 + $0x9c] sm:$0xff] %v8315_v26  ;;  %v256_v41 = vrot.slane %v254_v12, 2  ;;  %v255_v23 = vrot.slane %v252_v56, 2  ;;  %v729_v18 = vadd.f32 %v727_v7, %v723_v36  ;;  %v739_v21 = vmul.f32 %v737_v27, %v8310_v11  ;;  %v8351_v7 = vld [vmem:[#allocation2 + $0x5c] sm:$0xf] }
  0xc9   :  { %v740_v5 = vadd.f32 %v738_v9, %v734_v43  ;;  %v456_v54 = vadd.f32 %v454_v46, %v448_v49  ;;  %v470_v36 = vmul.f32 %v13113_v57, %v8109_v40  ;;  %v478_v40 = vmul.f32 %v13112_v62, %v8130_v22  ;;  %v8363_v43 = vld [vmem:[#allocation2 + $0x68] sm:$0xf] }
  0xca   :  { %v260_v58 = vsel %vm258_vm1, %v254_v12, %v256_v41  ;;  %v257_v35 = vsel %vm61_vm3, %v255_v23, %v256_v41  ;;  %v735_v41 = vadd.f32 %v733_v16, %v729_v18  ;;  %v745_v23 = vmul.f32 %v743_v28, %v8336_v32 }
  0xcb   :  { %265 = vst.msk [vmem:[#allocation2 + $0xb0] sm:$0xf] %vm7587_vm2, %v260_v58  ;;  %v8346_v59 = vsel %vm258_vm1, %v252_v56, %v257_v35  ;;  %v269_v47 = vpop.permute.xlu1 %268  ;;  %v267_v52 = vpop.permute.xlu0 %266  ;;  %v750_v56 = vmul.f32 %v749_v63, %v8130_v22  ;;  %v746_v9 = vadd.f32 %v744_v60, %v740_v5  ;;  %v464_v46 = vadd.f32 %v462_v39, %v456_v54 }
  0xcc   :  { %264 = vst [vmem:[#allocation2 + $0xa8] sm:$0xff] %v8346_v59  ;;  %v271_v27 = vrot.slane %v269_v47, 2  ;;  %v270_v12 = vrot.slane %v267_v52, 2  ;;  %v741_v16 = vadd.f32 %v739_v21, %v735_v41  ;;  %v756_v58 = vmul.f32 %v755_v3, %v8167_v48 }
  0xcd   :  { %v751_v39 = vmul.f32 %v749_v63, %v8351_v7  ;;  %v472_v35 = vadd.f32 %v470_v36, %v464_v46  ;;  %v486_v21 = vmul.f32 %v13111_v4, %v8167_v48  ;;  %v752_v54 = vadd.f32 %v750_v56, %v746_v9 }
  0xce   :  { %v275_v49 = vsel %vm273_vm4, %v269_v47, %v271_v27  ;;  %v272_v18 = vsel %vm61_vm3, %v270_v12, %v271_v27  ;;  %v8385_v27 = vld [vmem:[#allocation2 + $0x74] sm:$0xf]  ;;  %v747_v12 = vadd.f32 %v745_v23, %v741_v16  ;;  %v757_v63 = vmul.f32 %v755_v3, %v8363_v43 }
  0xcf   :  { %280 = vst.msk [vmem:[#allocation2 + $0xbc] sm:$0xf] %vm7587_vm2, %v275_v49  ;;  %v8373_v28 = vsel %vm273_vm4, %v267_v52, %v272_v18  ;;  %v284_v22 = vpop.permute.xlu1 %283  ;;  %v282_v60 = vpop.permute.xlu0 %281  ;;  %v762_v52 = vmul.f32 %v761_v55, %v8198_v17  ;;  %v480_v41 = vadd.f32 %v478_v40, %v472_v35  ;;  %v494_v36 = vmul.f32 %v13110_v45, %v8198_v17  ;;  %v8398_v49 = vld [vmem:[#allocation2 + $0x80] sm:$0xf] }
  0xd0   :  { %279 = vst [vmem:[#allocation2 + $0xb4] sm:$0xff] %v8373_v28  ;;  %v286_v47 = vrot.slane %v284_v22, 2  ;;  %v285_v5 = vrot.slane %v282_v60, 2  ;;  %v758_v56 = vadd.f32 %v756_v58, %v752_v54  ;;  %v768_v9 = vmul.f32 %v767_v42, %v8227_v61 }
  0xd1   :  { %v753_v40 = vadd.f32 %v751_v39, %v747_v12  ;;  %v488_v18 = vadd.f32 %v486_v21, %v480_v41  ;;  %v502_v16 = vmul.f32 %v13109_v24, %v8227_v61  ;;  %v763_v35 = vmul.f32 %v761_v55, %v8385_v27  ;;  %v8418_v21 = vld [vmem:[#allocation2 + $0x8c] sm:$0xf] }
  0xd2   :  { %v290_v48 = vsel %vm288_vm5, %v284_v22, %v286_v47  ;;  %v287_v46 = vsel %vm61_vm3, %v285_v5, %v286_v47  ;;  %v764_v47 = vadd.f32 %v762_v52, %v758_v56  ;;  %v774_v5 = vmul.f32 %v773_v44, %v8252_v37 }
  0xd3   :  { %295 = vst.msk [vmem:[#allocation2 + $0xc8] sm:$0xf] %vm7587_vm2, %v290_v48  ;;  %v8403_v3 = vsel %vm288_vm5, %v282_v60, %v287_v46  ;;  %v299_v17 = vpop.permute.xlu1 %298  ;;  %v297_v23 = vpop.permute.xlu0 %296  ;;  %v759_v60 = vadd.f32 %v757_v63, %v753_v40  ;;  %v496_v54 = vadd.f32 %v494_v36, %v488_v18  ;;  %v510_v39 = vmul.f32 %v13108_v1, %v8252_v37 }
  0xd4   :  { %294 = vst [vmem:[#allocation2 + $0xc0] sm:$0xff] %v8403_v3  ;;  %v301_v58 = vrot.slane %v299_v17, 2  ;;  %v300_v22 = vrot.slane %v297_v23, 2  ;;  %v769_v55 = vmul.f32 %v767_v42, %v8398_v49  ;;  %v770_v52 = vadd.f32 %v768_v9, %v764_v47 }
  0xd5   :  { %v780_v46 = vmul.f32 %v779_v33, %v8277_v50  ;;  %v504_v56 = vadd.f32 %v502_v16, %v496_v54  ;;  %v765_v18 = vadd.f32 %v763_v35, %v759_v60  ;;  %v13258_v16 = vstv %s13254_s3 }
  0xd6   :  { %v305_v12 = vsel %vm303_vm6, %v299_v17, %v301_v58  ;;  %v302_v41 = vsel %vm61_vm3, %v300_v22, %v301_v58  ;;  %v13256_v17 = vstv %s8105_s27  ;;  %v8442_v58 = vld [vmem:[#allocation2 + $0x98] sm:$0xf]  ;;  %v775_v22 = vmul.f32 %v773_v44, %v8418_v21 }
  0xd7   :  { %310 = vst.msk [vmem:[#allocation2 + $0xd4] sm:$0xf] %vm7587_vm2, %v305_v12  ;;  %v8428_v63 = vsel %vm303_vm6, %v297_v23, %v302_v41  ;;  %v314_v36 = vpop.permute.xlu1 %313  ;;  %v312_v48 = vpop.permute.xlu0 %311  ;;  %v518_v42 = vmul.f32 %v13256_v17, %v8277_v50  ;;  %v8440_v23 = vmul.f32 %v445_v53, %v8272_v0  ;;  %v776_v47 = vadd.f32 %v774_v5, %v770_v52  ;;  %v8455_v17 = vld [vmem:[#allocation2 + $0xa4] sm:$0xf] }
  0xd8   :  { %309 = vst [vmem:[#allocation2 + $0xcc] sm:$0xff] %v8428_v63  ;;  %v316_v9 = vrot.slane %v314_v36, 2  ;;  %v315_v40 = vrot.slane %v312_v48, 2  ;;  %v786_v54 = vmul.f32 %v13258_v16, %v8315_v26  ;;  %v512_v12 = vadd.f32 %v510_v39, %v504_v56 }
  0xd9   :  { %v771_v60 = vadd.f32 %v769_v55, %v765_v18  ;;  %v13259_v0 = vstv %s13255_s18  ;;  %v782_v52 = vadd.f32 %v780_v46, %v776_v47  ;;  %v13260_v55 = vstv %s13257_s23 }
  0xda   :  { %v320_v41 = vsel %vm318_vm7, %v314_v36, %v316_v9  ;;  %v317_v35 = vsel %vm61_vm3, %v315_v40, %v316_v9  ;;  %v526_v53 = vmul.f32 %v13259_v0, %v8315_v26  ;;  %v792_v36 = vmul.f32 %v13260_v55, %v8346_v59 }
  0xdb   :  { %325 = vst.msk [vmem:[#allocation2 + $0xe0] sm:$0xf] %vm7587_vm2, %v320_v41  ;;  %v8460_v44 = vsel %vm318_vm7, %v312_v48, %v317_v35  ;;  %v329_v5 = vpop.permute.xlu1 %328  ;;  %v327_v39 = vpop.permute.xlu0 %326  ;;  %v520_v56 = vadd.f32 %v518_v42, %v512_v12  ;;  %v781_v18 = vmul.f32 %v779_v33, %v8442_v58  ;;  %v13261_v16 = vstv %s8125_s24  ;;  %v8480_v12 = vld [vmem:[#allocation2 + $0xb0] sm:$0xf] }
  0xdc   :  { %324 = vst [vmem:[#allocation2 + $0xd8] sm:$0xff] %v8460_v44  ;;  %v331_v9 = vrot.slane %v329_v5, 2  ;;  %v330_v40 = vrot.slane %v327_v39, 2  ;;  %v534_v48 = vmul.f32 %v13261_v16, %v8346_v59  ;;  %v777_v41 = vadd.f32 %v775_v22, %v771_v60 }
  0xdd   :  { %v788_v35 = vadd.f32 %v786_v54, %v782_v52  ;;  %v13263_v46 = vstv %s8123_s26  ;;  %v8478_v42 = vmul.f32 %v453_v10, %v8292_v6  ;;  %v13264_v55 = vstv %s13254_s3  ;;  %s13309_s3 = sld [smem:[#allocation13_spill]] }
  0xde   :  { %v798_v47 = vmul.f32 %v13263_v46, %v8373_v28  ;;  %v335_v0 = vsel %vm333_vm8, %v329_v5, %v331_v9  ;;  %v332_v33 = vsel %vm61_vm3, %v330_v40, %v331_v9  ;;  %v787_v16 = vmul.f32 %v13264_v55, %v8455_v17 }
  0xdf   :  { %v528_v22 = vadd.f32 %v526_v53, %v520_v56  ;;  %340 = vst.msk [vmem:[#allocation2 + $0xec] sm:$0xf] %vm7587_vm2, %v335_v0  ;;  %v8490_v54 = vsel %vm333_vm8, %v327_v39, %v332_v33  ;;  %v344_v10 = vpop.permute.xlu1 %343  ;;  %v342_v6 = vpop.permute.xlu0 %341  ;;  %v794_v60 = vadd.f32 %v792_v36, %v788_v35  ;;  %v13265_v5 = vstv %s13262_s6  ;;  %v8499_v39 = vld [vmem:[#allocation2 + $0xbc] sm:$0xf] }
  0xe0   :  { %v804_v52 = vmul.f32 %v13265_v5, %v8403_v3  ;;  %v13266_v9 = vstv %s8139_s25  ;;  %339 = vst [vmem:[#allocation2 + $0xe4] sm:$0xff] %v8490_v54  ;;  %v346_v53 = vrot.slane %v344_v10, 2  ;;  %v345_v56 = vrot.slane %v342_v6, 2 }
  0xe1   :  { %v542_v40 = vmul.f32 %v13266_v9, %v8373_v28  ;;  %v783_v46 = vadd.f32 %v781_v18, %v777_v41  ;;  %v536_v0 = vadd.f32 %v534_v48, %v528_v22  ;;  %v13267_v33 = vstv %s13257_s23  ;;  %v8517_v41 = vld [vmem:[#allocation2 + $0xc8] sm:$0xf]  ;;  %s13310_s23 = sld [smem:[#allocation15_spill]] }
  0xe2   :  { %v793_v55 = vmul.f32 %v13267_v33, %v8480_v12  ;;  %v800_v36 = vadd.f32 %v798_v47, %v794_v60  ;;  %v13268_v35 = vstv %s8144_s0  ;;  %v13269_v5 = vstv %s8146_s4  ;;  %v8567_v57 = vld [vmem:[#allocation2 + $0xe0] sm:$0xf] }
  0xe3   :  { %v810_v1 = vmul.f32 %v13268_v35, %v8428_v63  ;;  %v550_v24 = vmul.f32 %v13269_v5, %v8403_v3  ;;  %v350_v9 = vsel %vm348_vm9, %v344_v10, %v346_v53  ;;  %v347_v45 = vsel %vm61_vm3, %v345_v56, %v346_v53  ;;  %v359_v22 = vpop.permute.xlu1 %358  ;;  %v357_v10 = vpop.permute.xlu0 %356 }
  0xe4   :  { %v789_v18 = vadd.f32 %v787_v16, %v783_v46  ;;  %v8515_v48 = vmul.f32 %v461_v13, %v8310_v11  ;;  %355 = vst.msk [vmem:[#allocation2 + $0xf8] sm:$0xf] %vm7587_vm2, %v350_v9  ;;  %v8522_v47 = vsel %vm348_vm9, %v342_v6, %v347_v45  ;;  %v806_v60 = vadd.f32 %v804_v52, %v800_v36 }
  0xe5   :  { %v544_v16 = vadd.f32 %v542_v40, %v536_v0  ;;  %v13271_v53 = vstv %s8154_s21  ;;  %354 = vst [vmem:[#allocation2 + $0xf0] sm:$0xff] %v8522_v47  ;;  %v361_v11 = vrot.slane %v359_v22, 2  ;;  %v360_v56 = vrot.slane %v357_v10, 2  ;;  %v8537_v0 = vld [vmem:[#allocation2 + $0xd4] sm:$0xf] }
  0xe6   :  { %v558_v13 = vmul.f32 %v13271_v53, %v8428_v63  ;;  %v13272_v46 = vstv %s8123_s26  ;;  %v13273_v45 = vstv %s13270_s14  ;;  %v795_v35 = vadd.f32 %v793_v55, %v789_v18  ;;  %s13285_s26 = sld [smem:[#allocation56_spill]] }
  0xe7   :  { %v799_v33 = vmul.f32 %v13272_v46, %v8499_v39  ;;  %v816_v6 = vmul.f32 %v13273_v45, %v8460_v44  ;;  %v812_v5 = vadd.f32 %v810_v1, %v806_v60  ;;  %v552_v9 = vadd.f32 %v550_v24, %v544_v16  ;;  %v374_v1 = vpop.permute.xlu1 %373  ;;  %v372_v55 = vpop.permute.xlu0 %371 }
  0xe8   :  { %v13274_v52 = vstv %s8162_s13  ;;  %v365_v36 = vsel %vm363_vm10, %v359_v22, %v361_v11  ;;  %v362_v53 = vsel %vm61_vm3, %v360_v56, %v361_v11  ;;  %v13275_v4 = vstv %s13262_s6  ;;  %s9088_s6 = sld [smem:[#allocation3 + $0x49]] }
  0xe9   :  { %v566_v40 = vmul.f32 %v13274_v52, %v8460_v44  ;;  %v805_v46 = vmul.f32 %v13275_v4, %v8517_v41  ;;  %v13276_v62 = vstv %s8158_s9  ;;  %370 = vst.msk [vmem:[#allocation2 + $0x104] sm:$0xf] %vm7587_vm2, %v365_v36  ;;  %v8550_v24 = vsel %vm363_vm10, %v357_v10, %v362_v53 }
  0xea   :  { %v822_v45 = vmul.f32 %v13276_v62, %v8490_v54  ;;  %v560_v18 = vadd.f32 %v558_v13, %v552_v9  ;;  %v13277_v22 = vstv %s8174_s15  ;;  %v441_v4 = vadd.f32 %v8308_v38, %v8324_v51  ;;  %369 = vst [vmem:[#allocation2 + $0xfc] sm:$0xff] %v8550_v24 }
  0xeb   :  { %v574_v60 = vmul.f32 %v13277_v22, %v8490_v54  ;;  %v376_v62 = vrot.slane %v374_v1, 2  ;;  %v375_v16 = vrot.slane %v372_v55, 2  ;;  %v801_v11 = vadd.f32 %v799_v33, %v795_v35 }
  0xec   :  { %v818_v56 = vadd.f32 %v816_v6, %v812_v5  ;;  %v13278_v10 = vstv %s8144_s0  ;;  %v13279_v36 = vstv %s8170_s11  ;;  %v568_v9 = vadd.f32 %v566_v40, %v560_v18  ;;  %v389_v5 = vpop.permute.xlu1 %388  ;;  %v387_v40 = vpop.permute.xlu0 %386  ;;  %s13292_s0 = sld [smem:[#allocation55_spill]] }
  0xed   :  { %v811_v52 = vmul.f32 %v13278_v10, %v8537_v0  ;;  %v828_v13 = vmul.f32 %v13279_v36, %v8522_v47  ;;  %v13280_v53 = vstv %s8181_s16  ;;  %v380_v38 = vsel %vm378_vm11, %v374_v1, %v376_v62 }
  0xee   :  { %v582_v22 = vmul.f32 %v13280_v53, %v8522_v47  ;;  %v377_v51 = vsel %vm61_vm3, %v375_v16, %v376_v62  ;;  %v807_v33 = vadd.f32 %v805_v46, %v801_v11  ;;  %v824_v6 = vadd.f32 %v822_v45, %v818_v56  ;;  %385 = vst.msk [vmem:[#allocation2 + $0x110] sm:$0xf] %vm7587_vm2, %v380_v38  ;;  %v8582_v46 = vld [vmem:[#allocation2 + $0xec] sm:$0xf] }
  0xef   :  { %v8574_v35 = vsel %vm378_vm11, %v372_v55, %v377_v51  ;;  %v13281_v18 = vstv %s8177_s7  ;;  %v576_v36 = vadd.f32 %v574_v60, %v568_v9  ;;  %v13282_v1 = vstv %s8189_s10 }
  0xf0   :  { %v834_v10 = vmul.f32 %v13281_v18, %v8550_v24  ;;  %v590_v62 = vmul.f32 %v13282_v1, %v8550_v24  ;;  %384 = vst [vmem:[#allocation2 + $0x108] sm:$0xff] %v8574_v35  ;;  %v391_v45 = vrot.slane %v389_v5, 2  ;;  %v390_v16 = vrot.slane %v387_v40, 2  ;;  %v8592_v18 = vld [vmem:[#allocation2 + $0xf8] sm:$0xf] }
  0xf1   :  { %v13283_v55 = vstv %s8065_s12  ;;  %v449_v56 = vadd.f32 %v8440_v23, %v441_v4  ;;  %v813_v53 = vadd.f32 %v811_v52, %v807_v33  ;;  %v13284_v38 = vstv %s13270_s14  ;;  %v404_v52 = vpop.permute.xlu1 %403  ;;  %s8818_s12 = sld [smem:[#allocation3 + $0x3b]]  ;;  %s9036_s14 = sld [smem:[#allocation3 + $0x46]] }
  0xf2   :  { %v471_v11 = vmul.f32 %v13283_v55, %v8336_v32  ;;  %v817_v60 = vmul.f32 %v13284_v38, %v8567_v57  ;;  %v830_v9 = vadd.f32 %v828_v13, %v824_v6  ;;  %v584_v51 = vadd.f32 %v582_v22, %v576_v36  ;;  %v402_v13 = vpop.permute.xlu0 %401 }
  0xf3   :  { %v395_v1 = vsel %vm393_vm12, %v389_v5, %v391_v45  ;;  %v392_v31 = vsel %vm61_vm3, %v390_v16, %v391_v45  ;;  %v840_v30 = vmul.f32 %v13286_v15, %v8574_v35  ;;  %v13287_v32 = vstv %s8210_s1  ;;  %v8611_v45 = vld [vmem:[#allocation2 + $0x104] sm:$0xf] }
  0xf4   :  { %v598_v23 = vmul.f32 %v13287_v32, %v8574_v35  ;;  %400 = vst.msk [vmem:[#allocation2 + $0x11c] sm:$0xf] %vm7587_vm2, %v395_v1  ;;  %v8605_v4 = vsel %vm393_vm12, %v387_v40, %v392_v31  ;;  %v13288_v22 = vstv %s8158_s9  ;;  %v836_v6 = vadd.f32 %v834_v10, %v830_v9  ;;  %s13303_s9 = sld [smem:[#allocation49_spill]] }
  0xf5   :  { %v823_v33 = vmul.f32 %v13288_v22, %v8582_v46  ;;  %v592_v5 = vadd.f32 %v590_v62, %v584_v51  ;;  %399 = vst [vmem:[#allocation2 + $0x114] sm:$0xff] %v8605_v4  ;;  %v406_v15 = vrot.slane %v404_v52, 2  ;;  %v405_v36 = vrot.slane %v402_v13, 2 }
  0xf6   :  { %v13289_v16 = vstv %s8202_s29  ;;  %v13290_v31 = vstv %s13285_s26  ;;  %v819_v38 = vadd.f32 %v817_v60, %v813_v53  ;;  %v13291_v1 = vstv %s8170_s11  ;;  %s8762_s11 = sld [smem:[#allocation3 + $0x38]] }
  0xf7   :  { %v846_v55 = vmul.f32 %v13289_v16, %v8605_v4  ;;  %v606_v40 = vmul.f32 %v13290_v31, %v8605_v4  ;;  %v829_v32 = vmul.f32 %v13291_v1, %v8592_v18  ;;  %v13293_v10 = vstv %s13248_s2  ;;  %v8628_v16 = vld [vmem:[#allocation2 + $0x110] sm:$0xf]  ;;  %s9331_s2 = sld [smem:[#allocation3 + $0x56]] }
  0xf8   :  { %v479_v62 = vmul.f32 %v13293_v10, %v8351_v7  ;;  %v457_v9 = vadd.f32 %v8478_v42, %v449_v56  ;;  %v410_v51 = vsel %vm408_vm13, %v404_v52, %v406_v15  ;;  %v407_v22 = vsel %vm61_vm3, %v405_v36, %v406_v15 }
  0xf9   :  { %v842_v31 = vadd.f32 %v840_v30, %v836_v6  ;;  %v600_v53 = vadd.f32 %v598_v23, %v592_v5  ;;  %415 = vst.msk [vmem:[#allocation2 + $0x128] sm:$0xf] %vm7587_vm2, %v410_v51  ;;  %v8633_v60 = vsel %vm408_vm13, %v402_v13, %v407_v22  ;;  %v825_v7 = vadd.f32 %v823_v33, %v819_v38 }
  0xfa   :  { %v13294_v1 = vstv %s8177_s7  ;;  %v465_v56 = vadd.f32 %v8515_v48, %v457_v9  ;;  %414 = vst [vmem:[#allocation2 + $0x120] sm:$0xff] %v8633_v60  ;;  %v13295_v30 = vstv %s13292_s0  ;;  %v614_v5 = vmul.f32 %v13296_v2, %v8633_v60  ;;  %s13301_s7 = sld [smem:[#allocation14_spill]] }
  0xfb   :  { %v835_v42 = vmul.f32 %v13294_v1, %v8611_v45  ;;  %v848_v52 = vadd.f32 %v846_v55, %v842_v31  ;;  %v852_v23 = vmul.f32 %v13295_v30, %v8633_v60  ;;  %v608_v6 = vadd.f32 %v606_v40, %v600_v53  ;;  %v8652_v10 = vld [vmem:[#allocation2 + $0x11c] sm:$0xf] }
  0xfc   :  { %v831_v13 = vadd.f32 %v829_v32, %v825_v7  ;;  %v13297_v33 = vstv %s8184_s17  ;;  %v13298_v36 = vstv %s8083_s30  ;;  %v473_v48 = vadd.f32 %v471_v11, %v465_v56  ;;  %s8667_s30 = sld [smem:[#allocation3 + $0x34]]  ;;  %s13304_s17 = sld [smem:[#allocation60_spill]] }
  0xfd   :  { %v841_v15 = vmul.f32 %v13297_v33, %v8628_v16  ;;  %v487_v38 = vmul.f32 %v13298_v36, %v8363_v43  ;;  %v854_v9 = vadd.f32 %v852_v23, %v848_v52  ;;  %v13299_v55 = vunpack.c.0.s8 %v8247_v34 }
  0xfe   :  { %v616_v40 = vadd.f32 %v614_v5, %v608_v6  ;;  %v837_v22 = vadd.f32 %v835_v42, %v831_v13  ;;  %v13300_v32 = vstv %s8202_s29  ;;  %v13302_v53 = vstv %s8085_s28  ;;  %v8681_v6 = vld [vmem:[#allocation2] sm:$0xff]  ;;  %s8686_s28 = sld [smem:[#allocation3 + $0x35]]  ;;  %s8720_s29 = sld [smem:[#allocation3 + $0x36]] }
  0xff   :  { %v8657_v51 = vsub.s32 %v13299_v55, %v8279_v8  ;;  %v847_v31 = vmul.f32 %v13300_v32, %v8652_v10  ;;  %v495_v7 = vmul.f32 %v13302_v53, %v8385_v27  ;;  %v481_v43 = vadd.f32 %v479_v62, %v473_v48 }
 0x100   :  { %v856_v11 = vmax.f32 %v854_v9, 0.0  ;;  %v8665_v1 = vmax.f32 %v616_v40, 0.0  ;;  %v843_v34 = vadd.f32 %v841_v15, %v837_v22  ;;  %v13305_v56 = vstv %s8091_s22  ;;  %v8678_v52 = vld [vmem:[#allocation2 + $0x128] sm:$0xf]  ;;  %s8776_s22 = sld [smem:[#allocation3 + $0x39]] }
 0x101   :  { %v503_v27 = vmul.f32 %v13305_v56, %v8398_v49  ;;  %v489_v62 = vadd.f32 %v487_v38, %v481_v43  ;;  %v13306_v2 = vstv %s13301_s7  ;;  %v13307_v33 = vstv %s13292_s0  ;;  %s8801_s0 = sld [smem:[#allocation3 + $0x3a]]  ;;  %s9002_s7 = sld [smem:[#allocation3 + $0x44]] }
 0x102   :  { %v4972_v8 = vld [vmem:[%s13304_s17 + $0x4a0] sm:$0xff]  ;;  %v4973_v42 = vld [vmem:[%s13304_s17 + $0x4a8] sm:$0xff]  ;;  %v952_v30 = vrot.slane %v856_v11, %v8657_v51  ;;  %v945_v23 = vcombine.high %v856_v11, %v856_v11  ;;  %v1436_v5 = vmul.f32 %v8681_v6, %v13306_v2  ;;  %v849_v13 = vadd.f32 %v847_v31, %v843_v34  ;;  %v638_v31 = vld [vmem:[%s13304_s17 + $0x90] sm:$0xff] }
 0x103   :  { %v853_v15 = vmul.f32 %v13307_v33, %v8678_v52  ;;  %v620_v49 = vld [vmem:[%s13304_s17] sm:$0xff]  ;;  %v621_v36 = vld [vmem:[%s13304_s17 + $0x8] sm:$0xff]  ;;  %v13308_v38 = vstv %s13303_s9  ;;  %v497_v9 = vadd.f32 %v495_v7, %v489_v62  ;;  %v6467_v40 = vpack.c.bf16 %v4973_v42, %v4972_v8  ;;  %v4974_v11 = vld [vmem:[%s13304_s17 + $0x4b0] sm:$0xff]  ;;  %s9659_s9 = sld [smem:[#allocation3 + $0x63]] }
 0x104   :  { %v511_v48 = vmul.f32 %v13308_v38, %v8418_v21  ;;  %v960_v55 = vcombine.high %v952_v30, %v952_v30  ;;  %v959_v22 = vrot.slane %v945_v23, %v8657_v51  ;;  %v8703_v32 = vrot.slane %v8665_v1, %v8657_v51  ;;  %v639_v21 = vld [vmem:[%s13304_s17 + $0x98] sm:$0xff]  ;;  %v8724_v2 = vld [vmem:[#allocation2 + $0xc] sm:$0xff] }
 0x105   :  { %v855_v53 = vadd.f32 %v853_v15, %v849_v13  ;;  %v13311_v7 = vstv %s8105_s27  ;;  %v4975_v34 = vld [vmem:[%s13304_s17 + $0x4b8] sm:$0xff]  ;;  %v505_v8 = vadd.f32 %v503_v27, %v497_v9  ;;  %v6498_v56 = vpack.c.bf16 %v621_v36, %v620_v49  ;;  %v622_v9 = vld [vmem:[%s13304_s17 + $0x10] sm:$0xff]  ;;  %s9014_s27 = sld [smem:[#allocation3 + $0x45]] }
 0x106   :  { %v519_v43 = vmul.f32 %v13311_v7, %v8442_v58  ;;  %1042 = vmatprep.mubr.f32.mxu0 %v960_v55  ;;  %v961_v42 = vcombine.high %v959_v22, %v959_v22  ;;  %v13312_v62 = vstv %s13309_s3  ;;  %v13313_v13 = vstv %s13310_s23  ;;  %v641_v55 = vld [vmem:[%s13304_s17 + $0xa8] sm:$0xff]  ;;  %v4976_v7 = vld [vmem:[%s13304_s17 + $0x4c0] sm:$0xff]  ;;  %s8842_s23 = sld [smem:[#allocation3 + $0x3c]]  ;;  %s9835_s3 = sld [smem:[#allocation3 + $0x68]] }
 0x107   :  { %v1438_v23 = vadd.f32 %v1436_v5, %v13312_v62  ;;  %v1442_v58 = vmul.f32 %v8724_v2, %v13313_v13  ;;  %v857_v33 = vmax.f32 %v855_v53, 0.0  ;;  %1043 = vmatmul.mubr.f32.vlgmr.msra.gmra.mrb[0].mxu0 %v952_v30  ;;  %v13314_v15 = vstv %s13255_s18  ;;  %v623_v5 = vld [vmem:[%s13304_s17 + $0x18] sm:$0xff]  ;;  %s13328_s18 = sld [smem:[#allocation16_spill]]  ;;  %v5074_v29 = vld [vmem:[%s13304_s17 + $0x6f0] sm:$0xff] }
 0x108   :  { %v527_v38 = vmul.f32 %v13314_v15, %v8455_v17  ;;  %v6500_v27 = vpack.c.bf16 %v639_v21, %v638_v31  ;;  %v513_v49 = vadd.f32 %v511_v48, %v505_v8  ;;  %6468 = vmatpush1.bf16.msra.mxu0 %v6467_v40  ;;  %1112 = vmatprep.mubr.f32.mxu1 %v961_v42  ;;  %v640_v17 = vld [vmem:[%s13304_s17 + $0xa0] sm:$0xff]  ;;  %v1447_v31 = vstv %s8667_s30  ;;  %v643_v15 = vld [vmem:[%s13304_s17 + $0xb8] sm:$0xff]  ;;  %s9048_s30 = sld [smem:[#allocation3 + $0x47]] }
 0x109   :  { %v1205_v30 = vcombine.high %v8703_v32, %v8703_v32  ;;  %v6470_v36 = vpack.c.bf16 %v4975_v34, %v4974_v11  ;;  %v8750_v48 = vrot.slane %v857_v33, %v8657_v51  ;;  %1113 = vmatmul.mubr.f32.vlgmr.msra.gmra.mrb[0].mxu1 %v959_v22  ;;  %v13315_v40 = vmov 0.0|0.0   ;;  %v4977_v11 = vld [vmem:[%s13304_s17 + $0x4c8] sm:$0xff] }
 0x10a   :  { %6469 = vmatprep.subr.bf16.mxu0 %v13315_v40  ;;  %v13316_v21 = vstv %s8125_s24  ;;  %v521_v34 = vadd.f32 %v519_v43, %v513_v49  ;;  %vm975_vm2 = vcmask 261120   ;;  %6499 = vmatpush3.bf16.msra.mxu1 %v6498_v56  ;;  %v6502_v22 = vpack.c.bf16 %v623_v5, %v622_v9  ;;  %v624_v43 = vld [vmem:[%s13304_s17 + $0x20] sm:$0xff]  ;;  %v625_v56 = vld [vmem:[%s13304_s17 + $0x28] sm:$0xff]  ;;  %v4978_v49 = vld [vmem:[%s13304_s17 + $0x4d0] sm:$0xff]  ;;  %s9070_s24 = sld [smem:[#allocation3 + $0x48]] }
 0x10b   :  { %v535_v53 = vmul.f32 %v13316_v21, %v8480_v12  ;;  %1286 = vmatprep.mubr.f32.mxu1 %v1205_v30  ;;  %v1444_v8 = vadd.f32 %v1442_v58, %v1438_v23  ;;  %v1453_v42 = vstv %s8686_s28  ;;  %v969_v12 = vcombine.high %v8750_v48, %v8750_v48  ;;  %6501 = vmatprep.subr.bf16.mxu1 %v6500_v27  ;;  %v8784_v27 = vld [vmem:[#allocation2 + $0x18] sm:$0xff]  ;;  %13327 = sst [smem:[#allocation12_spill]] %s9014_s27  ;;  %s9425_s28 = sld [smem:[#allocation3 + $0x5a]] }
 0x10c   :  { %v13317_v62 = vstv %s8139_s25  ;;  %v6504_v33 = vpack.c.bf16 %v641_v55, %v640_v17  ;;  %v529_v23 = vadd.f32 %v527_v38, %v521_v34  ;;  %6471 = vmatpush1.bf16.msra.mxu0 %v6470_v36  ;;  %v6473_v58 = vpack.c.bf16 %v4977_v11, %v4976_v7  ;;  %v4979_v30 = vld [vmem:[%s13304_s17 + $0x4d8] sm:$0xff]  ;;  %s8883_s25 = sld [smem:[#allocation3 + $0x3e]] }
 0x10d   :  { %v543_v13 = vmul.f32 %v13317_v62, %v8499_v39  ;;  %v642_v39 = vld [vmem:[%s13304_s17 + $0xb0] sm:$0xff]  ;;  %v1448_v9 = vmul.f32 %v8784_v27, %v1447_v31  ;;  %4992 = vmatprep.mubr.msk.f32.mxu0 %vm975_vm2, %v969_v12  ;;  %v13318_v38 = vstv %s8146_s4  ;;  %6472 = vmatprep.subr.bf16.mxu0 %v13315_v40  ;;  %v13114_v17 = vstv %s8720_s29  ;;  %s8900_s4 = sld [smem:[#allocation3 + $0x3f]] }
 0x10e   :  { %v551_v5 = vmul.f32 %v13318_v38, %v8517_v41  ;;  %v537_v36 = vadd.f32 %v535_v53, %v529_v23  ;;  %6503 = vmatpush3.bf16.msra.mxu1 %v6502_v22  ;;  %v6506_v55 = vpack.c.bf16 %v625_v56, %v624_v43  ;;  %v8803_v41 = vld [vmem:[#allocation2 + $0x24] sm:$0xff]  ;;  %v13319_v11 = vstv %s8154_s21  ;;  %v626_v53 = vld [vmem:[%s13304_s17 + $0x30] sm:$0xff]  ;;  %v627_v22 = vld [vmem:[%s13304_s17 + $0x38] sm:$0xff]  ;;  %s13330_s21 = sld [smem:[#allocation17_spill]] }
 0x10f   :  { %v1450_v21 = vadd.f32 %v1448_v9, %v1444_v8  ;;  %v1454_v7 = vmul.f32 %v8803_v41, %v1453_v42  ;;  %v559_v34 = vmul.f32 %v13319_v11, %v8537_v0  ;;  %6505 = vmatprep.subr.bf16.mxu1 %v6504_v33  ;;  %v6508_v12 = vpack.c.bf16 %v643_v15, %v642_v39  ;;  %v644_v0 = vld [vmem:[%s13304_s17 + $0xc0] sm:$0xff]  ;;  %v645_v33 = vld [vmem:[%s13304_s17 + $0xc8] sm:$0xff]  ;;  %v8826_v56 = vld [vmem:[#allocation2 + $0x30] sm:$0xff] }
 0x110   :  { %v545_v8 = vadd.f32 %v543_v13, %v537_v36  ;;  %v1465_v62 = vstv %s8738_s19  ;;  %6474 = vmatpush1.bf16.msra.mxu0 %v6473_v58  ;;  %v6476_v43 = vpack.c.bf16 %v4979_v30, %v4978_v49  ;;  %v1460_v13 = vmul.f32 %v8826_v56, %v13114_v17  ;;  %v4980_v58 = vld [vmem:[%s13304_s17 + $0x4e0] sm:$0xff]  ;;  %v4981_v15 = vld [vmem:[%s13304_s17 + $0x4e8] sm:$0xff]  ;;  %s9180_s19 = sld [smem:[#allocation3 + $0x4f]] }
 0x111   :  { %v13320_v23 = vstv %s8162_s13  ;;  %6475 = vmatprep.subr.bf16.mxu0 %v13315_v40  ;;  %v13115_v38 = vstv %s8762_s11  ;;  %v6510_v49 = vpack.c.bf16 %v627_v22, %v626_v53  ;;  %v1456_v30 = vadd.f32 %v1454_v7, %v1450_v21  ;;  %v8844_v36 = vld [vmem:[#allocation2 + $0x3c] sm:$0xff]  ;;  %v4982_v21 = vld [vmem:[%s13304_s17 + $0x4f0] sm:$0xff]  ;;  %s8947_s13 = sld [smem:[#allocation3 + $0x41]] }
 0x112   :  { %v567_v39 = vmul.f32 %v13320_v23, %v8567_v57  ;;  %v553_v9 = vadd.f32 %v551_v5, %v545_v8  ;;  %6507 = vmatpush3.bf16.msra.mxu1 %v6506_v55  ;;  %v1466_v57 = vmul.f32 %v8844_v36, %v1465_v62  ;;  %v13321_v11 = vstv %s8174_s15  ;;  %v628_v5 = vld [vmem:[%s13304_s17 + $0x40] sm:$0xff]  ;;  %v629_v55 = vld [vmem:[%s13304_s17 + $0x48] sm:$0xff]  ;;  %s8862_s15 = sld [smem:[#allocation3 + $0x3d]]  ;;  %v646_v22 = vld [vmem:[%s13304_s17 + $0xd0] sm:$0xff] }
 0x113   :  { %v575_v23 = vmul.f32 %v13321_v11, %v8582_v46  ;;  %6509 = vmatprep.subr.bf16.mxu1 %v6508_v12  ;;  %v6512_v17 = vpack.c.bf16 %v645_v33, %v644_v0  ;;  %v13116_v53 = vstv %s8776_s22  ;;  %v6479_v46 = vpack.c.bf16 %v4981_v15, %v4980_v58  ;;  %v4983_v12 = vld [vmem:[%s13304_s17 + $0x4f8] sm:$0xff] }
 0x114   :  { %v561_v7 = vadd.f32 %v559_v34, %v553_v9  ;;  %6477 = vmatpush1.bf16.msra.mxu0 %v6476_v43  ;;  %v647_v8 = vld [vmem:[%s13304_s17 + $0xd8] sm:$0xff]  ;;  %v1462_v0 = vadd.f32 %v1460_v13, %v1456_v30  ;;  %v8873_v34 = vld [vmem:[#allocation2 + $0x48] sm:$0xff]  ;;  %v13322_v33 = vstv %s8181_s16  ;;  %v13118_v9 = vstv %s8801_s0  ;;  %v630_v13 = vld [vmem:[%s13304_s17 + $0x50] sm:$0xff]  ;;  %s10060_s16 = sld [smem:[#allocation3 + $0x73]] }
 0x115   :  { %v1472_v43 = vmul.f32 %v8873_v34, %v13115_v38  ;;  %v583_v58 = vmul.f32 %v13322_v33, %v8592_v18  ;;  %6478 = vmatprep.subr.bf16.mxu0 %v13315_v40  ;;  %v6514_v11 = vpack.c.bf16 %v629_v55, %v628_v5  ;;  %v631_v30 = vld [vmem:[%s13304_s17 + $0x58] sm:$0xff]  ;;  %v6516_v38 = vpack.c.bf16 %v647_v8, %v646_v22  ;;  %v8917_v22 = vld [vmem:[#allocation2 + $0x60] sm:$0xff] }
 0x116   :  { %v569_v15 = vadd.f32 %v567_v39, %v561_v7  ;;  %6511 = vmatpush3.bf16.msra.mxu1 %v6510_v49  ;;  %v1468_v18 = vadd.f32 %v1466_v57, %v1462_v0  ;;  %v8891_v33 = vld [vmem:[#allocation2 + $0x54] sm:$0xff]  ;;  %v6482_v7 = vpack.c.bf16 %v4983_v12, %v4982_v21  ;;  %v4984_v49 = vld [vmem:[%s13304_s17 + $0x500] sm:$0xff]  ;;  %v13117_v55 = vstv %s8818_s12 }
 0x117   :  { %v1478_v39 = vmul.f32 %v8891_v33, %v13116_v53  ;;  %6513 = vmatprep.subr.bf16.mxu1 %v6512_v17  ;;  %v1449_v57 = vmul.f32 %v1447_v31, %v8261_v25  ;;  %v13323_v0 = vstv %s8189_s10  ;;  %v4985_v17 = vld [vmem:[%s13304_s17 + $0x508] sm:$0xff]  ;;  %v648_v21 = vld [vmem:[%s13304_s17 + $0xe0] sm:$0xff]  ;;  %v1484_v25 = vmul.f32 %v8917_v22, %v13118_v9  ;;  %s8924_s10 = sld [smem:[#allocation3 + $0x40]] }
 0x118   :  { %v577_v5 = vadd.f32 %v575_v23, %v569_v15  ;;  %v591_v53 = vmul.f32 %v13323_v0, %v8611_v45  ;;  %6480 = vmatpush1.bf16.msra.mxu0 %v6479_v46  ;;  %v649_v23 = vld [vmem:[%s13304_s17 + $0xe8] sm:$0xff]  ;;  %v1474_v12 = vadd.f32 %v1472_v43, %v1468_v18  ;;  %v6518_v45 = vpack.c.bf16 %v631_v30, %v630_v13  ;;  %v632_v43 = vld [vmem:[%s13304_s17 + $0x60] sm:$0xff] }
 0x119   :  { %6481 = vmatprep.subr.bf16.mxu0 %v13315_v40  ;;  %v1495_v46 = vstv %s8842_s23  ;;  %v13324_v8 = vstv %s8210_s1  ;;  %v633_v18 = vld [vmem:[%s13304_s17 + $0x68] sm:$0xff]  ;;  %v8941_v30 = vadd.f32 %v1449_v57, %v8046_v14  ;;  %v4987_v14 = vld [vmem:[%s13304_s17 + $0x518] sm:$0xff]  ;;  %s9104_s1 = sld [smem:[#allocation3 + $0x4a]]  ;;  %s9284_s23 = sld [smem:[#allocation3 + $0x54]]  ;;  %vm4828_vm3 = vcmask 74752  }
 0x11a   :  { %v585_v31 = vadd.f32 %v583_v58, %v577_v5  ;;  %v599_v15 = vmul.f32 %v13324_v8, %v8628_v16  ;;  %6515 = vmatpush3.bf16.msra.mxu1 %v6514_v11  ;;  %v1480_v0 = vadd.f32 %v1478_v39, %v1474_v12  ;;  %v8935_v13 = vld [vmem:[#allocation2 + $0x6c] sm:$0xff]  ;;  %v6485_v16 = vpack.c.bf16 %v4985_v17, %v4984_v49  ;;  %v651_v49 = vld [vmem:[%s13304_s17 + $0xf8] sm:$0xff] }
 0x11b   :  { %v1490_v58 = vmul.f32 %v8935_v13, %v13117_v55  ;;  %6517 = vmatprep.subr.bf16.mxu1 %v6516_v38  ;;  %v6520_v11 = vpack.c.bf16 %v649_v23, %v648_v21  ;;  %v4986_v5 = vld [vmem:[%s13304_s17 + $0x510] sm:$0xff]  ;;  %v1501_v8 = vstv %s8862_s15  ;;  %v13325_v39 = vstv %s13285_s26  ;;  %s8966_s26 = sld [smem:[#allocation3 + $0x42]]  ;;  %s9310_s15 = sld [smem:[#allocation3 + $0x55]] }
 0x11c   :  { %v607_v12 = vmul.f32 %v13325_v39, %v8652_v10  ;;  %6483 = vmatpush1.bf16.msra.mxu0 %v6482_v7  ;;  %v650_v38 = vld [vmem:[%s13304_s17 + $0xf0] sm:$0xff]  ;;  %v593_v57 = vadd.f32 %v591_v53, %v585_v31  ;;  %v1486_v17 = vadd.f32 %v1484_v25, %v1480_v0  ;;  %v1496_v10 = vmul.f32 %v1495_v46, %v8227_v61 }
 0x11d   :  { %6484 = vmatprep.subr.bf16.mxu0 %v13315_v40  ;;  %v6522_v7 = vpack.c.bf16 %v633_v18, %v632_v43  ;;  %v1507_v21 = vstv %s8883_s25  ;;  %v13326_v23 = vstv %s8231_s8  ;;  %v1502_v53 = vmul.f32 %v1501_v8, %v8252_v37  ;;  %v634_v31 = vld [vmem:[%s13304_s17 + $0x70] sm:$0xff]  ;;  %v635_v43 = vld [vmem:[%s13304_s17 + $0x78] sm:$0xff]  ;;  %s8981_s8 = sld [smem:[#allocation3 + $0x43]]  ;;  %s13361_s25 = sld [smem:[#allocation19_spill]] }
 0x11e   :  { %v615_v39 = vmul.f32 %v13326_v23, %v8678_v52  ;;  %6519 = vmatpush3.bf16.msra.mxu1 %v6518_v45  ;;  %v601_v55 = vadd.f32 %v599_v15, %v593_v57  ;;  %v1492_v9 = vadd.f32 %v1490_v58, %v1486_v17  ;;  %v6488_v25 = vpack.c.bf16 %v4987_v14, %v4986_v5  ;;  %v668_v37 = vld [vmem:[%s13304_s17 + $0x180] sm:$0xff]  ;;  %v669_v45 = vld [vmem:[%s13304_s17 + $0x188] sm:$0xff] }
 0x11f   :  { %6521 = vmatprep.subr.bf16.mxu1 %v6520_v11  ;;  %v6524_v61 = vpack.c.bf16 %v651_v49, %v650_v38  ;;  %v1513_v52 = vstv %s8900_s4  ;;  %v1190_v15 = vcombine.high %v8665_v1, %v8665_v1  ;;  %v1508_v58 = vmul.f32 %v1507_v21, %v8277_v50  ;;  %v4989_v11 = vld [vmem:[%s13304_s17 + $0x528] sm:$0xff]  ;;  %v652_v14 = vld [vmem:[%s13304_s17 + $0x100] sm:$0xff]  ;;  %s9356_s4 = sld [smem:[#allocation3 + $0x57]] }
 0x120   :  { %6486 = vmatpush1.bf16.msra.mxu0 %v6485_v16  ;;  %v609_v18 = vadd.f32 %v607_v12, %v601_v55  ;;  %v1498_v0 = vadd.f32 %v1496_v10, %v1492_v9  ;;  %v4988_v16 = vld [vmem:[%s13304_s17 + $0x520] sm:$0xff]  ;;  %v1519_v5 = vstv %s8924_s10  ;;  %v6526_v1 = vpack.c.bf16 %v635_v43, %v634_v31  ;;  %v653_v38 = vld [vmem:[%s13304_s17 + $0x108] sm:$0xff]  ;;  %v671_v10 = vld [vmem:[%s13304_s17 + $0x198] sm:$0xff]  ;;  %s9444_s10 = sld [smem:[#allocation3 + $0x5b]] }
 0x121   :  { %6487 = vmatprep.subr.bf16.mxu0 %v13315_v40  ;;  %v1514_v50 = vmul.f32 %v1513_v52, %v8315_v26  ;;  %v6528_v12 = vpack.c.bf16 %v669_v45, %v668_v37  ;;  %v1525_v49 = vstv %s8947_s13  ;;  %v6491_v57 = vpack.c.bf16 %v4989_v11, %v4988_v16  ;;  %v670_v26 = vld [vmem:[%s13304_s17 + $0x190] sm:$0xff]  ;;  %v655_v31 = vld [vmem:[%s13304_s17 + $0x118] sm:$0xff]  ;;  %v672_v16 = vld [vmem:[%s13304_s17 + $0x1a0] sm:$0xff]  ;;  %s9398_s13 = sld [smem:[#allocation3 + $0x59]] }
 0x122   :  { %6523 = vmatpush3.bf16.msra.mxu1 %v6522_v7  ;;  %v617_v9 = vadd.f32 %v615_v39, %v609_v18  ;;  %v1504_v55 = vadd.f32 %v1502_v53, %v1498_v0  ;;  %v9017_v17 = vrot.slane %v1190_v15, %v8657_v51  ;;  %v1520_v23 = vmul.f32 %v1519_v5, %v8346_v59  ;;  %v4990_v39 = vld [vmem:[%s13304_s17 + $0x530] sm:$0xff]  ;;  %v4991_v53 = vld [vmem:[%s13304_s17 + $0x538] sm:$0xff]  ;;  %v673_v11 = vld [vmem:[%s13304_s17 + $0x1a8] sm:$0xff] }
 0x123   :  { %6525 = vmatprep.subr.bf16.mxu1 %v6524_v61  ;;  %v6530_v61 = vpack.c.bf16 %v653_v38, %v652_v14  ;;  %v654_v59 = vld [vmem:[%s13304_s17 + $0x110] sm:$0xff]  ;;  %v1526_v45 = vmul.f32 %v1525_v49, %v8373_v28  ;;  %v6532_v15 = vpack.c.bf16 %v671_v10, %v670_v26  ;;  %v1537_v18 = vstv %s8981_s8  ;;  %v657_v14 = vld [vmem:[%s13304_s17 + $0x128] sm:$0xff]  ;;  %s9501_s8 = sld [smem:[#allocation3 + $0x5d]] }
 0x124   :  { %6489 = vmatpush1.bf16.msra.mxu0 %v6488_v25  ;;  %v1510_v7 = vadd.f32 %v1508_v58, %v1504_v55  ;;  %v1531_v25 = vstv %s8966_s26  ;;  %v619_v43 = vmax.f32 %v617_v9, 0.0  ;;  %v1206_v0 = vcombine.high %v9017_v17, %v9017_v17  ;;  %v684_v55 = vld [vmem:[%s13304_s17 + $0x200] sm:$0xff]  ;;  %v686_v10 = vld [vmem:[%s13304_s17 + $0x210] sm:$0xff]  ;;  %s10019_s26 = sld [smem:[#allocation3 + $0x71]] }
 0x125   :  { %6490 = vmatprep.subr.bf16.mxu0 %v13315_v40  ;;  %v6494_v58 = vpack.c.bf16 %v4991_v53, %v4990_v39  ;;  %v6534_v9 = vpack.c.bf16 %v655_v31, %v654_v59  ;;  %v6536_v26 = vpack.c.bf16 %v673_v11, %v672_v16  ;;  %v687_v39 = vld [vmem:[%s13304_s17 + $0x218] sm:$0xff] }
 0x126   :  { %6527 = vmatpush3.bf16.msra.mxu1 %v6526_v1  ;;  %v1516_v37 = vadd.f32 %v1514_v50, %v1510_v7  ;;  %v1532_v1 = vmul.f32 %v1531_v25, %v8403_v3  ;;  %v685_v50 = vld [vmem:[%s13304_s17 + $0x208] sm:$0xff]  ;;  %v9073_v3 = vrot.slane %v619_v43, %v8657_v51  ;;  %v1549_v7 = vstv %s9014_s27  ;;  %v675_v53 = vld [vmem:[%s13304_s17 + $0x1b8] sm:$0xff]  ;;  %s9154_s27 = sld [smem:[#allocation3 + $0x4e]] }
 0x127   :  { %6529 = vmatprep.subr.bf16.mxu1 %v6528_v12  ;;  %v1543_v12 = vstv %s9002_s7  ;;  %v1555_v43 = vstv %s9036_s14  ;;  %s9564_s7 = sld [smem:[#allocation3 + $0x5f]]  ;;  %s9587_s14 = sld [smem:[#allocation3 + $0x60]] }
 0x128   :  { %6492 = vmatpush1.bf16.msra.mxu0 %v6491_v57  ;;  %v1522_v28 = vadd.f32 %v1520_v23, %v1516_v37  ;;  %v1538_v57 = vmul.f32 %v1537_v18, %v8428_v63  ;;  %v6561_v23 = vpack.c.bf16 %v685_v50, %v684_v55  ;;  %v674_v63 = vld [vmem:[%s13304_s17 + $0x1b0] sm:$0xff]  ;;  %v1544_v59 = vmul.f32 %v1543_v12, %v8460_v44  ;;  %v659_v44 = vld [vmem:[%s13304_s17 + $0x138] sm:$0xff]  ;;  %v677_v55 = vld [vmem:[%s13304_s17 + $0x1c8] sm:$0xff] }
 0x129   :  { %1287 = vmatmul.mubr.f32.vlgmr.msra.gmra.mrb[2].mxu1 %v8703_v32  ;;  %6493 = vmatprep.subr.bf16.mxu0 %v13315_v40  ;;  %v656_v32 = vld [vmem:[%s13304_s17 + $0x120] sm:$0xff]  ;;  %v13329_v37 = vstv %s13328_s18  ;;  %s9125_s18 = sld [smem:[#allocation3 + $0x4d]]  ;;  %v9142_v50 = vld [vmem:[#allocation2 + $0x38] sm:$0xf]  ;;  %13340 = sst [smem:[#allocation34_spill]] %s9501_s8 }
 0x12a   :  { %6531 = vmatpush3.bf16.msra.mxu1 %v6530_v61  ;;  %1356 = vmatprep.mubr.f32.mxu1 %v1206_v0  ;;  %v1528_v38 = vadd.f32 %v1526_v45, %v1522_v28  ;;  %v6538_v31 = vpack.c.bf16 %v657_v14, %v656_v32  ;;  %v1920_v45 = vmul.f32 %v8681_v6, %v13329_v37  ;;  %v658_v0 = vld [vmem:[%s13304_s17 + $0x130] sm:$0xff]  ;;  %v13331_v32 = vstv %s8720_s29  ;;  %s9376_s29 = sld [smem:[#allocation3 + $0x58]] }
 0x12b   :  { %6533 = vmatprep.subr.bf16.mxu1 %v6532_v15  ;;  %v1214_v15 = vcombine.high %v9073_v3, %v9073_v3  ;;  %v1550_v6 = vmul.f32 %v1549_v7, %v8490_v54  ;;  %v6564_v28 = vpack.c.bf16 %v687_v39, %v686_v10  ;;  %v689_v54 = vld [vmem:[%s13304_s17 + $0x228] sm:$0xff]  ;;  %v1461_v14 = vmul.f32 %v9142_v50, %v13331_v32 }
 0x12c   :  { %6495 = vmatpush1.bf16.msra.mxu0 %v6494_v58  ;;  %v1534_v61 = vadd.f32 %v1532_v1, %v1528_v38  ;;  %v9117_v58 = vld [vmem:[#allocation2 + $0x2c] sm:$0xf]  ;;  %v6540_v1 = vpack.c.bf16 %v675_v53, %v674_v63  ;;  %v13120_v10 = vstv %s9070_s24  ;;  %v660_v63 = vld [vmem:[%s13304_s17 + $0x140] sm:$0xff]  ;;  %v13133_v32 = vstv %s9104_s1 }
 0x12d   :  { %6560 = vmatprep.subr.bf16.mxu0 %v13315_v40  ;;  %v1455_v16 = vmul.f32 %v9117_v58, %v1453_v42  ;;  %v1561_v42 = vstv %s9048_s30  ;;  %v661_v53 = vld [vmem:[%s13304_s17 + $0x148] sm:$0xff]  ;;  %s9678_s30 = sld [smem:[#allocation3 + $0x66]] }
 0x12e   :  { %6535 = vmatpush3.bf16.msra.mxu1 %v6534_v9  ;;  %v1540_v11 = vadd.f32 %v1538_v57, %v1534_v61  ;;  %v688_v9 = vld [vmem:[%s13304_s17 + $0x220] sm:$0xff]  ;;  %v1556_v57 = vmul.f32 %v1555_v43, %v8522_v47  ;;  %v1562_v37 = vmul.f32 %v1561_v42, %v8550_v24  ;;  %v691_v24 = vld [vmem:[%s13304_s17 + $0x238] sm:$0xff] }
 0x12f   :  { %1183 = vmatmul.mubr.f32.vlgmr.msra.gmra.mrb[2].mxu0 %v8750_v48  ;;  %6537 = vmatprep.subr.bf16.mxu1 %v6536_v26  ;;  %v676_v48 = vld [vmem:[%s13304_s17 + $0x1c0] sm:$0xff]  ;;  %v6542_v26 = vpack.c.bf16 %v659_v44, %v658_v0  ;;  %v690_v0 = vld [vmem:[%s13304_s17 + $0x230] sm:$0xff] }
 0x130   :  { %6562 = vmatpush1.bf16.msra.mxu0 %v6561_v23  ;;  %4993 = vmatprep.mubr.msk.f32.mxu0 %vm975_vm2, %v1214_v15  ;;  %v1546_v38 = vadd.f32 %v1544_v59, %v1540_v11  ;;  %v13332_v23 = vstv %s13330_s21  ;;  %v9162_v47 = vld [vmem:[#allocation2 + $0x44] sm:$0xf]  ;;  %s13333_s21 = sld [smem:[#allocation18_spill]]  ;;  %v6544_v15 = vpack.c.bf16 %v677_v55, %v676_v48  ;;  %v9174_v44 = vld [vmem:[#allocation2 + $0x50] sm:$0xf]  ;;  %v13334_v11 = vstv %s8762_s11  ;;  %s9199_s11 = sld [smem:[#allocation3 + $0x50]] }
 0x131   :  { %6563 = vmatprep.subr.bf16.mxu0 %v13315_v40  ;;  %v1922_v39 = vadd.f32 %v1920_v45, %v13332_v23  ;;  %v1467_v61 = vmul.f32 %v9162_v47, %v1465_v62  ;;  %v6567_v45 = vpack.c.bf16 %v689_v54, %v688_v9  ;;  %v1473_v62 = vmul.f32 %v9174_v44, %v13334_v11  ;;  %v692_v11 = vld [vmem:[%s13304_s17 + $0x240] sm:$0xff] }
 0x132   :  { %6539 = vmatpush3.bf16.msra.mxu1 %v6538_v31  ;;  %v1552_v59 = vadd.f32 %v1550_v6, %v1546_v38  ;;  %v1457_v31 = vadd.f32 %v1455_v16, %v8941_v30  ;;  %v1573_v6 = vstv %s9088_s6  ;;  %v678_v30 = vld [vmem:[%s13304_s17 + $0x1d0] sm:$0xff]  ;;  %v679_v16 = vld [vmem:[%s13304_s17 + $0x1d8] sm:$0xff]  ;;  %v1568_v9 = vmul.f32 %v13120_v10, %v8574_v35  ;;  %s13362_s6 = sld [smem:[#allocation21_spill]] }
 0x133   :  { %6541 = vmatprep.subr.bf16.mxu1 %v6540_v1  ;;  %v6546_v55 = vpack.c.bf16 %v661_v53, %v660_v63  ;;  %v662_v38 = vld [vmem:[%s13304_s17 + $0x150] sm:$0xff]  ;;  %v663_v35 = vld [vmem:[%s13304_s17 + $0x158] sm:$0xff]  ;;  %v1574_v63 = vmul.f32 %v1573_v6, %v8605_v4  ;;  %v13337_v10 = vstv %s8801_s0  ;;  %v693_v4 = vld [vmem:[%s13304_s17 + $0x248] sm:$0xff]  ;;  %s9240_s0 = sld [smem:[#allocation3 + $0x52]] }
 0x134   :  { %6565 = vmatpush1.bf16.msra.mxu0 %v6564_v28  ;;  %v1558_v1 = vadd.f32 %v1556_v57, %v1552_v59  ;;  %v1463_v28 = vadd.f32 %v1461_v14, %v1457_v31  ;;  %v9207_v14 = vld [vmem:[#allocation2 + $0x5c] sm:$0xf]  ;;  %v13336_v57 = vstv %s8776_s22  ;;  %v6570_v59 = vpack.c.bf16 %v691_v24, %v690_v0  ;;  %s9224_s22 = sld [smem:[#allocation3 + $0x51]] }
 0x135   :  { %6566 = vmatprep.subr.bf16.mxu0 %v13315_v40  ;;  %v6548_v31 = vpack.c.bf16 %v679_v16, %v678_v30  ;;  %v13131_v30 = vstv %s9154_s27  ;;  %v664_v16 = vld [vmem:[%s13304_s17 + $0x160] sm:$0xff] }
 0x136   :  { %v13335_v54 = vstv %s13333_s21  ;;  %6543 = vmatpush3.bf16.msra.mxu1 %v6542_v26  ;;  %v1564_v23 = vadd.f32 %v1562_v37, %v1558_v1  ;;  %v1469_v53 = vadd.f32 %v1467_v61, %v1463_v28  ;;  %v1931_v26 = vstv %s9125_s18  ;;  %v680_v61 = vld [vmem:[%s13304_s17 + $0x1e0] sm:$0xff]  ;;  %v681_v37 = vld [vmem:[%s13304_s17 + $0x1e8] sm:$0xff]  ;;  %s9534_s18 = sld [smem:[#allocation3 + $0x5e]]  ;;  %s9619_s21 = sld [smem:[#allocation3 + $0x61]] }
 0x137   :  { %v1926_v48 = vmul.f32 %v8724_v2, %v13335_v54  ;;  %v1479_v2 = vmul.f32 %v9207_v14, %v13336_v57  ;;  %6545 = vmatprep.subr.bf16.mxu1 %v6544_v15  ;;  %v9219_v54 = vld [vmem:[#allocation2 + $0x68] sm:$0xf] }
 0x138   :  { %v1485_v57 = vmul.f32 %v9219_v54, %v13337_v10  ;;  %6568 = vmatpush1.bf16.msra.mxu0 %v6567_v45  ;;  %v1570_v15 = vadd.f32 %v1568_v9, %v1564_v23  ;;  %v1580_v10 = vmul.f32 %v13133_v32, %v8633_v60  ;;  %v1475_v0 = vadd.f32 %v1473_v62, %v1469_v53  ;;  %v665_v1 = vld [vmem:[%s13304_s17 + $0x168] sm:$0xff]  ;;  %v9248_v60 = vld [vmem:[#allocation2 + $0x74] sm:$0xf]  ;;  %v695_v23 = vld [vmem:[%s13304_s17 + $0x258] sm:$0xff] }
 0x139   :  { %v1928_v24 = vadd.f32 %v1926_v48, %v1922_v39  ;;  %6569 = vmatprep.subr.bf16.mxu0 %v13315_v40  ;;  %v6550_v45 = vpack.c.bf16 %v663_v35, %v662_v38  ;;  %v13338_v39 = vstv %s8818_s12  ;;  %v1932_v48 = vmul.f32 %v8784_v27, %v1931_v26  ;;  %v9257_v35 = vld [vmem:[%s13304_s17 + $0x250] sm:$0xff]  ;;  %v9262_v53 = vld [vmem:[#allocation2 + $0x80] sm:$0xf]  ;;  %s9268_s12 = sld [smem:[#allocation3 + $0x53]] }
 0x13a   :  { %6547 = vmatpush3.bf16.msra.mxu1 %v6546_v55  ;;  %v1491_v62 = vmul.f32 %v9248_v60, %v13338_v39  ;;  %v1576_v9 = vadd.f32 %v1574_v63, %v1570_v15  ;;  %v1481_v28 = vadd.f32 %v1479_v2, %v1475_v0  ;;  %v6573_v55 = vpack.c.bf16 %v693_v4, %v692_v11  ;;  %v682_v63 = vld [vmem:[%s13304_s17 + $0x1f0] sm:$0xff]  ;;  %v696_v39 = vld [vmem:[%s13304_s17 + $0x260] sm:$0xff] }
 0x13b   :  { %6549 = vmatprep.subr.bf16.mxu1 %v6548_v31  ;;  %v6552_v38 = vpack.c.bf16 %v681_v37, %v680_v61  ;;  %v1497_v2 = vmul.f32 %v9262_v53, %v1495_v46  ;;  %v13130_v27 = vstv %s9180_s19  ;;  %v683_v31 = vld [vmem:[%s13304_s17 + $0x1f8] sm:$0xff]  ;;  %v1934_v61 = vadd.f32 %v1932_v48, %v1928_v24  ;;  %v9279_v37 = vld [vmem:[#allocation2 + $0x20] sm:$0xf] }
 0x13c   :  { %6571 = vmatpush1.bf16.msra.mxu0 %v6570_v59  ;;  %v1582_v11 = vadd.f32 %v1580_v10, %v1576_v9  ;;  %v1487_v4 = vadd.f32 %v1485_v57, %v1481_v28  ;;  %v1938_v46 = vmul.f32 %v8803_v41, %v13131_v30  ;;  %v1933_v59 = vmul.f32 %v9279_v37, %v1931_v26  ;;  %v666_v10 = vld [vmem:[%s13304_s17 + $0x170] sm:$0xff]  ;;  %v667_v41 = vld [vmem:[%s13304_s17 + $0x178] sm:$0xff]  ;;  %v9293_v26 = vld [vmem:[#allocation2 + $0x8c] sm:$0xf] }
 0x13d   :  { %6572 = vmatprep.subr.bf16.mxu0 %v13315_v40  ;;  %v6554_v15 = vpack.c.bf16 %v665_v1, %v664_v16  ;;  %v13129_v0 = vstv %s9199_s11  ;;  %v6576_v57 = vpack.c.bf16 %v695_v23, %v9257_v35  ;;  %v1503_v24 = vmul.f32 %v9293_v26, %v1501_v8  ;;  %v9304_v9 = vld [vmem:[#allocation2 + $0x98] sm:$0xf]  ;;  %v9561_v30 = vld [vmem:[%s13304_s17 + $0x650] sm:$0xff] }
 0x13e   :  { %6551 = vmatpush3.bf16.msra.mxu1 %v6550_v45  ;;  %v1493_v16 = vadd.f32 %v1491_v62, %v1487_v4  ;;  %v1944_v1 = vmul.f32 %v8826_v56, %v13130_v27  ;;  %v6556_v45 = vpack.c.bf16 %v683_v31, %v682_v63  ;;  %v1509_v28 = vmul.f32 %v9304_v9, %v1507_v21  ;;  %v697_v56 = vld [vmem:[%s13304_s17 + $0x268] sm:$0xff]  ;;  %v5036_v62 = vld [vmem:[%s13304_s17 + $0x5c0] sm:$0xff] }
 0x13f   :  { %6553 = vmatprep.subr.bf16.mxu1 %v6552_v38  ;;  %v13126_v48 = vstv %s9224_s22  ;;  %v9313_v8 = vadd.f32 %v1933_v59, %v8048_v19  ;;  %v5037_v21 = vld [vmem:[%s13304_s17 + $0x5c8] sm:$0xff]  ;;  %v9324_v38 = vmax.f32 %v1582_v11, 0.0  ;;  %v1940_v19 = vadd.f32 %v1938_v46, %v1934_v61  ;;  %v5020_v31 = vld [vmem:[%s13304_s17 + $0x540] sm:$0xff] }
 0x140   :  { %6574 = vmatpush1.bf16.msra.mxu0 %v6573_v55  ;;  %v1499_v35 = vadd.f32 %v1497_v2, %v1493_v16  ;;  %v1950_v55 = vmul.f32 %v8844_v36, %v13129_v0  ;;  %v6558_v23 = vpack.c.bf16 %v667_v41, %v666_v10  ;;  %v13125_v63 = vstv %s9240_s0  ;;  %v5021_v2 = vld [vmem:[%s13304_s17 + $0x548] sm:$0xff]  ;;  %v9339_v11 = vld [vmem:[#allocation2 + $0xa4] sm:$0xf]  ;;  %v9347_v10 = vld [vmem:[#allocation2 + $0xb0] sm:$0xf] }
 0x141   :  { %6575 = vmatprep.subr.bf16.mxu0 %v13315_v40  ;;  %v1515_v36 = vmul.f32 %v9339_v11, %v1513_v52  ;;  %v1946_v61 = vadd.f32 %v1944_v1, %v1940_v19  ;;  %v1956_v46 = vmul.f32 %v8873_v34, %v13126_v48  ;;  %v6579_v59 = vpack.c.bf16 %v697_v56, %v696_v39  ;;  %v698_v16 = vld [vmem:[%s13304_s17 + $0x270] sm:$0xff]  ;;  %v5039_v1 = vld [vmem:[%s13304_s17 + $0x5d8] sm:$0xff] }
 0x142   :  { %6555 = vmatpush3.bf16.msra.mxu1 %v6554_v15  ;;  %v1505_v4 = vadd.f32 %v1503_v24, %v1499_v35  ;;  %v6590_v15 = vpack.c.bf16 %v5037_v21, %v5036_v62  ;;  %v1521_v41 = vmul.f32 %v9347_v10, %v1519_v5  ;;  %v13124_v52 = vstv %s9268_s12  ;;  %v699_v24 = vld [vmem:[%s13304_s17 + $0x278] sm:$0xff]  ;;  %v5038_v5 = vld [vmem:[%s13304_s17 + $0x5d0] sm:$0xff] }
 0x143   :  { %6557 = vmatprep.subr.bf16.mxu1 %v6556_v45  ;;  %v9360_v34 = vrot.slane %v9324_v38, %v8657_v51  ;;  %v1952_v39 = vadd.f32 %v1950_v55, %v1946_v61  ;;  %v6592_v56 = vpack.c.bf16 %v5021_v2, %v5020_v31  ;;  %v13123_v62 = vstv %s9284_s23  ;;  %v9378_v21 = vld [vmem:[#allocation2 + $0xbc] sm:$0xf] }
 0x144   :  { %6577 = vmatpush1.bf16.msra.mxu0 %v6576_v57  ;;  %v1511_v45 = vadd.f32 %v1509_v28, %v1505_v4  ;;  %v1962_v57 = vmul.f32 %v8891_v33, %v13125_v63  ;;  %v1527_v35 = vmul.f32 %v9378_v21, %v1525_v49  ;;  %v5022_v28 = vld [vmem:[%s13304_s17 + $0x550] sm:$0xff]  ;;  %v5023_v33 = vld [vmem:[%s13304_s17 + $0x558] sm:$0xff]  ;;  %v1968_v31 = vmul.f32 %v8917_v22, %v13124_v52  ;;  %v5040_v22 = vld [vmem:[%s13304_s17 + $0x5e0] sm:$0xff] }
 0x145   :  { %6578 = vmatprep.subr.bf16.mxu0 %v13315_v40  ;;  %v1958_v55 = vadd.f32 %v1956_v46, %v1952_v39  ;;  %v6582_v2 = vpack.c.bf16 %v699_v24, %v698_v16  ;;  %v6594_v4 = vpack.c.bf16 %v5039_v1, %v5038_v5  ;;  %v13121_v61 = vstv %s9310_s15  ;;  %v5041_v46 = vld [vmem:[%s13304_s17 + $0x5e8] sm:$0xff] }
 0x146   :  { %6559 = vmatpush3.bf16.msra.mxu1 %v6558_v23  ;;  %v1517_v19 = vadd.f32 %v1515_v36, %v1511_v45  ;;  %v9392_v23 = vld [vmem:[#allocation2 + $0xc8] sm:$0xf]  ;;  %v1688_v36 = vcombine.high %v9360_v34, %v9360_v34  ;;  %v1974_v16 = vmul.f32 %v8935_v13, %v13123_v62  ;;  %v6596_v5 = vpack.c.bf16 %v5023_v33, %v5022_v28  ;;  %v9438_v33 = vld [vmem:[#allocation2 + $0xe0] sm:$0xf]  ;;  %v9495_v62 = vld [vmem:[#allocation2 + $0xf8] sm:$0xf] }
 0x147   :  { %6591 = vmatprep.subr.bf16.mxu1 %v6590_v15  ;;  %v1533_v49 = vmul.f32 %v9392_v23, %v1531_v25  ;;  %v1964_v25 = vadd.f32 %v1962_v57, %v1958_v55  ;;  %v701_v13 = vld [vmem:[%s13304_s17 + $0x288] sm:$0xff]  ;;  %v9433_v57 = vld [vmem:[#allocation2 + $0x78] sm:$0xff]  ;;  %v13127_v55 = vstv %s9356_s4  ;;  %v1557_v52 = vmul.f32 %v9495_v62, %v1555_v43 }
 0x148   :  { %6580 = vmatpush1.bf16.msra.mxu0 %v6579_v59  ;;  %v1523_v15 = vadd.f32 %v1521_v41, %v1517_v19  ;;  %v9412_v59 = vld [vmem:[#allocation2 + $0xd4] sm:$0xf]  ;;  %v700_v41 = vld [vmem:[%s13304_s17 + $0x280] sm:$0xff]  ;;  %v5025_v1 = vld [vmem:[%s13304_s17 + $0x568] sm:$0xff]  ;;  %v1980_v28 = vmul.f32 %v9433_v57, %v13121_v61  ;;  %v6598_v19 = vpack.c.bf16 %v5041_v46, %v5040_v22  ;;  %v13132_v48 = vstv %s9398_s13 }
 0x149   :  { %1357 = vmatmul.mubr.f32.vlgmr.msra.gmra.mrb[4].mxu1 %v9017_v17  ;;  %v1539_v24 = vmul.f32 %v9412_v59, %v1537_v18  ;;  %6581 = vmatprep.subr.bf16.mxu0 %v13315_v40  ;;  %v13122_v17 = vstv %s9331_s2  ;;  %v5024_v18 = vld [vmem:[%s13304_s17 + $0x560] sm:$0xff]  ;;  %v1970_v39 = vadd.f32 %v1968_v31, %v1964_v25  ;;  %v5042_v31 = vld [vmem:[%s13304_s17 + $0x5f0] sm:$0xff]  ;;  %v703_v46 = vld [vmem:[%s13304_s17 + $0x298] sm:$0xff] }
 0x14a   :  { %6593 = vmatpush3.bf16.msra.mxu1 %v6592_v56  ;;  %1769 = vmatprep.mubr.f32.mxu1 %v1688_v36  ;;  %v1529_v45 = vadd.f32 %v1527_v35, %v1523_v15  ;;  %v1545_v56 = vmul.f32 %v9438_v33, %v1543_v12  ;;  %v6585_v35 = vpack.c.bf16 %v701_v13, %v700_v41  ;;  %v5043_v36 = vld [vmem:[%s13304_s17 + $0x5f8] sm:$0xff]  ;;  %v9452_v61 = vld [vmem:[#allocation2 + $0x84] sm:$0xff] }
 0x14b   :  { %6595 = vmatprep.subr.bf16.mxu1 %v6594_v4  ;;  %v1976_v25 = vadd.f32 %v1974_v16, %v1970_v39  ;;  %v1986_v12 = vmul.f32 %v9452_v61, %v13122_v17  ;;  %v9457_v4 = vld [vmem:[#allocation2 + $0xec] sm:$0xf]  ;;  %v6600_v22 = vpack.c.bf16 %v5025_v1, %v5024_v18  ;;  %v9472_v16 = vld [vmem:[%s13304_s17 + $0x570] sm:$0xff]  ;;  %v9480_v41 = vld [vmem:[%s13304_s17 + $0x578] sm:$0xff]  ;;  %v1673_v1 = vcombine.high %v9324_v38, %v9324_v38 }
 0x14c   :  { %6583 = vmatpush1.bf16.msra.mxu0 %v6582_v2  ;;  %v1535_v15 = vadd.f32 %v1533_v49, %v1529_v45  ;;  %v1551_v2 = vmul.f32 %v9457_v4, %v1549_v7  ;;  %v702_v49 = vld [vmem:[%s13304_s17 + $0x290] sm:$0xff]  ;;  %v13128_v7 = vstv %s9376_s29  ;;  %v5068_v13 = vld [vmem:[%s13304_s17 + $0x6c0] sm:$0xff]  ;;  %v5069_v18 = vld [vmem:[%s13304_s17 + $0x6c8] sm:$0xff]  ;;  %v6602_v63 = vpack.c.bf16 %v5043_v36, %v5042_v31 }
 0x14d   :  { %6584 = vmatprep.subr.bf16.mxu0 %v13315_v40  ;;  %v1982_v39 = vadd.f32 %v1980_v28, %v1976_v25  ;;  %v6588_v38 = vpack.c.bf16 %v703_v46, %v702_v49  ;;  %v5045_v28 = vld [vmem:[%s13304_s17 + $0x608] sm:$0xff]  ;;  %v6604_v31 = vpack.c.bf16 %v9480_v41, %v9472_v16  ;;  %v6622_v36 = vpack.c.bf16 %v5069_v18, %v5068_v13  ;;  %v5070_v41 = vld [vmem:[%s13304_s17 + $0x6d0] sm:$0xff]  ;;  %v5071_v13 = vld [vmem:[%s13304_s17 + $0x6d8] sm:$0xff] }
 0x14e   :  { %6597 = vmatpush3.bf16.msra.mxu1 %v6596_v5  ;;  %v1541_v45 = vadd.f32 %v1539_v24, %v1535_v15  ;;  %v9490_v5 = vld [vmem:[#allocation2 + $0x90] sm:$0xff]  ;;  %v5044_v24 = vld [vmem:[%s13304_s17 + $0x600] sm:$0xff]  ;;  %v13134_v49 = vstv %s9425_s28  ;;  %v9537_v46 = vrot.slane %v1673_v1, %v8657_v51  ;;  %v5029_v16 = vld [vmem:[%s13304_s17 + $0x588] sm:$0xff]  ;;  %v6626_v32 = vpack.c.bf16 %v5071_v13, %v5070_v41 }
 0x14f   :  { %v1992_v17 = vmul.f32 %v9490_v5, %v13127_v55  ;;  %6599 = vmatprep.subr.bf16.mxu1 %v6598_v19  ;;  %v1988_v25 = vadd.f32 %v1986_v12, %v1982_v39  ;;  %v9509_v55 = vld [vmem:[#allocation2 + $0x9c] sm:$0xff]  ;;  %v9514_v19 = vld [vmem:[#allocation2 + $0x104] sm:$0xf]  ;;  %v5053_v12 = vld [vmem:[%s13304_s17 + $0x648] sm:$0xff]  ;;  %v6606_v27 = vpack.c.bf16 %v5045_v28, %v5044_v24  ;;  %v13343_v13 = vstv %s9104_s1  ;;  %s13409_s1 = sld [smem:[#allocation29_spill]] }
 0x150   :  { %6586 = vmatpush1.bf16.msra.mxu0 %v6585_v35  ;;  %v1547_v15 = vadd.f32 %v1545_v56, %v1541_v45  ;;  %v1998_v43 = vmul.f32 %v9509_v55, %v13128_v7  ;;  %v1563_v35 = vmul.f32 %v9514_v19, %v1561_v42  ;;  %v5052_v56 = vld [vmem:[%s13304_s17 + $0x640] sm:$0xff]  ;;  %v9548_v39 = vld [vmem:[#allocation2 + $0xa8] sm:$0xff]  ;;  %v9553_v1 = vld [vmem:[#allocation2 + $0x110] sm:$0xf]  ;;  %v13341_v7 = vstv %s9070_s24  ;;  %s9636_s24 = sld [smem:[#allocation3 + $0x62]] }
 0x151   :  { %6587 = vmatprep.subr.bf16.mxu0 %v13315_v40  ;;  %v9531_v42 = vld [vmem:[%s13304_s17 + $0x580] sm:$0xff]  ;;  %v1994_v45 = vadd.f32 %v1992_v17, %v1988_v25  ;;  %v1569_v0 = vmul.f32 %v9553_v1, %v13341_v7  ;;  %v5047_v7 = vld [vmem:[%s13304_s17 + $0x618] sm:$0xff] }
 0x152   :  { %6601 = vmatpush3.bf16.msra.mxu1 %v6600_v22  ;;  %v1553_v18 = vadd.f32 %v1551_v2, %v1547_v15  ;;  %v2004_v22 = vmul.f32 %v9548_v39, %v13132_v48  ;;  %v6624_v2 = vpack.c.bf16 %v5053_v12, %v5052_v56  ;;  %v5055_v15 = vld [vmem:[%s13304_s17 + $0x658] sm:$0xff]  ;;  %v6608_v48 = vpack.c.bf16 %v5029_v16, %v9531_v42  ;;  %v9597_v42 = vld [vmem:[#allocation2 + $0xc0] sm:$0xff] }
 0x153   :  { %6603 = vmatprep.subr.bf16.mxu1 %v6602_v63  ;;  %v5046_v63 = vld [vmem:[%s13304_s17 + $0x610] sm:$0xff]  ;;  %v2000_v28 = vadd.f32 %v1998_v43, %v1994_v45  ;;  %v9580_v56 = vld [vmem:[#allocation2 + $0x11c] sm:$0xf]  ;;  %v5072_v43 = vld [vmem:[%s13304_s17 + $0x6e0] sm:$0xff]  ;;  %v13342_v16 = vstv %s9444_s10 }
 0x154   :  { %6589 = vmatpush1.bf16.msra.mxu0 %v6588_v38  ;;  %v1559_v24 = vadd.f32 %v1557_v52, %v1553_v18  ;;  %v9575_v25 = vld [vmem:[#allocation2 + $0xb4] sm:$0xff]  ;;  %v1575_v12 = vmul.f32 %v9580_v56, %v1573_v6  ;;  %v1689_v52 = vcombine.high %v9537_v46, %v9537_v46  ;;  %v5073_v6 = vld [vmem:[%s13304_s17 + $0x6e8] sm:$0xff]  ;;  %v2016_v41 = vmul.f32 %v9597_v42, %v13342_v16 }
 0x155   :  { %v2010_v38 = vmul.f32 %v9575_v25, %v13134_v49  ;;  %6623 = vmatprep.subr.bf16.mxu0 %v6622_v36  ;;  %v2006_v18 = vadd.f32 %v2004_v22, %v2000_v28  ;;  %v6628_v49 = vpack.c.bf16 %v5055_v15, %v9561_v30  ;;  %v6610_v17 = vpack.c.bf16 %v5047_v7, %v5046_v63  ;;  %v5031_v22 = vld [vmem:[%s13304_s17 + $0x598] sm:$0xff]  ;;  %v5048_v30 = vld [vmem:[%s13304_s17 + $0x620] sm:$0xff]  ;;  %v9630_v7 = vld [vmem:[#allocation2 + $0xcc] sm:$0xff] }
 0x156   :  { %6605 = vmatpush3.bf16.msra.mxu1 %v6604_v31  ;;  %v1565_v36 = vadd.f32 %v1563_v35, %v1559_v24  ;;  %v9602_v31 = vld [vmem:[#allocation2 + $0x128] sm:$0xf]  ;;  %v5030_v35 = vld [vmem:[%s13304_s17 + $0x590] sm:$0xff]  ;;  %v5056_v24 = vld [vmem:[%s13304_s17 + $0x660] sm:$0xff]  ;;  %13344 = vst [vmem:[#allocation57_spill] sm:$0xff] %v9630_v7  ;;  %v13345_v16 = vstv %s9475_s20 }
 0x157   :  { %v1581_v45 = vmul.f32 %v9602_v31, %v13343_v13  ;;  %1427 = vmatmul.mubr.f32.vlgmr.msra.gmra.mrb[4].mxu0 %v9073_v3  ;;  %6607 = vmatprep.subr.bf16.mxu1 %v6606_v27  ;;  %v5057_v3 = vld [vmem:[%s13304_s17 + $0x668] sm:$0xff]  ;;  %v2012_v63 = vadd.f32 %v2010_v38, %v2006_v18  ;;  %v13136_v13 = vstv %s9534_s18  ;;  %v6612_v28 = vpack.c.bf16 %v5031_v22, %v5030_v35  ;;  %v9644_v18 = vld [vmem:[#allocation2 + $0xd8] sm:$0xff]  ;;  %v5032_v35 = vld [vmem:[%s13304_s17 + $0x5a0] sm:$0xff] }
 0x158   :  { %6625 = vmatpush3.bf16.msra.mxu0 %v6624_v2  ;;  %1839 = vmatprep.mubr.f32.mxu0 %v1689_v52  ;;  %v5049_v27 = vld [vmem:[%s13304_s17 + $0x628] sm:$0xff]  ;;  %v1571_v15 = vadd.f32 %v1569_v0, %v1565_v36  ;;  %v2022_v2 = vmul.f32 %v9630_v7, %v13345_v16  ;;  %v6630_v52 = vpack.c.bf16 %v5073_v6, %v5072_v43  ;;  %v5075_v0 = vld [vmem:[%s13304_s17 + $0x6f8] sm:$0xff]  ;;  %v5060_v7 = vld [vmem:[%s13304_s17 + $0x680] sm:$0xff] }
 0x159   :  { %6627 = vmatprep.subr.bf16.mxu0 %v6626_v32  ;;  %v2018_v36 = vadd.f32 %v2016_v41, %v2012_v63  ;;  %13346 = vst [vmem:[#allocation58_spill] sm:$0xff] %v9644_v18  ;;  %v13347_v32 = vstv %s9501_s8  ;;  %v6614_v6 = vpack.c.bf16 %v5049_v27, %v5048_v30  ;;  %v5033_v22 = vld [vmem:[%s13304_s17 + $0x5a8] sm:$0xff]  ;;  %v13140_v41 = vstv %s9564_s7  ;;  %s9937_s8 = sld [smem:[#allocation3 + $0x6d]] }
 0x15a   :  { %6609 = vmatpush3.bf16.msra.mxu1 %v6608_v48  ;;  %v1577_v38 = vadd.f32 %v1575_v12, %v1571_v15  ;;  %v2028_v43 = vmul.f32 %v9644_v18, %v13347_v32  ;;  %v6632_v48 = vpack.c.bf16 %v5057_v3, %v5056_v24  ;;  %v5058_v12 = vld [vmem:[%s13304_s17 + $0x670] sm:$0xff]  ;;  %v5051_v3 = vld [vmem:[%s13304_s17 + $0x638] sm:$0xff]  ;;  %v13348_v27 = vstv %s9154_s27  ;;  %s9954_s27 = sld [smem:[#allocation3 + $0x6e]] }
 0x15b   :  { %6611 = vmatprep.subr.bf16.mxu1 %v6610_v17  ;;  %v5059_v17 = vld [vmem:[%s13304_s17 + $0x678] sm:$0xff]  ;;  %v5050_v24 = vld [vmem:[%s13304_s17 + $0x630] sm:$0xff]  ;;  %v1939_v15 = vmul.f32 %v9117_v58, %v13348_v27  ;;  %v2024_v63 = vadd.f32 %v2022_v2, %v2018_v36  ;;  %v6634_v32 = vpack.c.bf16 %v5075_v0, %v5074_v29  ;;  %v6616_v58 = vpack.c.bf16 %v5033_v22, %v5032_v35  ;;  %v5076_v36 = vld [vmem:[%s13304_s17 + $0x700] sm:$0xff] }
 0x15c   :  { %6629 = vmatpush3.bf16.msra.mxu0 %v6628_v49  ;;  %v1583_v30 = vadd.f32 %v1581_v45, %v1577_v38  ;;  %v9673_v49 = vld [vmem:[#allocation2 + $0xe4] sm:$0xff]  ;;  %v5034_v45 = vld [vmem:[%s13304_s17 + $0x5b0] sm:$0xff]  ;;  %v5035_v2 = vld [vmem:[%s13304_s17 + $0x5b8] sm:$0xff]  ;;  %v6636_v35 = vpack.c.bf16 %v5059_v17, %v5058_v12  ;;  %v6618_v22 = vpack.c.bf16 %v5051_v3, %v5050_v24  ;;  %v13351_v38 = vstv %s9199_s11  ;;  %s10235_s11 = sld [smem:[#allocation3 + $0x7c]] }
 0x15d   :  { %13349 = vst [vmem:[#allocation59_spill] sm:$0xff] %v9673_v49  ;;  %v2034_v16 = vmul.f32 %v9673_v49, %v13136_v13  ;;  %6631 = vmatprep.subr.bf16.mxu0 %v6630_v52  ;;  %v5077_v29 = vld [vmem:[%s13304_s17 + $0x708] sm:$0xff]  ;;  %v13350_v52 = vstv %s9180_s19  ;;  %v2030_v27 = vadd.f32 %v2028_v43, %v2024_v63  ;;  %v9696_v13 = vld [vmem:[#allocation2 + $0xf0] sm:$0xff]  ;;  %v1951_v49 = vmul.f32 %v9162_v47, %v13351_v38  ;;  %v5084_v3 = vld [vmem:[%s13304_s17 + $0x740] sm:$0xff]  ;;  %s10182_s19 = sld [smem:[#allocation3 + $0x7a]] }
 0x15e   :  { %6613 = vmatpush3.bf16.msra.mxu1 %v6612_v28  ;;  %v1945_v0 = vmul.f32 %v9142_v50, %v13350_v52  ;;  %v2040_v28 = vmul.f32 %v9696_v13, %v13140_v41  ;;  %v2051_v18 = vstv %s9619_s21  ;;  %v5061_v50 = vld [vmem:[%s13304_s17 + $0x688] sm:$0xff]  ;;  %v1585_v43 = vmax.f32 %v1583_v30, 0.0  ;;  %s10639_s21 = sld [smem:[#allocation3 + $0x8f]] }
 0x15f   :  { %6615 = vmatprep.subr.bf16.mxu1 %v6614_v6  ;;  %v2036_v63 = vadd.f32 %v2034_v16, %v2030_v27  ;;  %v9711_v6 = vld [vmem:[#allocation2 + $0xfc] sm:$0xff]  ;;  %v13352_v12 = vstv %s9587_s14  ;;  %v1941_v47 = vadd.f32 %v1939_v15, %v9313_v8  ;;  %v6638_v24 = vpack.c.bf16 %v5077_v29, %v5076_v36  ;;  %v5085_v30 = vld [vmem:[%s13304_s17 + $0x748] sm:$0xff]  ;;  %v5078_v16 = vld [vmem:[%s13304_s17 + $0x710] sm:$0xff] }
 0x160   :  { %6633 = vmatpush3.bf16.msra.mxu0 %v6632_v48  ;;  %v2046_v17 = vmul.f32 %v9711_v6, %v13352_v12  ;;  %v6620_v48 = vpack.c.bf16 %v5035_v2, %v5034_v45  ;;  %v2057_v38 = vstv %s9636_s24  ;;  %v5079_v8 = vld [vmem:[%s13304_s17 + $0x718] sm:$0xff]  ;;  %v13353_v15 = vstv %s9224_s22  ;;  %v9733_v2 = vld [vmem:[#allocation2 + $0x108] sm:$0xff]  ;;  %s10135_s24 = sld [smem:[#allocation3 + $0x77]]  ;;  %s10672_s22 = sld [smem:[#allocation3 + $0x90]] }
 0x161   :  { %6635 = vmatprep.subr.bf16.mxu0 %v6634_v32  ;;  %v1957_v32 = vmul.f32 %v9174_v44, %v13353_v15  ;;  %v2042_v45 = vadd.f32 %v2040_v28, %v2036_v63  ;;  %v1947_v36 = vadd.f32 %v1945_v0, %v1941_v47  ;;  %v6640_v29 = vpack.c.bf16 %v5061_v50, %v5060_v7  ;;  %v5062_v44 = vld [vmem:[%s13304_s17 + $0x690] sm:$0xff]  ;;  %v5063_v28 = vld [vmem:[%s13304_s17 + $0x698] sm:$0xff]  ;;  %v5080_v47 = vld [vmem:[%s13304_s17 + $0x720] sm:$0xff] }
 0x162   :  { %6617 = vmatpush3.bf16.msra.mxu1 %v6616_v58  ;;  %v2052_v58 = vmul.f32 %v9733_v2, %v2051_v18  ;;  %v13354_v52 = vstv %s9240_s0  ;;  %v2063_v12 = vstv %s9659_s9  ;;  %v9743_v41 = vrot.slane %v1585_v43, %v8657_v51  ;;  %v9751_v7 = vld [vmem:[#allocation2 + $0x114] sm:$0xff]  ;;  %s10086_s9 = sld [smem:[#allocation3 + $0x7f]]  ;;  %s10213_s0 = sld [smem:[#allocation3 + $0x7b]] }
 0x163   :  { %6619 = vmatprep.subr.bf16.mxu1 %v6618_v22  ;;  %v1963_v27 = vmul.f32 %v9207_v14, %v13354_v52  ;;  %v2048_v0 = vadd.f32 %v2046_v17, %v2042_v45  ;;  %v2058_v14 = vmul.f32 %v9751_v7, %v2057_v38  ;;  %v2415_v22 = vstv %s9678_s30  ;;  %v5086_v63 = vld [vmem:[%s13304_s17 + $0x750] sm:$0xff]  ;;  %v5087_v17 = vld [vmem:[%s13304_s17 + $0x758] sm:$0xff]  ;;  %s9910_s30 = sld [smem:[#allocation3 + $0x6c]] }
 0x164   :  { %6637 = vmatpush3.bf16.msra.mxu0 %v6636_v35  ;;  %v1953_v35 = vadd.f32 %v1951_v49, %v1947_v36  ;;  %v6655_v50 = vpack.c.bf16 %v5085_v30, %v5084_v3  ;;  %v6642_v43 = vpack.c.bf16 %v5079_v8, %v5078_v16  ;;  %v5081_v49 = vld [vmem:[%s13304_s17 + $0x728] sm:$0xff]  ;;  %v9772_v16 = vld [vmem:[#allocation2 + $0x120] sm:$0xff]  ;;  %v2417_v15 = vmul.f32 %v9279_v37, %v2415_v22  ;;  %13390 = sst [smem:[#allocation36_spill]] %s10639_s21 }
 0x165   :  { %6639 = vmatprep.subr.bf16.mxu0 %v6638_v24  ;;  %v13355_v24 = vstv %s9268_s12  ;;  %v2054_v30 = vadd.f32 %v2052_v58, %v2048_v0  ;;  %v6644_v45 = vpack.c.bf16 %v5063_v28, %v5062_v44  ;;  %v1697_v36 = vcombine.high %v9743_v41, %v9743_v41  ;;  %s13357_s12 = sld [smem:[#allocation20_spill]]  ;;  %v5064_v37 = vld [vmem:[%s13304_s17 + $0x6a0] sm:$0xff]  ;;  %v5089_v44 = vld [vmem:[%s13304_s17 + $0x768] sm:$0xff]  ;;  %v5082_v28 = vld [vmem:[%s13304_s17 + $0x730] sm:$0xff] }
 0x166   :  { %6621 = vmatpush3.bf16.msra.mxu1 %v6620_v48  ;;  %v1969_v3 = vmul.f32 %v9219_v54, %v13355_v24  ;;  %v2064_v48 = vmul.f32 %v9772_v16, %v2063_v12  ;;  %v1959_v8 = vadd.f32 %v1957_v32, %v1953_v35  ;;  %v13356_v52 = vstv %s9284_s23  ;;  %s10096_s23 = sld [smem:[#allocation3 + $0x75]] }
 0x167   :  { %6654 = vmatprep.subr.bf16.mxu1 %v13315_v40  ;;  %v1975_v54 = vmul.f32 %v9248_v60, %v13356_v52  ;;  %v2060_v58 = vadd.f32 %v2058_v14, %v2054_v30  ;;  %v6658_v32 = vpack.c.bf16 %v5087_v17, %v5086_v63  ;;  %v6646_v35 = vpack.c.bf16 %v5081_v49, %v5080_v47  ;;  %v5088_v60 = vld [vmem:[%s13304_s17 + $0x760] sm:$0xff]  ;;  %v5083_v14 = vld [vmem:[%s13304_s17 + $0x738] sm:$0xff] }
 0x168   :  { %6641 = vmatpush3.bf16.msra.mxu0 %v6640_v29  ;;  %v1965_v0 = vadd.f32 %v1963_v27, %v1959_v8  ;;  %v5065_v29 = vld [vmem:[%s13304_s17 + $0x6a8] sm:$0xff]  ;;  %v13358_v27 = vstv %s9310_s15  ;;  %v9809_v17 = vld [vmem:[#allocation2] sm:$0xff]  ;;  %s9815_s15 = sld [smem:[#allocation3 + $0x67]]  ;;  %v13360_v49 = vstv %s9331_s2  ;;  %v6650_v8 = vpack.c.bf16 %v5083_v14, %v5082_v28  ;;  %s13380_s2 = sld [smem:[#allocation22_spill]] }
 0x169   :  { %1770 = vmatmul.mubr.f32.vlgmr.msra.gmra.mrb[6].mxu1 %v9360_v34  ;;  %6643 = vmatprep.subr.bf16.mxu0 %v6642_v43  ;;  %v1981_v34 = vmul.f32 %v9262_v53, %v13358_v27  ;;  %v2066_v43 = vadd.f32 %v2064_v48, %v2060_v58  ;;  %v6648_v47 = vpack.c.bf16 %v5065_v29, %v5064_v37  ;;  %v13363_v52 = vstv %s9356_s4  ;;  %v5148_v58 = vld [vmem:[%s13304_s17 + $0x868] sm:$0xff]  ;;  %s9856_s4 = sld [smem:[#allocation3 + $0x69]] }
 0x16a   :  { %6656 = vmatpush1.bf16.msra.mxu1 %v6655_v50  ;;  %5104 = vmatprep.mubr.msk.f32.mxu1 %vm975_vm2, %v1697_v36  ;;  %v1971_v63 = vadd.f32 %v1969_v3, %v1965_v0  ;;  %v1987_v24 = vmul.f32 %v9293_v26, %v13360_v49  ;;  %v9821_v48 = vadd.f32 %v2417_v15, %v8050_v20  ;;  %v5066_v36 = vld [vmem:[%s13304_s17 + $0x6b0] sm:$0xff]  ;;  %v5091_v15 = vld [vmem:[%s13304_s17 + $0x778] sm:$0xff]  ;;  %v13364_v37 = vstv %s13361_s25  ;;  %s10331_s25 = sld [smem:[#allocation3 + $0x82]] }
 0x16b   :  { %v13359_v53 = vstv %s13357_s12  ;;  %6657 = vmatprep.subr.bf16.mxu1 %v13315_v40  ;;  %v6661_v3 = vpack.c.bf16 %v5089_v44, %v5088_v60  ;;  %v5090_v26 = vld [vmem:[%s13304_s17 + $0x770] sm:$0xff]  ;;  %v1993_v20 = vmul.f32 %v9304_v9, %v13363_v52  ;;  %v9846_v0 = vmax.f32 %v2066_v43, 0.0  ;;  %s13370_s12 = sld [smem:[#allocation34_spill]] }
 0x16c   :  { %v2404_v50 = vmul.f32 %v9809_v17, %v13359_v53  ;;  %6645 = vmatpush3.bf16.msra.mxu0 %v6644_v45  ;;  %v1977_v30 = vadd.f32 %v1975_v54, %v1971_v63  ;;  %v5067_v45 = vld [vmem:[%s13304_s17 + $0x6b8] sm:$0xff]  ;;  %v5147_v54 = vld [vmem:[%s13304_s17 + $0x860] sm:$0xff]  ;;  %v9850_v29 = vld [vmem:[#allocation2 + $0xc] sm:$0xff]  ;;  %v13366_v44 = vstv %s9376_s29  ;;  %s9870_s29 = sld [smem:[#allocation3 + $0x6a]] }
 0x16d   :  { %6647 = vmatprep.subr.bf16.mxu0 %v6646_v35  ;;  %v6652_v27 = vpack.c.bf16 %v5067_v45, %v5066_v36  ;;  %v1999_v28 = vmul.f32 %v9339_v11, %v13366_v44  ;;  %v6684_v43 = vpack.c.bf16 %v5148_v58, %v5147_v54  ;;  %v5131_v63 = vld [vmem:[%s13304_s17 + $0x7e0] sm:$0xff]  ;;  %v5132_v53 = vld [vmem:[%s13304_s17 + $0x7e8] sm:$0xff]  ;;  %v13367_v11 = vstv %s9398_s13  ;;  %s9890_s13 = sld [smem:[#allocation3 + $0x6b]]  ;;  %v9895_v54 = vld [vmem:[#allocation2 + $0x18] sm:$0xff] }
 0x16e   :  { %6659 = vmatpush1.bf16.msra.mxu1 %v6658_v32  ;;  %v1983_v35 = vadd.f32 %v1981_v34, %v1977_v30  ;;  %v2406_v9 = vadd.f32 %v2404_v50, %v13364_v37  ;;  %v13365_v32 = vstv %s13362_s6  ;;  %v6664_v34 = vpack.c.bf16 %v5091_v15, %v5090_v26  ;;  %v5092_v50 = vld [vmem:[%s13304_s17 + $0x780] sm:$0xff]  ;;  %v5149_v30 = vld [vmem:[%s13304_s17 + $0x870] sm:$0xff]  ;;  %s10551_s6 = sld [smem:[#allocation3 + $0x8c]] }
 0x16f   :  { %v2410_v60 = vmul.f32 %v9850_v29, %v13365_v32  ;;  %6660 = vmatprep.subr.bf16.mxu1 %v13315_v40  ;;  %v9877_v49 = vrot.slane %v9846_v0, %v8657_v51  ;;  %v6686_v45 = vpack.c.bf16 %v5132_v53, %v5131_v63  ;;  %v13368_v26 = vstv %s9425_s28  ;;  %v5133_v32 = vld [vmem:[%s13304_s17 + $0x7f0] sm:$0xff]  ;;  %s13383_s28 = sld [smem:[#allocation27_spill]] }
 0x170   :  { %6649 = vmatpush3.bf16.msra.mxu0 %v6648_v47  ;;  %v1989_v14 = vadd.f32 %v1987_v24, %v1983_v35  ;;  %v2005_v47 = vmul.f32 %v9347_v10, %v13367_v11  ;;  %v5093_v24 = vld [vmem:[%s13304_s17 + $0x788] sm:$0xff]  ;;  %v2421_v10 = vstv %s9815_s15  ;;  %v2011_v52 = vmul.f32 %v9378_v21, %v13368_v26  ;;  %v5134_v21 = vld [vmem:[%s13304_s17 + $0x7f8] sm:$0xff]  ;;  %v5094_v53 = vld [vmem:[%s13304_s17 + $0x790] sm:$0xff]  ;;  %s13382_s15 = sld [smem:[#allocation26_spill]] }
 0x171   :  { %6651 = vmatprep.subr.bf16.mxu0 %v6650_v8  ;;  %v2412_v36 = vadd.f32 %v2410_v60, %v2406_v9  ;;  %v2416_v58 = vmul.f32 %v9895_v54, %v2415_v22  ;;  %v6667_v37 = vpack.c.bf16 %v5093_v24, %v5092_v50  ;;  %v2427_v60 = vstv %s9835_s3  ;;  %v5095_v50 = vld [vmem:[%s13304_s17 + $0x798] sm:$0xff]  ;;  %v9939_v24 = vld [vmem:[#allocation2 + $0x30] sm:$0xff]  ;;  %s10284_s3 = sld [smem:[#allocation3 + $0x80]] }
 0x172   :  { %6662 = vmatpush1.bf16.msra.mxu1 %v6661_v3  ;;  %v5150_v3 = vld [vmem:[%s13304_s17 + $0x878] sm:$0xff]  ;;  %v1995_v8 = vadd.f32 %v1993_v20, %v1989_v14  ;;  %v13369_v20 = vstv %s9444_s10  ;;  %v2172_v22 = vcombine.high %v9877_v49, %v9877_v49  ;;  %v9920_v14 = vld [vmem:[#allocation2 + $0x24] sm:$0xff]  ;;  %v2433_v11 = vstv %s9856_s4  ;;  %s10169_s10 = sld [smem:[#allocation3 + $0x79]] }
 0x173   :  { %6663 = vmatprep.subr.bf16.mxu1 %v13315_v40  ;;  %v2017_v35 = vmul.f32 %v9392_v23, %v13369_v20  ;;  %v6688_v9 = vpack.c.bf16 %v5150_v3, %v5149_v30  ;;  %v5151_v23 = vld [vmem:[%s13304_s17 + $0x880] sm:$0xff]  ;;  %v13372_v30 = vstv %s13370_s12  ;;  %v2439_v26 = vstv %s9870_s29  ;;  %s10116_s12 = sld [smem:[#allocation3 + $0x76]]  ;;  %s10313_s4 = sld [smem:[#allocation3 + $0x81]] }
 0x174   :  { %6653 = vmatpush3.bf16.msra.mxu0 %v6652_v27  ;;  %v2001_v15 = vadd.f32 %v1999_v28, %v1995_v8  ;;  %v5152_v27 = vld [vmem:[%s13304_s17 + $0x888] sm:$0xff]  ;;  %v2418_v28 = vadd.f32 %v2416_v58, %v2412_v36  ;;  %v2029_v3 = vmul.f32 %v9438_v33, %v13372_v30  ;;  %v5135_v36 = vld [vmem:[%s13304_s17 + $0x800] sm:$0xff]  ;;  %v5153_v33 = vld [vmem:[%s13304_s17 + $0x890] sm:$0xff]  ;;  %s10482_s29 = sld [smem:[#allocation3 + $0x89]] }
 0x175   :  { %6685 = vmatprep.subr.bf16.mxu0 %v6684_v43  ;;  %v13371_v43 = vstv %s9475_s20  ;;  %v6692_v8 = vpack.c.bf16 %v5152_v27, %v5151_v23  ;;  %v2445_v23 = vstv %s9890_s13  ;;  %s9995_s20 = sld [smem:[#allocation3 + $0x70]]  ;;  %v5156_v30 = vld [vmem:[%s13304_s17 + $0x8a8] sm:$0xff]  ;;  %s10355_s13 = sld [smem:[#allocation3 + $0x83]] }
 0x176   :  { %6665 = vmatpush1.bf16.msra.mxu1 %v6664_v34  ;;  %v2007_v44 = vadd.f32 %v2005_v47, %v2001_v15  ;;  %v2422_v34 = vmul.f32 %v9920_v14, %v2421_v10  ;;  %v2023_v63 = vmul.f32 %v9412_v59, %v13371_v43  ;;  %v2428_v59 = vmul.f32 %v9939_v24, %v2427_v60  ;;  %v5154_v15 = vld [vmem:[%s13304_s17 + $0x898] sm:$0xff] }
 0x177   :  { %1840 = vmatmul.mubr.f32.vlgmr.msra.gmra.mrb[6].mxu0 %v9537_v46  ;;  %6666 = vmatprep.subr.bf16.mxu1 %v13315_v40  ;;  %v6690_v46 = vpack.c.bf16 %v5134_v21, %v5133_v32  ;;  %v13373_v21 = vstv %s9534_s18  ;;  %v13374_v43 = vstv %s9564_s7  ;;  %s10036_s18 = sld [smem:[#allocation3 + $0x72]]  ;;  %s10156_s7 = sld [smem:[#allocation3 + $0x78]] }
 0x178   :  { %6687 = vmatpush3.bf16.msra.mxu0 %v6686_v45  ;;  %2253 = vmatprep.mubr.f32.mxu0 %v2172_v22  ;;  %v2013_v47 = vadd.f32 %v2011_v52, %v2007_v44  ;;  %v5136_v45 = vld [vmem:[%s13304_s17 + $0x808] sm:$0xff]  ;;  %v6670_v52 = vpack.c.bf16 %v5095_v50, %v5094_v53  ;;  %v2424_v20 = vadd.f32 %v2422_v34, %v2418_v28  ;;  %v5096_v22 = vld [vmem:[%s13304_s17 + $0x7a0] sm:$0xff] }
 0x179   :  { %6689 = vmatprep.subr.bf16.mxu0 %v6688_v9  ;;  %v9962_v9 = vld [vmem:[#allocation2 + $0x3c] sm:$0xff]  ;;  %v6694_v27 = vpack.c.bf16 %v5136_v45, %v5135_v36  ;;  %v9980_v34 = vld [vmem:[#allocation2 + $0x48] sm:$0xff]  ;;  %v2041_v53 = vmul.f32 %v9495_v62, %v13374_v43  ;;  %v6696_v50 = vpack.c.bf16 %v5154_v15, %v5153_v33  ;;  %v10003_v45 = vld [vmem:[#allocation2 + $0x54] sm:$0xff]  ;;  %v13375_v15 = vstv %s9587_s14  ;;  %s10075_s14 = sld [smem:[#allocation3 + $0x74]] }
 0x17a   :  { %6668 = vmatpush1.bf16.msra.mxu1 %v6667_v37  ;;  %v2019_v58 = vadd.f32 %v2017_v35, %v2013_v47  ;;  %v2434_v32 = vmul.f32 %v9962_v9, %v2433_v11  ;;  %v2035_v37 = vmul.f32 %v9457_v4, %v13373_v21  ;;  %v5097_v35 = vld [vmem:[%s13304_s17 + $0x7a8] sm:$0xff]  ;;  %v2430_v28 = vadd.f32 %v2428_v59, %v2424_v20  ;;  %v5137_v47 = vld [vmem:[%s13304_s17 + $0x810] sm:$0xff]  ;;  %v5155_v62 = vld [vmem:[%s13304_s17 + $0x8a0] sm:$0xff] }
 0x17b   :  { %6669 = vmatprep.subr.bf16.mxu1 %v13315_v40  ;;  %v2440_v4 = vmul.f32 %v9980_v34, %v2439_v26  ;;  %v6673_v59 = vpack.c.bf16 %v5097_v35, %v5096_v22  ;;  %v2446_v33 = vmul.f32 %v10003_v45, %v2445_v23  ;;  %v2457_v20 = vstv %s9937_s8  ;;  %v10021_v35 = vld [vmem:[#allocation2 + $0x60] sm:$0xff]  ;;  %s10733_s8 = sld [smem:[#allocation3 + $0x92]] }
 0x17c   :  { %6691 = vmatpush3.bf16.msra.mxu0 %v6690_v46  ;;  %v2025_v44 = vadd.f32 %v2023_v63, %v2019_v58  ;;  %v5138_v63 = vld [vmem:[%s13304_s17 + $0x818] sm:$0xff]  ;;  %v2451_v46 = vstv %s9910_s30  ;;  %v2436_v36 = vadd.f32 %v2434_v32, %v2430_v28  ;;  %v5098_v58 = vld [vmem:[%s13304_s17 + $0x7b0] sm:$0xff]  ;;  %v6700_v28 = vpack.c.bf16 %v5156_v30, %v5155_v62  ;;  %v5139_v43 = vld [vmem:[%s13304_s17 + $0x820] sm:$0xff]  ;;  %s10371_s30 = sld [smem:[#allocation3 + $0x84]] }
 0x17d   :  { %6693 = vmatprep.subr.bf16.mxu0 %v6692_v8  ;;  %v6698_v32 = vpack.c.bf16 %v5138_v63, %v5137_v47  ;;  %v10044_v63 = vld [vmem:[#allocation2 + $0x6c] sm:$0xff]  ;;  %v5100_v30 = vld [vmem:[%s13304_s17 + $0x7c0] sm:$0xff] }
 0x17e   :  { %6671 = vmatpush1.bf16.msra.mxu1 %v6670_v52  ;;  %v2031_v8 = vadd.f32 %v2029_v3, %v2025_v44  ;;  %v2047_v52 = vmul.f32 %v9514_v19, %v13375_v15  ;;  %v5099_v3 = vld [vmem:[%s13304_s17 + $0x7b8] sm:$0xff]  ;;  %v2442_v22 = vadd.f32 %v2440_v4, %v2436_v36  ;;  %v2452_v19 = vmul.f32 %v10021_v35, %v2451_v46 }
 0x17f   :  { %6672 = vmatprep.subr.bf16.mxu1 %v13315_v40  ;;  %v2053_v44 = vmul.f32 %v9553_v1, %v2051_v18  ;;  %v6676_v4 = vpack.c.bf16 %v5099_v3, %v5098_v58  ;;  %v5157_v1 = vld [vmem:[%s13304_s17 + $0x8b0] sm:$0xff]  ;;  %v5158_v18 = vld [vmem:[%s13304_s17 + $0x8b8] sm:$0xff]  ;;  %v2458_v62 = vmul.f32 %v10044_v63, %v2457_v20  ;;  %v2065_v3 = vmul.f32 %v9602_v31, %v2063_v12 }
 0x180   :  { %6695 = vmatpush3.bf16.msra.mxu0 %v6694_v27  ;;  %v2037_v21 = vadd.f32 %v2035_v37, %v2031_v8  ;;  %v5140_v37 = vld [vmem:[%s13304_s17 + $0x828] sm:$0xff]  ;;  %v2463_v27 = vstv %s9954_s27  ;;  %v2448_v47 = vadd.f32 %v2446_v33, %v2442_v22  ;;  %v2469_v8 = vstv %s9978_s5  ;;  %s10412_s27 = sld [smem:[#allocation3 + $0x86]]  ;;  %s10437_s5 = sld [smem:[#allocation3 + $0x87]] }
 0x181   :  { %6697 = vmatprep.subr.bf16.mxu0 %v6696_v50  ;;  %v6702_v36 = vpack.c.bf16 %v5140_v37, %v5139_v43  ;;  %v2464_v58 = vmul.f32 %v9433_v57, %v2463_v27  ;;  %v5159_v43 = vld [vmem:[%s13304_s17 + $0x8c0] sm:$0xff]  ;;  %v2470_v31 = vmul.f32 %v9452_v61, %v2469_v8  ;;  %v5103_v37 = vld [vmem:[%s13304_s17 + $0x7d8] sm:$0xff] }
 0x182   :  { %6674 = vmatpush1.bf16.msra.mxu1 %v6673_v59  ;;  %v2043_v50 = vadd.f32 %v2041_v53, %v2037_v21  ;;  %v2059_v59 = vmul.f32 %v9580_v56, %v2057_v38  ;;  %v5101_v53 = vld [vmem:[%s13304_s17 + $0x7c8] sm:$0xff]  ;;  %v5141_v56 = vld [vmem:[%s13304_s17 + $0x830] sm:$0xff]  ;;  %v5142_v38 = vld [vmem:[%s13304_s17 + $0x838] sm:$0xff]  ;;  %v2454_v15 = vadd.f32 %v2452_v19, %v2448_v47  ;;  %v2475_v21 = vstv %s9995_s20  ;;  %s10455_s20 = sld [smem:[#allocation3 + $0x88]] }
 0x183   :  { %6675 = vmatprep.subr.bf16.mxu1 %v13315_v40  ;;  %v6679_v22 = vpack.c.bf16 %v5101_v53, %v5100_v30  ;;  %v6706_v12 = vpack.c.bf16 %v5142_v38, %v5141_v56  ;;  %v5179_v61 = vld [vmem:[%s13304_s17 + $0x960] sm:$0xff]  ;;  %v2476_v47 = vmul.f32 %v9490_v5, %v2475_v21  ;;  %v5144_v53 = vld [vmem:[%s13304_s17 + $0x848] sm:$0xff]  ;;  %v5161_v5 = vld [vmem:[%s13304_s17 + $0x8d0] sm:$0xff] }
 0x184   :  { %6699 = vmatpush3.bf16.msra.mxu0 %v6698_v32  ;;  %v2049_v33 = vadd.f32 %v2047_v52, %v2043_v50  ;;  %v6704_v32 = vpack.c.bf16 %v5158_v18, %v5157_v1  ;;  %v5160_v52 = vld [vmem:[%s13304_s17 + $0x8c8] sm:$0xff]  ;;  %v2460_v19 = vadd.f32 %v2458_v62, %v2454_v15  ;;  %v2157_v1 = vcombine.high %v9846_v0, %v9846_v0  ;;  %v5143_v30 = vld [vmem:[%s13304_s17 + $0x840] sm:$0xff] }
 0x185   :  { %6701 = vmatprep.subr.bf16.mxu0 %v6700_v28  ;;  %v5102_v28 = vld [vmem:[%s13304_s17 + $0x7d0] sm:$0xff]  ;;  %v6708_v62 = vpack.c.bf16 %v5160_v52, %v5159_v43  ;;  %v5182_v52 = vld [vmem:[%s13304_s17 + $0x978] sm:$0xff] }
 0x186   :  { %6677 = vmatpush1.bf16.msra.mxu1 %v6676_v4  ;;  %v2055_v57 = vadd.f32 %v2053_v44, %v2049_v33  ;;  %v2481_v44 = vstv %s10019_s26  ;;  %v5180_v4 = vld [vmem:[%s13304_s17 + $0x968] sm:$0xff]  ;;  %v2466_v50 = vadd.f32 %v2464_v58, %v2460_v19  ;;  %v6682_v0 = vpack.c.bf16 %v5103_v37, %v5102_v28  ;;  %v5163_v58 = vld [vmem:[%s13304_s17 + $0x8e0] sm:$0xff]  ;;  %v5146_v28 = vld [vmem:[%s13304_s17 + $0x858] sm:$0xff]  ;;  %s10781_s26 = sld [smem:[#allocation3 + $0x94]] }
 0x187   :  { %6678 = vmatprep.subr.bf16.mxu1 %v13315_v40  ;;  %v2482_v33 = vmul.f32 %v9509_v55, %v2481_v44  ;;  %v6716_v15 = vpack.c.bf16 %v5180_v4, %v5179_v61  ;;  %v10138_v43 = vrot.slane %v2157_v1, %v8657_v51  ;;  %v5181_v55 = vld [vmem:[%s13304_s17 + $0x970] sm:$0xff]  ;;  %v13143_v37 = vstv %s10075_s14  ;;  %v5166_v4 = vld [vmem:[%s13304_s17 + $0x8f8] sm:$0xff] }
 0x188   :  { %6703 = vmatpush3.bf16.msra.mxu0 %v6702_v36  ;;  %v2061_v18 = vadd.f32 %v2059_v59, %v2055_v57  ;;  %v2487_v36 = vstv %s10036_s18  ;;  %v5162_v59 = vld [vmem:[%s13304_s17 + $0x8d8] sm:$0xff]  ;;  %v2472_v38 = vadd.f32 %v2470_v31, %v2466_v50  ;;  %s11185_s18 = sld [smem:[#allocation3 + $0xa4]] }
 0x189   :  { %6705 = vmatprep.subr.bf16.mxu0 %v6704_v32  ;;  %v5164_v32 = vld [vmem:[%s13304_s17 + $0x8e8] sm:$0xff]  ;;  %v2488_v19 = vmul.f32 %v9548_v39, %v2487_v36  ;;  %v6712_v31 = vpack.c.bf16 %v5162_v59, %v5161_v5  ;;  %v5165_v39 = vld [vmem:[%s13304_s17 + $0x8f0] sm:$0xff]  ;;  %v5183_v5 = vld [vmem:[%s13304_s17 + $0x980] sm:$0xff] }
 0x18a   :  { %6680 = vmatpush1.bf16.msra.mxu1 %v6679_v22  ;;  %v2067_v56 = vadd.f32 %v2065_v3, %v2061_v18  ;;  %v2493_v22 = vstv %s10060_s16  ;;  %v6710_v3 = vpack.c.bf16 %v5144_v53, %v5143_v30  ;;  %v2478_v57 = vadd.f32 %v2476_v47, %v2472_v38  ;;  %v10184_v38 = vld [vmem:[#allocation2 + $0x20] sm:$0xf]  ;;  %s10524_s16 = sld [smem:[#allocation3 + $0x8b]] }
 0x18b   :  { %6681 = vmatprep.subr.bf16.mxu1 %v13315_v40  ;;  %v6718_v61 = vpack.c.bf16 %v5164_v32, %v5163_v58  ;;  %v2494_v50 = vmul.f32 %v9575_v25, %v2493_v22  ;;  %v2899_v47 = vstv %s10086_s9  ;;  %v13142_v30 = vstv %s10096_s23  ;;  %v5184_v25 = vld [vmem:[%s13304_s17 + $0x988] sm:$0xff]  ;;  %v5195_v58 = vld [vmem:[%s13304_s17 + $0x9e0] sm:$0xff]  ;;  %s10396_s9 = sld [smem:[#allocation3 + $0x85]] }
 0x18c   :  { %6707 = vmatpush3.bf16.msra.mxu0 %v6706_v12  ;;  %v5145_v12 = vld [vmem:[%s13304_s17 + $0x850] sm:$0xff]  ;;  %v2069_v1 = vmax.f32 %v2067_v56, 0.0  ;;  %v2484_v18 = vadd.f32 %v2482_v33, %v2478_v57  ;;  %v2173_v53 = vcombine.high %v10138_v43, %v10138_v43  ;;  %v2500_v56 = vmul.f32 %v9597_v42, %v13143_v37  ;;  %v5196_v42 = vld [vmem:[%s13304_s17 + $0x9e8] sm:$0xff] }
 0x18d   :  { %6709 = vmatprep.subr.bf16.mxu0 %v6708_v62  ;;  %v6720_v62 = vpack.c.bf16 %v5182_v52, %v5181_v55  ;;  %v2901_v33 = vmul.f32 %v10184_v38, %v2899_v47  ;;  %v13141_v32 = vstv %s10116_s12  ;;  %v5168_v55 = vld [vmem:[%s13304_s17 + $0x908] sm:$0xff]  ;;  %v2529_v37 = vstv %s10169_s10  ;;  %s10709_s10 = sld [smem:[#allocation3 + $0x91]] }
 0x18e   :  { %6683 = vmatpush1.bf16.msra.mxu1 %v6682_v0  ;;  %v6714_v0 = vpack.c.bf16 %v5146_v28, %v5145_v12  ;;  %v2490_v59 = vadd.f32 %v2488_v19, %v2484_v18  ;;  %v13376_v57 = vld [vmem:[#allocation57_spill] sm:$0xff]  ;;  %v2517_v28 = vstv %s10135_s24  ;;  %s11031_s24 = sld [smem:[#allocation3 + $0x9d]] }
 0x18f   :  { %6717 = vmatprep.subr.bf16.mxu1 %v6716_v15  ;;  %v6722_v15 = vpack.c.bf16 %v5166_v4, %v5165_v39  ;;  %v2506_v19 = vmul.f32 %v13376_v57, %v13142_v30  ;;  %v5197_v12 = vld [vmem:[%s13304_s17 + $0x9f0] sm:$0xff]  ;;  %v5198_v39 = vld [vmem:[%s13304_s17 + $0x9f8] sm:$0xff] }
 0x190   :  { %6711 = vmatpush3.bf16.msra.mxu0 %v6710_v3  ;;  %v10198_v3 = vrot.slane %v2069_v1, %v8657_v51  ;;  %v2496_v52 = vadd.f32 %v2494_v50, %v2490_v59  ;;  %v5185_v4 = vld [vmem:[%s13304_s17 + $0x990] sm:$0xff]  ;;  %v5186_v1 = vld [vmem:[%s13304_s17 + $0x998] sm:$0xff]  ;;  %v2523_v59 = vstv %s10156_s7  ;;  %s11729_s7 = sld [smem:[#allocation3 + $0xbe]] }
 0x191   :  { %1910 = vmatmul.mubr.f32.vlgmr.msra.gmra.mrb[8].mxu1 %v9743_v41  ;;  %6713 = vmatprep.subr.bf16.mxu0 %v6712_v31  ;;  %v5167_v41 = vld [vmem:[%s13304_s17 + $0x900] sm:$0xff]  ;;  %v6724_v31 = vpack.c.bf16 %v5184_v25, %v5183_v5  ;;  %v13377_v50 = vld [vmem:[#allocation58_spill] sm:$0xff] }
 0x192   :  { %6719 = vmatpush3.bf16.msra.mxu1 %v6718_v61  ;;  %2323 = vmatprep.mubr.f32.mxu1 %v2173_v53  ;;  %v6749_v61 = vpack.c.bf16 %v5196_v42, %v5195_v58  ;;  %v2502_v18 = vadd.f32 %v2500_v56, %v2496_v52  ;;  %v13378_v53 = vld [vmem:[#allocation43_spill] sm:$0xff]  ;;  %v6726_v5 = vpack.c.bf16 %v5168_v55, %v5167_v41  ;;  %v10245_v58 = vld [vmem:[%s13304_s17 + $0xa00] sm:$0xff] }
 0x193   :  { %6721 = vmatprep.subr.bf16.mxu1 %v6720_v62  ;;  %v2512_v62 = vmul.f32 %v13377_v50, %v13141_v32  ;;  %v5169_v25 = vld [vmem:[%s13304_s17 + $0x910] sm:$0xff]  ;;  %v2181_v56 = vcombine.high %v10198_v3, %v10198_v3  ;;  %v10250_v42 = vld [vmem:[%s13304_s17 + $0xa08] sm:$0xff]  ;;  %v13379_v52 = vld [vmem:[#allocation59_spill] sm:$0xff]  ;;  %v6752_v50 = vpack.c.bf16 %v5198_v39, %v5197_v12  ;;  %v2535_v12 = vstv %s10182_s19  ;;  %s11328_s19 = sld [smem:[#allocation3 + $0xac]] }
 0x194   :  { %6715 = vmatpush3.bf16.msra.mxu0 %v6714_v0  ;;  %v10228_v0 = vadd.f32 %v2901_v33, %v13378_v53  ;;  %v5170_v33 = vld [vmem:[%s13304_s17 + $0x918] sm:$0xff]  ;;  %v10252_v41 = vld [vmem:[#allocation2 + $0x2c] sm:$0xf]  ;;  %v2508_v55 = vadd.f32 %v2506_v19, %v2502_v18  ;;  %v2518_v57 = vmul.f32 %v13379_v52, %v2517_v28  ;;  %v6728_v53 = vpack.c.bf16 %v5186_v1, %v5185_v4  ;;  %v10292_v1 = vld [vmem:[#allocation2 + $0x44] sm:$0xf] }
 0x195   :  { %6748 = vmatprep.subr.bf16.mxu0 %v13315_v40  ;;  %v10261_v32 = vld [vmem:[#allocation2 + $0x38] sm:$0xf]  ;;  %v6730_v39 = vpack.c.bf16 %v5170_v33, %v5169_v25  ;;  %v6755_v4 = vpack.c.bf16 %v10250_v42, %v10245_v58  ;;  %v2435_v18 = vmul.f32 %v10292_v1, %v2433_v11  ;;  %v2530_v25 = vmul.f32 %v9711_v6, %v2529_v37  ;;  %v5201_v33 = vld [vmem:[%s13304_s17 + $0xa10] sm:$0xff] }
 0x196   :  { %6723 = vmatpush3.bf16.msra.mxu1 %v6722_v15  ;;  %v2423_v15 = vmul.f32 %v10252_v41, %v2421_v10  ;;  %v2429_v30 = vmul.f32 %v10261_v32, %v2427_v60  ;;  %v5187_v10 = vld [vmem:[%s13304_s17 + $0x9a0] sm:$0xff]  ;;  %v2514_v19 = vadd.f32 %v2512_v62, %v2508_v55  ;;  %v13381_v60 = vstv %s13380_s2  ;;  %v10304_v58 = vld [vmem:[#allocation2 + $0x50] sm:$0xf]  ;;  %s10575_s2 = sld [smem:[#allocation3 + $0x8d]] }
 0x197   :  { %2254 = vmatmul.mubr.f32.vlgmr.msra.gmra.mrb[8].mxu0 %v9877_v49  ;;  %6725 = vmatprep.subr.bf16.mxu1 %v6724_v31  ;;  %v5188_v49 = vld [vmem:[%s13304_s17 + $0x9a8] sm:$0xff]  ;;  %v2524_v31 = vmul.f32 %v9696_v13, %v2523_v59  ;;  %v5171_v13 = vld [vmem:[%s13304_s17 + $0x920] sm:$0xff]  ;;  %v2441_v11 = vmul.f32 %v10304_v58, %v2439_v26  ;;  %v2536_v42 = vmul.f32 %v9733_v2, %v2535_v12  ;;  %v2541_v6 = vstv %s10213_s0  ;;  %v5190_v26 = vld [vmem:[%s13304_s17 + $0x9b8] sm:$0xff]  ;;  %s13408_s0 = sld [smem:[#allocation28_spill]] }
 0x198   :  { %6750 = vmatpush1.bf16.msra.mxu0 %v6749_v61  ;;  %5215 = vmatprep.mubr.msk.f32.mxu0 %vm975_vm2, %v2181_v56  ;;  %v2888_v61 = vmul.f32 %v9809_v17, %v13381_v60  ;;  %v5172_v17 = vld [vmem:[%s13304_s17 + $0x928] sm:$0xff]  ;;  %v2520_v62 = vadd.f32 %v2518_v57, %v2514_v19  ;;  %v6732_v56 = vpack.c.bf16 %v5188_v49, %v5187_v10  ;;  %v13384_v52 = vstv %s13382_s15  ;;  %v5173_v19 = vld [vmem:[%s13304_s17 + $0x930] sm:$0xff]  ;;  %s10502_s15 = sld [smem:[#allocation3 + $0x8a]] }
 0x199   :  { %6751 = vmatprep.subr.bf16.mxu0 %v13315_v40  ;;  %v6734_v10 = vpack.c.bf16 %v5172_v17, %v5171_v13  ;;  %v2547_v49 = vstv %s10235_s11  ;;  %s11165_s11 = sld [smem:[#allocation3 + $0xa3]] }
 0x19a   :  { %6727 = vmatpush3.bf16.msra.mxu1 %v6726_v5  ;;  %v2425_v5 = vadd.f32 %v2423_v15, %v9821_v48  ;;  %v5202_v48 = vld [vmem:[%s13304_s17 + $0xa18] sm:$0xff]  ;;  %v5189_v15 = vld [vmem:[%s13304_s17 + $0x9b0] sm:$0xff]  ;;  %v2526_v55 = vadd.f32 %v2524_v31, %v2520_v62  ;;  %v2890_v57 = vadd.f32 %v2888_v61, %v13384_v52  ;;  %v2542_v61 = vmul.f32 %v9751_v7, %v2541_v6  ;;  %v5203_v62 = vld [vmem:[%s13304_s17 + $0xa20] sm:$0xff] }
 0x19b   :  { %6729 = vmatprep.subr.bf16.mxu1 %v6728_v53  ;;  %v13385_v53 = vstv %s13383_s28  ;;  %v10339_v31 = vld [vmem:[#allocation2 + $0x5c] sm:$0xf]  ;;  %v6736_v17 = vpack.c.bf16 %v5190_v26, %v5189_v15  ;;  %v5204_v7 = vld [vmem:[%s13304_s17 + $0xa28] sm:$0xff]  ;;  %v10373_v15 = vld [vmem:[#allocation2 + $0x74] sm:$0xf]  ;;  %s10471_s28 = sld [smem:[#allocation3 + $0x98]] }
 0x19c   :  { %6753 = vmatpush1.bf16.msra.mxu0 %v6752_v50  ;;  %v2431_v2 = vadd.f32 %v2429_v30, %v2425_v5  ;;  %v2894_v50 = vmul.f32 %v9850_v29, %v13385_v53  ;;  %v5174_v30 = vld [vmem:[%s13304_s17 + $0x938] sm:$0xff]  ;;  %v2447_v29 = vmul.f32 %v10339_v31, %v2445_v23  ;;  %v2532_v60 = vadd.f32 %v2530_v25, %v2526_v55  ;;  %v10350_v5 = vld [vmem:[#allocation2 + $0x68] sm:$0xf]  ;;  %v5191_v23 = vld [vmem:[%s13304_s17 + $0x9c0] sm:$0xff] }
 0x19d   :  { %6754 = vmatprep.subr.bf16.mxu0 %v13315_v40  ;;  %v2453_v52 = vmul.f32 %v10350_v5, %v2451_v46  ;;  %v2548_v46 = vmul.f32 %v9772_v16, %v2547_v49  ;;  %v2459_v26 = vmul.f32 %v10373_v15, %v2457_v20  ;;  %v2900_v16 = vmul.f32 %v9895_v54, %v2899_v47  ;;  %v5176_v53 = vld [vmem:[%s13304_s17 + $0x948] sm:$0xff]  ;;  %v5205_v20 = vld [vmem:[%s13304_s17 + $0xa30] sm:$0xff] }
 0x19e   :  { %6731 = vmatpush3.bf16.msra.mxu1 %v6730_v39  ;;  %v2437_v13 = vadd.f32 %v2435_v18, %v2431_v2  ;;  %v6758_v39 = vpack.c.bf16 %v5202_v48, %v5201_v33  ;;  %v5192_v18 = vld [vmem:[%s13304_s17 + $0x9c8] sm:$0xff]  ;;  %v2538_v25 = vadd.f32 %v2536_v42, %v2532_v60  ;;  %v2896_v33 = vadd.f32 %v2894_v50, %v2890_v57  ;;  %v5175_v57 = vld [vmem:[%s13304_s17 + $0x940] sm:$0xff] }
 0x19f   :  { %6733 = vmatprep.subr.bf16.mxu1 %v6732_v56  ;;  %v13156_v48 = vstv %s10284_s3  ;;  %v6740_v2 = vpack.c.bf16 %v5192_v18, %v5191_v23  ;;  %v10390_v50 = vld [vmem:[#allocation2 + $0x80] sm:$0xf]  ;;  %v13155_v47 = vstv %s10313_s4 }
 0x1a0   :  { %6756 = vmatpush1.bf16.msra.mxu0 %v6755_v4  ;;  %v2443_v56 = vadd.f32 %v2441_v11, %v2437_v13  ;;  %v6738_v4 = vpack.c.bf16 %v5174_v30, %v5173_v19  ;;  %v2544_v42 = vadd.f32 %v2542_v61, %v2538_v25  ;;  %v6761_v11 = vpack.c.bf16 %v5204_v7, %v5203_v62  ;;  %v5193_v19 = vld [vmem:[%s13304_s17 + $0x9d0] sm:$0xff]  ;;  %v5194_v30 = vld [vmem:[%s13304_s17 + $0x9d8] sm:$0xff] }
 0x1a1   :  { %6757 = vmatprep.subr.bf16.mxu0 %v13315_v40  ;;  %v2465_v54 = vmul.f32 %v10390_v50, %v2463_v27  ;;  %v2902_v60 = vadd.f32 %v2900_v16, %v2896_v33  ;;  %v2906_v61 = vmul.f32 %v9920_v14, %v13156_v48  ;;  %v13153_v13 = vstv %s10331_s25  ;;  %v5178_v62 = vld [vmem:[%s13304_s17 + $0x958] sm:$0xff] }
 0x1a2   :  { %6735 = vmatpush3.bf16.msra.mxu1 %v6734_v10  ;;  %v2449_v55 = vadd.f32 %v2447_v29, %v2443_v56  ;;  %v5206_v10 = vld [vmem:[%s13304_s17 + $0xa38] sm:$0xff]  ;;  %v2550_v29 = vadd.f32 %v2548_v46, %v2544_v42  ;;  %v2912_v23 = vmul.f32 %v9939_v24, %v13155_v47  ;;  %v6744_v25 = vpack.c.bf16 %v5194_v30, %v5193_v19  ;;  %v5207_v46 = vld [vmem:[%s13304_s17 + $0xa40] sm:$0xff]  ;;  %v5208_v24 = vld [vmem:[%s13304_s17 + $0xa48] sm:$0xff] }
 0x1a3   :  { %6737 = vmatprep.subr.bf16.mxu1 %v6736_v17  ;;  %v5177_v17 = vld [vmem:[%s13304_s17 + $0x950] sm:$0xff]  ;;  %v6764_v18 = vpack.c.bf16 %v5206_v10, %v5205_v20  ;;  %v10431_v56 = vld [vmem:[#allocation2 + $0x98] sm:$0xf]  ;;  %v2918_v16 = vmul.f32 %v9962_v9, %v13153_v13  ;;  %v10463_v20 = vld [vmem:[#allocation2 + $0xa4] sm:$0xf]  ;;  %v6767_v30 = vpack.c.bf16 %v5208_v24, %v5207_v46 }
 0x1a4   :  { %6759 = vmatpush1.bf16.msra.mxu0 %v6758_v39  ;;  %v2455_v27 = vadd.f32 %v2453_v52, %v2449_v55  ;;  %v6742_v39 = vpack.c.bf16 %v5176_v53, %v5175_v57  ;;  %v10420_v52 = vld [vmem:[#allocation2 + $0x8c] sm:$0xf]  ;;  %v2477_v33 = vmul.f32 %v10431_v56, %v2475_v21  ;;  %v10448_v42 = vmax.f32 %v2550_v29, 0.0  ;;  %v5242_v57 = vld [vmem:[%s13304_s17 + $0xa80] sm:$0xff] }
 0x1a5   :  { %6760 = vmatprep.subr.bf16.mxu0 %v13315_v40  ;;  %v2471_v14 = vmul.f32 %v10420_v52, %v2469_v8  ;;  %v5258_v8 = vld [vmem:[%s13304_s17 + $0xb00] sm:$0xff]  ;;  %v2908_v55 = vadd.f32 %v2906_v61, %v2902_v60  ;;  %v5243_v53 = vld [vmem:[%s13304_s17 + $0xa88] sm:$0xff]  ;;  %v2483_v9 = vmul.f32 %v10463_v20, %v2481_v44  ;;  %v5209_v44 = vld [vmem:[%s13304_s17 + $0xa50] sm:$0xff]  ;;  %v13147_v61 = vstv %s10396_s9 }
 0x1a6   :  { %6739 = vmatpush3.bf16.msra.mxu1 %v6738_v4  ;;  %v2461_v7 = vadd.f32 %v2459_v26, %v2455_v27  ;;  %v13152_v4 = vstv %s10355_s13  ;;  %v5259_v26 = vld [vmem:[%s13304_s17 + $0xb08] sm:$0xff]  ;;  %v10473_v27 = vld [vmem:[#allocation2 + $0xb0] sm:$0xf] }
 0x1a7   :  { %6741 = vmatprep.subr.bf16.mxu1 %v6740_v2  ;;  %v13148_v2 = vstv %s10371_s30  ;;  %v2914_v10 = vadd.f32 %v2912_v23, %v2908_v55  ;;  %v2924_v19 = vmul.f32 %v9980_v34, %v13152_v4  ;;  %v6778_v29 = vpack.c.bf16 %v5259_v26, %v5258_v8  ;;  %v10698_v4 = vld [vmem:[#allocation2 + $0x11c] sm:$0xf] }
 0x1a8   :  { %6762 = vmatpush1.bf16.msra.mxu0 %v6761_v11  ;;  %v2467_v21 = vadd.f32 %v2465_v54, %v2461_v7  ;;  %v6746_v11 = vpack.c.bf16 %v5178_v62, %v5177_v17  ;;  %v2489_v60 = vmul.f32 %v10473_v27, %v2487_v36  ;;  %v10486_v34 = vrot.slane %v10448_v42, %v8657_v51  ;;  %v5260_v36 = vld [vmem:[%s13304_s17 + $0xb10] sm:$0xff]  ;;  %v5261_v17 = vld [vmem:[%s13304_s17 + $0xb18] sm:$0xff] }
 0x1a9   :  { %6763 = vmatprep.subr.bf16.mxu0 %v13315_v40  ;;  %v2930_v7 = vmul.f32 %v10003_v45, %v13148_v2  ;;  %v6780_v23 = vpack.c.bf16 %v5243_v53, %v5242_v57  ;;  %v5245_v45 = vld [vmem:[%s13304_s17 + $0xa98] sm:$0xff]  ;;  %v2936_v26 = vmul.f32 %v10021_v35, %v13147_v61  ;;  %v13386_v55 = vstv %s10075_s14  ;;  %v5262_v35 = vld [vmem:[%s13304_s17 + $0xb20] sm:$0xff]  ;;  %s10608_s14 = sld [smem:[#allocation3 + $0x8e]] }
 0x1aa   :  { %6743 = vmatpush3.bf16.msra.mxu1 %v6742_v39  ;;  %v2473_v54 = vadd.f32 %v2471_v14, %v2467_v21  ;;  %v5210_v39 = vld [vmem:[%s13304_s17 + $0xa58] sm:$0xff]  ;;  %v2920_v14 = vadd.f32 %v2918_v16, %v2914_v10  ;;  %v10518_v21 = vld [vmem:[#allocation2 + $0xc8] sm:$0xf]  ;;  %v13144_v57 = vstv %s10437_s5  ;;  %v2656_v53 = vcombine.high %v10486_v34, %v10486_v34 }
 0x1ab   :  { %6745 = vmatprep.subr.bf16.mxu1 %v6744_v25  ;;  %v10504_v25 = vld [vmem:[#allocation2 + $0xbc] sm:$0xf]  ;;  %v6770_v16 = vpack.c.bf16 %v5210_v39, %v5209_v44  ;;  %v10633_v61 = vld [vmem:[#allocation2 + $0xf8] sm:$0xf]  ;;  %v2543_v13 = vmul.f32 %v10698_v4, %v2541_v6  ;;  %v5268_v6 = vld [vmem:[%s13304_s17 + $0xb50] sm:$0xff] }
 0x1ac   :  { %6765 = vmatpush1.bf16.msra.mxu0 %v6764_v18  ;;  %v2479_v62 = vadd.f32 %v2477_v33, %v2473_v54  ;;  %v13146_v18 = vstv %s10412_s27  ;;  %v2495_v46 = vmul.f32 %v10504_v25, %v2493_v22  ;;  %v5244_v33 = vld [vmem:[%s13304_s17 + $0xa90] sm:$0xff]  ;;  %v2926_v8 = vadd.f32 %v2924_v19, %v2920_v14 }
 0x1ad   :  { %6766 = vmatprep.subr.bf16.mxu0 %v13315_v40  ;;  %v2501_v22 = vmul.f32 %v10518_v21, %v13386_v55  ;;  %v2942_v19 = vmul.f32 %v10044_v63, %v13146_v18  ;;  %v6784_v39 = vpack.c.bf16 %v5245_v45, %v5244_v33  ;;  %v5212_v63 = vld [vmem:[%s13304_s17 + $0xa68] sm:$0xff]  ;;  %v10569_v45 = vld [vmem:[#allocation2 + $0xe0] sm:$0xf]  ;;  %v2525_v2 = vmul.f32 %v10633_v61, %v2523_v59 }
 0x1ae   :  { %6747 = vmatpush3.bf16.msra.mxu1 %v6746_v11  ;;  %v2485_v24 = vadd.f32 %v2483_v9, %v2479_v62  ;;  %v6782_v11 = vpack.c.bf16 %v5261_v17, %v5260_v36  ;;  %v5263_v9 = vld [vmem:[%s13304_s17 + $0xb28] sm:$0xff]  ;;  %v2932_v10 = vadd.f32 %v2930_v7, %v2926_v8  ;;  %v10556_v36 = vld [vmem:[%s13304_s17 + $0xaa0] sm:$0xff]  ;;  %v10563_v7 = vld [vmem:[#allocation2 + $0x78] sm:$0xff] }
 0x1af   :  { %6779 = vmatprep.subr.bf16.mxu1 %v6778_v29  ;;  %v13387_v29 = vstv %s10096_s23  ;;  %v10561_v17 = vld [vmem:[%s13304_s17 + $0xaa8] sm:$0xff]  ;;  %v2948_v33 = vmul.f32 %v10563_v7, %v13144_v57  ;;  %v6786_v55 = vpack.c.bf16 %v5263_v9, %v5262_v35  ;;  %13389 = sst [smem:[#allocation35_spill]] %s10608_s14  ;;  %s10804_s23 = sld [smem:[#allocation3 + $0x95]] }
 0x1b0   :  { %6768 = vmatpush1.bf16.msra.mxu0 %v6767_v30  ;;  %v2491_v54 = vadd.f32 %v2489_v60, %v2485_v24  ;;  %v10538_v30 = vld [vmem:[#allocation2 + $0xd4] sm:$0xf]  ;;  %v5211_v60 = vld [vmem:[%s13304_s17 + $0xa60] sm:$0xff]  ;;  %v2938_v14 = vadd.f32 %v2936_v26, %v2932_v10  ;;  %v13388_v24 = vstv %s10116_s12  ;;  %v10588_v35 = vld [vmem:[#allocation2 + $0xec] sm:$0xf]  ;;  %v6788_v9 = vpack.c.bf16 %v10561_v17, %v10556_v36  ;;  %s10760_s12 = sld [smem:[#allocation3 + $0x93]] }
 0x1b1   :  { %2324 = vmatmul.mubr.f32.vlgmr.msra.gmra.mrb[10].mxu1 %v10138_v43  ;;  %v2507_v44 = vmul.f32 %v10538_v30, %v13387_v29  ;;  %6769 = vmatprep.subr.bf16.mxu0 %v13315_v40  ;;  %v13145_v43 = vstv %s10455_s20  ;;  %v2513_v8 = vmul.f32 %v10569_v45, %v13388_v24  ;;  %v5264_v26 = vld [vmem:[%s13304_s17 + $0xb30] sm:$0xff]  ;;  %v10583_v57 = vld [vmem:[#allocation2 + $0x84] sm:$0xff] }
 0x1b2   :  { %6781 = vmatpush3.bf16.msra.mxu1 %v6780_v23  ;;  %2737 = vmatprep.mubr.f32.mxu1 %v2656_v53  ;;  %v2497_v62 = vadd.f32 %v2495_v46, %v2491_v54  ;;  %v13149_v23 = vstv %s10471_s28  ;;  %v13150_v53 = vstv %s10482_s29  ;;  %v6773_v46 = vpack.c.bf16 %v5212_v63, %v5211_v60  ;;  %v5265_v54 = vld [vmem:[%s13304_s17 + $0xb38] sm:$0xff]  ;;  %v5290_v36 = vld [vmem:[%s13304_s17 + $0xc00] sm:$0xff] }
 0x1b3   :  { %6783 = vmatprep.subr.bf16.mxu1 %v6782_v11  ;;  %v2944_v29 = vadd.f32 %v2942_v19, %v2938_v14  ;;  %v2954_v11 = vmul.f32 %v10583_v57, %v13145_v43  ;;  %v5214_v19 = vld [vmem:[%s13304_s17 + $0xa78] sm:$0xff]  ;;  %v13151_v60 = vstv %s10502_s15  ;;  %v5291_v17 = vld [vmem:[%s13304_s17 + $0xc08] sm:$0xff]  ;;  %v10623_v43 = vld [vmem:[#allocation2 + $0x90] sm:$0xff]  ;;  %v10631_v18 = vmul.f32 %v10184_v38, %v13149_v23 }
 0x1b4   :  { %6771 = vmatpush1.bf16.msra.mxu0 %v6770_v16  ;;  %v2503_v10 = vadd.f32 %v2501_v22, %v2497_v62  ;;  %v2519_v16 = vmul.f32 %v10588_v35, %v2517_v28  ;;  %v5213_v22 = vld [vmem:[%s13304_s17 + $0xa70] sm:$0xff]  ;;  %v10613_v63 = vld [vmem:[%s13304_s17 + $0xab8] sm:$0xff]  ;;  %v2641_v62 = vcombine.high %v10448_v42, %v10448_v42  ;;  %v6790_v42 = vpack.c.bf16 %v5265_v54, %v5264_v26  ;;  %v5267_v38 = vld [vmem:[%s13304_s17 + $0xb48] sm:$0xff] }
 0x1b5   :  { %6772 = vmatprep.subr.bf16.mxu0 %v13315_v40  ;;  %v10605_v28 = vld [vmem:[%s13304_s17 + $0xab0] sm:$0xff]  ;;  %v2950_v24 = vadd.f32 %v2948_v33, %v2944_v29  ;;  %v6776_v33 = vpack.c.bf16 %v5214_v19, %v5213_v22  ;;  %v6810_v54 = vpack.c.bf16 %v5291_v17, %v5290_v36  ;;  %v13157_v22 = vstv %s10551_s6  ;;  %v5293_v36 = vld [vmem:[%s13304_s17 + $0xc18] sm:$0xff] }
 0x1b6   :  { %6785 = vmatpush3.bf16.msra.mxu1 %v6784_v39  ;;  %v2509_v14 = vadd.f32 %v2507_v44, %v2503_v10  ;;  %v2960_v39 = vmul.f32 %v10623_v43, %v13150_v53  ;;  %v13154_v44 = vstv %s10524_s16  ;;  %v5266_v10 = vld [vmem:[%s13304_s17 + $0xb40] sm:$0xff]  ;;  %v6792_v26 = vpack.c.bf16 %v10613_v63, %v10605_v28  ;;  %v10680_v28 = vld [vmem:[%s13304_s17 + $0xac8] sm:$0xff]  ;;  %v5292_v63 = vld [vmem:[%s13304_s17 + $0xc10] sm:$0xff] }
 0x1b7   :  { %6787 = vmatprep.subr.bf16.mxu1 %v6786_v55  ;;  %v2956_v23 = vadd.f32 %v2954_v11, %v2950_v24  ;;  %v10647_v53 = vld [vmem:[#allocation2 + $0x9c] sm:$0xff]  ;;  %v10652_v55 = vld [vmem:[#allocation2 + $0x104] sm:$0xf]  ;;  %v5275_v11 = vld [vmem:[%s13304_s17 + $0xb88] sm:$0xff]  ;;  %v10675_v19 = vrot.slane %v2641_v62, %v8657_v51  ;;  %v6814_v48 = vpack.c.bf16 %v5293_v36, %v5292_v63 }
 0x1b8   :  { %6774 = vmatpush1.bf16.msra.mxu0 %v6773_v46  ;;  %v2515_v29 = vadd.f32 %v2513_v8, %v2509_v14  ;;  %v2966_v59 = vmul.f32 %v10647_v53, %v13151_v60  ;;  %v2531_v46 = vmul.f32 %v10652_v55, %v2529_v37  ;;  %v5274_v8 = vld [vmem:[%s13304_s17 + $0xb80] sm:$0xff]  ;;  %v10693_v24 = vld [vmem:[#allocation2 + $0x110] sm:$0xf] }
 0x1b9   :  { %6775 = vmatprep.subr.bf16.mxu0 %v13315_v40  ;;  %v10669_v37 = vld [vmem:[%s13304_s17 + $0xac0] sm:$0xff]  ;;  %v2962_v14 = vadd.f32 %v2960_v39, %v2956_v23  ;;  %v2537_v60 = vmul.f32 %v10693_v24, %v2535_v12  ;;  %v10706_v23 = vld [vmem:[%s13304_s17 + $0xb90] sm:$0xff]  ;;  %v6812_v12 = vpack.c.bf16 %v5275_v11, %v5274_v8  ;;  %v10725_v8 = vld [vmem:[#allocation2 + $0x128] sm:$0xf]  ;;  %v13161_v39 = vstv %s10608_s14  ;;  %s11303_s14 = sld [smem:[#allocation3 + $0xaa]] }
 0x1ba   :  { %6789 = vmatpush3.bf16.msra.mxu1 %v6788_v9  ;;  %v2521_v17 = vadd.f32 %v2519_v16, %v2515_v29  ;;  %v10688_v9 = vld [vmem:[#allocation2 + $0xa8] sm:$0xff]  ;;  %v6794_v16 = vpack.c.bf16 %v5267_v38, %v5266_v10  ;;  %v5277_v29 = vld [vmem:[%s13304_s17 + $0xb98] sm:$0xff]  ;;  %v2549_v11 = vmul.f32 %v10725_v8, %v2547_v49  ;;  %v6796_v47 = vpack.c.bf16 %v10680_v28, %v10669_v37  ;;  %v10743_v37 = vld [vmem:[#allocation2 + $0xc0] sm:$0xff] }
 0x1bb   :  { %v2972_v62 = vmul.f32 %v10688_v9, %v13154_v44  ;;  %6791 = vmatprep.subr.bf16.mxu1 %v6790_v42  ;;  %v5269_v42 = vld [vmem:[%s13304_s17 + $0xb58] sm:$0xff]  ;;  %v2968_v38 = vadd.f32 %v2966_v59, %v2962_v14  ;;  %v5294_v59 = vld [vmem:[%s13304_s17 + $0xc20] sm:$0xff]  ;;  %v5295_v49 = vld [vmem:[%s13304_s17 + $0xc28] sm:$0xff]  ;;  %v13391_v28 = vstv %s10575_s2 }
 0x1bc   :  { %6777 = vmatpush1.bf16.msra.mxu0 %v6776_v33  ;;  %v2527_v10 = vadd.f32 %v2525_v2, %v2521_v17  ;;  %v10720_v44 = vld [vmem:[#allocation2 + $0xb4] sm:$0xff]  ;;  %v2657_v2 = vcombine.high %v10675_v19, %v10675_v19  ;;  %v2984_v63 = vmul.f32 %v10743_v37, %v13391_v28  ;;  %v6798_v36 = vpack.c.bf16 %v5269_v42, %v5268_v6  ;;  %v5271_v6 = vld [vmem:[%s13304_s17 + $0xb68] sm:$0xff] }
 0x1bd   :  { %v2978_v33 = vmul.f32 %v10720_v44, %v13157_v22  ;;  %6811 = vmatprep.subr.bf16.mxu0 %v6810_v54  ;;  %v2974_v17 = vadd.f32 %v2972_v62, %v2968_v38  ;;  %v5252_v14 = vld [vmem:[%s13304_s17 + $0xad0] sm:$0xff]  ;;  %v5278_v62 = vld [vmem:[%s13304_s17 + $0xba0] sm:$0xff] }
 0x1be   :  { %6793 = vmatpush3.bf16.msra.mxu1 %v6792_v26  ;;  %v2533_v54 = vadd.f32 %v2531_v46, %v2527_v10  ;;  %v6816_v26 = vpack.c.bf16 %v5277_v29, %v10706_v23  ;;  %v5253_v46 = vld [vmem:[%s13304_s17 + $0xad8] sm:$0xff]  ;;  %v13160_v10 = vstv %s10639_s21  ;;  %v5279_v23 = vld [vmem:[%s13304_s17 + $0xba8] sm:$0xff]  ;;  %v5270_v29 = vld [vmem:[%s13304_s17 + $0xb60] sm:$0xff]  ;;  %s11243_s21 = sld [smem:[#allocation3 + $0xa7]] }
 0x1bf   :  { %2394 = vmatmul.mubr.f32.vlgmr.msra.gmra.mrb[10].mxu0 %v10198_v3  ;;  %6795 = vmatprep.subr.bf16.mxu1 %v6794_v16  ;;  %v13392_v3 = vld [vmem:[#allocation44_spill] sm:$0xff]  ;;  %v2980_v38 = vadd.f32 %v2978_v33, %v2974_v17  ;;  %v10775_v28 = vld [vmem:[#allocation2 + $0xcc] sm:$0xff] }
 0x1c0   :  { %v10764_v16 = vadd.f32 %v10631_v18, %v13392_v3  ;;  %6813 = vmatpush3.bf16.msra.mxu0 %v6812_v12  ;;  %2807 = vmatprep.mubr.f32.mxu0 %v2657_v2  ;;  %v2539_v42 = vadd.f32 %v2537_v60, %v2533_v54  ;;  %v2990_v18 = vmul.f32 %v10775_v28, %v13161_v39  ;;  %v13162_v2 = vstv %s10672_s22  ;;  %v5296_v22 = vld [vmem:[%s13304_s17 + $0xc30] sm:$0xff]  ;;  %v5297_v60 = vld [vmem:[%s13304_s17 + $0xc38] sm:$0xff] }
 0x1c1   :  { %6815 = vmatprep.subr.bf16.mxu0 %v6814_v48  ;;  %v6818_v12 = vpack.c.bf16 %v5295_v49, %v5294_v59  ;;  %v6800_v3 = vpack.c.bf16 %v5253_v46, %v5252_v14  ;;  %v2986_v54 = vadd.f32 %v2984_v63, %v2980_v38  ;;  %v10789_v17 = vld [vmem:[#allocation2 + $0xd8] sm:$0xff]  ;;  %v6802_v59 = vpack.c.bf16 %v5271_v6, %v5270_v29  ;;  %v5254_v49 = vld [vmem:[%s13304_s17 + $0xae0] sm:$0xff]  ;;  %v5255_v14 = vld [vmem:[%s13304_s17 + $0xae8] sm:$0xff] }
 0x1c2   :  { %13393 = vst [vmem:[#allocation57_spill] sm:$0xff] %v10764_v16  ;;  %6797 = vmatpush3.bf16.msra.mxu1 %v6796_v47  ;;  %v2545_v33 = vadd.f32 %v2543_v13, %v2539_v42  ;;  %v2996_v48 = vmul.f32 %v10789_v17, %v13160_v10  ;;  %v6820_v47 = vpack.c.bf16 %v5279_v23, %v5278_v62  ;;  %v5280_v13 = vld [vmem:[%s13304_s17 + $0xbb0] sm:$0xff]  ;;  %v5273_v62 = vld [vmem:[%s13304_s17 + $0xb78] sm:$0xff]  ;;  %v13394_v29 = vstv %s10284_s3  ;;  %s11645_s3 = sld [smem:[#allocation3 + $0xbb]] }
 0x1c3   :  { %6799 = vmatprep.subr.bf16.mxu1 %v6798_v36  ;;  %v5281_v36 = vld [vmem:[%s13304_s17 + $0xbb8] sm:$0xff]  ;;  %v5272_v46 = vld [vmem:[%s13304_s17 + $0xb70] sm:$0xff]  ;;  %v2907_v6 = vmul.f32 %v10252_v41, %v13394_v29  ;;  %v2992_v42 = vadd.f32 %v2990_v18, %v2986_v54  ;;  %v6822_v10 = vpack.c.bf16 %v5297_v60, %v5296_v22  ;;  %v5298_v18 = vld [vmem:[%s13304_s17 + $0xc40] sm:$0xff]  ;;  %v3019_v16 = vstv %s10760_s12  ;;  %s11263_s12 = sld [smem:[#allocation3 + $0xa8]] }
 0x1c4   :  { %6817 = vmatpush3.bf16.msra.mxu0 %v6816_v26  ;;  %v2551_v23 = vadd.f32 %v2549_v11, %v2545_v33  ;;  %v10818_v26 = vld [vmem:[#allocation2 + $0xe4] sm:$0xff]  ;;  %v5256_v39 = vld [vmem:[%s13304_s17 + $0xaf0] sm:$0xff]  ;;  %v6804_v11 = vpack.c.bf16 %v5255_v14, %v5254_v49  ;;  %v5257_v41 = vld [vmem:[%s13304_s17 + $0xaf8] sm:$0xff]  ;;  %v6824_v14 = vpack.c.bf16 %v5281_v36, %v5280_v13  ;;  %v6806_v29 = vpack.c.bf16 %v5273_v62, %v5272_v46 }
 0x1c5   :  { %13395 = vst [vmem:[#allocation58_spill] sm:$0xff] %v10818_v26  ;;  %v3002_v38 = vmul.f32 %v10818_v26, %v13162_v2  ;;  %6819 = vmatprep.subr.bf16.mxu0 %v6818_v12  ;;  %v5299_v22 = vld [vmem:[%s13304_s17 + $0xc48] sm:$0xff]  ;;  %v13396_v12 = vstv %s10313_s4  ;;  %v2998_v33 = vadd.f32 %v2996_v48, %v2992_v42  ;;  %v10839_v54 = vld [vmem:[#allocation2 + $0xf0] sm:$0xff]  ;;  %v13398_v2 = vstv %s10331_s25  ;;  %v5282_v26 = vld [vmem:[%s13304_s17 + $0xbc0] sm:$0xff]  ;;  %s11094_s25 = sld [smem:[#allocation3 + $0xa0]]  ;;  %s11141_s4 = sld [smem:[#allocation3 + $0xa2]] }
 0x1c6   :  { %6801 = vmatpush3.bf16.msra.mxu1 %v6800_v3  ;;  %v2913_v60 = vmul.f32 %v10261_v32, %v13396_v12  ;;  %v13397_v3 = vstv %s10709_s10  ;;  %v2919_v63 = vmul.f32 %v10292_v1, %v13398_v2  ;;  %v5283_v32 = vld [vmem:[%s13304_s17 + $0xbc8] sm:$0xff]  ;;  %v2553_v48 = vmax.f32 %v2551_v23, 0.0  ;;  %v5306_v46 = vld [vmem:[%s13304_s17 + $0xc80] sm:$0xff] }
 0x1c7   :  { %v3008_v49 = vmul.f32 %v10839_v54, %v13397_v3  ;;  %6803 = vmatprep.subr.bf16.mxu1 %v6802_v59  ;;  %v3004_v42 = vadd.f32 %v3002_v38, %v2998_v33  ;;  %v10854_v59 = vld [vmem:[#allocation2 + $0xfc] sm:$0xff]  ;;  %v13399_v13 = vstv %s10733_s8  ;;  %v2909_v1 = vadd.f32 %v2907_v6, %v10228_v0  ;;  %v5307_v23 = vld [vmem:[%s13304_s17 + $0xc88] sm:$0xff]  ;;  %v5300_v38 = vld [vmem:[%s13304_s17 + $0xc50] sm:$0xff] }
 0x1c8   :  { %6821 = vmatpush3.bf16.msra.mxu0 %v6820_v47  ;;  %v3014_v36 = vmul.f32 %v10854_v59, %v13399_v13  ;;  %v6808_v2 = vpack.c.bf16 %v5257_v41, %v5256_v39  ;;  %v6826_v47 = vpack.c.bf16 %v5299_v22, %v5298_v18  ;;  %v3025_v62 = vstv %s10781_s26  ;;  %v5301_v0 = vld [vmem:[%s13304_s17 + $0xc58] sm:$0xff]  ;;  %v10876_v41 = vld [vmem:[#allocation2 + $0x108] sm:$0xff]  ;;  %s11282_s26 = sld [smem:[#allocation3 + $0xa9]] }
 0x1c9   :  { %6823 = vmatprep.subr.bf16.mxu0 %v6822_v10  ;;  %v13400_v39 = vstv %s10355_s13  ;;  %v3010_v6 = vadd.f32 %v3008_v49, %v3004_v42  ;;  %v2915_v18 = vadd.f32 %v2913_v60, %v2909_v1  ;;  %v6828_v22 = vpack.c.bf16 %v5283_v32, %v5282_v26  ;;  %v5285_v49 = vld [vmem:[%s13304_s17 + $0xbd8] sm:$0xff]  ;;  %s11075_s13 = sld [smem:[#allocation3 + $0x9f]] }
 0x1ca   :  { %6805 = vmatpush3.bf16.msra.mxu1 %v6804_v11  ;;  %v2925_v10 = vmul.f32 %v10304_v58, %v13400_v39  ;;  %v3020_v11 = vmul.f32 %v10876_v41, %v3019_v16  ;;  %v13401_v12 = vstv %s10371_s30  ;;  %v3031_v3 = vstv %s10804_s23  ;;  %v5284_v58 = vld [vmem:[%s13304_s17 + $0xbd0] sm:$0xff]  ;;  %v5309_v42 = vld [vmem:[%s13304_s17 + $0xc98] sm:$0xff]  ;;  %s11853_s23 = sld [smem:[#allocation3 + $0xc2]]  ;;  %s12295_s30 = sld [smem:[#allocation3 + $0xd4]] }
 0x1cb   :  { %6807 = vmatprep.subr.bf16.mxu1 %v6806_v29  ;;  %v2931_v33 = vmul.f32 %v10339_v31, %v13401_v12  ;;  %v10886_v13 = vrot.slane %v2553_v48, %v8657_v51  ;;  %v3016_v60 = vadd.f32 %v3014_v36, %v3010_v6  ;;  %v10894_v26 = vld [vmem:[#allocation2 + $0x114] sm:$0xff]  ;;  %v6843_v29 = vpack.c.bf16 %v5307_v23, %v5306_v46  ;;  %v5302_v36 = vld [vmem:[%s13304_s17 + $0xc60] sm:$0xff] }
 0x1cc   :  { %6825 = vmatpush3.bf16.msra.mxu0 %v6824_v14  ;;  %v3026_v31 = vmul.f32 %v10894_v26, %v3025_v62  ;;  %v2921_v14 = vadd.f32 %v2919_v63, %v2915_v18  ;;  %v6830_v32 = vpack.c.bf16 %v5301_v0, %v5300_v38  ;;  %v5308_v48 = vld [vmem:[%s13304_s17 + $0xc90] sm:$0xff]  ;;  %v5303_v63 = vld [vmem:[%s13304_s17 + $0xc68] sm:$0xff]  ;;  %v13402_v1 = vstv %s10396_s9  ;;  %v10914_v23 = vld [vmem:[#allocation2 + $0x120] sm:$0xff]  ;;  %s13404_s9 = sld [smem:[#allocation23_spill]] }
 0x1cd   :  { %6827 = vmatprep.subr.bf16.mxu0 %v6826_v47  ;;  %v2937_v47 = vmul.f32 %v10350_v5, %v13402_v1  ;;  %v3022_v46 = vadd.f32 %v3020_v11, %v3016_v60  ;;  %v6832_v0 = vpack.c.bf16 %v5285_v49, %v5284_v58  ;;  %v2665_v39 = vcombine.high %v10886_v13, %v10886_v13  ;;  %v5311_v58 = vld [vmem:[%s13304_s17 + $0xca8] sm:$0xff]  ;;  %v5304_v49 = vld [vmem:[%s13304_s17 + $0xc70] sm:$0xff] }
 0x1ce   :  { %6809 = vmatpush3.bf16.msra.mxu1 %v6808_v2  ;;  %v3032_v2 = vmul.f32 %v10914_v23, %v3031_v3  ;;  %v2927_v38 = vadd.f32 %v2925_v10, %v2921_v14  ;;  %v13403_v6 = vstv %s10412_s27  ;;  %v6846_v11 = vpack.c.bf16 %v5309_v42, %v5308_v48  ;;  %v5286_v10 = vld [vmem:[%s13304_s17 + $0xbe0] sm:$0xff]  ;;  %s11025_s27 = sld [smem:[#allocation3 + $0xb1]] }
 0x1cf   :  { %6842 = vmatprep.subr.bf16.mxu1 %v13315_v40  ;;  %v2943_v18 = vmul.f32 %v10373_v15, %v13403_v6  ;;  %v3028_v12 = vadd.f32 %v3026_v31, %v3022_v46  ;;  %v6834_v60 = vpack.c.bf16 %v5303_v63, %v5302_v36  ;;  %v5310_v15 = vld [vmem:[%s13304_s17 + $0xca0] sm:$0xff]  ;;  %v5305_v31 = vld [vmem:[%s13304_s17 + $0xc78] sm:$0xff]  ;;  %v13407_v36 = vstv %s10455_s20  ;;  %s10971_s20 = sld [smem:[#allocation3 + $0x9a]] }
 0x1d0   :  { %6829 = vmatpush3.bf16.msra.mxu0 %v6828_v22  ;;  %v2933_v5 = vadd.f32 %v2931_v33, %v2927_v38  ;;  %v5287_v22 = vld [vmem:[%s13304_s17 + $0xbe8] sm:$0xff]  ;;  %v13405_v33 = vstv %s10437_s5  ;;  %v10948_v48 = vld [vmem:[#allocation2] sm:$0xff]  ;;  %s10953_s5 = sld [smem:[#allocation3 + $0x99]]  ;;  %v2955_v63 = vmul.f32 %v10420_v52, %v13407_v36  ;;  %v6849_v46 = vpack.c.bf16 %v5311_v58, %v5310_v15  ;;  %v5289_v38 = vld [vmem:[%s13304_s17 + $0xbf8] sm:$0xff] }
 0x1d1   :  { %2738 = vmatmul.mubr.f32.vlgmr.msra.gmra.mrb[12].mxu1 %v10486_v34  ;;  %6831 = vmatprep.subr.bf16.mxu0 %v6830_v32  ;;  %v2949_v34 = vmul.f32 %v10390_v50, %v13405_v33  ;;  %v3034_v14 = vadd.f32 %v3032_v2, %v3028_v12  ;;  %v6836_v42 = vpack.c.bf16 %v5287_v22, %v5286_v10  ;;  %v5288_v2 = vld [vmem:[%s13304_s17 + $0xbf0] sm:$0xff]  ;;  %v5313_v6 = vld [vmem:[%s13304_s17 + $0xcb8] sm:$0xff]  ;;  %v5370_v12 = vld [vmem:[%s13304_s17 + $0xda8] sm:$0xff] }
 0x1d2   :  { %6844 = vmatpush1.bf16.msra.mxu1 %v6843_v29  ;;  %5326 = vmatprep.mubr.msk.f32.mxu1 %vm975_vm2, %v2665_v39  ;;  %v2939_v32 = vadd.f32 %v2937_v47, %v2933_v5  ;;  %v13406_v50 = vstv %s13404_s9  ;;  %v6838_v47 = vpack.c.bf16 %v5305_v31, %v5304_v49  ;;  %v13410_v39 = vstv %s10482_s29  ;;  %v10986_v22 = vld [vmem:[#allocation2 + $0xc] sm:$0xff]  ;;  %s10992_s29 = sld [smem:[#allocation3 + $0x9b]]  ;;  %v5353_v58 = vld [vmem:[%s13304_s17 + $0xd20] sm:$0xff]  ;;  %s11009_s9 = sld [smem:[#allocation3 + $0x9c]] }
 0x1d3   :  { %v3372_v29 = vmul.f32 %v10948_v48, %v13406_v50  ;;  %6845 = vmatprep.subr.bf16.mxu1 %v13315_v40  ;;  %v2961_v52 = vmul.f32 %v10431_v56, %v13410_v39  ;;  %v10982_v5 = vmax.f32 %v3034_v14, 0.0  ;;  %v6840_v33 = vpack.c.bf16 %v5289_v38, %v5288_v2  ;;  %v5314_v36 = vld [vmem:[%s13304_s17 + $0xcc0] sm:$0xff] }
 0x1d4   :  { %6833 = vmatpush3.bf16.msra.mxu0 %v6832_v0  ;;  %v2945_v1 = vadd.f32 %v2943_v18, %v2939_v32  ;;  %v5312_v0 = vld [vmem:[%s13304_s17 + $0xcb0] sm:$0xff]  ;;  %v5369_v18 = vld [vmem:[%s13304_s17 + $0xda0] sm:$0xff]  ;;  %v13413_v49 = vstv %s10502_s15  ;;  %s11119_s15 = sld [smem:[#allocation3 + $0xa1]] }
 0x1d5   :  { %6835 = vmatprep.subr.bf16.mxu0 %v6834_v60  ;;  %v13411_v60 = vstv %s13408_s0  ;;  %v2967_v31 = vmul.f32 %v10463_v20, %v13413_v49  ;;  %v6852_v32 = vpack.c.bf16 %v5313_v6, %v5312_v0  ;;  %v6872_v50 = vpack.c.bf16 %v5370_v12, %v5369_v18  ;;  %s13419_s0 = sld [smem:[#allocation36_spill]] }
 0x1d6   :  { %6847 = vmatpush1.bf16.msra.mxu1 %v6846_v11  ;;  %v2951_v56 = vadd.f32 %v2949_v34, %v2945_v1  ;;  %v3374_v10 = vadd.f32 %v3372_v29, %v13411_v60  ;;  %v13412_v11 = vstv %s13409_s1  ;;  %v5354_v34 = vld [vmem:[%s13304_s17 + $0xd28] sm:$0xff]  ;;  %v13414_v29 = vstv %s10524_s16  ;;  %s11430_s16 = sld [smem:[#allocation3 + $0xb2]]  ;;  %s11817_s1 = sld [smem:[#allocation3 + $0xc1]] }
 0x1d7   :  { %v3378_v15 = vmul.f32 %v10986_v22, %v13412_v11  ;;  %6848 = vmatprep.subr.bf16.mxu1 %v13315_v40  ;;  %v11013_v20 = vrot.slane %v10982_v5, %v8657_v51  ;;  %v3389_v38 = vstv %s10953_s5  ;;  %v6874_v39 = vpack.c.bf16 %v5354_v34, %v5353_v58  ;;  %v5356_v11 = vld [vmem:[%s13304_s17 + $0xd38] sm:$0xff]  ;;  %s13434_s5 = sld [smem:[#allocation31_spill]] }
 0x1d8   :  { %6837 = vmatpush3.bf16.msra.mxu0 %v6836_v42  ;;  %v2957_v14 = vadd.f32 %v2955_v63, %v2951_v56  ;;  %v2973_v42 = vmul.f32 %v10473_v27, %v13414_v29  ;;  %v5315_v63 = vld [vmem:[%s13304_s17 + $0xcc8] sm:$0xff]  ;;  %v5371_v27 = vld [vmem:[%s13304_s17 + $0xdb0] sm:$0xff]  ;;  %v13415_v6 = vstv %s10551_s6  ;;  %v13417_v58 = vstv %s10471_s28  ;;  %s13418_s6 = sld [smem:[#allocation35_spill]]  ;;  %s11209_s28 = sld [smem:[#allocation3 + $0xa5]] }
 0x1d9   :  { %6839 = vmatprep.subr.bf16.mxu0 %v6838_v47  ;;  %v5372_v47 = vld [vmem:[%s13304_s17 + $0xdb8] sm:$0xff]  ;;  %v2979_v18 = vmul.f32 %v10504_v25, %v13415_v6  ;;  %v5316_v6 = vld [vmem:[%s13304_s17 + $0xcd0] sm:$0xff] }
 0x1da   :  { %6850 = vmatpush1.bf16.msra.mxu1 %v6849_v46  ;;  %v5804_v1 = vpop.f32.mrb[0].mxu0  ;;  %v2963_v2 = vadd.f32 %v2961_v52, %v2957_v14  ;;  %v3380_v46 = vadd.f32 %v3378_v15, %v3374_v10  ;;  %v13416_v52 = vstv %s10575_s2  ;;  %v5355_v10 = vld [vmem:[%s13304_s17 + $0xd30] sm:$0xff]  ;;  %v11042_v25 = vld [vmem:[#allocation2 + $0x18] sm:$0xff]  ;;  %v6876_v14 = vpack.c.bf16 %v5372_v47, %v5371_v27  ;;  %s11053_s2 = sld [smem:[#allocation3 + $0x9e]] }
 0x1db   :  { %v5805_v0 = vpop.f32.mrb[1].mxu0  ;;  %6851 = vmatprep.subr.bf16.mxu1 %v13315_v40  ;;  %v2985_v60 = vmul.f32 %v10518_v21, %v13416_v52  ;;  %v3384_v34 = vmul.f32 %v11042_v25, %v13417_v58  ;;  %v11047_v21 = vld [vmem:[#allocation2 + $0x24] sm:$0xff] }
 0x1dc   :  { %v5806_v12 = vadd.f32 %v5805_v0, %v5804_v1  ;;  %6841 = vmatpush3.bf16.msra.mxu0 %v6840_v33  ;;  %v5839_v56 = vpop.f32.mrb[0].mxu1  ;;  %v2969_v15 = vadd.f32 %v2967_v31, %v2963_v2  ;;  %v6855_v33 = vpack.c.bf16 %v5315_v63, %v5314_v36  ;;  %v3390_v29 = vmul.f32 %v11047_v21, %v3389_v38  ;;  %v5374_v36 = vld [vmem:[%s13304_s17 + $0xdc8] sm:$0xff]  ;;  %13444 = sst [smem:[#allocation47_spill]] %s11817_s1 }
 0x1dd   :  { %v5840_v49 = vpop.f32.mrb[1].mxu1  ;;  %6873 = vmatprep.subr.bf16.mxu0 %v6872_v50  ;;  %v3395_v1 = vstv %s10971_s20  ;;  %v3140_v2 = vcombine.high %v11013_v20, %v11013_v20  ;;  %v5373_v50 = vld [vmem:[%s13304_s17 + $0xdc0] sm:$0xff]  ;;  %v3386_v27 = vadd.f32 %v3384_v34, %v3380_v46  ;;  %v6878_v0 = vpack.c.bf16 %v5356_v11, %v5355_v10  ;;  %v5376_v34 = vld [vmem:[%s13304_s17 + $0xdd8] sm:$0xff]  ;;  %s11432_s20 = sld [smem:[#allocation3 + $0xca]] }
 0x1de   :  { %v5841_v31 = vadd.f32 %v5840_v49, %v5839_v56  ;;  %6853 = vmatpush1.bf16.msra.mxu1 %v6852_v32  ;;  %v2975_v63 = vadd.f32 %v2973_v42, %v2969_v15  ;;  %v13420_v47 = vstv %s13418_s6  ;;  %v5317_v56 = vld [vmem:[%s13304_s17 + $0xcd8] sm:$0xff]  ;;  %v13164_v42 = vstv %s10992_s29  ;;  %s11356_s6 = sld [smem:[#allocation3 + $0xad]] }
 0x1df   :  { %2808 = vmatmul.mubr.f32.vlgmr.msra.gmra.mrb[12].mxu0 %v10675_v19  ;;  %v2991_v32 = vmul.f32 %v10538_v30, %v13420_v47  ;;  %6854 = vmatprep.subr.bf16.mxu1 %v13315_v40  ;;  %v11079_v30 = vld [vmem:[#allocation2 + $0x30] sm:$0xff]  ;;  %v13421_v10 = vstv %s13419_s0  ;;  %v6880_v15 = vpack.c.bf16 %v5374_v36, %v5373_v50  ;;  %v6858_v58 = vpack.c.bf16 %v5317_v56, %v5316_v6  ;;  %v5360_v47 = vld [vmem:[%s13304_s17 + $0xd58] sm:$0xff]  ;;  %s11224_s0 = sld [smem:[#allocation3 + $0xa6]] }
 0x1e0   :  { %6875 = vmatpush3.bf16.msra.mxu0 %v6874_v39  ;;  %3221 = vmatprep.mubr.f32.mxu0 %v3140_v2  ;;  %v2981_v19 = vadd.f32 %v2979_v18, %v2975_v63  ;;  %v11077_v46 = vadd.f32 %v5841_v31, %v5806_v12  ;;  %v3396_v52 = vmul.f32 %v11079_v30, %v3395_v1  ;;  %v5357_v39 = vld [vmem:[%s13304_s17 + $0xd40] sm:$0xff]  ;;  %v5358_v18 = vld [vmem:[%s13304_s17 + $0xd48] sm:$0xff]  ;;  %v13166_v12 = vstv %s11009_s9 }
 0x1e1   :  { %v2997_v11 = vmul.f32 %v10569_v45, %v13421_v10  ;;  %6877 = vmatprep.subr.bf16.mxu0 %v6876_v14  ;;  %v5375_v45 = vld [vmem:[%s13304_s17 + $0xdd0] sm:$0xff]  ;;  %v3392_v14 = vadd.f32 %v3390_v29, %v3386_v27  ;;  %v11102_v31 = vld [vmem:[#allocation2 + $0x3c] sm:$0xff]  ;;  %v13165_v50 = vstv %s11025_s27  ;;  %v13422_v36 = vstv %s10672_s22  ;;  %s13427_s22 = sld [smem:[#allocation24_spill]] }
 0x1e2   :  { %6856 = vmatpush1.bf16.msra.mxu1 %v6855_v33  ;;  %v2987_v49 = vadd.f32 %v2985_v60, %v2981_v19  ;;  %v3402_v2 = vmul.f32 %v11102_v31, %v13164_v42  ;;  %v3003_v33 = vmul.f32 %v10588_v35, %v13422_v36  ;;  %v5318_v63 = vld [vmem:[%s13304_s17 + $0xce0] sm:$0xff]  ;;  %v5319_v60 = vld [vmem:[%s13304_s17 + $0xce8] sm:$0xff]  ;;  %v3413_v29 = vstv %s11031_s24  ;;  %v5359_v35 = vld [vmem:[%s13304_s17 + $0xd50] sm:$0xff]  ;;  %s11526_s24 = sld [smem:[#allocation3 + $0xb5]] }
 0x1e3   :  { %6857 = vmatprep.subr.bf16.mxu1 %v13315_v40  ;;  %v6882_v27 = vpack.c.bf16 %v5358_v18, %v5357_v39  ;;  %v3398_v56 = vadd.f32 %v3396_v52, %v3392_v14  ;;  %v11127_v19 = vld [vmem:[#allocation2 + $0x48] sm:$0xff]  ;;  %v11132_v36 = vld [vmem:[#allocation2 + $0x20] sm:$0xf]  ;;  %v13423_v39 = vstv %s10709_s10  ;;  %v6884_v42 = vpack.c.bf16 %v5376_v34, %v5375_v45  ;;  %s11358_s10 = sld [smem:[#allocation3 + $0xae]] }
 0x1e4   :  { %6879 = vmatpush3.bf16.msra.mxu0 %v6878_v0  ;;  %v2993_v6 = vadd.f32 %v2991_v32, %v2987_v49  ;;  %v3408_v10 = vmul.f32 %v11127_v19, %v13166_v12  ;;  %v3869_v0 = vmul.f32 %v11132_v36, %v13165_v50  ;;  %v3009_v18 = vmul.f32 %v10633_v61, %v13423_v39  ;;  %v5377_v49 = vld [vmem:[%s13304_s17 + $0xde0] sm:$0xff]  ;;  %v5378_v14 = vld [vmem:[%s13304_s17 + $0xde8] sm:$0xff]  ;;  %v11149_v61 = vld [vmem:[#allocation2 + $0x54] sm:$0xff] }
 0x1e5   :  { %6881 = vmatprep.subr.bf16.mxu0 %v6880_v15  ;;  %v3419_v32 = vstv %s11053_s2  ;;  %v6861_v52 = vpack.c.bf16 %v5319_v60, %v5318_v63  ;;  %v3404_v12 = vadd.f32 %v3402_v2, %v3398_v56  ;;  %v3414_v15 = vmul.f32 %v11149_v61, %v3413_v29  ;;  %v5320_v63 = vld [vmem:[%s13304_s17 + $0xcf0] sm:$0xff]  ;;  %v11167_v56 = vld [vmem:[#allocation2 + $0x60] sm:$0xff]  ;;  %s11539_s2 = sld [smem:[#allocation3 + $0xb6]] }
 0x1e6   :  { %6859 = vmatpush1.bf16.msra.mxu1 %v6858_v58  ;;  %v2999_v50 = vadd.f32 %v2997_v11, %v2993_v6  ;;  %v13424_v45 = vstv %s10733_s8  ;;  %v6886_v34 = vpack.c.bf16 %v5360_v47, %v5359_v35  ;;  %v5321_v11 = vld [vmem:[%s13304_s17 + $0xcf8] sm:$0xff]  ;;  %v13167_v2 = vstv %s11075_s13  ;;  %s11315_s8 = sld [smem:[#allocation3 + $0xab]] }
 0x1e7   :  { %v3015_v58 = vmul.f32 %v10652_v55, %v13424_v45  ;;  %6860 = vmatprep.subr.bf16.mxu1 %v13315_v40  ;;  %v3410_v6 = vadd.f32 %v3408_v10, %v3404_v12  ;;  %v3420_v55 = vmul.f32 %v11167_v56, %v3419_v32  ;;  %v13425_v35 = vld [vmem:[#allocation45_spill] sm:$0xff]  ;;  %v3021_v39 = vmul.f32 %v10693_v24, %v3019_v16  ;;  %v5362_v12 = vld [vmem:[%s13304_s17 + $0xd68] sm:$0xff]  ;;  %v5379_v24 = vld [vmem:[%s13304_s17 + $0xdf0] sm:$0xff] }
 0x1e8   :  { %6883 = vmatpush3.bf16.msra.mxu0 %v6882_v27  ;;  %v3005_v60 = vadd.f32 %v3003_v33, %v2999_v50  ;;  %v11173_v47 = vadd.f32 %v3869_v0, %v13425_v35  ;;  %v6888_v45 = vpack.c.bf16 %v5378_v14, %v5377_v49  ;;  %v5361_v50 = vld [vmem:[%s13304_s17 + $0xd60] sm:$0xff]  ;;  %v3431_v33 = vstv %s11094_s25  ;;  %v5380_v16 = vld [vmem:[%s13304_s17 + $0xdf8] sm:$0xff]  ;;  %v11193_v0 = vld [vmem:[#allocation2 + $0x6c] sm:$0xff]  ;;  %s11583_s25 = sld [smem:[#allocation3 + $0xb8]] }
 0x1e9   :  { %6885 = vmatprep.subr.bf16.mxu0 %v6884_v42  ;;  %v6864_v27 = vpack.c.bf16 %v5321_v11, %v5320_v63  ;;  %v3416_v10 = vadd.f32 %v3414_v15, %v3410_v6  ;;  %v3426_v49 = vmul.f32 %v11193_v0, %v13167_v2  ;;  %v5322_v14 = vld [vmem:[%s13304_s17 + $0xd00] sm:$0xff]  ;;  %v3437_v15 = vstv %s11119_s15  ;;  %s11611_s15 = sld [smem:[#allocation3 + $0xb9]] }
 0x1ea   :  { %6862 = vmatpush1.bf16.msra.mxu1 %v6861_v52  ;;  %v3011_v42 = vadd.f32 %v3009_v18, %v3005_v60  ;;  %v3027_v52 = vmul.f32 %v10698_v4, %v3025_v62  ;;  %v5323_v18 = vld [vmem:[%s13304_s17 + $0xd08] sm:$0xff]  ;;  %v6890_v63 = vpack.c.bf16 %v5362_v12, %v5361_v50  ;;  %v5363_v4 = vld [vmem:[%s13304_s17 + $0xd70] sm:$0xff]  ;;  %v5364_v62 = vld [vmem:[%s13304_s17 + $0xd78] sm:$0xff]  ;;  %v3432_v6 = vmul.f32 %v10563_v7, %v3431_v33 }
 0x1eb   :  { %6863 = vmatprep.subr.bf16.mxu1 %v13315_v40  ;;  %v3422_v60 = vadd.f32 %v3420_v55, %v3416_v10  ;;  %v3033_v35 = vmul.f32 %v10725_v8, %v3031_v3  ;;  %v3443_v50 = vstv %s11141_s4  ;;  %v6867_v12 = vpack.c.bf16 %v5323_v18, %v5322_v14  ;;  %v5381_v2 = vld [vmem:[%s13304_s17 + $0xe00] sm:$0xff]  ;;  %s12481_s4 = sld [smem:[#allocation3 + $0xde]] }
 0x1ec   :  { %6887 = vmatpush3.bf16.msra.mxu0 %v6886_v34  ;;  %v3017_v11 = vadd.f32 %v3015_v58, %v3011_v42  ;;  %v6892_v34 = vpack.c.bf16 %v5380_v16, %v5379_v24  ;;  %v5382_v58 = vld [vmem:[%s13304_s17 + $0xe08] sm:$0xff]  ;;  %v3438_v8 = vmul.f32 %v10583_v57, %v3437_v15  ;;  %v6894_v3 = vpack.c.bf16 %v5364_v62, %v5363_v4  ;;  %v5401_v57 = vld [vmem:[%s13304_s17 + $0xea0] sm:$0xff]  ;;  %13426 = sst [smem:[#allocation42_spill]] %s11315_s8 }
 0x1ed   :  { %6889 = vmatprep.subr.bf16.mxu0 %v6888_v45  ;;  %v3428_v55 = vadd.f32 %v3426_v49, %v3422_v60  ;;  %v5324_v45 = vld [vmem:[%s13304_s17 + $0xd10] sm:$0xff]  ;;  %v3449_v24 = vstv %s11165_s11  ;;  %v3125_v16 = vcombine.high %v10982_v5, %v10982_v5  ;;  %v3444_v49 = vmul.f32 %v10623_v43, %v3443_v50  ;;  %v5365_v18 = vld [vmem:[%s13304_s17 + $0xd80] sm:$0xff]  ;;  %s11987_s11 = sld [smem:[#allocation3 + $0xc7]] }
 0x1ee   :  { %6865 = vmatpush1.bf16.msra.mxu1 %v6864_v27  ;;  %v3023_v7 = vadd.f32 %v3021_v39, %v3017_v11  ;;  %v5325_v27 = vld [vmem:[%s13304_s17 + $0xd18] sm:$0xff]  ;;  %v5402_v39 = vld [vmem:[%s13304_s17 + $0xea8] sm:$0xff]  ;;  %v6896_v14 = vpack.c.bf16 %v5382_v58, %v5381_v2  ;;  %v3455_v4 = vstv %s11185_s18  ;;  %v5383_v43 = vld [vmem:[%s13304_s17 + $0xe10] sm:$0xff]  ;;  %v3450_v11 = vmul.f32 %v10647_v53, %v3449_v24  ;;  %s12134_s18 = sld [smem:[#allocation3 + $0xcb]] }
 0x1ef   :  { %6866 = vmatprep.subr.bf16.mxu1 %v13315_v40  ;;  %v3434_v10 = vadd.f32 %v3432_v6, %v3428_v55  ;;  %v6870_v5 = vpack.c.bf16 %v5325_v27, %v5324_v45  ;;  %v5384_v2 = vld [vmem:[%s13304_s17 + $0xe18] sm:$0xff]  ;;  %v6904_v60 = vpack.c.bf16 %v5402_v39, %v5401_v57  ;;  %v5385_v6 = vld [vmem:[%s13304_s17 + $0xe20] sm:$0xff]  ;;  %v11285_v58 = vrot.slane %v3125_v16, %v8657_v51  ;;  %v5403_v53 = vld [vmem:[%s13304_s17 + $0xeb0] sm:$0xff] }
 0x1f0   :  { %6891 = vmatpush3.bf16.msra.mxu0 %v6890_v63  ;;  %v3029_v42 = vadd.f32 %v3027_v52, %v3023_v7  ;;  %v5366_v63 = vld [vmem:[%s13304_s17 + $0xd88] sm:$0xff]  ;;  %v5404_v7 = vld [vmem:[%s13304_s17 + $0xeb8] sm:$0xff]  ;;  %v5367_v45 = vld [vmem:[%s13304_s17 + $0xd90] sm:$0xff]  ;;  %v3467_v57 = vstv %s11224_s0  ;;  %s11757_s0 = sld [smem:[#allocation3 + $0xbf]] }
 0x1f1   :  { %6893 = vmatprep.subr.bf16.mxu0 %v6892_v34  ;;  %v3440_v62 = vadd.f32 %v3438_v8, %v3434_v10  ;;  %v5386_v34 = vld [vmem:[%s13304_s17 + $0xe28] sm:$0xff]  ;;  %v3456_v8 = vmul.f32 %v10688_v9, %v3455_v4  ;;  %v5368_v27 = vld [vmem:[%s13304_s17 + $0xd98] sm:$0xff]  ;;  %v5387_v9 = vld [vmem:[%s13304_s17 + $0xe30] sm:$0xff] }
 0x1f2   :  { %6868 = vmatpush1.bf16.msra.mxu1 %v6867_v12  ;;  %v3035_v52 = vadd.f32 %v3033_v35, %v3029_v42  ;;  %v3461_v12 = vstv %s11209_s28  ;;  %v6898_v35 = vpack.c.bf16 %v5366_v63, %v5365_v18  ;;  %v6906_v39 = vpack.c.bf16 %v5386_v34, %v5385_v6  ;;  %v5388_v16 = vld [vmem:[%s13304_s17 + $0xe38] sm:$0xff]  ;;  %v5390_v34 = vld [vmem:[%s13304_s17 + $0xe48] sm:$0xff]  ;;  %s11700_s28 = sld [smem:[#allocation3 + $0xbd]] }
 0x1f3   :  { %6869 = vmatprep.subr.bf16.mxu1 %v13315_v40  ;;  %v3446_v55 = vadd.f32 %v3444_v49, %v3440_v62  ;;  %v3462_v49 = vmul.f32 %v10720_v44, %v3461_v12  ;;  %v3473_v18 = vstv %s11243_s21  ;;  %v3141_v63 = vcombine.high %v11285_v58, %v11285_v58  ;;  %s13443_s21 = sld [smem:[#allocation42_spill]] }
 0x1f4   :  { %6895 = vmatpush3.bf16.msra.mxu0 %v6894_v3  ;;  %v6900_v3 = vpack.c.bf16 %v5384_v2, %v5383_v43  ;;  %v3037_v42 = vmax.f32 %v3035_v52, 0.0  ;;  %v5405_v43 = vld [vmem:[%s13304_s17 + $0xec0] sm:$0xff]  ;;  %v5406_v2 = vld [vmem:[%s13304_s17 + $0xec8] sm:$0xff]  ;;  %v3468_v52 = vmul.f32 %v10743_v37, %v3467_v57  ;;  %v6910_v62 = vpack.c.bf16 %v5388_v16, %v5387_v9 }
 0x1f5   :  { %6897 = vmatprep.subr.bf16.mxu0 %v6896_v14  ;;  %v3452_v10 = vadd.f32 %v3450_v11, %v3446_v55  ;;  %v6908_v14 = vpack.c.bf16 %v5404_v7, %v5403_v53  ;;  %v5417_v11 = vld [vmem:[%s13304_s17 + $0xf20] sm:$0xff]  ;;  %v13168_v6 = vstv %s11263_s12  ;;  %v3474_v53 = vmul.f32 %v10775_v28, %v3473_v18  ;;  %v11353_v55 = vld [vmem:[%s13304_s17 + $0xf30] sm:$0xff]  ;;  %v5420_v28 = vld [vmem:[%s13304_s17 + $0xf38] sm:$0xff] }
 0x1f6   :  { %6871 = vmatpush1.bf16.msra.mxu1 %v6870_v5  ;;  %v6902_v5 = vpack.c.bf16 %v5368_v27, %v5367_v45  ;;  %v11339_v37 = vrot.slane %v3037_v42, %v8657_v51  ;;  %v6912_v7 = vpack.c.bf16 %v5406_v2, %v5405_v43  ;;  %v5407_v27 = vld [vmem:[%s13304_s17 + $0xed0] sm:$0xff]  ;;  %v3480_v16 = vmul.f32 %v10789_v17, %v13168_v6  ;;  %v11388_v17 = vld [vmem:[#allocation2 + $0x2c] sm:$0xf] }
 0x1f7   :  { %6905 = vmatprep.subr.bf16.mxu1 %v6904_v60  ;;  %v3458_v44 = vadd.f32 %v3456_v8, %v3452_v10  ;;  %v5418_v60 = vld [vmem:[%s13304_s17 + $0xf28] sm:$0xff]  ;;  %v3485_v8 = vstv %s11282_s26  ;;  %v3491_v43 = vstv %s11303_s14  ;;  %v13171_v6 = vstv %s11315_s8  ;;  %s11629_s8 = sld [smem:[#allocation3 + $0xba]]  ;;  %s11794_s26 = sld [smem:[#allocation3 + $0xc0]] }
 0x1f8   :  { %6899 = vmatpush3.bf16.msra.mxu0 %v6898_v35  ;;  %v6937_v45 = vpack.c.bf16 %v5418_v60, %v5417_v11  ;;  %v11404_v11 = vld [vmem:[%s13304_s17 + $0xee0] sm:$0xff]  ;;  %v13428_v60 = vld [vmem:[#allocation58_spill] sm:$0xff]  ;;  %s11961_s14 = sld [smem:[#allocation3 + $0xc6]] }
 0x1f9   :  { %2878 = vmatmul.mubr.f32.vlgmr.msra.gmra.mrb[14].mxu1 %v10886_v13  ;;  %6901 = vmatprep.subr.bf16.mxu0 %v6900_v3  ;;  %v5389_v13 = vld [vmem:[%s13304_s17 + $0xe40] sm:$0xff]  ;;  %v3464_v35 = vadd.f32 %v3462_v49, %v3458_v44  ;;  %v11376_v49 = vld [vmem:[%s13304_s17 + $0xe50] sm:$0xff]  ;;  %v3149_v44 = vcombine.high %v11339_v37, %v11339_v37 }
 0x1fa   :  { %6907 = vmatpush3.bf16.msra.mxu1 %v6906_v39  ;;  %3291 = vmatprep.mubr.f32.mxu1 %v3141_v63  ;;  %v5408_v39 = vld [vmem:[%s13304_s17 + $0xed8] sm:$0xff]  ;;  %v6914_v10 = vpack.c.bf16 %v5390_v34, %v5389_v13  ;;  %v11386_v63 = vld [vmem:[%s13304_s17 + $0xf40] sm:$0xff]  ;;  %v3486_v13 = vmul.f32 %v13428_v60, %v3485_v8  ;;  %v6940_v34 = vpack.c.bf16 %v5420_v28, %v11353_v55 }
 0x1fb   :  { %6909 = vmatprep.subr.bf16.mxu1 %v6908_v14  ;;  %v3470_v9 = vadd.f32 %v3468_v52, %v3464_v35  ;;  %v11381_v14 = vld [vmem:[%s13304_s17 + $0xe58] sm:$0xff]  ;;  %v11399_v52 = vld [vmem:[%s13304_s17 + $0xf48] sm:$0xff]  ;;  %v6916_v35 = vpack.c.bf16 %v5408_v39, %v5407_v27  ;;  %v11441_v28 = vld [vmem:[#allocation2 + $0x44] sm:$0xf] }
 0x1fc   :  { %v5874_v3 = vpop.f32.mrb[2].mxu1  ;;  %6903 = vmatpush3.bf16.msra.mxu0 %v6902_v5  ;;  %v3391_v5 = vmul.f32 %v11388_v17, %v3389_v38  ;;  %v11409_v38 = vld [vmem:[%s13304_s17 + $0xee8] sm:$0xff] }
 0x1fd   :  { %v5875_v42 = vpop.f32.mrb[3].mxu1  ;;  %6936 = vmatprep.subr.bf16.mxu0 %v13315_v40  ;;  %13442 = sst [smem:[#allocation37_spill]] %s11794_s26 }
 0x1fe   :  { %v5876_v2 = vadd.f32 %v5875_v42, %v5874_v3  ;;  %6911 = vmatpush3.bf16.msra.mxu1 %v6910_v62  ;;  %v3476_v62 = vadd.f32 %v3474_v53, %v3470_v9  ;;  %v11416_v3 = vld [vmem:[#allocation2 + $0x38] sm:$0xf]  ;;  %v3492_v9 = vmul.f32 %v10839_v54, %v3491_v43  ;;  %v6920_v54 = vpack.c.bf16 %v11409_v38, %v11404_v11  ;;  %v13432_v38 = vld [vmem:[#allocation57_spill] sm:$0xff] }
 0x1ff   :  { %3222 = vmatmul.mubr.f32.vlgmr.msra.gmra.mrb[14].mxu0 %v11013_v20  ;;  %6913 = vmatprep.subr.bf16.mxu1 %v6912_v7  ;;  %v3397_v42 = vmul.f32 %v11416_v3, %v3395_v1  ;;  %v13170_v20 = vstv %s11328_s19  ;;  %v13429_v7 = vstv %s13427_s22  ;;  %v6918_v1 = vpack.c.bf16 %v11381_v14, %v11376_v49  ;;  %v5394_v49 = vld [vmem:[%s13304_s17 + $0xe68] sm:$0xff]  ;;  %v11452_v14 = vld [vmem:[#allocation2 + $0x50] sm:$0xf]  ;;  %s11488_s22 = sld [smem:[#allocation3 + $0xb4]] }
 0x200   :  { %6938 = vmatpush1.bf16.msra.mxu0 %v6937_v45  ;;  %5437 = vmatprep.mubr.msk.f32.mxu0 %vm975_vm2, %v3149_v44  ;;  %v3482_v53 = vadd.f32 %v3480_v16, %v3476_v62  ;;  %v3856_v55 = vmul.f32 %v10948_v48, %v13429_v7  ;;  %v6943_v45 = vpack.c.bf16 %v11399_v52, %v11386_v63  ;;  %v13430_v48 = vstv %s10992_s29  ;;  %v5393_v16 = vld [vmem:[%s13304_s17 + $0xe60] sm:$0xff]  ;;  %s13433_s29 = sld [smem:[#allocation30_spill]]  ;;  %v11465_v7 = vld [vmem:[%s13304_s17 + $0xf50] sm:$0xff] }
 0x201   :  { %6939 = vmatprep.subr.bf16.mxu0 %v13315_v40  ;;  %v3403_v27 = vmul.f32 %v11441_v28, %v13430_v48  ;;  %v13431_v63 = vstv %s11009_s9  ;;  %v3498_v11 = vmul.f32 %v10854_v59, %v13171_v6  ;;  %v3504_v48 = vmul.f32 %v10876_v41, %v13170_v20  ;;  %s11472_s9 = sld [smem:[#allocation3 + $0xb3]]  ;;  %v5424_v59 = vld [vmem:[%s13304_s17 + $0xf58] sm:$0xff] }
 0x202   :  { %v1184_v39 = vpop.f32.mrb[2].mxu0  ;;  %6915 = vmatpush3.bf16.msra.mxu1 %v6914_v10  ;;  %v3409_v44 = vmul.f32 %v11452_v14, %v13431_v63  ;;  %v3488_v52 = vadd.f32 %v3486_v13, %v3482_v53  ;;  %v3393_v10 = vadd.f32 %v3391_v5, %v13432_v38  ;;  %v3509_v13 = vstv %s11356_s6  ;;  %v5412_v5 = vld [vmem:[%s13304_s17 + $0xef8] sm:$0xff] }
 0x203   :  { %v1185_v62 = vadd.f32 %v1184_v39, %v11077_v46  ;;  %v1186_v60 = vpop.f32.mrb[3].mxu0  ;;  %6917 = vmatprep.subr.bf16.mxu1 %v6916_v35  ;;  %v13185_v53 = vstv %s11358_s10  ;;  %v5411_v46 = vld [vmem:[%s13304_s17 + $0xef0] sm:$0xff]  ;;  %v13436_v38 = vstv %s13434_s5  ;;  %v6922_v20 = vpack.c.bf16 %v5394_v49, %v5393_v16  ;;  %s11911_s5 = sld [smem:[#allocation3 + $0xc4]] }
 0x204   :  { %6941 = vmatpush1.bf16.msra.mxu0 %v6940_v34  ;;  %v3494_v35 = vadd.f32 %v3492_v9, %v3488_v52  ;;  %v3399_v41 = vadd.f32 %v3397_v42, %v3393_v10  ;;  %v3862_v34 = vmul.f32 %v10986_v22, %v13436_v38  ;;  %v5395_v9 = vld [vmem:[%s13304_s17 + $0xe70] sm:$0xff]  ;;  %v5396_v42 = vld [vmem:[%s13304_s17 + $0xe78] sm:$0xff]  ;;  %v11502_v22 = vld [vmem:[%s13304_s17 + $0xf60] sm:$0xff]  ;;  %v3510_v49 = vmul.f32 %v10894_v26, %v3509_v13 }
 0x205   :  { %v11490_v60 = vadd.f32 %v5876_v2, %v1185_v62  ;;  %6942 = vmatprep.subr.bf16.mxu0 %v13315_v40  ;;  %v11507_v2 = vld [vmem:[%s13304_s17 + $0xf68] sm:$0xff]  ;;  %v6946_v10 = vpack.c.bf16 %v5424_v59, %v11465_v7  ;;  %v6924_v62 = vpack.c.bf16 %v5412_v5, %v5411_v46  ;;  %v3516_v6 = vmul.f32 %v10914_v23, %v13185_v53  ;;  %v5413_v26 = vld [vmem:[%s13304_s17 + $0xf00] sm:$0xff]  ;;  %v11547_v59 = vld [vmem:[#allocation2 + $0x74] sm:$0xf] }
 0x206   :  { %v13435_v39 = vstv %s13433_s29  ;;  %6919 = vmatpush3.bf16.msra.mxu1 %v6918_v1  ;;  %v3500_v1 = vadd.f32 %v3498_v11, %v3494_v35  ;;  %v3405_v52 = vadd.f32 %v3403_v27, %v3399_v41  ;;  %v13172_v7 = vstv %s11432_s20  ;;  %s12281_s29 = sld [smem:[#allocation3 + $0xd3]] }
 0x207   :  { %v3858_v63 = vadd.f32 %v3856_v55, %v13435_v39  ;;  %v11509_v55 = vld [vmem:[#allocation2 + $0x5c] sm:$0xf]  ;;  %6921 = vmatprep.subr.bf16.mxu1 %v6920_v54  ;;  %v11518_v39 = vld [vmem:[#allocation2 + $0x68] sm:$0xf]  ;;  %v6926_v23 = vpack.c.bf16 %v5396_v42, %v5395_v9  ;;  %v13437_v46 = vstv %s11075_s13  ;;  %v5427_v9 = vld [vmem:[%s13304_s17 + $0xf70] sm:$0xff]  ;;  %s11674_s13 = sld [smem:[#allocation3 + $0xbc]]  ;;  %v13188_v53 = vstv %s11794_s26 }
 0x208   :  { %v3415_v16 = vmul.f32 %v11509_v55, %v3413_v29  ;;  %v3421_v38 = vmul.f32 %v11518_v39, %v3419_v32  ;;  %6944 = vmatpush1.bf16.msra.mxu0 %v6943_v45  ;;  %v5414_v29 = vld [vmem:[%s13304_s17 + $0xf08] sm:$0xff]  ;;  %v3506_v54 = vadd.f32 %v3504_v48, %v3500_v1  ;;  %v3411_v27 = vadd.f32 %v3409_v44, %v3405_v52  ;;  %v5397_v48 = vld [vmem:[%s13304_s17 + $0xe80] sm:$0xff]  ;;  %v5428_v42 = vld [vmem:[%s13304_s17 + $0xf78] sm:$0xff]  ;;  %s12263_s26 = sld [smem:[#allocation3 + $0xd2]] }
 0x209   :  { %v3864_v11 = vadd.f32 %v3862_v34, %v3858_v63  ;;  %v13184_v32 = vstv %s11430_s16  ;;  %6945 = vmatprep.subr.bf16.mxu0 %v13315_v40  ;;  %v6949_v45 = vpack.c.bf16 %v11507_v2, %v11502_v22  ;;  %v5398_v44 = vld [vmem:[%s13304_s17 + $0xe88] sm:$0xff]  ;;  %v3427_v5 = vmul.f32 %v11547_v59, %v13437_v46  ;;  %v11561_v22 = vld [vmem:[#allocation2 + $0x80] sm:$0xf]  ;;  %v5415_v1 = vld [vmem:[%s13304_s17 + $0xf10] sm:$0xff] }
 0x20a   :  { %6923 = vmatpush3.bf16.msra.mxu1 %v6922_v20  ;;  %v3512_v35 = vadd.f32 %v3510_v49, %v3506_v54  ;;  %v3417_v41 = vadd.f32 %v3415_v16, %v3411_v27  ;;  %v13438_v63 = vstv %s11025_s27  ;;  %v6928_v20 = vpack.c.bf16 %v5414_v29, %v5413_v26  ;;  %s11570_s27 = sld [smem:[#allocation3 + $0xb7]]  ;;  %v5416_v49 = vld [vmem:[%s13304_s17 + $0xf18] sm:$0xff]  ;;  %v11591_v54 = vld [vmem:[#allocation2 + $0x8c] sm:$0xf] }
 0x20b   :  { %v3868_v34 = vmul.f32 %v11042_v25, %v13438_v63  ;;  %6925 = vmatprep.subr.bf16.mxu1 %v6924_v62  ;;  %v3433_v2 = vmul.f32 %v11561_v22, %v3431_v33  ;;  %v3874_v25 = vmul.f32 %v11047_v21, %v13184_v32  ;;  %v13182_v16 = vstv %s11472_s9 }
 0x20c   :  { %6947 = vmatpush1.bf16.msra.mxu0 %v6946_v10  ;;  %v3518_v52 = vadd.f32 %v3516_v6, %v3512_v35  ;;  %v3423_v62 = vadd.f32 %v3421_v38, %v3417_v41  ;;  %v13181_v26 = vstv %s11488_s22  ;;  %v4353_v21 = vmul.f32 %v11132_v36, %v13172_v7  ;;  %v5399_v6 = vld [vmem:[%s13304_s17 + $0xe90] sm:$0xff]  ;;  %v5400_v38 = vld [vmem:[%s13304_s17 + $0xe98] sm:$0xff] }
 0x20d   :  { %v3870_v33 = vadd.f32 %v3868_v34, %v3864_v11  ;;  %6948 = vmatprep.subr.bf16.mxu0 %v13315_v40  ;;  %v6930_v10 = vpack.c.bf16 %v5398_v44, %v5397_v48  ;;  %v6952_v29 = vpack.c.bf16 %v5428_v42, %v5427_v9  ;;  %v3439_v36 = vmul.f32 %v11591_v54, %v3437_v15  ;;  %v5429_v48 = vld [vmem:[%s13304_s17 + $0xf80] sm:$0xff]  ;;  %v11602_v44 = vld [vmem:[#allocation2 + $0x98] sm:$0xf] }
 0x20e   :  { %6927 = vmatpush3.bf16.msra.mxu1 %v6926_v23  ;;  %v3429_v27 = vadd.f32 %v3427_v5, %v3423_v62  ;;  %v3880_v11 = vmul.f32 %v11079_v30, %v13182_v16  ;;  %v6932_v23 = vpack.c.bf16 %v5416_v49, %v5415_v1  ;;  %v3445_v46 = vmul.f32 %v11602_v44, %v3443_v50  ;;  %v5430_v30 = vld [vmem:[%s13304_s17 + $0xf88] sm:$0xff]  ;;  %v5480_v5 = vld [vmem:[%s13304_s17 + $0x1040] sm:$0xff]  ;;  %v11882_v16 = vld [vmem:[%s13304_s17 + $0x10d0] sm:$0xff] }
 0x20f   :  { %6929 = vmatprep.subr.bf16.mxu1 %v6928_v20  ;;  %v3886_v35 = vmul.f32 %v11102_v31, %v13181_v26  ;;  %v13180_v15 = vstv %s11526_s24  ;;  %v5481_v50 = vld [vmem:[%s13304_s17 + $0x1048] sm:$0xff]  ;;  %v11622_v41 = vmax.f32 %v3518_v52, 0.0  ;;  %v3876_v63 = vadd.f32 %v3874_v25, %v3870_v33  ;;  %v5464_v42 = vld [vmem:[%s13304_s17 + $0xfc0] sm:$0xff] }
 0x210   :  { %6950 = vmatpush1.bf16.msra.mxu0 %v6949_v45  ;;  %v3435_v31 = vadd.f32 %v3433_v2, %v3429_v27  ;;  %v13439_v34 = vld [vmem:[#allocation46_spill] sm:$0xff]  ;;  %v6934_v20 = vpack.c.bf16 %v5400_v38, %v5399_v6  ;;  %v13178_v9 = vstv %s11539_s2  ;;  %v3892_v62 = vmul.f32 %v11127_v19, %v13180_v15  ;;  %v5482_v27 = vld [vmem:[%s13304_s17 + $0x1050] sm:$0xff] }
 0x211   :  { %v11625_v45 = vadd.f32 %v4353_v21, %v13439_v34  ;;  %6951 = vmatprep.subr.bf16.mxu0 %v13315_v40  ;;  %v5465_v2 = vld [vmem:[%s13304_s17 + $0xfc8] sm:$0xff]  ;;  %v11637_v25 = vld [vmem:[#allocation2 + $0xa4] sm:$0xf]  ;;  %v3882_v52 = vadd.f32 %v3880_v11, %v3876_v63  ;;  %v6955_v33 = vpack.c.bf16 %v5430_v30, %v5429_v48  ;;  %v6966_v21 = vpack.c.bf16 %v5481_v50, %v5480_v5  ;;  %v11676_v5 = vld [vmem:[#allocation2 + $0xbc] sm:$0xf] }
 0x212   :  { %6931 = vmatpush3.bf16.msra.mxu1 %v6930_v10  ;;  %v3451_v1 = vmul.f32 %v11637_v25, %v3449_v24  ;;  %v3441_v49 = vadd.f32 %v3439_v36, %v3435_v31  ;;  %v11647_v10 = vld [vmem:[#allocation2 + $0xb0] sm:$0xf]  ;;  %v13177_v38 = vstv %s11570_s27  ;;  %v11658_v19 = vrot.slane %v11622_v41, %v8657_v51  ;;  %v5432_v36 = vld [vmem:[%s13304_s17 + $0xf98] sm:$0xff]  ;;  %v11694_v34 = vld [vmem:[#allocation2 + $0xc8] sm:$0xf] }
 0x213   :  { %13440 = vst [vmem:[#allocation43_spill] sm:$0xff] %v11625_v45  ;;  %6933 = vmatprep.subr.bf16.mxu1 %v6932_v23  ;;  %v3457_v6 = vmul.f32 %v11647_v10, %v3455_v4  ;;  %v5431_v24 = vld [vmem:[%s13304_s17 + $0xf90] sm:$0xff]  ;;  %v5483_v4 = vld [vmem:[%s13304_s17 + $0x1058] sm:$0xff]  ;;  %v3888_v23 = vadd.f32 %v3886_v35, %v3882_v52  ;;  %v6968_v48 = vpack.c.bf16 %v5465_v2, %v5464_v42  ;;  %v13176_v30 = vstv %s11583_s25 }
 0x214   :  { %6953 = vmatpush1.bf16.msra.mxu0 %v6952_v29  ;;  %v3447_v11 = vadd.f32 %v3445_v46, %v3441_v49  ;;  %v3898_v29 = vmul.f32 %v11149_v61, %v13178_v9  ;;  %v3463_v50 = vmul.f32 %v11676_v5, %v3461_v12  ;;  %v11684_v46 = vld [vmem:[%s13304_s17 + $0xfd0] sm:$0xff]  ;;  %v11689_v61 = vld [vmem:[%s13304_s17 + $0xfd8] sm:$0xff]  ;;  %v3904_v63 = vmul.f32 %v11167_v56, %v13177_v38  ;;  %v5484_v56 = vld [vmem:[%s13304_s17 + $0x1060] sm:$0xff] }
 0x215   :  { %6954 = vmatprep.subr.bf16.mxu0 %v13315_v40  ;;  %v3894_v31 = vadd.f32 %v3892_v62, %v3888_v23  ;;  %v3469_v12 = vmul.f32 %v11694_v34, %v3467_v57  ;;  %v6970_v42 = vpack.c.bf16 %v5483_v4, %v5482_v27  ;;  %v13175_v2 = vstv %s11611_s15  ;;  %v5485_v49 = vld [vmem:[%s13304_s17 + $0x1068] sm:$0xff] }
 0x216   :  { %6935 = vmatpush3.bf16.msra.mxu1 %v6934_v20  ;;  %v3453_v35 = vadd.f32 %v3451_v1, %v3447_v11  ;;  %v6958_v20 = vpack.c.bf16 %v5432_v36, %v5431_v24  ;;  %v3624_v1 = vcombine.high %v11658_v19, %v11658_v19  ;;  %v3910_v62 = vmul.f32 %v11193_v0, %v13176_v30  ;;  %v5434_v0 = vld [vmem:[%s13304_s17 + $0xfa8] sm:$0xff]  ;;  %v11741_v11 = vld [vmem:[#allocation2 + $0x78] sm:$0xff] }
 0x217   :  { %6967 = vmatprep.subr.bf16.mxu1 %v6966_v21  ;;  %v3900_v57 = vadd.f32 %v3898_v29, %v3894_v31  ;;  %v6972_v24 = vpack.c.bf16 %v11689_v61, %v11684_v46  ;;  %v11739_v36 = vld [vmem:[%s13304_s17 + $0xfe8] sm:$0xff]  ;;  %v3916_v23 = vmul.f32 %v11741_v11, %v13175_v2  ;;  %v13174_v29 = vstv %s11645_s3 }
 0x218   :  { %6956 = vmatpush1.bf16.msra.mxu0 %v6955_v33  ;;  %v3459_v52 = vadd.f32 %v3457_v6, %v3453_v35  ;;  %v11714_v33 = vld [vmem:[#allocation2 + $0xd4] sm:$0xf]  ;;  %v5433_v6 = vld [vmem:[%s13304_s17 + $0xfa0] sm:$0xff]  ;;  %v13441_v46 = vstv %s11263_s12  ;;  %v6974_v35 = vpack.c.bf16 %v5485_v49, %v5484_v56  ;;  %v5487_v56 = vld [vmem:[%s13304_s17 + $0x1078] sm:$0xff]  ;;  %v13183_v9 = vstv %s11700_s28  ;;  %s11944_s12 = sld [smem:[#allocation3 + $0xc5]] }
 0x219   :  { %3292 = vmatmul.mubr.f32.vlgmr.msra.gmra.mrb[16].mxu1 %v11285_v58  ;;  %v3475_v21 = vmul.f32 %v11714_v33, %v3473_v18  ;;  %6957 = vmatprep.subr.bf16.mxu0 %v13315_v40  ;;  %v13173_v58 = vstv %s11629_s8  ;;  %v11734_v18 = vld [vmem:[%s13304_s17 + $0xfe0] sm:$0xff]  ;;  %v3906_v4 = vadd.f32 %v3904_v63, %v3900_v57  ;;  %v6961_v63 = vpack.c.bf16 %v5434_v0, %v5433_v6  ;;  %v11775_v6 = vld [vmem:[#allocation2 + $0xec] sm:$0xf] }
 0x21a   :  { %6969 = vmatpush3.bf16.msra.mxu1 %v6968_v48  ;;  %3705 = vmatprep.mubr.f32.mxu1 %v3624_v1  ;;  %v3465_v27 = vadd.f32 %v3463_v50, %v3459_v52  ;;  %v11747_v48 = vld [vmem:[#allocation2 + $0xe0] sm:$0xf]  ;;  %v11755_v50 = vld [vmem:[%s13304_s17 + $0xfb0] sm:$0xff]  ;;  %v11762_v1 = vld [vmem:[%s13304_s17 + $0xfb8] sm:$0xff]  ;;  %v3487_v0 = vmul.f32 %v11775_v6, %v3485_v8  ;;  %v6976_v7 = vpack.c.bf16 %v11739_v36, %v11734_v18 }
 0x21b   :  { %v3481_v61 = vmul.f32 %v11747_v48, %v13441_v46  ;;  %6971 = vmatprep.subr.bf16.mxu1 %v6970_v42  ;;  %v5486_v42 = vld [vmem:[%s13304_s17 + $0x1070] sm:$0xff]  ;;  %v3912_v52 = vadd.f32 %v3910_v62, %v3906_v4  ;;  %v11770_v57 = vld [vmem:[#allocation2 + $0x84] sm:$0xff]  ;;  %v13179_v4 = vstv %s11674_s13  ;;  %v11799_v18 = vld [vmem:[%s13304_s17 + $0xff8] sm:$0xff]  ;;  %v6964_v30 = vpack.c.bf16 %v11762_v1, %v11755_v50 }
 0x21c   :  { %v5909_v31 = vpop.f32.mrb[4].mxu1  ;;  %6959 = vmatpush1.bf16.msra.mxu0 %v6958_v20  ;;  %v3471_v49 = vadd.f32 %v3469_v12, %v3465_v27  ;;  %v3922_v20 = vmul.f32 %v11770_v57, %v13173_v58  ;;  %v11786_v12 = vld [vmem:[%s13304_s17 + $0xff0] sm:$0xff]  ;;  %v5512_v36 = vld [vmem:[%s13304_s17 + $0x1140] sm:$0xff]  ;;  %v5513_v58 = vld [vmem:[%s13304_s17 + $0x1148] sm:$0xff]  ;;  %v6978_v38 = vpack.c.bf16 %v5487_v56, %v5486_v42  ;;  %v13445_v42 = vstv %s13443_s21  ;;  %s11885_s21 = sld [smem:[#allocation3 + $0xc3]] }
 0x21d   :  { %v5910_v46 = vpop.f32.mrb[5].mxu1  ;;  %6960 = vmatprep.subr.bf16.mxu0 %v13315_v40  ;;  %v11788_v62 = vld [vmem:[#allocation2 + $0x90] sm:$0xff]  ;;  %v11828_v50 = vld [vmem:[#allocation2 + $0x9c] sm:$0xff] }
 0x21e   :  { %v3928_v27 = vmul.f32 %v11788_v62, %v13174_v29  ;;  %v5911_v8 = vadd.f32 %v5910_v46, %v5909_v31  ;;  %6973 = vmatpush3.bf16.msra.mxu1 %v6972_v24  ;;  %v3609_v29 = vcombine.high %v11622_v41, %v11622_v41  ;;  %v3477_v2 = vadd.f32 %v3475_v21, %v3471_v49  ;;  %v11809_v24 = vld [vmem:[#allocation2 + $0xf8] sm:$0xf]  ;;  %v5488_v41 = vld [vmem:[%s13304_s17 + $0x1080] sm:$0xff]  ;;  %v5489_v21 = vld [vmem:[%s13304_s17 + $0x1088] sm:$0xff] }
 0x21f   :  { %v3918_v31 = vadd.f32 %v3916_v23, %v3912_v52  ;;  %v3493_v46 = vmul.f32 %v11809_v24, %v3491_v43  ;;  %6975 = vmatprep.subr.bf16.mxu1 %v6974_v35  ;;  %v3934_v1 = vmul.f32 %v11828_v50, %v13179_v4  ;;  %v6980_v49 = vpack.c.bf16 %v11799_v18, %v11786_v12  ;;  %v11850_v52 = vld [vmem:[%s13304_s17 + $0x1000] sm:$0xff]  ;;  %v11861_v12 = vld [vmem:[%s13304_s17 + $0x1008] sm:$0xff]  ;;  %v5515_v18 = vld [vmem:[%s13304_s17 + $0x1158] sm:$0xff] }
 0x220   :  { %6962 = vmatpush1.bf16.msra.mxu0 %v6961_v63  ;;  %v11826_v43 = vadd.f32 %v5911_v8, %v11490_v60  ;;  %v3483_v23 = vadd.f32 %v3481_v61, %v3477_v2  ;;  %v11833_v63 = vld [vmem:[#allocation2 + $0x104] sm:$0xf]  ;;  %v6998_v60 = vpack.c.bf16 %v5513_v58, %v5512_v36  ;;  %v5497_v61 = vld [vmem:[%s13304_s17 + $0x10c8] sm:$0xff]  ;;  %v11856_v58 = vrot.slane %v3609_v29, %v8657_v51  ;;  %v5514_v8 = vld [vmem:[%s13304_s17 + $0x1150] sm:$0xff] }
 0x221   :  { %v3924_v35 = vadd.f32 %v3922_v20, %v3918_v31  ;;  %v3499_v56 = vmul.f32 %v11833_v63, %v13445_v42  ;;  %6963 = vmatprep.subr.bf16.mxu0 %v13315_v40  ;;  %v5496_v2 = vld [vmem:[%s13304_s17 + $0x10c0] sm:$0xff]  ;;  %v13186_v20 = vstv %s11729_s7  ;;  %v11869_v42 = vld [vmem:[#allocation2 + $0xa8] sm:$0xff]  ;;  %v11874_v29 = vld [vmem:[#allocation2 + $0x110] sm:$0xf]  ;;  %v13446_v4 = vstv %s11328_s19  ;;  %s13475_s19 = sld [smem:[#allocation37_spill]] }
 0x222   :  { %6977 = vmatpush3.bf16.msra.mxu1 %v6976_v7  ;;  %v3489_v36 = vadd.f32 %v3487_v0, %v3483_v23  ;;  %v3940_v7 = vmul.f32 %v11869_v42, %v13183_v9  ;;  %v3505_v15 = vmul.f32 %v11874_v29, %v13446_v4  ;;  %v6982_v26 = vpack.c.bf16 %v5489_v21, %v5488_v41  ;;  %v11890_v23 = vld [vmem:[%s13304_s17 + $0x10d8] sm:$0xff] }
 0x223   :  { %v3930_v31 = vadd.f32 %v3928_v27, %v3924_v35  ;;  %6979 = vmatprep.subr.bf16.mxu1 %v6978_v38  ;;  %v13187_v0 = vstv %s11757_s0  ;;  %v7000_v27 = vpack.c.bf16 %v5497_v61, %v5496_v2  ;;  %v5490_v38 = vld [vmem:[%s13304_s17 + $0x1090] sm:$0xff]  ;;  %v5491_v4 = vld [vmem:[%s13304_s17 + $0x1098] sm:$0xff]  ;;  %v6984_v9 = vpack.c.bf16 %v11861_v12, %v11850_v52  ;;  %v11921_v52 = vld [vmem:[#allocation2 + $0xc0] sm:$0xff] }
 0x224   :  { %6965 = vmatpush1.bf16.msra.mxu0 %v6964_v30  ;;  %v3495_v41 = vadd.f32 %v3493_v46, %v3489_v36  ;;  %v11898_v35 = vld [vmem:[#allocation2 + $0xb4] sm:$0xff]  ;;  %v11903_v2 = vld [vmem:[#allocation2 + $0x11c] sm:$0xf]  ;;  %v7002_v32 = vpack.c.bf16 %v5515_v18, %v5514_v8  ;;  %v3625_v46 = vcombine.high %v11856_v58, %v11856_v58  ;;  %v3952_v12 = vmul.f32 %v11921_v52, %v13187_v0 }
 0x225   :  { %v3936_v21 = vadd.f32 %v3934_v1, %v3930_v31  ;;  %v3946_v30 = vmul.f32 %v11898_v35, %v13186_v20  ;;  %v3511_v61 = vmul.f32 %v11903_v2, %v3509_v13  ;;  %6999 = vmatprep.subr.bf16.mxu0 %v6998_v60  ;;  %v5516_v1 = vld [vmem:[%s13304_s17 + $0x1160] sm:$0xff]  ;;  %v5517_v13 = vld [vmem:[%s13304_s17 + $0x1168] sm:$0xff]  ;;  %v13447_v8 = vstv %s11358_s10  ;;  %s13466_s10 = sld [smem:[#allocation32_spill]] }
 0x226   :  { %6981 = vmatpush3.bf16.msra.mxu1 %v6980_v49  ;;  %v3501_v60 = vadd.f32 %v3499_v56, %v3495_v41  ;;  %v11926_v49 = vld [vmem:[#allocation2 + $0x128] sm:$0xf]  ;;  %v7004_v31 = vpack.c.bf16 %v11890_v23, %v11882_v16  ;;  %v6986_v20 = vpack.c.bf16 %v5491_v4, %v5490_v38  ;;  %v5474_v56 = vld [vmem:[%s13304_s17 + $0x1010] sm:$0xff]  ;;  %v5500_v41 = vld [vmem:[%s13304_s17 + $0x10e0] sm:$0xff] }
 0x227   :  { %v3942_v36 = vadd.f32 %v3940_v7, %v3936_v21  ;;  %v3517_v18 = vmul.f32 %v11926_v49, %v13447_v8  ;;  %3362 = vmatmul.mubr.f32.vlgmr.msra.gmra.mrb[16].mxu0 %v11339_v37  ;;  %6983 = vmatprep.subr.bf16.mxu1 %v6982_v26  ;;  %v5475_v7 = vld [vmem:[%s13304_s17 + $0x1018] sm:$0xff]  ;;  %v5501_v16 = vld [vmem:[%s13304_s17 + $0x10e8] sm:$0xff]  ;;  %v5492_v26 = vld [vmem:[%s13304_s17 + $0x10a0] sm:$0xff] }
 0x228   :  { %7001 = vmatpush3.bf16.msra.mxu0 %v7000_v27  ;;  %3775 = vmatprep.mubr.f32.mxu0 %v3625_v46  ;;  %v5493_v23 = vld [vmem:[%s13304_s17 + $0x10a8] sm:$0xff]  ;;  %v3507_v38 = vadd.f32 %v3505_v15, %v3501_v60  ;;  %v7006_v46 = vpack.c.bf16 %v5517_v13, %v5516_v1  ;;  %v6988_v37 = vpack.c.bf16 %v5475_v7, %v5474_v56  ;;  %v5518_v15 = vld [vmem:[%s13304_s17 + $0x1170] sm:$0xff]  ;;  %v5476_v8 = vld [vmem:[%s13304_s17 + $0x1020] sm:$0xff] }
 0x229   :  { %v3948_v4 = vadd.f32 %v3946_v30, %v3942_v36  ;;  %v11955_v21 = vld [vmem:[#allocation2 + $0xcc] sm:$0xff]  ;;  %7003 = vmatprep.subr.bf16.mxu0 %v7002_v32  ;;  %v5519_v30 = vld [vmem:[%s13304_s17 + $0x1178] sm:$0xff]  ;;  %v13448_v32 = vstv %s11817_s1  ;;  %v7008_v56 = vpack.c.bf16 %v5501_v16, %v5500_v41  ;;  %v6990_v7 = vpack.c.bf16 %v5493_v23, %v5492_v26  ;;  %s12319_s1 = sld [smem:[#allocation3 + $0xd5]] }
 0x22a   :  { %v3958_v27 = vmul.f32 %v11955_v21, %v13188_v53  ;;  %v1428_v0 = vpop.f32.mrb[4].mxu0  ;;  %6985 = vmatpush3.bf16.msra.mxu1 %v6984_v9  ;;  %v3513_v60 = vadd.f32 %v3511_v61, %v3507_v38  ;;  %v11969_v53 = vld [vmem:[#allocation2 + $0xd8] sm:$0xff]  ;;  %v5477_v61 = vld [vmem:[%s13304_s17 + $0x1028] sm:$0xff]  ;;  %v13450_v26 = vstv %s11430_s16 }
 0x22b   :  { %v3954_v36 = vadd.f32 %v3952_v12, %v3948_v4  ;;  %v3964_v1 = vmul.f32 %v11969_v53, %v13448_v32  ;;  %v11975_v9 = vadd.f32 %v1428_v0, %v11826_v43  ;;  %v1430_v13 = vpop.f32.mrb[5].mxu0  ;;  %6987 = vmatprep.subr.bf16.mxu1 %v6986_v20  ;;  %v5502_v12 = vld [vmem:[%s13304_s17 + $0x10f0] sm:$0xff]  ;;  %v5503_v20 = vld [vmem:[%s13304_s17 + $0x10f8] sm:$0xff]  ;;  %v3875_v23 = vmul.f32 %v11388_v17, %v13450_v26 }
 0x22c   :  { %7005 = vmatpush3.bf16.msra.mxu0 %v7004_v31  ;;  %v5494_v0 = vld [vmem:[%s13304_s17 + $0x10b0] sm:$0xff]  ;;  %v5495_v41 = vld [vmem:[%s13304_s17 + $0x10b8] sm:$0xff]  ;;  %v3519_v16 = vadd.f32 %v3517_v18, %v3513_v60  ;;  %v12001_v31 = vld [vmem:[#allocation2 + $0xe4] sm:$0xff]  ;;  %v13452_v4 = vstv %s11853_s23  ;;  %v7010_v13 = vpack.c.bf16 %v5519_v30, %v5518_v15  ;;  %v6992_v18 = vpack.c.bf16 %v5477_v61, %v5476_v8 }
 0x22d   :  { %13449 = vst [vmem:[#allocation59_spill] sm:$0xff] %v11975_v9  ;;  %v3960_v38 = vadd.f32 %v3958_v27, %v3954_v36  ;;  %13451 = vst [vmem:[#allocation44_spill] sm:$0xff] %v12001_v31  ;;  %v3970_v32 = vmul.f32 %v12001_v31, %v13452_v4  ;;  %7007 = vmatprep.subr.bf16.mxu0 %v7006_v46  ;;  %v5478_v43 = vld [vmem:[%s13304_s17 + $0x1030] sm:$0xff]  ;;  %v5479_v17 = vld [vmem:[%s13304_s17 + $0x1038] sm:$0xff]  ;;  %v13453_v15 = vstv %s11472_s9  ;;  %v13455_v4 = vstv %s11488_s22  ;;  %s12171_s22 = sld [smem:[#allocation3 + $0xcd]] }
 0x22e   :  { %6989 = vmatpush3.bf16.msra.mxu1 %v6988_v37  ;;  %v5520_v27 = vld [vmem:[%s13304_s17 + $0x1180] sm:$0xff]  ;;  %v5521_v46 = vld [vmem:[%s13304_s17 + $0x1188] sm:$0xff]  ;;  %v3881_v30 = vmul.f32 %v11416_v3, %v13453_v15  ;;  %v12022_v36 = vld [vmem:[#allocation2 + $0xf0] sm:$0xff]  ;;  %v13454_v37 = vstv %s11885_s21  ;;  %v7012_v61 = vpack.c.bf16 %v5503_v20, %v5502_v12  ;;  %v6994_v26 = vpack.c.bf16 %v5495_v41, %v5494_v0 }
 0x22f   :  { %v3966_v60 = vadd.f32 %v3964_v1, %v3960_v38  ;;  %v3976_v8 = vmul.f32 %v12022_v36, %v13454_v37  ;;  %6991 = vmatprep.subr.bf16.mxu1 %v6990_v7  ;;  %v3887_v45 = vmul.f32 %v11441_v28, %v13455_v4  ;;  %v3987_v9 = vstv %s11944_s12  ;;  %v5504_v31 = vld [vmem:[%s13304_s17 + $0x1100] sm:$0xff]  ;;  %v5505_v3 = vld [vmem:[%s13304_s17 + $0x1108] sm:$0xff] }
 0x230   :  { %7009 = vmatpush3.bf16.msra.mxu0 %v7008_v56  ;;  %v3521_v1 = vmax.f32 %v3519_v16, 0.0  ;;  %v12037_v7 = vld [vmem:[#allocation2 + $0xfc] sm:$0xff]  ;;  %v13456_v12 = vstv %s11911_s5  ;;  %v3877_v28 = vadd.f32 %v3875_v23, %v11173_v47  ;;  %v6996_v56 = vpack.c.bf16 %v5479_v17, %v5478_v43  ;;  %v5529_v16 = vld [vmem:[%s13304_s17 + $0x11c8] sm:$0xff] }
 0x231   :  { %v3972_v38 = vadd.f32 %v3970_v32, %v3966_v60  ;;  %v3982_v20 = vmul.f32 %v12037_v7, %v13456_v12  ;;  %7011 = vmatprep.subr.bf16.mxu0 %v7010_v13  ;;  %v7014_v0 = vpack.c.bf16 %v5521_v46, %v5520_v27  ;;  %v5528_v41 = vld [vmem:[%s13304_s17 + $0x11c0] sm:$0xff]  ;;  %v3993_v15 = vstv %s11961_s14  ;;  %v5522_v32 = vld [vmem:[%s13304_s17 + $0x1190] sm:$0xff]  ;;  %v5523_v47 = vld [vmem:[%s13304_s17 + $0x1198] sm:$0xff] }
 0x232   :  { %6993 = vmatpush3.bf16.msra.mxu1 %v6992_v18  ;;  %v13457_v43 = vstv %s11526_s24  ;;  %v12059_v17 = vld [vmem:[#allocation2 + $0x108] sm:$0xff]  ;;  %v3883_v27 = vadd.f32 %v3881_v30, %v3877_v28  ;;  %v7016_v46 = vpack.c.bf16 %v5505_v3, %v5504_v31  ;;  %v13458_v60 = vstv %s11539_s2  ;;  %v12077_v31 = vld [vmem:[#allocation2 + $0x114] sm:$0xff]  ;;  %s12246_s24 = sld [smem:[#allocation3 + $0xd1]]  ;;  %s12354_s2 = sld [smem:[#allocation3 + $0xd7]] }
 0x233   :  { %v3893_v23 = vmul.f32 %v11452_v14, %v13457_v43  ;;  %v3978_v13 = vadd.f32 %v3976_v8, %v3972_v38  ;;  %v3988_v18 = vmul.f32 %v12059_v17, %v3987_v9  ;;  %6995 = vmatprep.subr.bf16.mxu1 %v6994_v26  ;;  %v3899_v37 = vmul.f32 %v11509_v55, %v13458_v60  ;;  %v5506_v14 = vld [vmem:[%s13304_s17 + $0x1110] sm:$0xff]  ;;  %v5507_v8 = vld [vmem:[%s13304_s17 + $0x1118] sm:$0xff] }
 0x234   :  { %v3999_v4 = vstv %s11987_s11  ;;  %7013 = vmatpush3.bf16.msra.mxu0 %v7012_v61  ;;  %v12069_v12 = vrot.slane %v3521_v1, %v8657_v51  ;;  %v3994_v55 = vmul.f32 %v12077_v31, %v3993_v15  ;;  %v3889_v61 = vadd.f32 %v3887_v45, %v3883_v27  ;;  %v5530_v1 = vld [vmem:[%s13304_s17 + $0x11d0] sm:$0xff]  ;;  %v5531_v38 = vld [vmem:[%s13304_s17 + $0x11d8] sm:$0xff]  ;;  %v5525_v45 = vld [vmem:[%s13304_s17 + $0x11a8] sm:$0xff] }
 0x235   :  { %v3984_v30 = vadd.f32 %v3982_v20, %v3978_v13  ;;  %7015 = vmatprep.subr.bf16.mxu0 %v7014_v0  ;;  %v7031_v26 = vpack.c.bf16 %v5529_v16, %v5528_v41  ;;  %v7018_v3 = vpack.c.bf16 %v5523_v47, %v5522_v32  ;;  %v5524_v20 = vld [vmem:[%s13304_s17 + $0x11a0] sm:$0xff]  ;;  %v13459_v28 = vstv %s11570_s27  ;;  %s13461_s27 = sld [smem:[#allocation25_spill]] }
 0x236   :  { %6997 = vmatpush3.bf16.msra.mxu1 %v6996_v56  ;;  %v3905_v0 = vmul.f32 %v11518_v39, %v13459_v28  ;;  %v12097_v16 = vld [vmem:[#allocation2 + $0x120] sm:$0xff]  ;;  %v3895_v32 = vadd.f32 %v3893_v23, %v3889_v61  ;;  %v7020_v47 = vpack.c.bf16 %v5507_v8, %v5506_v14  ;;  %v3633_v43 = vcombine.high %v12069_v12, %v12069_v12  ;;  %v5526_v8 = vld [vmem:[%s13304_s17 + $0x11b0] sm:$0xff] }
 0x237   :  { %v3990_v41 = vadd.f32 %v3988_v18, %v3984_v30  ;;  %v4000_v56 = vmul.f32 %v12097_v16, %v3999_v4  ;;  %7030 = vmatprep.subr.bf16.mxu1 %v13315_v40  ;;  %v13460_v13 = vstv %s11583_s25  ;;  %v7034_v18 = vpack.c.bf16 %v5531_v38, %v5530_v1  ;;  %v5508_v23 = vld [vmem:[%s13304_s17 + $0x1120] sm:$0xff] }
 0x238   :  { %7017 = vmatpush3.bf16.msra.mxu0 %v7016_v46  ;;  %v3911_v27 = vmul.f32 %v11547_v59, %v13460_v13  ;;  %v3901_v39 = vadd.f32 %v3899_v37, %v3895_v32  ;;  %v7022_v30 = vpack.c.bf16 %v5525_v45, %v5524_v20  ;;  %v5509_v46 = vld [vmem:[%s13304_s17 + $0x1128] sm:$0xff]  ;;  %v5532_v59 = vld [vmem:[%s13304_s17 + $0x11e0] sm:$0xff]  ;;  %v13462_v14 = vstv %s11611_s15  ;;  %s13464_s15 = sld [smem:[#allocation33_spill]]  ;;  %v5511_v13 = vld [vmem:[%s13304_s17 + $0x1138] sm:$0xff] }
 0x239   :  { %v3996_v60 = vadd.f32 %v3994_v55, %v3990_v41  ;;  %3706 = vmatmul.mubr.f32.vlgmr.msra.gmra.mrb[18].mxu1 %v11658_v19  ;;  %7019 = vmatprep.subr.bf16.mxu0 %v7018_v3  ;;  %v3917_v19 = vmul.f32 %v11561_v22, %v13462_v14  ;;  %v5533_v37 = vld [vmem:[%s13304_s17 + $0x11e8] sm:$0xff]  ;;  %v5527_v55 = vld [vmem:[%s13304_s17 + $0x11b8] sm:$0xff]  ;;  %v7425_v1 = vld [vmem:[#allocation2] sm:$0xff]  ;;  %v7024_v20 = vpack.c.bf16 %v5509_v46, %v5508_v23  ;;  %v13465_v45 = vstv %s11629_s8  ;;  %s12153_s8 = sld [smem:[#allocation3 + $0xcc]] }
 0x23a   :  { %7032 = vmatpush1.bf16.msra.mxu1 %v7031_v26  ;;  %5548 = vmatprep.mubr.msk.f32.mxu1 %vm975_vm2, %v3633_v43  ;;  %v3907_v3 = vadd.f32 %v3905_v0, %v3901_v39  ;;  %v3923_v28 = vmul.f32 %v11591_v54, %v13465_v45  ;;  %v7026_v0 = vpack.c.bf16 %v5527_v55, %v5526_v8  ;;  %v5510_v43 = vld [vmem:[%s13304_s17 + $0x1130] sm:$0xff]  ;;  %v5535_v46 = vld [vmem:[%s13304_s17 + $0x11f8] sm:$0xff]  ;;  %v13469_v8 = vstv %s13466_s10  ;;  %s13476_s10 = sld [smem:[#allocation47_spill]] }
 0x23b   :  { %v4002_v61 = vadd.f32 %v4000_v56, %v3996_v60  ;;  %v13463_v38 = vstv %s13461_s27  ;;  %7033 = vmatprep.subr.bf16.mxu1 %v13315_v40  ;;  %v7037_v56 = vpack.c.bf16 %v5533_v37, %v5532_v59  ;;  %v13467_v60 = vstv %s11645_s3  ;;  %v5591_v59 = vld [vmem:[%s13304_s17 + $0x12e0] sm:$0xff]  ;;  %s12448_s27 = sld [smem:[#allocation3 + $0xdc]]  ;;  %s12460_s3 = sld [smem:[#allocation3 + $0xdd]] }
 0x23c   :  { %v4340_v22 = vmul.f32 %v7425_v1, %v13463_v38  ;;  %v5944_v26 = vpop.f32.mrb[6].mxu1  ;;  %7021 = vmatpush3.bf16.msra.mxu0 %v7020_v47  ;;  %v3913_v41 = vadd.f32 %v3911_v27, %v3907_v3  ;;  %v5534_v47 = vld [vmem:[%s13304_s17 + $0x11f0] sm:$0xff]  ;;  %v3929_v54 = vmul.f32 %v11602_v44, %v13467_v60  ;;  %v5592_v44 = vld [vmem:[%s13304_s17 + $0x12e8] sm:$0xff]  ;;  %v13470_v3 = vstv %s11674_s13  ;;  %s12185_s13 = sld [smem:[#allocation3 + $0xce]] }
 0x23d   :  { %v5945_v32 = vpop.f32.mrb[7].mxu1  ;;  %7023 = vmatprep.subr.bf16.mxu0 %v7022_v30  ;;  %v7426_v27 = vld [vmem:[#allocation2 + $0xc] sm:$0xff]  ;;  %v12166_v14 = vmax.f32 %v4002_v61, 0.0  ;;  %v3935_v1 = vmul.f32 %v11637_v25, %v13470_v3  ;;  %v7060_v45 = vpack.c.bf16 %v5592_v44, %v5591_v59  ;;  %v13471_v25 = vstv %s11700_s28  ;;  %s12205_s28 = sld [smem:[#allocation3 + $0xcf]] }
 0x23e   :  { %v13468_v39 = vstv %s13464_s15  ;;  %v12155_v23 = vadd.f32 %v5945_v32, %v5944_v26  ;;  %7035 = vmatpush1.bf16.msra.mxu1 %v7034_v18  ;;  %v3919_v37 = vadd.f32 %v3917_v19, %v3913_v41  ;;  %v4342_v55 = vadd.f32 %v4340_v22, %v13469_v8  ;;  %v5575_v19 = vld [vmem:[%s13304_s17 + $0x1260] sm:$0xff]  ;;  %v5576_v61 = vld [vmem:[%s13304_s17 + $0x1268] sm:$0xff]  ;;  %v5593_v32 = vld [vmem:[%s13304_s17 + $0x12f0] sm:$0xff]  ;;  %s12408_s15 = sld [smem:[#allocation3 + $0xda]] }
 0x23f   :  { %v4346_v30 = vmul.f32 %v7426_v27, %v13468_v39  ;;  %7036 = vmatprep.subr.bf16.mxu1 %v13315_v40  ;;  %v7028_v18 = vpack.c.bf16 %v5511_v13, %v5510_v43  ;;  %v7040_v26 = vpack.c.bf16 %v5535_v46, %v5534_v47  ;;  %v5536_v22 = vld [vmem:[%s13304_s17 + $0x1200] sm:$0xff]  ;;  %v5537_v41 = vld [vmem:[%s13304_s17 + $0x1208] sm:$0xff]  ;;  %v7062_v13 = vpack.c.bf16 %v5576_v61, %v5575_v19  ;;  %v7427_v39 = vld [vmem:[#allocation2 + $0x18] sm:$0xff] }
 0x240   :  { %7025 = vmatpush3.bf16.msra.mxu0 %v7024_v20  ;;  %v3925_v38 = vadd.f32 %v3923_v28, %v3919_v37  ;;  %v3941_v20 = vmul.f32 %v11647_v10, %v13471_v25  ;;  %v12192_v28 = vrot.slane %v12166_v14, %v8657_v51  ;;  %v4357_v10 = vstv %s12134_s18  ;;  %v5577_v8 = vld [vmem:[%s13304_s17 + $0x1270] sm:$0xff]  ;;  %v5596_v3 = vld [vmem:[%s13304_s17 + $0x1308] sm:$0xff]  ;;  %v5539_v25 = vld [vmem:[%s13304_s17 + $0x1218] sm:$0xff] }
 0x241   :  { %7027 = vmatprep.subr.bf16.mxu0 %v7026_v0  ;;  %v4348_v43 = vadd.f32 %v4346_v30, %v4342_v55  ;;  %v13472_v47 = vstv %s11729_s7  ;;  %v13473_v46 = vstv %s11432_s20  ;;  %v13474_v44 = vstv %s11757_s0  ;;  %s12222_s20 = sld [smem:[#allocation3 + $0xd0]]  ;;  %s7537_s0 = smov [#allocation8]  }
 0x242   :  { %7038 = vmatpush1.bf16.msra.mxu1 %v7037_v56  ;;  %v5594_v56 = vld [vmem:[%s13304_s17 + $0x12f8] sm:$0xff]  ;;  %v3931_v0 = vadd.f32 %v3929_v54, %v3925_v38  ;;  %v3947_v60 = vmul.f32 %v11676_v5, %v13472_v47  ;;  %v4352_v59 = vmul.f32 %v7427_v39, %v13473_v46  ;;  %v3953_v54 = vmul.f32 %v11694_v34, %v13474_v44  ;;  %v5595_v34 = vld [vmem:[%s13304_s17 + $0x1300] sm:$0xff]  ;;  %s12516_s7 = sld [smem:[#allocation3 + $0xe0]] }
 0x243   :  { %7039 = vmatprep.subr.bf16.mxu1 %v13315_v40  ;;  %v7043_v30 = vpack.c.bf16 %v5537_v41, %v5536_v22  ;;  %v7064_v37 = vpack.c.bf16 %v5594_v56, %v5593_v32  ;;  %v5578_v5 = vld [vmem:[%s13304_s17 + $0x1278] sm:$0xff]  ;;  %v4363_v55 = vstv %s12153_s8  ;;  %v5538_v22 = vld [vmem:[%s13304_s17 + $0x1210] sm:$0xff]  ;;  %v5580_v41 = vld [vmem:[%s13304_s17 + $0x1288] sm:$0xff] }
 0x244   :  { %7029 = vmatpush3.bf16.msra.mxu0 %v7028_v18  ;;  %v3937_v27 = vadd.f32 %v3935_v1, %v3931_v0  ;;  %v4108_v18 = vcombine.high %v12192_v28, %v12192_v28  ;;  %v4354_v38 = vadd.f32 %v4352_v59, %v4348_v43  ;;  %v7429_v56 = vld [vmem:[#allocation2 + $0x30] sm:$0xff]  ;;  %v13478_v43 = vstv %s13476_s10  ;;  %v5541_v59 = vld [vmem:[%s13304_s17 + $0x1228] sm:$0xff]  ;;  %v5598_v44 = vld [vmem:[%s13304_s17 + $0x1318] sm:$0xff]  ;;  %s12499_s10 = sld [smem:[#allocation3 + $0xdf]] }
 0x245   :  { %7061 = vmatprep.subr.bf16.mxu0 %v7060_v45  ;;  %v7428_v45 = vld [vmem:[#allocation2 + $0x24] sm:$0xff]  ;;  %v4364_v0 = vmul.f32 %v7429_v56, %v4363_v55  ;;  %v3965_v47 = vmul.f32 %v11747_v48, %v13478_v43  ;;  %v4375_v39 = vstv %s12185_s13  ;;  %v5597_v48 = vld [vmem:[%s13304_s17 + $0x1310] sm:$0xff] }
 0x246   :  { %7041 = vmatpush1.bf16.msra.mxu1 %v7040_v26  ;;  %v3943_v1 = vadd.f32 %v3941_v20, %v3937_v27  ;;  %v4358_v19 = vmul.f32 %v7428_v45, %v4357_v10  ;;  %v13477_v26 = vstv %s13475_s19  ;;  %v4369_v20 = vstv %s12171_s22  ;;  %v5540_v27 = vld [vmem:[%s13304_s17 + $0x1220] sm:$0xff]  ;;  %s12427_s19 = sld [smem:[#allocation3 + $0xdb]] }
 0x247   :  { %3776 = vmatmul.mubr.f32.vlgmr.msra.gmra.mrb[18].mxu0 %v11856_v58  ;;  %v3959_v61 = vmul.f32 %v11714_v33, %v13477_v26  ;;  %7042 = vmatprep.subr.bf16.mxu1 %v13315_v40  ;;  %v7066_v58 = vpack.c.bf16 %v5578_v5, %v5577_v8  ;;  %v5579_v33 = vld [vmem:[%s13304_s17 + $0x1280] sm:$0xff]  ;;  %v4381_v45 = vstv %s12205_s28  ;;  %v7072_v56 = vpack.c.bf16 %v5598_v44, %v5597_v48  ;;  %v5542_v48 = vld [vmem:[%s13304_s17 + $0x1230] sm:$0xff] }
 0x248   :  { %7063 = vmatpush3.bf16.msra.mxu0 %v7062_v13  ;;  %4189 = vmatprep.mubr.f32.mxu0 %v4108_v18  ;;  %v3949_v32 = vadd.f32 %v3947_v60, %v3943_v1  ;;  %v7068_v13 = vpack.c.bf16 %v5596_v3, %v5595_v34  ;;  %v7046_v60 = vpack.c.bf16 %v5539_v25, %v5538_v22  ;;  %v7430_v5 = vld [vmem:[#allocation2 + $0x3c] sm:$0xff]  ;;  %v13479_v18 = vstv %s11853_s23  ;;  %v7431_v25 = vld [vmem:[#allocation2 + $0x48] sm:$0xff]  ;;  %s12333_s23 = sld [smem:[#allocation3 + $0xd6]] }
 0x249   :  { %7065 = vmatprep.subr.bf16.mxu0 %v7064_v37  ;;  %v4360_v8 = vadd.f32 %v4358_v19, %v4354_v38  ;;  %v3971_v34 = vmul.f32 %v11775_v6, %v13479_v18  ;;  %v7070_v1 = vpack.c.bf16 %v5580_v41, %v5579_v33  ;;  %v4376_v38 = vmul.f32 %v7431_v25, %v4375_v39  ;;  %v5581_v33 = vld [vmem:[%s13304_s17 + $0x1290] sm:$0xff]  ;;  %v5600_v41 = vld [vmem:[%s13304_s17 + $0x1328] sm:$0xff] }
 0x24a   :  { %v5979_v46 = vpop.f32.mrb[6].mxu0  ;;  %7044 = vmatpush1.bf16.msra.mxu1 %v7043_v30  ;;  %v3955_v37 = vadd.f32 %v3953_v54, %v3949_v32  ;;  %v4370_v30 = vmul.f32 %v7430_v5, %v4369_v20  ;;  %v13480_v19 = vstv %s11885_s21  ;;  %v7049_v6 = vpack.c.bf16 %v5541_v59, %v5540_v27  ;;  %v7432_v27 = vld [vmem:[#allocation2 + $0x54] sm:$0xff]  ;;  %v7433_v5 = vld [vmem:[#allocation2 + $0x60] sm:$0xff]  ;;  %v7434_v25 = vld [vmem:[#allocation2 + $0x6c] sm:$0xff]  ;;  %s12388_s21 = sld [smem:[#allocation3 + $0xd9]] }
 0x24b   :  { %v5980_v3 = vpop.f32.mrb[7].mxu0  ;;  %7045 = vmatprep.subr.bf16.mxu1 %v13315_v40  ;;  %v4366_v54 = vadd.f32 %v4364_v0, %v4360_v8  ;;  %v3977_v32 = vmul.f32 %v11809_v24, %v13480_v19  ;;  %v5599_v24 = vld [vmem:[%s13304_s17 + $0x1320] sm:$0xff]  ;;  %v13481_v59 = vstv %s11911_s5  ;;  %v3995_v19 = vmul.f32 %v11903_v2, %v3993_v15  ;;  %v5585_v2 = vld [vmem:[%s13304_s17 + $0x12b0] sm:$0xff]  ;;  %v5586_v15 = vld [vmem:[%s13304_s17 + $0x12b8] sm:$0xff]  ;;  %s12369_s5 = sld [smem:[#allocation3 + $0xd8]] }
 0x24c   :  { %v5981_v26 = vadd.f32 %v5980_v3, %v5979_v46  ;;  %7067 = vmatpush3.bf16.msra.mxu0 %v7066_v58  ;;  %v3961_v22 = vadd.f32 %v3959_v61, %v3955_v37  ;;  %v5582_v61 = vld [vmem:[%s13304_s17 + $0x1298] sm:$0xff]  ;;  %v4387_v58 = vstv %s12222_s20  ;;  %v4382_v46 = vmul.f32 %v7432_v27, %v4381_v45  ;;  %v5583_v3 = vld [vmem:[%s13304_s17 + $0x12a0] sm:$0xff] }
 0x24d   :  { %7069 = vmatprep.subr.bf16.mxu0 %v7068_v13  ;;  %v4372_v13 = vadd.f32 %v4370_v30, %v4366_v54  ;;  %v7074_v44 = vpack.c.bf16 %v5582_v61, %v5581_v33  ;;  %v3989_v30 = vmul.f32 %v11874_v29, %v3987_v9  ;;  %v7076_v18 = vpack.c.bf16 %v5600_v41, %v5599_v24  ;;  %v5601_v29 = vld [vmem:[%s13304_s17 + $0x1330] sm:$0xff]  ;;  %v5602_v9 = vld [vmem:[%s13304_s17 + $0x1338] sm:$0xff] }
 0x24e   :  { %7047 = vmatpush1.bf16.msra.mxu1 %v7046_v60  ;;  %v12304_v0 = vadd.f32 %v5981_v26, %v12155_v23  ;;  %v3967_v43 = vadd.f32 %v3965_v47, %v3961_v22  ;;  %v3983_v60 = vmul.f32 %v11833_v63, %v13481_v59  ;;  %v5543_v23 = vld [vmem:[%s13304_s17 + $0x1238] sm:$0xff]  ;;  %v4393_v47 = vstv %s12246_s24  ;;  %v5603_v59 = vld [vmem:[%s13304_s17 + $0x1340] sm:$0xff] }
 0x24f   :  { %7048 = vmatprep.subr.bf16.mxu1 %v13315_v40  ;;  %v4378_v8 = vadd.f32 %v4376_v38, %v4372_v13  ;;  %v4388_v63 = vmul.f32 %v7433_v5, %v4387_v58  ;;  %v7052_v26 = vpack.c.bf16 %v5543_v23, %v5542_v48  ;;  %v4394_v38 = vmul.f32 %v7434_v25, %v4393_v47  ;;  %v5546_v23 = vld [vmem:[%s13304_s17 + $0x1250] sm:$0xff] }
 0x250   :  { %7071 = vmatpush3.bf16.msra.mxu0 %v7070_v1  ;;  %v3973_v37 = vadd.f32 %v3971_v34, %v3967_v43  ;;  %v5584_v34 = vld [vmem:[%s13304_s17 + $0x12a8] sm:$0xff]  ;;  %v4399_v1 = vstv %s12263_s26  ;;  %v4001_v43 = vmul.f32 %v11926_v49, %v3999_v4  ;;  %v7080_v13 = vpack.c.bf16 %v5602_v9, %v5601_v29  ;;  %v5606_v9 = vld [vmem:[%s13304_s17 + $0x1358] sm:$0xff] }
 0x251   :  { %7073 = vmatprep.subr.bf16.mxu0 %v7072_v56  ;;  %v4384_v54 = vadd.f32 %v4382_v46, %v4378_v8  ;;  %v4405_v56 = vstv %s12281_s29  ;;  %v7078_v33 = vpack.c.bf16 %v5584_v34, %v5583_v3  ;;  %v4400_v41 = vmul.f32 %v11741_v11, %v4399_v1  ;;  %v5624_v8 = vld [vmem:[%s13304_s17 + $0x13e8] sm:$0xff]  ;;  %v5587_v34 = vld [vmem:[%s13304_s17 + $0x12c0] sm:$0xff] }
 0x252   :  { %7050 = vmatpush1.bf16.msra.mxu1 %v7049_v6  ;;  %v3979_v22 = vadd.f32 %v3977_v32, %v3973_v37  ;;  %v5544_v6 = vld [vmem:[%s13304_s17 + $0x1240] sm:$0xff]  ;;  %v5545_v32 = vld [vmem:[%s13304_s17 + $0x1248] sm:$0xff]  ;;  %v4411_v27 = vstv %s12295_s30  ;;  %v4406_v49 = vmul.f32 %v11770_v57, %v4405_v56  ;;  %v7082_v4 = vpack.c.bf16 %v5586_v15, %v5585_v2  ;;  %v5626_v15 = vld [vmem:[%s13304_s17 + $0x13f8] sm:$0xff] }
 0x253   :  { %7051 = vmatprep.subr.bf16.mxu1 %v13315_v40  ;;  %v4390_v24 = vadd.f32 %v4388_v63, %v4384_v54  ;;  %v7055_v46 = vpack.c.bf16 %v5545_v32, %v5544_v6  ;;  %v4417_v37 = vstv %s12319_s1  ;;  %v5623_v57 = vld [vmem:[%s13304_s17 + $0x13e0] sm:$0xff]  ;;  %v4093_v5 = vcombine.high %v12166_v14, %v12166_v14  ;;  %v5608_v6 = vld [vmem:[%s13304_s17 + $0x1368] sm:$0xff] }
 0x254   :  { %7075 = vmatpush3.bf16.msra.mxu0 %v7074_v44  ;;  %v3985_v61 = vadd.f32 %v3983_v60, %v3979_v22  ;;  %v5604_v60 = vld [vmem:[%s13304_s17 + $0x1348] sm:$0xff]  ;;  %v5547_v44 = vld [vmem:[%s13304_s17 + $0x1258] sm:$0xff]  ;;  %v4423_v29 = vstv %s12333_s23  ;;  %v4418_v25 = vmul.f32 %v11828_v50, %v4417_v37  ;;  %v4429_v32 = vstv %s12354_s2 }
 0x255   :  { %7077 = vmatprep.subr.bf16.mxu0 %v7076_v18  ;;  %v4396_v48 = vadd.f32 %v4394_v38, %v4390_v24  ;;  %v4412_v18 = vmul.f32 %v11788_v62, %v4411_v27  ;;  %v7084_v3 = vpack.c.bf16 %v5604_v60, %v5603_v59  ;;  %v7058_v14 = vpack.c.bf16 %v5547_v44, %v5546_v23  ;;  %v5605_v62 = vld [vmem:[%s13304_s17 + $0x1350] sm:$0xff]  ;;  %v5610_v60 = vld [vmem:[%s13304_s17 + $0x1378] sm:$0xff] }
 0x256   :  { %7053 = vmatpush1.bf16.msra.mxu1 %v7052_v26  ;;  %v3991_v11 = vadd.f32 %v3989_v30, %v3985_v61  ;;  %v5588_v26 = vld [vmem:[%s13304_s17 + $0x12c8] sm:$0xff]  ;;  %v7092_v38 = vpack.c.bf16 %v5624_v8, %v5623_v57  ;;  %v12430_v2 = vrot.slane %v4093_v5, %v8657_v51  ;;  %v5625_v50 = vld [vmem:[%s13304_s17 + $0x13f0] sm:$0xff]  ;;  %v4424_v24 = vmul.f32 %v11869_v42, %v4423_v29  ;;  %v5627_v8 = vld [vmem:[%s13304_s17 + $0x1400] sm:$0xff] }
 0x257   :  { %7054 = vmatprep.subr.bf16.mxu1 %v13315_v40  ;;  %v4402_v30 = vadd.f32 %v4400_v41, %v4396_v48  ;;  %v7088_v41 = vpack.c.bf16 %v5606_v9, %v5605_v62  ;;  %v5609_v42 = vld [vmem:[%s13304_s17 + $0x1370] sm:$0xff]  ;;  %v4441_v23 = vstv %s12388_s21  ;;  %v5628_v5 = vld [vmem:[%s13304_s17 + $0x1408] sm:$0xff] }
 0x258   :  { %7079 = vmatpush3.bf16.msra.mxu0 %v7078_v33  ;;  %v3997_v63 = vadd.f32 %v3995_v19, %v3991_v11  ;;  %v5607_v19 = vld [vmem:[%s13304_s17 + $0x1360] sm:$0xff]  ;;  %v7086_v33 = vpack.c.bf16 %v5588_v26, %v5587_v34  ;;  %v4109_v44 = vcombine.high %v12430_v2, %v12430_v2  ;;  %v4447_v34 = vstv %s12408_s15  ;;  %v5612_v26 = vld [vmem:[%s13304_s17 + $0x1388] sm:$0xff]  ;;  %s4848_s15 = sshll.u32 %s7537_s0, 4  ;;  %s4849_s15 = int_to_ptr.vmem [resolvable:$true] %s4848_s15 }
 0x259   :  { %7081 = vmatprep.subr.bf16.mxu0 %v7080_v13  ;;  %v4408_v54 = vadd.f32 %v4406_v49, %v4402_v30  ;;  %v5590_v13 = vld [vmem:[%s13304_s17 + $0x12d8] sm:$0xff]  ;;  %v7094_v59 = vpack.c.bf16 %v5608_v6, %v5607_v19  ;;  %v4430_v49 = vmul.f32 %v11898_v35, %v4429_v32  ;;  %v7098_v30 = vpack.c.bf16 %v5610_v60, %v5609_v42  ;;  %s7481_s16 = scalar_lea.vmem %s4849_s15, 32  ;;  %p7486_p11 = scmp.lt.s32.totalorder %s4849_s15, %s4849_s15 }
 0x25a   :  { %7056 = vmatpush1.bf16.msra.mxu1 %v7055_v46  ;;  %v4003_v22 = vadd.f32 %v4001_v43, %v3997_v63  ;;  %v5589_v43 = vld [vmem:[%s13304_s17 + $0x12d0] sm:$0xff]  ;;  %v4435_v46 = vstv %s12369_s5  ;;  %v4442_v62 = vmul.f32 %v11955_v21, %v4441_v23  ;;  %v7100_v9 = vpack.c.bf16 %v5628_v5, %v5627_v8  ;;  %v5642_v19 = vld [vmem:[%s13304_s17 + $0x1478] sm:$0xff]  ;;  %v5644_v8 = vld [vmem:[%s13304_s17 + $0x1488] sm:$0xff]  ;;  %p7482_p10 = scmp.ne.s32.totalorder %s4849_s15, %s7481_s16  ;;  %p7487_p12 = scmp.lt.s32.totalorder %s7481_s16, %s7481_s16 }
 0x25b   :  { %7057 = vmatprep.subr.bf16.mxu1 %v13315_v40  ;;  %v4414_v61 = vadd.f32 %v4412_v18, %v4408_v54  ;;  %v7090_v57 = vpack.c.bf16 %v5590_v13, %v5589_v43  ;;  %v4436_v63 = vmul.f32 %v11921_v52, %v4435_v46  ;;  %v5639_v18 = vld [vmem:[%s13304_s17 + $0x1460] sm:$0xff]  ;;  %v4453_v54 = vstv %s12427_s19  ;;  %v5629_v21 = vld [vmem:[%s13304_s17 + $0x1410] sm:$0xff]  ;;  %v5630_v6 = vld [vmem:[%s13304_s17 + $0x1418] sm:$0xff] }
 0x25c   :  { %7083 = vmatpush3.bf16.msra.mxu0 %v7082_v4  ;;  %v4005_v11 = vmax.f32 %v4003_v22, 0.0  ;;  %v7096_v4 = vpack.c.bf16 %v5626_v15, %v5625_v50  ;;  %v5641_v22 = vld [vmem:[%s13304_s17 + $0x1470] sm:$0xff]  ;;  %v4448_v50 = vmul.f32 %v11969_v53, %v4447_v34  ;;  %v5614_v53 = vld [vmem:[%s13304_s17 + $0x1398] sm:$0xff]  ;;  %v5632_v5 = vld [vmem:[%s13304_s17 + $0x1428] sm:$0xff]  ;;  %p7488_p13 = por %p7487_p12, %p7486_p11 }
 0x25d   :  { %7085 = vmatprep.subr.bf16.mxu0 %v7084_v3  ;;  %v4420_v48 = vadd.f32 %v4418_v25, %v4414_v61  ;;  %v5640_v3 = vld [vmem:[%s13304_s17 + $0x1468] sm:$0xff]  ;;  %v5613_v13 = vld [vmem:[%s13304_s17 + $0x1390] sm:$0xff] }
 0x25e   :  { %7059 = vmatpush1.bf16.msra.mxu1 %v7058_v14  ;;  %v12484_v52 = vrot.slane %v4005_v11, %v8657_v51  ;;  %v13482_v60 = vld [vmem:[#allocation44_spill] sm:$0xff]  ;;  %p7489_p0 = pnand %p7488_p13, %p7482_p10 }
 0x25f   :  { %7093 = vmatprep.subr.bf16.mxu1 %v7092_v38  ;;  %v4426_v35 = vadd.f32 %v4424_v24, %v4420_v48  ;;  %v7125_v38 = vpack.c.bf16 %v5640_v3, %v5639_v18  ;;  %v4454_v11 = vmul.f32 %v13482_v60, %v4453_v54  ;;  %v13483_v48 = vld [vmem:[#allocation59_spill] sm:$0xff]  ;;  %v7106_v3 = vpack.c.bf16 %v5614_v53, %v5613_v13 }
 0x260   :  { %7087 = vmatpush3.bf16.msra.mxu0 %v7086_v33  ;;  %v4117_v43 = vcombine.high %v12484_v52, %v12484_v52 }
 0x261   :  { %3846 = vmatmul.mubr.f32.vlgmr.msra.gmra.mrb[20].mxu1 %v12069_v12  ;;  %7089 = vmatprep.subr.bf16.mxu0 %v7088_v41  ;;  %v5611_v12 = vld [vmem:[%s13304_s17 + $0x1380] sm:$0xff]  ;;  %v4432_v14 = vadd.f32 %v4430_v49, %v4426_v35  ;;  %v4459_v41 = vstv %s12448_s27  ;;  %v7436_v35 = vld [vmem:[#allocation2 + $0x38] sm:$0xf] }
 0x262   :  { %7095 = vmatpush3.bf16.msra.mxu1 %v7094_v59  ;;  %4259 = vmatprep.mubr.f32.mxu1 %v4109_v44  ;;  %v7102_v24 = vpack.c.bf16 %v5612_v26, %v5611_v12  ;;  %v7104_v44 = vpack.c.bf16 %v5630_v6, %v5629_v21  ;;  %v4460_v18 = vmul.f32 %v12022_v36, %v4459_v41  ;;  %v4471_v12 = vstv %s12481_s4 }
 0x263   :  { %7097 = vmatprep.subr.bf16.mxu1 %v7096_v4  ;;  %v4438_v33 = vadd.f32 %v4436_v63, %v4432_v14  ;;  %v7128_v4 = vpack.c.bf16 %v5642_v19, %v5641_v22  ;;  %v4365_v63 = vmul.f32 %v7436_v35, %v4363_v55  ;;  %v5615_v14 = vld [vmem:[%s13304_s17 + $0x13a0] sm:$0xff]  ;;  %v5616_v55 = vld [vmem:[%s13304_s17 + $0x13a8] sm:$0xff] }
 0x264   :  { %v1911_v25 = vpop.f32.mrb[8].mxu1  ;;  %7091 = vmatpush3.bf16.msra.mxu0 %v7090_v57  ;;  %v5643_v57 = vld [vmem:[%s13304_s17 + $0x1480] sm:$0xff] }
 0x265   :  { %v1912_v15 = vadd.f32 %v1911_v25, %v12304_v0  ;;  %v1913_v61 = vpop.f32.mrb[9].mxu1  ;;  %7124 = vmatprep.subr.bf16.mxu0 %v13315_v40  ;;  %v7435_v0 = vld [vmem:[#allocation2 + $0x2c] sm:$0xf]  ;;  %v4444_v42 = vadd.f32 %v4442_v62, %v4438_v33  ;;  %v7437_v62 = vld [vmem:[#allocation2 + $0x44] sm:$0xf]  ;;  %v7131_v21 = vpack.c.bf16 %v5644_v8, %v5643_v57  ;;  %v5645_v33 = vld [vmem:[%s13304_s17 + $0x1490] sm:$0xff] }
 0x266   :  { %7099 = vmatpush3.bf16.msra.mxu1 %v7098_v30  ;;  %v4359_v59 = vmul.f32 %v7435_v0, %v4357_v10  ;;  %v4465_v10 = vstv %s12460_s3  ;;  %v13484_v25 = vld [vmem:[#allocation43_spill] sm:$0xff]  ;;  %v7110_v0 = vpack.c.bf16 %v5616_v55, %v5615_v14  ;;  %v5618_v8 = vld [vmem:[%s13304_s17 + $0x13b8] sm:$0xff]  ;;  %s13485_s3 = sld [smem:[#allocation61_spill]] }
 0x267   :  { %v12532_v49 = vadd.f32 %v1912_v15, %v13483_v48  ;;  %4190 = vmatmul.mubr.f32.vlgmr.msra.gmra.mrb[20].mxu0 %v12192_v28  ;;  %7101 = vmatprep.subr.bf16.mxu1 %v7100_v9  ;;  %v5631_v28 = vld [vmem:[%s13304_s17 + $0x1420] sm:$0xff]  ;;  %v4450_v30 = vadd.f32 %v4448_v50, %v4444_v42  ;;  %v4371_v9 = vmul.f32 %v7437_v62, %v4369_v20  ;;  %v7438_v50 = vld [vmem:[#allocation2 + $0x50] sm:$0xf]  ;;  %v4477_v15 = vstv %s12499_s10  ;;  %v7439_v42 = vld [vmem:[#allocation2 + $0x5c] sm:$0xf] }
 0x268   :  { %7126 = vmatpush1.bf16.msra.mxu0 %v7125_v38  ;;  %5659 = vmatprep.mubr.msk.f32.mxu0 %vm975_vm2, %v4117_v43  ;;  %v4466_v22 = vmul.f32 %v12037_v7, %v4465_v10  ;;  %v4361_v38 = vadd.f32 %v4359_v59, %v13484_v25  ;;  %v7108_v6 = vpack.c.bf16 %v5632_v5, %v5631_v28  ;;  %v5646_v7 = vld [vmem:[%s13304_s17 + $0x1498] sm:$0xff]  ;;  %v4483_v59 = vstv %s12516_s7  ;;  %v7440_v28 = vld [vmem:[#allocation2 + $0x68] sm:$0xf]  ;;  %v7441_v14 = vld [vmem:[#allocation2 + $0x74] sm:$0xf] }
 0x269   :  { %7127 = vmatprep.subr.bf16.mxu0 %v13315_v40  ;;  %v4456_v36 = vadd.f32 %v4454_v11, %v4450_v30  ;;  %v4377_v20 = vmul.f32 %v7438_v50, %v4375_v39  ;;  %v5634_v43 = vld [vmem:[%s13304_s17 + $0x1438] sm:$0xff]  ;;  %v4472_v39 = vmul.f32 %v12059_v17, %v4471_v12  ;;  %v4383_v60 = vmul.f32 %v7439_v42, %v4381_v45  ;;  %v5617_v17 = vld [vmem:[%s13304_s17 + $0x13b0] sm:$0xff]  ;;  %v5635_v45 = vld [vmem:[%s13304_s17 + $0x1440] sm:$0xff] }
 0x26a   :  { %v6014_v26 = vpop.f32.mrb[8].mxu0  ;;  %7103 = vmatpush3.bf16.msra.mxu1 %v7102_v24  ;;  %v5633_v24 = vld [vmem:[%s13304_s17 + $0x1430] sm:$0xff]  ;;  %v4367_v53 = vadd.f32 %v4365_v63, %v4361_v38  ;;  %v4478_v48 = vmul.f32 %v12077_v31, %v4477_v15  ;;  %v5636_v31 = vld [vmem:[%s13304_s17 + $0x1448] sm:$0xff]  ;;  %v4389_v5 = vmul.f32 %v7440_v28, %v4387_v58  ;;  %v4484_v63 = vmul.f32 %v12097_v16, %v4483_v59  ;;  %v7442_v38 = vld [vmem:[#allocation2 + $0x80] sm:$0xf] }
 0x26b   :  { %v6015_v19 = vpop.f32.mrb[9].mxu0  ;;  %7105 = vmatprep.subr.bf16.mxu1 %v7104_v44  ;;  %v4462_v13 = vadd.f32 %v4460_v18, %v4456_v36  ;;  %v7134_v44 = vpack.c.bf16 %v5646_v7, %v5645_v33  ;;  %v7112_v57 = vpack.c.bf16 %v5634_v43, %v5633_v24  ;;  %v5647_v18 = vld [vmem:[%s13304_s17 + $0x14a0] sm:$0xff]  ;;  %v4395_v58 = vmul.f32 %v7441_v14, %v4393_v47  ;;  %v5620_v36 = vld [vmem:[%s13304_s17 + $0x13c8] sm:$0xff]  ;;  %v5637_v25 = vld [vmem:[%s13304_s17 + $0x1450] sm:$0xff] }
 0x26c   :  { %v12574_v61 = vadd.f32 %v6015_v19, %v6014_v26  ;;  %7129 = vmatpush1.bf16.msra.mxu0 %v7128_v4  ;;  %v4373_v4 = vadd.f32 %v4371_v9, %v4367_v53  ;;  %v7114_v26 = vpack.c.bf16 %v5618_v8, %v5617_v17  ;;  %v7116_v16 = vpack.c.bf16 %v5636_v31, %v5635_v45  ;;  %v5619_v9 = vld [vmem:[%s13304_s17 + $0x13c0] sm:$0xff]  ;;  %v5638_v47 = vld [vmem:[%s13304_s17 + $0x1458] sm:$0xff]  ;;  %v5649_v33 = vld [vmem:[%s13304_s17 + $0x14b0] sm:$0xff] }
 0x26d   :  { %7130 = vmatprep.subr.bf16.mxu0 %v13315_v40  ;;  %v4468_v11 = vadd.f32 %v4466_v22, %v4462_v13  ;;  %v4401_v19 = vmul.f32 %v7442_v38, %v4399_v1  ;;  %v5650_v50 = vld [vmem:[%s13304_s17 + $0x14b8] sm:$0xff]  ;;  %v7443_v7 = vld [vmem:[#allocation2 + $0x8c] sm:$0xf]  ;;  %v7120_v1 = vpack.c.bf16 %v5638_v47, %v5637_v25  ;;  %v5621_v13 = vld [vmem:[%s13304_s17 + $0x13d0] sm:$0xff] }
 0x26e   :  { %7107 = vmatpush3.bf16.msra.mxu1 %v7106_v3  ;;  %v4379_v30 = vadd.f32 %v4377_v20, %v4373_v4  ;;  %v5648_v3 = vld [vmem:[%s13304_s17 + $0x14a8] sm:$0xff]  ;;  %v7118_v20 = vpack.c.bf16 %v5620_v36, %v5619_v9  ;;  %v4407_v24 = vmul.f32 %v7443_v7, %v4405_v56  ;;  %v7140_v53 = vpack.c.bf16 %v5650_v50, %v5649_v33  ;;  %v7444_v42 = vld [vmem:[#allocation2 + $0x98] sm:$0xf]  ;;  %v5651_v4 = vld [vmem:[%s13304_s17 + $0x14c0] sm:$0xff] }
 0x26f   :  { %7109 = vmatprep.subr.bf16.mxu1 %v7108_v6  ;;  %v4474_v35 = vadd.f32 %v4472_v39, %v4468_v11  ;;  %v7137_v22 = vpack.c.bf16 %v5648_v3, %v5647_v18  ;;  %v5622_v39 = vld [vmem:[%s13304_s17 + $0x13d8] sm:$0xff]  ;;  %v5703_v56 = vld [vmem:[%s13304_s17 + $0x1588] sm:$0xff]  ;;  %v7445_v17 = vld [vmem:[#allocation2 + $0xa4] sm:$0xf] }
 0x270   :  { %7132 = vmatpush1.bf16.msra.mxu0 %v7131_v21  ;;  %v4385_v62 = vadd.f32 %v4383_v60, %v4379_v30  ;;  %v4413_v60 = vmul.f32 %v7444_v42, %v4411_v27  ;;  %v4419_v8 = vmul.f32 %v7445_v17, %v4417_v37  ;;  %v5686_v31 = vld [vmem:[%s13304_s17 + $0x1500] sm:$0xff]  ;;  %v5687_v28 = vld [vmem:[%s13304_s17 + $0x1508] sm:$0xff]  ;;  %v5704_v30 = vld [vmem:[%s13304_s17 + $0x1590] sm:$0xff] }
 0x271   :  { %7133 = vmatprep.subr.bf16.mxu0 %v13315_v40  ;;  %v4480_v55 = vadd.f32 %v4478_v48, %v4474_v35  ;;  %v7446_v35 = vld [vmem:[#allocation2 + $0xb0] sm:$0xf]  ;;  %v5705_v18 = vld [vmem:[%s13304_s17 + $0x1598] sm:$0xff]  ;;  %v7156_v14 = vpack.c.bf16 %v5687_v28, %v5686_v31  ;;  %v5706_v38 = vld [vmem:[%s13304_s17 + $0x15a0] sm:$0xff] }
 0x272   :  { %7111 = vmatpush3.bf16.msra.mxu1 %v7110_v0  ;;  %v4391_v6 = vadd.f32 %v4389_v5, %v4385_v62  ;;  %v5702_v0 = vld [vmem:[%s13304_s17 + $0x1580] sm:$0xff]  ;;  %v5688_v9 = vld [vmem:[%s13304_s17 + $0x1510] sm:$0xff]  ;;  %v5689_v36 = vld [vmem:[%s13304_s17 + $0x1518] sm:$0xff] }
 0x273   :  { %7113 = vmatprep.subr.bf16.mxu1 %v7112_v57  ;;  %v4486_v21 = vadd.f32 %v4484_v63, %v4480_v55  ;;  %v7122_v57 = vpack.c.bf16 %v5622_v39, %v5621_v13  ;;  %v7154_v45 = vpack.c.bf16 %v5703_v56, %v5702_v0  ;;  %v4425_v63 = vmul.f32 %v7446_v35, %v4423_v29  ;;  %v5653_v29 = vld [vmem:[%s13304_s17 + $0x14d0] sm:$0xff]  ;;  %v5709_v0 = vld [vmem:[%s13304_s17 + $0x15b8] sm:$0xff]  ;;  %v7451_v42 = vld [vmem:[#allocation2 + $0xec] sm:$0xf] }
 0x274   :  { %7135 = vmatpush1.bf16.msra.mxu0 %v7134_v44  ;;  %v4397_v43 = vadd.f32 %v4395_v58, %v4391_v6  ;;  %v5652_v44 = vld [vmem:[%s13304_s17 + $0x14c8] sm:$0xff]  ;;  %v7447_v58 = vld [vmem:[#allocation2 + $0xbc] sm:$0xf]  ;;  %v7449_v33 = vld [vmem:[#allocation2 + $0xd4] sm:$0xf] }
 0x275   :  { %7136 = vmatprep.subr.bf16.mxu0 %v13315_v40  ;;  %v12658_v11 = vmax.f32 %v4486_v21, 0.0  ;;  %v7143_v5 = vpack.c.bf16 %v5652_v44, %v5651_v4  ;;  %v4431_v55 = vmul.f32 %v7447_v58, %v4429_v32  ;;  %v5656_v6 = vld [vmem:[%s13304_s17 + $0x14e8] sm:$0xff]  ;;  %v4443_v50 = vmul.f32 %v7449_v33, %v4441_v23  ;;  %v5658_v4 = vld [vmem:[%s13304_s17 + $0x14f8] sm:$0xff]  ;;  %v5734_v17 = vld [vmem:[%s13304_s17 + $0x1680] sm:$0xff] }
 0x276   :  { %7115 = vmatpush3.bf16.msra.mxu1 %v7114_v26  ;;  %v4403_v48 = vadd.f32 %v4401_v19, %v4397_v43  ;;  %v5654_v26 = vld [vmem:[%s13304_s17 + $0x14d8] sm:$0xff]  ;;  %v5707_v19 = vld [vmem:[%s13304_s17 + $0x15a8] sm:$0xff]  ;;  %v5692_v31 = vld [vmem:[%s13304_s17 + $0x1530] sm:$0xff] }
 0x277   :  { %7117 = vmatprep.subr.bf16.mxu1 %v7116_v16  ;;  %v12679_v37 = vrot.slane %v12658_v11, %v8657_v51  ;;  %v7158_v16 = vpack.c.bf16 %v5705_v18, %v5704_v30  ;;  %v7146_v32 = vpack.c.bf16 %v5654_v26, %v5653_v29  ;;  %v5691_v43 = vld [vmem:[%s13304_s17 + $0x1528] sm:$0xff]  ;;  %v5693_v28 = vld [vmem:[%s13304_s17 + $0x1538] sm:$0xff] }
 0x278   :  { %7138 = vmatpush1.bf16.msra.mxu0 %v7137_v22  ;;  %v4409_v27 = vadd.f32 %v4407_v24, %v4403_v48  ;;  %v7448_v22 = vld [vmem:[#allocation2 + $0xc8] sm:$0xf]  ;;  %v5690_v24 = vld [vmem:[%s13304_s17 + $0x1520] sm:$0xff]  ;;  %v7455_v33 = vld [vmem:[#allocation2 + $0x11c] sm:$0xf] }
 0x279   :  { %7139 = vmatprep.subr.bf16.mxu0 %v13315_v40  ;;  %v4437_v25 = vmul.f32 %v7448_v22, %v4435_v46  ;;  %v4592_v47 = vcombine.high %v12679_v37, %v12679_v37  ;;  %v5655_v46 = vld [vmem:[%s13304_s17 + $0x14e0] sm:$0xff]  ;;  %v5711_v30 = vld [vmem:[%s13304_s17 + $0x15c8] sm:$0xff] }
 0x27a   :  { %7119 = vmatpush3.bf16.msra.mxu1 %v7118_v20  ;;  %v4415_v3 = vadd.f32 %v4413_v60, %v4409_v27  ;;  %v7160_v20 = vpack.c.bf16 %v5689_v36, %v5688_v9  ;;  %v7149_v23 = vpack.c.bf16 %v5656_v6, %v5655_v46  ;;  %v4455_v60 = vmul.f32 %v7451_v42, %v4453_v54  ;;  %v5735_v54 = vld [vmem:[%s13304_s17 + $0x1688] sm:$0xff]  ;;  %v5720_v6 = vld [vmem:[%s13304_s17 + $0x1610] sm:$0xff] }
 0x27b   :  { %7121 = vmatprep.subr.bf16.mxu1 %v7120_v1  ;;  %v7450_v1 = vld [vmem:[#allocation2 + $0xe0] sm:$0xf]  ;;  %v7186_v29 = vpack.c.bf16 %v5735_v54, %v5734_v17  ;;  %v5719_v26 = vld [vmem:[%s13304_s17 + $0x1608] sm:$0xff] }
 0x27c   :  { %7141 = vmatpush1.bf16.msra.mxu0 %v7140_v53  ;;  %v4421_v62 = vadd.f32 %v4419_v8, %v4415_v3  ;;  %v4449_v13 = vmul.f32 %v7450_v1, %v4447_v34  ;;  %v5708_v53 = vld [vmem:[%s13304_s17 + $0x15b0] sm:$0xff]  ;;  %v4577_v8 = vcombine.high %v12658_v11, %v12658_v11  ;;  %v5710_v11 = vld [vmem:[%s13304_s17 + $0x15c0] sm:$0xff]  ;;  %v5695_v22 = vld [vmem:[%s13304_s17 + $0x1548] sm:$0xff] }
 0x27d   :  { %7142 = vmatprep.subr.bf16.mxu0 %v13315_v40  ;;  %v5657_v34 = vld [vmem:[%s13304_s17 + $0x14f0] sm:$0xff]  ;;  %v7170_v36 = vpack.c.bf16 %v5711_v30, %v5710_v11 }
 0x27e   :  { %7123 = vmatpush3.bf16.msra.mxu1 %v7122_v57  ;;  %v4427_v21 = vadd.f32 %v4425_v63, %v4421_v62  ;;  %v7164_v57 = vpack.c.bf16 %v5691_v43, %v5690_v24  ;;  %v7152_v63 = vpack.c.bf16 %v5658_v4, %v5657_v34  ;;  %v5736_v62 = vld [vmem:[%s13304_s17 + $0x1690] sm:$0xff]  ;;  %v5739_v24 = vld [vmem:[%s13304_s17 + $0x16a8] sm:$0xff] }
 0x27f   :  { %7155 = vmatprep.subr.bf16.mxu1 %v7154_v45  ;;  %v7166_v45 = vpack.c.bf16 %v5709_v0, %v5708_v53  ;;  %v5715_v0 = vld [vmem:[%s13304_s17 + $0x15e8] sm:$0xff]  ;;  %v5740_v4 = vld [vmem:[%s13304_s17 + $0x16b0] sm:$0xff] }
 0x280   :  { %7144 = vmatpush1.bf16.msra.mxu0 %v7143_v5  ;;  %v4433_v7 = vadd.f32 %v4431_v55, %v4427_v21  ;;  %v7452_v5 = vld [vmem:[#allocation2 + $0xf8] sm:$0xf]  ;;  %v7168_v55 = vpack.c.bf16 %v5693_v28, %v5692_v31  ;;  %v5716_v28 = vld [vmem:[%s13304_s17 + $0x15f0] sm:$0xff] }
 0x281   :  { %4260 = vmatmul.mubr.f32.vlgmr.msra.gmra.mrb[22].mxu1 %v12430_v2  ;;  %7145 = vmatprep.subr.bf16.mxu0 %v13315_v40  ;;  %v7162_v2 = vpack.c.bf16 %v5707_v19, %v5706_v38  ;;  %v4461_v35 = vmul.f32 %v7452_v5, %v4459_v41  ;;  %v5718_v41 = vld [vmem:[%s13304_s17 + $0x1600] sm:$0xff]  ;;  %v5712_v38 = vld [vmem:[%s13304_s17 + $0x15d0] sm:$0xff]  ;;  %v5713_v19 = vld [vmem:[%s13304_s17 + $0x15d8] sm:$0xff] }
 0x282   :  { %7157 = vmatpush3.bf16.msra.mxu1 %v7156_v14  ;;  %4673 = vmatprep.mubr.f32.mxu1 %v4592_v47  ;;  %v4439_v56 = vadd.f32 %v4437_v25, %v4433_v7  ;;  %v7453_v14 = vld [vmem:[#allocation2 + $0x104] sm:$0xf]  ;;  %v7454_v25 = vld [vmem:[#allocation2 + $0x110] sm:$0xf]  ;;  %v7174_v1 = vpack.c.bf16 %v5713_v19, %v5712_v38  ;;  %v5717_v5 = vld [vmem:[%s13304_s17 + $0x15f8] sm:$0xff] }
 0x283   :  { %7159 = vmatprep.subr.bf16.mxu1 %v7158_v16  ;;  %v4467_v58 = vmul.f32 %v7453_v14, %v4465_v10  ;;  %v5737_v16 = vld [vmem:[%s13304_s17 + $0x1698] sm:$0xff]  ;;  %v5694_v10 = vld [vmem:[%s13304_s17 + $0x1540] sm:$0xff]  ;;  %v4473_v47 = vmul.f32 %v7454_v25, %v4471_v12  ;;  %v5724_v30 = vld [vmem:[%s13304_s17 + $0x1630] sm:$0xff] }
 0x284   :  { %v6049_v39 = vpop.f32.mrb[10].mxu1  ;;  %7147 = vmatpush1.bf16.msra.mxu0 %v7146_v32  ;;  %v4445_v27 = vadd.f32 %v4443_v50, %v4439_v56  ;;  %v7188_v32 = vpack.c.bf16 %v5719_v26, %v5718_v41  ;;  %v7190_v46 = vpack.c.bf16 %v5737_v16, %v5736_v62  ;;  %v5721_v12 = vld [vmem:[%s13304_s17 + $0x1618] sm:$0xff]  ;;  %v4479_v50 = vmul.f32 %v7455_v33, %v4477_v15  ;;  %v5696_v15 = vld [vmem:[%s13304_s17 + $0x1550] sm:$0xff]  ;;  %v5726_v16 = vld [vmem:[%s13304_s17 + $0x1640] sm:$0xff] }
 0x285   :  { %v6050_v48 = vpop.f32.mrb[11].mxu1  ;;  %7148 = vmatprep.subr.bf16.mxu0 %v13315_v40  ;;  %v7172_v7 = vpack.c.bf16 %v5695_v22, %v5694_v10  ;;  %v7192_v53 = vpack.c.bf16 %v5721_v12, %v5720_v6  ;;  %v7182_v41 = vpack.c.bf16 %v5717_v5, %v5716_v28  ;;  %v5700_v26 = vld [vmem:[%s13304_s17 + $0x1570] sm:$0xff]  ;;  %v5701_v14 = vld [vmem:[%s13304_s17 + $0x1578] sm:$0xff]  ;;  %v5750_v25 = vld [vmem:[%s13304_s17 + $0x1700] sm:$0xff] }
 0x286   :  { %v6051_v44 = vadd.f32 %v6050_v48, %v6049_v39  ;;  %7161 = vmatpush3.bf16.msra.mxu1 %v7160_v20  ;;  %v4451_v3 = vadd.f32 %v4449_v13, %v4445_v27  ;;  %v5697_v13 = vld [vmem:[%s13304_s17 + $0x1558] sm:$0xff]  ;;  %v7456_v39 = vld [vmem:[#allocation2 + $0x128] sm:$0xf]  ;;  %v5698_v27 = vld [vmem:[%s13304_s17 + $0x1560] sm:$0xff] }
 0x287   :  { %7163 = vmatprep.subr.bf16.mxu1 %v7162_v2  ;;  %v5738_v2 = vld [vmem:[%s13304_s17 + $0x16a0] sm:$0xff]  ;;  %v7176_v34 = vpack.c.bf16 %v5697_v13, %v5696_v15  ;;  %v5744_v10 = vld [vmem:[%s13304_s17 + $0x16d0] sm:$0xff]  ;;  %v5745_v22 = vld [vmem:[%s13304_s17 + $0x16d8] sm:$0xff] }
 0x288   :  { %7150 = vmatpush1.bf16.msra.mxu0 %v7149_v23  ;;  %v2326_v18 = vadd.f32 %v6051_v44, %v12574_v61  ;;  %v12778_v61 = vrot.slane %v4577_v8, %v8657_v51  ;;  %v4457_v9 = vadd.f32 %v4455_v60, %v4451_v3  ;;  %v4485_v23 = vmul.f32 %v7456_v39, %v4483_v59  ;;  %v5722_v60 = vld [vmem:[%s13304_s17 + $0x1620] sm:$0xff]  ;;  %v5723_v59 = vld [vmem:[%s13304_s17 + $0x1628] sm:$0xff]  ;;  %v5741_v44 = vld [vmem:[%s13304_s17 + $0x16b8] sm:$0xff] }
 0x289   :  { %7151 = vmatprep.subr.bf16.mxu0 %v13315_v40  ;;  %v7194_v42 = vpack.c.bf16 %v5739_v24, %v5738_v2  ;;  %v7196_v31 = vpack.c.bf16 %v5723_v59, %v5722_v60  ;;  %v7198_v11 = vpack.c.bf16 %v5741_v44, %v5740_v4  ;;  %v7206_v19 = vpack.c.bf16 %v5745_v22, %v5744_v10  ;;  %v5746_v12 = vld [vmem:[%s13304_s17 + $0x16e0] sm:$0xff]  ;;  %v5752_v33 = vld [vmem:[%s13304_s17 + $0x1710] sm:$0xff]  ;;  %v5755_v39 = vld [vmem:[%s13304_s17 + $0x1728] sm:$0xff] }
 0x28a   :  { %7165 = vmatpush3.bf16.msra.mxu1 %v7164_v57  ;;  %v4463_v21 = vadd.f32 %v4461_v35, %v4457_v9  ;;  %v4593_v20 = vcombine.high %v12778_v61, %v12778_v61  ;;  %v5727_v9 = vld [vmem:[%s13304_s17 + $0x1648] sm:$0xff]  ;;  %v5730_v24 = vld [vmem:[%s13304_s17 + $0x1660] sm:$0xff]  ;;  %v5748_v15 = vld [vmem:[%s13304_s17 + $0x16f0] sm:$0xff] }
 0x28b   :  { %7167 = vmatprep.subr.bf16.mxu1 %v7166_v45  ;;  %v5699_v45 = vld [vmem:[%s13304_s17 + $0x1568] sm:$0xff]  ;;  %v5754_v13 = vld [vmem:[%s13304_s17 + $0x1720] sm:$0xff] }
 0x28c   :  { %7153 = vmatpush1.bf16.msra.mxu0 %v7152_v63  ;;  %v4469_v43 = vadd.f32 %v4467_v58, %v4463_v21  ;;  %v7180_v3 = vpack.c.bf16 %v5699_v45, %v5698_v27  ;;  %v5728_v21 = vld [vmem:[%s13304_s17 + $0x1650] sm:$0xff]  ;;  %v7225_v59 = vpack.c.bf16 %v5755_v39, %v5754_v13  ;;  %v5761_v27 = vld [vmem:[%s13304_s17 + $0x1758] sm:$0xff]  ;;  %v5763_v5 = vld [vmem:[%s13304_s17 + $0x1768] sm:$0xff] }
 0x28d   :  { %7187 = vmatprep.subr.bf16.mxu0 %v7186_v29  ;;  %v5742_v29 = vld [vmem:[%s13304_s17 + $0x16c0] sm:$0xff] }
 0x28e   :  { %7169 = vmatpush3.bf16.msra.mxu1 %v7168_v55  ;;  %v4475_v56 = vadd.f32 %v4473_v47, %v4469_v43  ;;  %v5751_v47 = vld [vmem:[%s13304_s17 + $0x1708] sm:$0xff] }
 0x28f   :  { %4330 = vmatmul.mubr.f32.vlgmr.msra.gmra.mrb[22].mxu0 %v12484_v52  ;;  %7171 = vmatprep.subr.bf16.mxu1 %v7170_v36  ;;  %v5714_v52 = vld [vmem:[%s13304_s17 + $0x15e0] sm:$0xff]  ;;  %v7184_v36 = vpack.c.bf16 %v5701_v14, %v5700_v26  ;;  %v7219_v6 = vpack.c.bf16 %v5751_v47, %v5750_v25  ;;  %v5731_v43 = vld [vmem:[%s13304_s17 + $0x1668] sm:$0xff]  ;;  %v5768_v14 = vld [vmem:[%s13304_s17 + $0x1790] sm:$0xff] }
 0x290   :  { %7189 = vmatpush3.bf16.msra.mxu0 %v7188_v32  ;;  %4743 = vmatprep.mubr.f32.mxu0 %v4593_v20  ;;  %v4481_v57 = vadd.f32 %v4479_v50, %v4475_v56  ;;  %v7178_v8 = vpack.c.bf16 %v5715_v0, %v5714_v52  ;;  %v7204_v32 = vpack.c.bf16 %v5727_v9, %v5726_v16  ;;  %v5753_v50 = vld [vmem:[%s13304_s17 + $0x1718] sm:$0xff]  ;;  %v5732_v56 = vld [vmem:[%s13304_s17 + $0x1670] sm:$0xff] }
 0x291   :  { %7191 = vmatprep.subr.bf16.mxu0 %v7190_v46  ;;  %v5729_v46 = vld [vmem:[%s13304_s17 + $0x1658] sm:$0xff] }
 0x292   :  { %v2395_v48 = vpop.f32.mrb[10].mxu0  ;;  %7173 = vmatpush3.bf16.msra.mxu1 %v7172_v7  ;;  %v4487_v35 = vadd.f32 %v4485_v23, %v4481_v57  ;;  %v7208_v7 = vpack.c.bf16 %v5729_v46, %v5728_v21  ;;  %v5758_v57 = vld [vmem:[%s13304_s17 + $0x1740] sm:$0xff] }
 0x293   :  { %v2396_v17 = vadd.f32 %v2395_v48, %v2326_v18  ;;  %v2397_v54 = vpop.f32.mrb[11].mxu0  ;;  %7175 = vmatprep.subr.bf16.mxu1 %v7174_v1  ;;  %v5725_v18 = vld [vmem:[%s13304_s17 + $0x1638] sm:$0xff]  ;;  %v7222_v1 = vpack.c.bf16 %v5753_v50, %v5752_v33  ;;  %v5756_v48 = vld [vmem:[%s13304_s17 + $0x1730] sm:$0xff] }
 0x294   :  { %7193 = vmatpush3.bf16.msra.mxu0 %v7192_v53  ;;  %v7200_v58 = vpack.c.bf16 %v5725_v18, %v5724_v30  ;;  %v4489_v55 = vmax.f32 %v4487_v35, 0.0  ;;  %v7212_v53 = vpack.c.bf16 %v5731_v43, %v5730_v24  ;;  %v5764_v18 = vld [vmem:[%s13304_s17 + $0x1770] sm:$0xff] }
 0x295   :  { %v12856_v63 = vadd.f32 %v2396_v17, %v12532_v49  ;;  %7195 = vmatprep.subr.bf16.mxu0 %v7194_v42  ;;  %v5743_v49 = vld [vmem:[%s13304_s17 + $0x16c8] sm:$0xff]  ;;  %v5733_v42 = vld [vmem:[%s13304_s17 + $0x1678] sm:$0xff] }
 0x296   :  { %7177 = vmatpush3.bf16.msra.mxu1 %v7176_v34  ;;  %v7202_v62 = vpack.c.bf16 %v5743_v49, %v5742_v29  ;;  %v12895_v38 = vrot.slane %v4489_v55, %v8657_v51  ;;  %v5747_v51 = vld [vmem:[%s13304_s17 + $0x16e8] sm:$0xff]  ;;  %v5757_v34 = vld [vmem:[%s13304_s17 + $0x1738] sm:$0xff]  ;;  %v7216_v4 = vpack.c.bf16 %v5733_v42, %v5732_v56  ;;  %v5766_v49 = vld [vmem:[%s13304_s17 + $0x1780] sm:$0xff] }
 0x297   :  { %7179 = vmatprep.subr.bf16.mxu1 %v7178_v8  ;;  %v7210_v2 = vpack.c.bf16 %v5747_v51, %v5746_v12  ;;  %v7228_v44 = vpack.c.bf16 %v5757_v34, %v5756_v48  ;;  %v5759_v17 = vld [vmem:[%s13304_s17 + $0x1748] sm:$0xff]  ;;  %v5760_v8 = vld [vmem:[%s13304_s17 + $0x1750] sm:$0xff] }
 0x298   :  { %7197 = vmatpush3.bf16.msra.mxu0 %v7196_v31  ;;  %v4601_v20 = vcombine.high %v12895_v38, %v12895_v38  ;;  %v7231_v54 = vpack.c.bf16 %v5759_v17, %v5758_v57  ;;  %v7234_v31 = vpack.c.bf16 %v5761_v27, %v5760_v8 }
 0x299   :  { %7199 = vmatprep.subr.bf16.mxu0 %v7198_v11 }
 0x29a   :  { %7181 = vmatpush3.bf16.msra.mxu1 %v7180_v3  ;;  %v5765_v3 = vld [vmem:[%s13304_s17 + $0x1778] sm:$0xff] }
 0x29b   :  { %7183 = vmatprep.subr.bf16.mxu1 %v7182_v41  ;;  %v7240_v29 = vpack.c.bf16 %v5765_v3, %v5764_v18  ;;  %v5767_v41 = vld [vmem:[%s13304_s17 + $0x1788] sm:$0xff] }
 0x29c   :  { %7201 = vmatpush3.bf16.msra.mxu0 %v7200_v58  ;;  %v7243_v26 = vpack.c.bf16 %v5767_v41, %v5766_v49  ;;  %v5769_v58 = vld [vmem:[%s13304_s17 + $0x1798] sm:$0xff] }
 0x29d   :  { %7203 = vmatprep.subr.bf16.mxu0 %v7202_v62  ;;  %v7246_v55 = vpack.c.bf16 %v5769_v58, %v5768_v14 }
 0x29e   :  { %7185 = vmatpush3.bf16.msra.mxu1 %v7184_v36 }
 0x29f   :  { %7218 = vmatprep.subr.bf16.mxu1 %v13315_v40 }
 0x2a0   :  { %7205 = vmatpush3.bf16.msra.mxu0 %v7204_v32 }
 0x2a1   :  { %4674 = vmatmul.mubr.f32.vlgmr.msra.gmra.mrb[24].mxu1 %v12679_v37  ;;  %7207 = vmatprep.subr.bf16.mxu0 %v7206_v19  ;;  %v5749_v37 = vld [vmem:[%s13304_s17 + $0x16f8] sm:$0xff] }
 0x2a2   :  { %7220 = vmatpush1.bf16.msra.mxu1 %v7219_v6  ;;  %5770 = vmatprep.mubr.msk.f32.mxu1 %vm975_vm2, %v4601_v20  ;;  %v7214_v0 = vpack.c.bf16 %v5749_v37, %v5748_v15 }
 0x2a3   :  { %7221 = vmatprep.subr.bf16.mxu1 %v13315_v40 }
 0x2a4   :  { %v6084_v23 = vpop.f32.mrb[12].mxu1  ;;  %7209 = vmatpush3.bf16.msra.mxu0 %v7208_v7 }
 0x2a5   :  { %v6085_v52 = vpop.f32.mrb[13].mxu1  ;;  %7211 = vmatprep.subr.bf16.mxu0 %v7210_v2 }
 0x2a6   :  { %v6086_v60 = vadd.f32 %v6085_v52, %v6084_v23  ;;  %7223 = vmatpush1.bf16.msra.mxu1 %v7222_v1 }
 0x2a7   :  { %7224 = vmatprep.subr.bf16.mxu1 %v13315_v40 }
 0x2a8   :  { %7213 = vmatpush3.bf16.msra.mxu0 %v7212_v53 }
 0x2a9   :  { %7215 = vmatprep.subr.bf16.mxu0 %v7214_v0 }
 0x2aa   :  { %7226 = vmatpush1.bf16.msra.mxu1 %v7225_v59 }
 0x2ab   :  { %7227 = vmatprep.subr.bf16.mxu1 %v13315_v40 }
 0x2ac   :  { %7217 = vmatpush3.bf16.msra.mxu0 %v7216_v4 }
 0x2ae   :  { %7229 = vmatpush1.bf16.msra.mxu1 %v7228_v44 }
 0x2af   :  { %4744 = vmatmul.mubr.f32.vlgmr.msra.gmra.mrb[24].mxu0 %v12778_v61  ;;  %7230 = vmatprep.subr.bf16.mxu1 %v13315_v40  ;;  %v5762_v61 = vld [vmem:[%s13304_s17 + $0x1760] sm:$0xff] }
 0x2b0   :  { %v7237_v11 = vpack.c.bf16 %v5763_v5, %v5762_v61 }
 0x2b2   :  { %v6119_v45 = vpop.f32.mrb[12].mxu0  ;;  %7232 = vmatpush1.bf16.msra.mxu1 %v7231_v54 }
 0x2b3   :  { %v6120_v28 = vpop.f32.mrb[13].mxu0  ;;  %7233 = vmatprep.subr.bf16.mxu1 %v13315_v40 }
 0x2b4   :  { %v6121_v35 = vadd.f32 %v6120_v28, %v6119_v45  ;;  %v5771_v45 = vld [vmem:[%s13485_s3] ss:$0 sm:$0xff] }
 0x2b6   :  { %7235 = vmatpush1.bf16.msra.mxu1 %v7234_v31  ;;  %v2810_v30 = vadd.f32 %v6121_v35, %v6086_v60 }
 0x2b7   :  { %7236 = vmatprep.subr.bf16.mxu1 %v13315_v40 }
 0x2ba   :  { %7238 = vmatpush1.bf16.msra.mxu1 %v7237_v11 }
 0x2bb   :  { %7239 = vmatprep.subr.bf16.mxu1 %v13315_v40 }
 0x2be   :  { %7241 = vmatpush1.bf16.msra.mxu1 %v7240_v29 }
 0x2bf   :  { %7242 = vmatprep.subr.bf16.mxu1 %v13315_v40 }
 0x2c2   :  { %7244 = vmatpush1.bf16.msra.mxu1 %v7243_v26 }
 0x2c3   :  { %7245 = vmatprep.subr.bf16.mxu1 %v13315_v40 }
 0x2c6   :  { %7247 = vmatpush1.bf16.msra.mxu1 %v7246_v55 }
 0x2c9   :  { %4814 = vmatmul.mubr.f32.vlgmr.msra.gmra.mrb[26].mxu1 %v12895_v38 }
 0x2cc   :  { %v2879_v62 = vpop.f32.mrb[14].mxu1 }
 0x2cd   :  { %v2880_v16 = vadd.f32 %v2879_v62, %v2810_v30  ;;  %v2881_v9 = vpop.f32.mrb[15].mxu1 }
 0x2cf   :  { %v2883_v36 = vadd.f32 %v2880_v16, %v12856_v63 }
 0x2d2   :  { %v6154_v10 = vpop.f32.mrb[14].mxu0 }
 0x2d3   :  { %v6155_v22 = vpop.f32.mrb[15].mxu0 }
 0x2d4   :  { %v6156_v25 = vadd.f32 %v6155_v22, %v6154_v10 }
 0x2ec   :  { %v6189_v47 = vpop.f32.mrb[16].mxu1 }
 0x2ed   :  { %v6190_v32 = vpop.f32.mrb[17].mxu1 }
 0x2ee   :  { %v6191_v19 = vadd.f32 %v6190_v32, %v6189_v47 }
 0x2f0   :  { %v3294_v21 = vadd.f32 %v6191_v19, %v6156_v25 }
 0x2fa   :  { %v3363_v46 = vpop.f32.mrb[16].mxu0 }
 0x2fb   :  { %v3364_v6 = vadd.f32 %v3363_v46, %v3294_v21  ;;  %v3365_v12 = vpop.f32.mrb[17].mxu0 }
 0x2fd   :  { %v3367_v51 = vadd.f32 %v3364_v6, %v2883_v36 }
 0x30c   :  { %v6224_v40 = vpop.f32.mrb[18].mxu1 }
 0x30d   :  { %v6225_v33 = vpop.f32.mrb[19].mxu1 }
 0x30e   :  { %v6226_v50 = vadd.f32 %v6225_v33, %v6224_v40 }
 0x31a   :  { %v6259_v38 = vpop.f32.mrb[18].mxu0 }
 0x31b   :  { %v6260_v20 = vpop.f32.mrb[19].mxu0 }
 0x31c   :  { %v6261_v7 = vadd.f32 %v6260_v20, %v6259_v38 }
 0x31e   :  { %v3778_v2 = vadd.f32 %v6261_v7, %v6226_v50 }
 0x334   :  { %v3847_v24 = vpop.f32.mrb[20].mxu1 }
 0x335   :  { %v3848_v63 = vadd.f32 %v3847_v24, %v3778_v2  ;;  %v3849_v43 = vpop.f32.mrb[21].mxu1 }
 0x337   :  { %v3851_v1 = vadd.f32 %v3848_v63, %v3367_v51 }
 0x33a   :  { %v6294_v15 = vpop.f32.mrb[20].mxu0 }
 0x33b   :  { %v6295_v37 = vpop.f32.mrb[21].mxu0 }
 0x33c   :  { %v6296_v13 = vadd.f32 %v6295_v37, %v6294_v15 }
 0x354   :  { %v6329_v39 = vpop.f32.mrb[22].mxu1 }
 0x355   :  { %v6330_v23 = vpop.f32.mrb[23].mxu1 }
 0x356   :  { %v6331_v53 = vadd.f32 %v6330_v23, %v6329_v39 }
 0x358   :  { %v4262_v52 = vadd.f32 %v6331_v53, %v6296_v13 }
 0x362   :  { %v4331_v0 = vpop.f32.mrb[22].mxu0 }
 0x363   :  { %v4332_v56 = vadd.f32 %v4331_v0, %v4262_v52  ;;  %v4333_v42 = vpop.f32.mrb[23].mxu0 }
 0x365   :  { %v4335_v60 = vadd.f32 %v4332_v56, %v3851_v1 }
 0x374   :  { %v6364_v59 = vpop.f32.mrb[24].mxu1 }
 0x375   :  { %v6365_v48 = vpop.f32.mrb[25].mxu1 }
 0x376   :  { %v6366_v34 = vadd.f32 %v6365_v48, %v6364_v59 }
 0x382   :  { %v6399_v4 = vpop.f32.mrb[24].mxu0 }
 0x383   :  { %v6400_v44 = vpop.f32.mrb[25].mxu0 }
 0x384   :  { %v6401_v57 = vadd.f32 %v6400_v44, %v6399_v4 }
 0x386   :  { %v4746_v17 = vadd.f32 %v6401_v57, %v6366_v34 }
 0x39c   :  { %v4815_v54 = vpop.f32.mrb[26].mxu1 }
 0x39d   :  { %v4816_v8 = vadd.f32 %v4815_v54, %v4746_v17  ;;  %v4817_v27 = vpop.f32.mrb[27].mxu1 }
 0x39f   :  { %v4819_v31 = vadd.f32 %v4816_v8, %v4335_v60 }
 0x3a1   :  { %v4827_v28 = vadd.f32 %v5771_v45, %v4819_v31 }
 0x3a3   :  { %v4829_v61 = vsel %vm4828_vm3, %v4827_v28, -inf }
 0x3a4   :  { %4830 = vmax.xlane.f32.xlu0 %v4829_v61 }
 0x431   :  { %v4831_v5 = vpop.xlane.xlu0 %4830 }
 0x432   :  { %v4832_v35 = vsub.f32 %v4827_v28, %v4831_v5 }
 0x434   :  { %v4833_v11 = vmul.f32 1.442695, %v4832_v35 }
 0x436   :  { %7277 = vpow2.f32 %v4833_v11 }
 0x440   :  { %v7278_v30 = vpop.eup %7277 }
 0x441   :  { %v4835_v18 = vsel %vm4828_vm3, %v7278_v30, 0.0 }
 0x442   :  { %4836 = vadd.xlane.f32.xlu1 %v4835_v18 }
 0x4cf   :  { %v4837_v3 = vpop.xlane.xlu1 %4836 }
 0x4d0   :  { %7279 = vlog2.f32 %v4837_v3 }
 0x4da   :  { %v7280_v29 = vpop.eup %7279 }
 0x4db   :  { %v4839_v49 = vmul.f32 0.6931472, %v7280_v29 }
 0x4dd   :  { %v4840_v41 = vsub.f32 %v4832_v35, %v4839_v49 }
 0x4df   :  { %4841 = vst.msk [vmem:[#allocation8] sm:$0x3] %vm4828_vm3, %v4840_v41 }
 0x4e0   :  { %7492 = shalt.err (!%p7489_p0)
}
 0x4e1   :  { %s13486_s20 = sld [smem:[#allocation62_spill]] }
 0x4e7   :  { %s7493_s11 = scalar_lea.hbm %s13486_s20, 32 }
 0x4e8   :  { %p7494_p1 = scmp.ne.s32.totalorder %s13486_s20, %s7493_s11  ;;  %p7497_p2 = scmp.lt.u32.totalorder %s7493_s11, %s13486_s20 }
 0x4ea   :  { %p7499_p3 = pnand %p7497_p2, %p7494_p1 }
 0x4ec   :  { %7502 = shalt.err (!%p7499_p3)
}
 0x4ed   :  { %4851 = dma.vmem_to_hbm [thread:$0]  %s4849_s15, 32, %s13486_s20, [#allocation4]  }
 0x4ee   :  { %7507 = dma.done.wait [#allocation4], 32  }
 0x4ef   :  { %7508 = vsyncadd [#allocation4], 4294967264 }
 0x4f0   :  { %4855 = vsyncpa [#allocation4], 1 }
 0x4f1   :  { %4856 = vsyncpa [#allocation5], 1 }
 0x4f2   :  { %4857 = vsyncpa [#allocation7], 1 }

</bundles_post_ra>
